<compile_context>
chip_gen: v6e
topology: v6e:2x2x1
jax: 0.10.0
libtpu: 0.0.40
codegen_flags: <defaults>
</compile_context>

<pallas_src>
import functools

import jax
import jax.numpy as jnp
import numpy as np
from jax.experimental import pallas as pl
from jax.experimental.pallas import tpu as pltpu

_B = 16  # images per grid step (lane batch); per-image lane strides are 32 / 16 / 8


# ------------------------------ fused Pallas kernel ------------------------------ #

def _lenet_kernel(
    x_ref,      # (32, 32*B)      padded images, lanes = b*32 + w
    bb1_ref,    # (168, 96)       banded conv1 weights (6ch x 28 rows, 3 dx-blocks x 32)
    bc1_ref,    # (168, 1)        conv1 bias repeated per output row
    ce1_ref,    # (32*B, 16*B)    0/1 block-diag selector: even cols of each image
    co1_ref,    # (32*B, 16*B)    0/1 block-diag selector: odd  cols
    re1_ref,    # (96, 168)       0/1 selector: even rows (6ch, 28 -> 16-row blocks)
    ro1_ref,    # (96, 168)       0/1 selector: odd  rows
    bb2_ref,    # (168, 288)      banded conv2 weights (12ch x 14 rows, 3 dx x 6ci x 16)
    bc2_ref,    # (168, 1)
    ce2_ref,    # (16*B, 8*B)
    co2_ref,    # (16*B, 8*B)
    re2_ref,    # (96, 168)       (12ch, 14 -> 8-row blocks)
    ro2_ref,    # (96, 168)
    wst_ref,    # (192, 96)       fc1 weights stacked by pooled col j: [j*24+o, c*8+i]
    msk_ref,    # (192, 8*B)      0/1 diagonal mask: 1 iff lane%8 == row//24
    ones_ref,   # (8*B, B)        per-image lane-sum matrix
    sel24_ref,  # (24, 192)       row-block-sum selector
    bf1_ref,    # (24, 1)
    wf2_ref,    # (10, 24)
    bf2_ref,    # (10, 1)
    out_ref,    # (1, 10, B)
    s1_ref,     # scratch (96, 32*B)   conv1 banded operand (3 dx-shifted image copies)
    s2_ref,     # scratch (288, 16*B)  conv2 banded operand (3 dx-shifted p1 copies)
):
    f32 = jnp.float32
    w1 = s1_ref.shape[1]   # 32*B
    w2 = s2_ref.shape[1]   # 16*B

    def mm(a, b):
        return jnp.dot(a, b, preferred_element_type=f32)

    # --- conv1 operand: 3 dx-shifted copies of the padded image block ------------
    # (per-image dx shift == global lane shift because the per-image stride is 32)
    s1_ref[0:32, :] = x_ref[...]
    s1_ref[32:64, 0:w1 - 1] = x_ref[:, 1:w1]
    s1_ref[32:64, w1 - 1:w1] = jnp.zeros((32, 1), f32)
    s1_ref[64:96, 0:w1 - 2] = x_ref[:, 2:w1]
    s1_ref[64:96, w1 - 2:w1] = jnp.zeros((32, 2), f32)

    # --- conv1: one MXU GEMM + bias + ReLU ----------------------------------------
    c1 = jnp.maximum(mm(bb1_ref[...], s1_ref[...]) + bc1_ref[...], 0.0)   # (168, 32B)

    # --- pool1 (2x2 / 2): exact 0/1 selection matmuls + max -----------------------
    pw1 = jnp.maximum(mm(c1, ce1_ref[...]), mm(c1, co1_ref[...]))         # (168, 16B)
    p1 = jnp.maximum(mm(re1_ref[...], pw1), mm(ro1_ref[...], pw1))        # (96, 16B)
    # p1 lanes b*16+{14,15} and rows c*16+{14,15} are exactly 0 (selector padding);
    # those zeros provide conv2's W-padding under the +-1 lane shifts below.

    # --- conv2 operand: 3 dx-shifted copies of p1 ---------------------------------
    s2_ref[0:96, 1:w2] = p1[:, 0:w2 - 1]
    s2_ref[0:96, 0:1] = jnp.zeros((96, 1), f32)            # left pad of first image
    s2_ref[96:192, :] = p1
    s2_ref[192:288, 0:w2 - 1] = p1[:, 1:w2]
    s2_ref[192:288, w2 - 1:w2] = jnp.zeros((96, 1), f32)

    # --- conv2: one MXU GEMM + bias + ReLU ----------------------------------------
    c2 = jnp.maximum(mm(bb2_ref[...], s2_ref[...]) + bc2_ref[...], 0.0)   # (168, 16B)

    # --- pool2 ---------------------------------------------------------------------
    pw2 = jnp.maximum(mm(c2, ce2_ref[...]), mm(c2, co2_ref[...]))         # (168, 8B)
    p2 = jnp.maximum(mm(re2_ref[...], pw2), mm(ro2_ref[...], pw2))        # (96, 8B)

    # --- dropout(p=0.2): identity in inference mode --------------------------------
    # TODO(synk): training-mode dropout (random masking) is intentionally not emitted.

    # --- fc1 (588 -> 24) as one stacked GEMM + diag-mask + lane/row reductions ------
    q = mm(wst_ref[...], p2)                       # (192, 8B): partials per (j, o)
    r = mm(q * msk_ref[...], ones_ref[...])        # (192, B):  keep lane j == row block j
    f1 = jnp.maximum(mm(sel24_ref[...], r) + bf1_ref[...], 0.0)           # (24, B)

    # --- fc2 (24 -> 10) -------------------------------------------------------------
    out_ref[0] = mm(wf2_ref[...], f1) + bf2_ref[...]                      # (10, B)


# --------------------------- host-side weight precompute -------------------------- #

def prepare_params(params, block_b=_B):
    """One-time re-layout of PyTorch-style weights into the kernel's operands."""
    bsz = block_b
    w1 = np.asarray(params["w1"], np.float32)     # (6, 1, 3, 3)
    b1 = np.asarray(params["b1"], np.float32)     # (6,)
    w2 = np.asarray(params["w2"], np.float32)     # (12, 6, 3, 3)
    b2 = np.asarray(params["b2"], np.float32)     # (12,)
    wf1 = np.asarray(params["wf1"], np.float32)   # (24, 588)
    bf1 = np.asarray(params["bf1"], np.float32)   # (24,)
    wf2 = np.asarray(params["wf2"], np.float32)   # (10, 24)
    bf2 = np.asarray(params["bf2"], np.float32)   # (10,)

    # conv1 band: c1[co*28+h, lane] = sum_{dy,dx} w1[co,0,dy,dx] * s1[dx*32 + h+dy, lane]
    bb1 = np.zeros((168, 96), np.float32)
    for co in range(6):
        for h in range(28):
            for dy in range(3):
                for dx in range(3):
                    bb1[co * 28 + h, dx * 32 + h + dy] = w1[co, 0, dy, dx]
    bc1 = np.repeat(b1, 28).reshape(168, 1)

    # conv2 band; the H padding (h+dy-1 outside [0,14)) is absorbed into the band.
    bb2 = np.zeros((168, 288), np.float32)
    for co in range(12):
        for h in range(14):
            for ci in range(6):
                for dy in range(3):
                    r = h + dy - 1
                    if 0 <= r < 14:
                        for dx in range(3):
                            bb2[co * 14 + h, dx * 96 + ci * 16 + r] = w2[co, ci, dy, dx]
    bc2 = np.repeat(b2, 14).reshape(168, 1)

    # Column-pool selectors (block diagonal per image; pooled stride 16 / 8,
    # the unused pooled columns {14,15} / {7} stay exactly zero).
    ce1 = np.zeros((32 * bsz, 16 * bsz), np.float32)
    co1 = np.zeros((32 * bsz, 16 * bsz), np.float32)
    for b in range(bsz):
        for j in range(14):
            ce1[b * 32 + 2 * j, b * 16 + j] = 1.0
            co1[b * 32 + 2 * j + 1, b * 16 + j] = 1.0
    ce2 = np.zeros((16 * bsz, 8 * bsz), np.float32)
    co2 = np.zeros((16 * bsz, 8 * bsz), np.float32)
    for b in range(bsz):
        for j in range(7):
            ce2[b * 16 + 2 * j, b * 8 + j] = 1.0
            co2[b * 16 + 2 * j + 1, b * 8 + j] = 1.0

    # Row-pool selectors (16- / 8-row aligned channel blocks; rows {14,15} / {7} zero).
    re1 = np.zeros((96, 168), np.float32)
    ro1 = np.zeros((96, 168), np.float32)
    for c in range(6):
        for i in range(14):
            re1[c * 16 + i, c * 28 + 2 * i] = 1.0
            ro1[c * 16 + i, c * 28 + 2 * i + 1] = 1.0
    re2 = np.zeros((96, 168), np.float32)
    ro2 = np.zeros((96, 168), np.float32)
    for c in range(12):
        for i in range(7):
            re2[c * 8 + i, c * 14 + 2 * i] = 1.0
            ro2[c * 8 + i, c * 14 + 2 * i + 1] = 1.0

    # fc1 stacked weights (PyTorch NCHW flatten order c*49 + i*7 + j baked in),
    # diagonal mask, per-image lane-sum matrix and row-block-sum selector.
    wf1r = wf1.reshape(24, 12, 7, 7)
    wst = np.zeros((192, 96), np.float32)
    for j in range(7):
        for o in range(24):
            for c in range(12):
                for i in range(7):
                    wst[j * 24 + o, c * 8 + i] = wf1r[o, c, i, j]
    msk = np.zeros((192, 8 * bsz), np.float32)
    for j in range(8):
        for o in range(24):
            for b in range(bsz):
                msk[j * 24 + o, b * 8 + j] = 1.0
    ones8 = np.zeros((8 * bsz, bsz), np.float32)
    for b in range(bsz):
        ones8[b * 8:(b + 1) * 8, b] = 1.0
    sel24 = np.zeros((24, 192), np.float32)
    for j in range(8):
        for o in range(24):
            sel24[o, j * 24 + o] = 1.0

    prep = dict(
        bb1=bb1, bc1=bc1, ce1=ce1, co1=co1, re1=re1, ro1=ro1,
        bb2=bb2, bc2=bc2, ce2=ce2, co2=co2, re2=re2, ro2=ro2,
        wst=wst, msk=msk, ones8=ones8, sel24=sel24,
        bf1=bf1.reshape(24, 1), wf2=wf2, bf2=bf2.reshape(10, 1),
    )
    return {k: jnp.asarray(v) for k, v in prep.items()}


# ---------------------------------- forward pass ---------------------------------- #

@functools.partial(jax.jit, static_argnames=("block_b",))
def forward_pallas(prep, x_nchw, block_b=_B):
    bsz = block_b
    n = x_nchw.shape[0]
    npad = ((n + bsz - 1) // bsz) * bsz
    ngrid = npad // bsz

    # Lane-batched input layout: xh[h, b*32 + w] = zero-padded image b at (h, w).
    x = x_nchw.astype(jnp.float32).reshape(n, 28, 28)
    xpad = jnp.pad(x, ((0, npad - n), (1, 3), (1, 3)))            # (npad, 32, 32)
    xh = jnp.transpose(xpad, (1, 0, 2)).reshape(32, npad * 32)

    def full(shape):
        return pl.BlockSpec(shape, lambda i: (0, 0))

    in_specs = [
        pl.BlockSpec((32, 32 * bsz), lambda i: (0, i)),   # images (B per grid step)
        full((168, 96)), full((168, 1)),                  # bb1, bc1
        full((32 * bsz, 16 * bsz)), full((32 * bsz, 16 * bsz)),   # ce1, co1
        full((96, 168)), full((96, 168)),                 # re1, ro1
        full((168, 288)), full((168, 1)),                 # bb2, bc2
        full((16 * bsz, 8 * bsz)), full((16 * bsz, 8 * bsz)),     # ce2, co2
        full((96, 168)), full((96, 168)),                 # re2, ro2
        full((192, 96)), full((192, 8 * bsz)),            # wst, msk
        full((8 * bsz, bsz)), full((24, 192)),            # ones8, sel24
        full((24, 1)), full((10, 24)), full((10, 1)),     # bf1, wf2, bf2
    ]
    out_specs = pl.BlockSpec((1, 10, bsz), lambda i: (i, 0, 0))

    out = pl.pallas_call(
        _lenet_kernel,
        out_shape=jax.ShapeDtypeStruct((ngrid, 10, bsz), jnp.float32),
        grid_spec=pltpu.PrefetchScalarGridSpec(
            num_scalar_prefetch=0,
            grid=(ngrid,),
            in_specs=in_specs,
            out_specs=out_specs,
            scratch_shapes=[
                pltpu.VMEM((96, 32 * bsz), jnp.float32),    # s1
                pltpu.VMEM((288, 16 * bsz), jnp.float32),   # s2
            ],
        ),
        compiler_params=pltpu.CompilerParams(
            dimension_semantics=("parallel",),
            vmem_limit_bytes=32 * 1024 * 1024,
        ),
    )(xh, prep["bb1"], prep["bc1"], prep["ce1"], prep["co1"], prep["re1"],
      prep["ro1"], prep["bb2"], prep["bc2"], prep["ce2"], prep["co2"],
      prep["re2"], prep["ro2"], prep["wst"], prep["msk"], prep["ones8"],
      prep["sel24"], prep["bf1"], prep["wf2"], prep["bf2"])

    # (ngrid, 10, B) -> (N, 10)
    return jnp.transpose(out, (0, 2, 1)).reshape(npad, 10)[:n]


# ----------------------------- pure-JAX reference path ----------------------------- #

def _im2col_3x3_pad1(x_nhwc):
    N, H, W, C = x_nhwc.shape
    xp = jnp.pad(x_nhwc, ((0, 0), (1, 1), (1, 1), (0, 0)))
    cols = [xp[:, dy:dy + H, dx:dx + W, :] for dy in range(3) for dx in range(3)]
    patches = jnp.stack(cols, axis=-2)
    return patches.reshape(N * H * W, 9 * C)


def _conv_w_mat(w):
    cout, cin, kh, kw = w.shape
    return jnp.transpose(w, (2, 3, 1, 0)).reshape(kh * kw * cin, cout)


def forward_ref(params, x_nchw):
    N = x_nchw.shape[0]
    x = jnp.transpose(x_nchw, (0, 2, 3, 1))
    h1 = jnp.maximum(_im2col_3x3_pad1(x) @ _conv_w_mat(params["w1"]) + params["b1"], 0.0)
    h1 = h1.reshape(N, 28, 28, 6)
    p1 = jnp.max(h1.reshape(N, 14, 2, 14, 2, 6), axis=(2, 4))
    h2 = jnp.maximum(_im2col_3x3_pad1(p1) @ _conv_w_mat(params["w2"]) + params["b2"], 0.0)
    h2 = h2.reshape(N, 14, 14, 12)
    p2 = jnp.max(h2.reshape(N, 7, 2, 7, 2, 12), axis=(2, 4))
    flat = jnp.transpose(p2, (0, 3, 1, 2)).reshape(N, 12 * 7 * 7)
    f1 = jnp.maximum(flat @ params["wf1"].T + params["bf1"], 0.0)
    return f1 @ params["wf2"].T + params["bf2"]


def init_params(seed=0):
    k = jax.random.PRNGKey(seed)
    ks = jax.random.split(k, 8)
    return {
        "w1": jax.random.normal(ks[0], (6, 1, 3, 3), jnp.float32) * 0.1,
        "b1": jax.random.normal(ks[1], (6,), jnp.float32) * 0.1,
        "w2": jax.random.normal(ks[2], (12, 6, 3, 3), jnp.float32) * 0.1,
        "b2": jax.random.normal(ks[3], (12,), jnp.float32) * 0.1,
        "wf1": jax.random.normal(ks[4], (24, 12 * 7 * 7), jnp.float32) * 0.05,
        "bf1": jax.random.normal(ks[5], (24,), jnp.float32) * 0.05,
        "wf2": jax.random.normal(ks[6], (10, 24), jnp.float32) * 0.05,
        "bf2": jax.random.normal(ks[7], (10,), jnp.float32) * 0.05,
    }


if __name__ == "__main__":
    params = init_params(seed=0)
    prep = prepare_params(params, block_b=_B)

    key = jax.random.PRNGKey(0)
    # Small but exercises both the N < B padding path and a 2-step ("parallel") grid.
    x = jax.random.normal(key, (20, 1, 28, 28), jnp.float32)   # NCHW, like PyTorch

    out = jax.block_until_ready(forward_pallas(prep, x))
    assert out.shape == (20, 10), out.shape

    ref = jax.block_until_ready(forward_ref(params, x))
    np.testing.assert_allclose(np.asarray(out), np.asarray(ref), rtol=2e-4, atol=2e-4)
    print("KERNEL_OK")
</pallas_src>

<mosaic_0001>
module attributes {stable_mosaic.version = 11 : i64} {
  func.func @_lenet_kernel(%arg0: i32, %arg1: memref<32x512xf32, #tpu.memory_space<vmem>>, %arg2: memref<168x96xf32, #tpu.memory_space<vmem>>, %arg3: memref<168x1xf32, #tpu.memory_space<vmem>>, %arg4: memref<512x256xf32, #tpu.memory_space<vmem>>, %arg5: memref<512x256xf32, #tpu.memory_space<vmem>>, %arg6: memref<96x168xf32, #tpu.memory_space<vmem>>, %arg7: memref<96x168xf32, #tpu.memory_space<vmem>>, %arg8: memref<168x288xf32, #tpu.memory_space<vmem>>, %arg9: memref<168x1xf32, #tpu.memory_space<vmem>>, %arg10: memref<256x128xf32, #tpu.memory_space<vmem>>, %arg11: memref<256x128xf32, #tpu.memory_space<vmem>>, %arg12: memref<96x168xf32, #tpu.memory_space<vmem>>, %arg13: memref<96x168xf32, #tpu.memory_space<vmem>>, %arg14: memref<192x96xf32, #tpu.memory_space<vmem>>, %arg15: memref<192x128xf32, #tpu.memory_space<vmem>>, %arg16: memref<128x16xf32, #tpu.memory_space<vmem>>, %arg17: memref<24x192xf32, #tpu.memory_space<vmem>>, %arg18: memref<24x1xf32, #tpu.memory_space<vmem>>, %arg19: memref<10x24xf32, #tpu.memory_space<vmem>>, %arg20: memref<10x1xf32, #tpu.memory_space<vmem>>, %arg21: memref<1x10x16xf32, #tpu.memory_space<vmem>>, %arg22: memref<96x512xf32, #tpu.memory_space<vmem>>, %arg23: memref<288x256xf32, #tpu.memory_space<vmem>>) attributes {dimension_semantics = [#tpu.dimension_semantics<parallel>], iteration_bounds = array<i64: 2>, scalar_prefetch = 0 : i64, scratch_operands = 2 : i64, tpu.core_type = #tpu.core_type<tc>, window_params = [{transform_indices = @transform_0, window_bounds = array<i64: 32, 512>}, {pipeline_mode = #tpu.pipeline_mode<synchronous>, transform_indices = @transform_1, window_bounds = array<i64: 168, 96>}, {pipeline_mode = #tpu.pipeline_mode<synchronous>, transform_indices = @transform_2, window_bounds = array<i64: 168, 1>}, {pipeline_mode = #tpu.pipeline_mode<synchronous>, transform_indices = @transform_3, window_bounds = array<i64: 512, 256>}, {pipeline_mode = #tpu.pipeline_mode<synchronous>, transform_indices = @transform_4, window_bounds = array<i64: 512, 256>}, {pipeline_mode = #tpu.pipeline_mode<synchronous>, transform_indices = @transform_5, window_bounds = array<i64: 96, 168>}, {pipeline_mode = #tpu.pipeline_mode<synchronous>, transform_indices = @transform_6, window_bounds = array<i64: 96, 168>}, {pipeline_mode = #tpu.pipeline_mode<synchronous>, transform_indices = @transform_7, window_bounds = array<i64: 168, 288>}, {pipeline_mode = #tpu.pipeline_mode<synchronous>, transform_indices = @transform_8, window_bounds = array<i64: 168, 1>}, {pipeline_mode = #tpu.pipeline_mode<synchronous>, transform_indices = @transform_9, window_bounds = array<i64: 256, 128>}, {pipeline_mode = #tpu.pipeline_mode<synchronous>, transform_indices = @transform_10, window_bounds = array<i64: 256, 128>}, {pipeline_mode = #tpu.pipeline_mode<synchronous>, transform_indices = @transform_11, window_bounds = array<i64: 96, 168>}, {pipeline_mode = #tpu.pipeline_mode<synchronous>, transform_indices = @transform_12, window_bounds = array<i64: 96, 168>}, {pipeline_mode = #tpu.pipeline_mode<synchronous>, transform_indices = @transform_13, window_bounds = array<i64: 192, 96>}, {pipeline_mode = #tpu.pipeline_mode<synchronous>, transform_indices = @transform_14, window_bounds = array<i64: 192, 128>}, {pipeline_mode = #tpu.pipeline_mode<synchronous>, transform_indices = @transform_15, window_bounds = array<i64: 128, 16>}, {pipeline_mode = #tpu.pipeline_mode<synchronous>, transform_indices = @transform_16, window_bounds = array<i64: 24, 192>}, {pipeline_mode = #tpu.pipeline_mode<synchronous>, transform_indices = @transform_17, window_bounds = array<i64: 24, 1>}, {pipeline_mode = #tpu.pipeline_mode<synchronous>, transform_indices = @transform_18, window_bounds = array<i64: 10, 24>}, {pipeline_mode = #tpu.pipeline_mode<synchronous>, transform_indices = @transform_19, window_bounds = array<i64: 10, 1>}, {transform_indices = @transform_20, window_bounds = array<i64: 1, 10, 16>}]} {
    %c0 = arith.constant 0 : index
    %c0_0 = arith.constant 0 : index
    %0 = vector.load %arg1[%c0, %c0_0] : memref<32x512xf32, #tpu.memory_space<vmem>>, vector<32x512xf32>
    %c0_1 = arith.constant 0 : index
    %c0_2 = arith.constant 0 : index
    %1 = vector.load %arg22[%c0_1, %c0_2] : memref<96x512xf32, #tpu.memory_space<vmem>>, vector<32x512xf32>
    tpu.vector_store %arg22[%c0_1, %c0_2], %0 {strides = array<i32>} : memref<96x512xf32, #tpu.memory_space<vmem>>, vector<32x512xf32>,
    %c0_3 = arith.constant 0 : index
    %c1 = arith.constant 1 : index
    %2 = vector.load %arg1[%c0_3, %c1] : memref<32x512xf32, #tpu.memory_space<vmem>>, vector<32x511xf32>
    %c32 = arith.constant 32 : index
    %c0_4 = arith.constant 0 : index
    %3 = vector.load %arg22[%c32, %c0_4] : memref<96x512xf32, #tpu.memory_space<vmem>>, vector<32x511xf32>
    tpu.vector_store %arg22[%c32, %c0_4], %2 {strides = array<i32>} : memref<96x512xf32, #tpu.memory_space<vmem>>, vector<32x511xf32>,
    %cst = arith.constant 0.000000e+00 : f32
    %4 = vector.broadcast %cst : f32 to vector<32x1xf32>
    %c32_5 = arith.constant 32 : index
    %c511 = arith.constant 511 : index
    %5 = vector.load %arg22[%c32_5, %c511] : memref<96x512xf32, #tpu.memory_space<vmem>>, vector<32x1xf32>
    tpu.vector_store %arg22[%c32_5, %c511], %4 {strides = array<i32>} : memref<96x512xf32, #tpu.memory_space<vmem>>, vector<32x1xf32>,
    %c0_6 = arith.constant 0 : index
    %c2 = arith.constant 2 : index
    %6 = vector.load %arg1[%c0_6, %c2] : memref<32x512xf32, #tpu.memory_space<vmem>>, vector<32x510xf32>
    %c64 = arith.constant 64 : index
    %c0_7 = arith.constant 0 : index
    %7 = vector.load %arg22[%c64, %c0_7] : memref<96x512xf32, #tpu.memory_space<vmem>>, vector<32x510xf32>
    tpu.vector_store %arg22[%c64, %c0_7], %6 {strides = array<i32>} : memref<96x512xf32, #tpu.memory_space<vmem>>, vector<32x510xf32>,
    %cst_8 = arith.constant 0.000000e+00 : f32
    %8 = vector.broadcast %cst_8 : f32 to vector<32x2xf32>
    %c64_9 = arith.constant 64 : index
    %c510 = arith.constant 510 : index
    %9 = vector.load %arg22[%c64_9, %c510] : memref<96x512xf32, #tpu.memory_space<vmem>>, vector<32x2xf32>
    tpu.vector_store %arg22[%c64_9, %c510], %8 {strides = array<i32>} : memref<96x512xf32, #tpu.memory_space<vmem>>, vector<32x2xf32>,
    %c0_10 = arith.constant 0 : index
    %c0_11 = arith.constant 0 : index
    %10 = vector.load %arg2[%c0_10, %c0_11] : memref<168x96xf32, #tpu.memory_space<vmem>>, vector<168x96xf32>
    %c0_12 = arith.constant 0 : index
    %c0_13 = arith.constant 0 : index
    %11 = vector.load %arg22[%c0_12, %c0_13] : memref<96x512xf32, #tpu.memory_space<vmem>>, vector<96x512xf32>
    %cst_14 = arith.constant dense<0.000000e+00> : vector<168x512xf32>
    %12 = tpu.matmul %10, %11, %cst_14 {dimension_numbers = #tpu.dot_dimension_numbers<[1], [0], [0], [1], [0, 0, 1, 1], [], []>} : vector<168x96xf32>, vector<96x512xf32>, vector<168x512xf32> -> vector<168x512xf32>
    %c0_15 = arith.constant 0 : index
    %c0_16 = arith.constant 0 : index
    %13 = vector.load %arg3[%c0_15, %c0_16] : memref<168x1xf32, #tpu.memory_space<vmem>>, vector<168x1xf32>
    %14 = vector.broadcast %13 : vector<168x1xf32> to vector<168x512xf32>
    %15 = arith.addf %12, %14 : vector<168x512xf32>
    %cst_17 = arith.constant 0.000000e+00 : f32
    %16 = vector.broadcast %cst_17 : f32 to vector<168x512xf32>
    %17 = arith.maximumf %15, %16 : vector<168x512xf32>
    %c0_18 = arith.constant 0 : index
    %c0_19 = arith.constant 0 : index
    %18 = vector.load %arg4[%c0_18, %c0_19] : memref<512x256xf32, #tpu.memory_space<vmem>>, vector<512x256xf32>
    %cst_20 = arith.constant dense<0.000000e+00> : vector<168x256xf32>
    %19 = tpu.matmul %17, %18, %cst_20 {dimension_numbers = #tpu.dot_dimension_numbers<[1], [0], [0], [1], [0, 0, 1, 1], [], []>} : vector<168x512xf32>, vector<512x256xf32>, vector<168x256xf32> -> vector<168x256xf32>
    %c0_21 = arith.constant 0 : index
    %c0_22 = arith.constant 0 : index
    %20 = vector.load %arg5[%c0_21, %c0_22] : memref<512x256xf32, #tpu.memory_space<vmem>>, vector<512x256xf32>
    %cst_23 = arith.constant dense<0.000000e+00> : vector<168x256xf32>
    %21 = tpu.matmul %17, %20, %cst_23 {dimension_numbers = #tpu.dot_dimension_numbers<[1], [0], [0], [1], [0, 0, 1, 1], [], []>} : vector<168x512xf32>, vector<512x256xf32>, vector<168x256xf32> -> vector<168x256xf32>
    %22 = arith.maximumf %19, %21 : vector<168x256xf32>
    %c0_24 = arith.constant 0 : index
    %c0_25 = arith.constant 0 : index
    %23 = vector.load %arg6[%c0_24, %c0_25] : memref<96x168xf32, #tpu.memory_space<vmem>>, vector<96x168xf32>
    %cst_26 = arith.constant dense<0.000000e+00> : vector<96x256xf32>
    %24 = tpu.matmul %23, %22, %cst_26 {dimension_numbers = #tpu.dot_dimension_numbers<[1], [0], [0], [1], [0, 0, 1, 1], [], []>} : vector<96x168xf32>, vector<168x256xf32>, vector<96x256xf32> -> vector<96x256xf32>
    %c0_27 = arith.constant 0 : index
    %c0_28 = arith.constant 0 : index
    %25 = vector.load %arg7[%c0_27, %c0_28] : memref<96x168xf32, #tpu.memory_space<vmem>>, vector<96x168xf32>
    %cst_29 = arith.constant dense<0.000000e+00> : vector<96x256xf32>
    %26 = tpu.matmul %25, %22, %cst_29 {dimension_numbers = #tpu.dot_dimension_numbers<[1], [0], [0], [1], [0, 0, 1, 1], [], []>} : vector<96x168xf32>, vector<168x256xf32>, vector<96x256xf32> -> vector<96x256xf32>
    %27 = arith.maximumf %24, %26 : vector<96x256xf32>
    %28 = vector.extract_strided_slice %27 {offsets = [0, 0], sizes = [96, 255], strides = [1, 1]} : vector<96x256xf32> to vector<96x255xf32>
    %c0_30 = arith.constant 0 : index
    %c1_31 = arith.constant 1 : index
    %29 = vector.load %arg23[%c0_30, %c1_31] : memref<288x256xf32, #tpu.memory_space<vmem>>, vector<96x255xf32>
    tpu.vector_store %arg23[%c0_30, %c1_31], %28 {strides = array<i32>} : memref<288x256xf32, #tpu.memory_space<vmem>>, vector<96x255xf32>,
    %cst_32 = arith.constant 0.000000e+00 : f32
    %30 = vector.broadcast %cst_32 : f32 to vector<96x1xf32>
    %c0_33 = arith.constant 0 : index
    %c0_34 = arith.constant 0 : index
    %31 = vector.load %arg23[%c0_33, %c0_34] : memref<288x256xf32, #tpu.memory_space<vmem>>, vector<96x1xf32>
    tpu.vector_store %arg23[%c0_33, %c0_34], %30 {strides = array<i32>} : memref<288x256xf32, #tpu.memory_space<vmem>>, vector<96x1xf32>,
    %c96 = arith.constant 96 : index
    %c0_35 = arith.constant 0 : index
    %32 = vector.load %arg23[%c96, %c0_35] : memref<288x256xf32, #tpu.memory_space<vmem>>, vector<96x256xf32>
    tpu.vector_store %arg23[%c96, %c0_35], %27 {strides = array<i32>} : memref<288x256xf32, #tpu.memory_space<vmem>>, vector<96x256xf32>,
    %33 = vector.extract_strided_slice %27 {offsets = [0, 1], sizes = [96, 255], strides = [1, 1]} : vector<96x256xf32> to vector<96x255xf32>
    %c192 = arith.constant 192 : index
    %c0_36 = arith.constant 0 : index
    %34 = vector.load %arg23[%c192, %c0_36] : memref<288x256xf32, #tpu.memory_space<vmem>>, vector<96x255xf32>
    tpu.vector_store %arg23[%c192, %c0_36], %33 {strides = array<i32>} : memref<288x256xf32, #tpu.memory_space<vmem>>, vector<96x255xf32>,
    %cst_37 = arith.constant 0.000000e+00 : f32
    %35 = vector.broadcast %cst_37 : f32 to vector<96x1xf32>
    %c192_38 = arith.constant 192 : index
    %c255 = arith.constant 255 : index
    %36 = vector.load %arg23[%c192_38, %c255] : memref<288x256xf32, #tpu.memory_space<vmem>>, vector<96x1xf32>
    tpu.vector_store %arg23[%c192_38, %c255], %35 {strides = array<i32>} : memref<288x256xf32, #tpu.memory_space<vmem>>, vector<96x1xf32>,
    %c0_39 = arith.constant 0 : index
    %c0_40 = arith.constant 0 : index
    %37 = vector.load %arg8[%c0_39, %c0_40] : memref<168x288xf32, #tpu.memory_space<vmem>>, vector<168x288xf32>
    %c0_41 = arith.constant 0 : index
    %c0_42 = arith.constant 0 : index
    %38 = vector.load %arg23[%c0_41, %c0_42] : memref<288x256xf32, #tpu.memory_space<vmem>>, vector<288x256xf32>
    %cst_43 = arith.constant dense<0.000000e+00> : vector<168x256xf32>
    %39 = tpu.matmul %37, %38, %cst_43 {dimension_numbers = #tpu.dot_dimension_numbers<[1], [0], [0], [1], [0, 0, 1, 1], [], []>} : vector<168x288xf32>, vector<288x256xf32>, vector<168x256xf32> -> vector<168x256xf32>
    %c0_44 = arith.constant 0 : index
    %c0_45 = arith.constant 0 : index
    %40 = vector.load %arg9[%c0_44, %c0_45] : memref<168x1xf32, #tpu.memory_space<vmem>>, vector<168x1xf32>
    %41 = vector.broadcast %40 : vector<168x1xf32> to vector<168x256xf32>
    %42 = arith.addf %39, %41 : vector<168x256xf32>
    %cst_46 = arith.constant 0.000000e+00 : f32
    %43 = vector.broadcast %cst_46 : f32 to vector<168x256xf32>
    %44 = arith.maximumf %42, %43 : vector<168x256xf32>
    %c0_47 = arith.constant 0 : index
    %c0_48 = arith.constant 0 : index
    %45 = vector.load %arg10[%c0_47, %c0_48] : memref<256x128xf32, #tpu.memory_space<vmem>>, vector<256x128xf32>
    %cst_49 = arith.constant dense<0.000000e+00> : vector<168x128xf32>
    %46 = tpu.matmul %44, %45, %cst_49 {dimension_numbers = #tpu.dot_dimension_numbers<[1], [0], [0], [1], [0, 0, 1, 1], [], []>} : vector<168x256xf32>, vector<256x128xf32>, vector<168x128xf32> -> vector<168x128xf32>
    %c0_50 = arith.constant 0 : index
    %c0_51 = arith.constant 0 : index
    %47 = vector.load %arg11[%c0_50, %c0_51] : memref<256x128xf32, #tpu.memory_space<vmem>>, vector<256x128xf32>
    %cst_52 = arith.constant dense<0.000000e+00> : vector<168x128xf32>
    %48 = tpu.matmul %44, %47, %cst_52 {dimension_numbers = #tpu.dot_dimension_numbers<[1], [0], [0], [1], [0, 0, 1, 1], [], []>} : vector<168x256xf32>, vector<256x128xf32>, vector<168x128xf32> -> vector<168x128xf32>
    %49 = arith.maximumf %46, %48 : vector<168x128xf32>
    %c0_53 = arith.constant 0 : index
    %c0_54 = arith.constant 0 : index
    %50 = vector.load %arg12[%c0_53, %c0_54] : memref<96x168xf32, #tpu.memory_space<vmem>>, vector<96x168xf32>
    %cst_55 = arith.constant dense<0.000000e+00> : vector<96x128xf32>
    %51 = tpu.matmul %50, %49, %cst_55 {dimension_numbers = #tpu.dot_dimension_numbers<[1], [0], [0], [1], [0, 0, 1, 1], [], []>} : vector<96x168xf32>, vector<168x128xf32>, vector<96x128xf32> -> vector<96x128xf32>
    %c0_56 = arith.constant 0 : index
    %c0_57 = arith.constant 0 : index
    %52 = vector.load %arg13[%c0_56, %c0_57] : memref<96x168xf32, #tpu.memory_space<vmem>>, vector<96x168xf32>
    %cst_58 = arith.constant dense<0.000000e+00> : vector<96x128xf32>
    %53 = tpu.matmul %52, %49, %cst_58 {dimension_numbers = #tpu.dot_dimension_numbers<[1], [0], [0], [1], [0, 0, 1, 1], [], []>} : vector<96x168xf32>, vector<168x128xf32>, vector<96x128xf32> -> vector<96x128xf32>
    %54 = arith.maximumf %51, %53 : vector<96x128xf32>
    %c0_59 = arith.constant 0 : index
    %c0_60 = arith.constant 0 : index
    %55 = vector.load %arg14[%c0_59, %c0_60] : memref<192x96xf32, #tpu.memory_space<vmem>>, vector<192x96xf32>
    %cst_61 = arith.constant dense<0.000000e+00> : vector<192x128xf32>
    %56 = tpu.matmul %55, %54, %cst_61 {dimension_numbers = #tpu.dot_dimension_numbers<[1], [0], [0], [1], [0, 0, 1, 1], [], []>} : vector<192x96xf32>, vector<96x128xf32>, vector<192x128xf32> -> vector<192x128xf32>
    %c0_62 = arith.constant 0 : index
    %c0_63 = arith.constant 0 : index
    %57 = vector.load %arg15[%c0_62, %c0_63] : memref<192x128xf32, #tpu.memory_space<vmem>>, vector<192x128xf32>
    %58 = arith.mulf %56, %57 : vector<192x128xf32>
    %c0_64 = arith.constant 0 : index
    %c0_65 = arith.constant 0 : index
    %59 = vector.load %arg16[%c0_64, %c0_65] : memref<128x16xf32, #tpu.memory_space<vmem>>, vector<128x16xf32>
    %cst_66 = arith.constant dense<0.000000e+00> : vector<192x16xf32>
    %60 = tpu.matmul %58, %59, %cst_66 {dimension_numbers = #tpu.dot_dimension_numbers<[1], [0], [0], [1], [0, 0, 1, 1], [], []>} : vector<192x128xf32>, vector<128x16xf32>, vector<192x16xf32> -> vector<192x16xf32>
    %c0_67 = arith.constant 0 : index
    %c0_68 = arith.constant 0 : index
    %61 = vector.load %arg17[%c0_67, %c0_68] : memref<24x192xf32, #tpu.memory_space<vmem>>, vector<24x192xf32>
    %cst_69 = arith.constant dense<0.000000e+00> : vector<24x16xf32>
    %62 = tpu.matmul %61, %60, %cst_69 {dimension_numbers = #tpu.dot_dimension_numbers<[1], [0], [0], [1], [0, 0, 1, 1], [], []>} : vector<24x192xf32>, vector<192x16xf32>, vector<24x16xf32> -> vector<24x16xf32>
    %c0_70 = arith.constant 0 : index
    %c0_71 = arith.constant 0 : index
    %63 = vector.load %arg18[%c0_70, %c0_71] : memref<24x1xf32, #tpu.memory_space<vmem>>, vector<24x1xf32>
    %64 = vector.broadcast %63 : vector<24x1xf32> to vector<24x16xf32>
    %65 = arith.addf %62, %64 : vector<24x16xf32>
    %cst_72 = arith.constant 0.000000e+00 : f32
    %66 = vector.broadcast %cst_72 : f32 to vector<24x16xf32>
    %67 = arith.maximumf %65, %66 : vector<24x16xf32>
    %c0_73 = arith.constant 0 : index
    %c0_74 = arith.constant 0 : index
    %68 = vector.load %arg19[%c0_73, %c0_74] : memref<10x24xf32, #tpu.memory_space<vmem>>, vector<10x24xf32>
    %cst_75 = arith.constant dense<0.000000e+00> : vector<10x16xf32>
    %69 = tpu.matmul %68, %67, %cst_75 {dimension_numbers = #tpu.dot_dimension_numbers<[1], [0], [0], [1], [0, 0, 1, 1], [], []>} : vector<10x24xf32>, vector<24x16xf32>, vector<10x16xf32> -> vector<10x16xf32>
    %c0_76 = arith.constant 0 : index
    %c0_77 = arith.constant 0 : index
    %70 = vector.load %arg20[%c0_76, %c0_77] : memref<10x1xf32, #tpu.memory_space<vmem>>, vector<10x1xf32>
    %71 = vector.broadcast %70 : vector<10x1xf32> to vector<10x16xf32>
    %72 = arith.addf %69, %71 : vector<10x16xf32>
    %c0_78 = arith.constant 0 : index
    %c0_79 = arith.constant 0 : index
    %c0_80 = arith.constant 0 : index
    %73 = vector.load %arg21[%c0_78, %c0_79, %c0_80] : memref<1x10x16xf32, #tpu.memory_space<vmem>>, vector<1x10x16xf32>
    %74 = vector.shape_cast %73 : vector<1x10x16xf32> to vector<10x16xf32>
    %75 = vector.shape_cast %72 : vector<10x16xf32> to vector<1x10x16xf32>
    tpu.vector_store %arg21[%c0_78, %c0_79, %c0_80], %75 {strides = array<i32>} : memref<1x10x16xf32, #tpu.memory_space<vmem>>, vector<1x10x16xf32>,
    return
  }
  func.func @transform_0(%arg0: i32) -> (i32, i32) {
    %c0_i32 = arith.constant 0 : i32
    %c0_i32_0 = arith.constant 0 : i32
    return %c0_i32, %arg0 : i32, i32
  }
  func.func @transform_1(%arg0: i32) -> (i32, i32) {
    %c0_i32 = arith.constant 0 : i32
    %c0_i32_0 = arith.constant 0 : i32
    %c0_i32_1 = arith.constant 0 : i32
    return %c0_i32, %c0_i32_0 : i32, i32
  }
  func.func @transform_2(%arg0: i32) -> (i32, i32) {
    %c0_i32 = arith.constant 0 : i32
    %c0_i32_0 = arith.constant 0 : i32
    %c0_i32_1 = arith.constant 0 : i32
    return %c0_i32, %c0_i32_0 : i32, i32
  }
  func.func @transform_3(%arg0: i32) -> (i32, i32) {
    %c0_i32 = arith.constant 0 : i32
    %c0_i32_0 = arith.constant 0 : i32
    %c0_i32_1 = arith.constant 0 : i32
    return %c0_i32, %c0_i32_0 : i32, i32
  }
  func.func @transform_4(%arg0: i32) -> (i32, i32) {
    %c0_i32 = arith.constant 0 : i32
    %c0_i32_0 = arith.constant 0 : i32
    %c0_i32_1 = arith.constant 0 : i32
    return %c0_i32, %c0_i32_0 : i32, i32
  }
  func.func @transform_5(%arg0: i32) -> (i32, i32) {
    %c0_i32 = arith.constant 0 : i32
    %c0_i32_0 = arith.constant 0 : i32
    %c0_i32_1 = arith.constant 0 : i32
    return %c0_i32, %c0_i32_0 : i32, i32
  }
  func.func @transform_6(%arg0: i32) -> (i32, i32) {
    %c0_i32 = arith.constant 0 : i32
    %c0_i32_0 = arith.constant 0 : i32
    %c0_i32_1 = arith.constant 0 : i32
    return %c0_i32, %c0_i32_0 : i32, i32
  }
  func.func @transform_7(%arg0: i32) -> (i32, i32) {
    %c0_i32 = arith.constant 0 : i32
    %c0_i32_0 = arith.constant 0 : i32
    %c0_i32_1 = arith.constant 0 : i32
    return %c0_i32, %c0_i32_0 : i32, i32
  }
  func.func @transform_8(%arg0: i32) -> (i32, i32) {
    %c0_i32 = arith.constant 0 : i32
    %c0_i32_0 = arith.constant 0 : i32
    %c0_i32_1 = arith.constant 0 : i32
    return %c0_i32, %c0_i32_0 : i32, i32
  }
  func.func @transform_9(%arg0: i32) -> (i32, i32) {
    %c0_i32 = arith.constant 0 : i32
    %c0_i32_0 = arith.constant 0 : i32
    %c0_i32_1 = arith.constant 0 : i32
    return %c0_i32, %c0_i32_0 : i32, i32
  }
  func.func @transform_10(%arg0: i32) -> (i32, i32) {
    %c0_i32 = arith.constant 0 : i32
    %c0_i32_0 = arith.constant 0 : i32
    %c0_i32_1 = arith.constant 0 : i32
    return %c0_i32, %c0_i32_0 : i32, i32
  }
  func.func @transform_11(%arg0: i32) -> (i32, i32) {
    %c0_i32 = arith.constant 0 : i32
    %c0_i32_0 = arith.constant 0 : i32
    %c0_i32_1 = arith.constant 0 : i32
    return %c0_i32, %c0_i32_0 : i32, i32
  }
  func.func @transform_12(%arg0: i32) -> (i32, i32) {
    %c0_i32 = arith.constant 0 : i32
    %c0_i32_0 = arith.constant 0 : i32
    %c0_i32_1 = arith.constant 0 : i32
    return %c0_i32, %c0_i32_0 : i32, i32
  }
  func.func @transform_13(%arg0: i32) -> (i32, i32) {
    %c0_i32 = arith.constant 0 : i32
    %c0_i32_0 = arith.constant 0 : i32
    %c0_i32_1 = arith.constant 0 : i32
    return %c0_i32, %c0_i32_0 : i32, i32
  }
  func.func @transform_14(%arg0: i32) -> (i32, i32) {
    %c0_i32 = arith.constant 0 : i32
    %c0_i32_0 = arith.constant 0 : i32
    %c0_i32_1 = arith.constant 0 : i32
    return %c0_i32, %c0_i32_0 : i32, i32
  }
  func.func @transform_15(%arg0: i32) -> (i32, i32) {
    %c0_i32 = arith.constant 0 : i32
    %c0_i32_0 = arith.constant 0 : i32
    %c0_i32_1 = arith.constant 0 : i32
    return %c0_i32, %c0_i32_0 : i32, i32
  }
  func.func @transform_16(%arg0: i32) -> (i32, i32) {
    %c0_i32 = arith.constant 0 : i32
    %c0_i32_0 = arith.constant 0 : i32
    %c0_i32_1 = arith.constant 0 : i32
    return %c0_i32, %c0_i32_0 : i32, i32
  }
  func.func @transform_17(%arg0: i32) -> (i32, i32) {
    %c0_i32 = arith.constant 0 : i32
    %c0_i32_0 = arith.constant 0 : i32
    %c0_i32_1 = arith.constant 0 : i32
    return %c0_i32, %c0_i32_0 : i32, i32
  }
  func.func @transform_18(%arg0: i32) -> (i32, i32) {
    %c0_i32 = arith.constant 0 : i32
    %c0_i32_0 = arith.constant 0 : i32
    %c0_i32_1 = arith.constant 0 : i32
    return %c0_i32, %c0_i32_0 : i32, i32
  }
  func.func @transform_19(%arg0: i32) -> (i32, i32) {
    %c0_i32 = arith.constant 0 : i32
    %c0_i32_0 = arith.constant 0 : i32
    %c0_i32_1 = arith.constant 0 : i32
    return %c0_i32, %c0_i32_0 : i32, i32
  }
  func.func @transform_20(%arg0: i32) -> (i32, i32, i32) {
    %c0_i32 = arith.constant 0 : i32
    %c0_i32_0 = arith.constant 0 : i32
    %c0_i32_1 = arith.constant 0 : i32
    return %arg0, %c0_i32, %c0_i32_0 : i32, i32, i32
  }
}

</mosaic_0001>

<bundles_post_ra>
// kernel: forward_pallas.1
= control target key start
LH: loop header
LB: loop body
LE: loop exit
PB: predicated region body
PF: predicated region fallthrough
CT: control target
= control target key end

     0   :  { %s10121_s0 = inlined_call_operand.vmem [shape: f32[32,1024], index: 0, kind: input, shape index: {}]   ;;  %s10122_s1 = inlined_call_operand.vmem [shape: f32[168,96], index: 1, kind: input, shape index: {}]   ;;  %s10123_s2 = inlined_call_operand.vmem [shape: f32[168,1], index: 2, kind: input, shape index: {}]   ;;  %s10124_s3 = inlined_call_operand.vmem [shape: f32[512,256], index: 3, kind: input, shape index: {}]   ;;  %s10125_s4 = inlined_call_operand.vmem [shape: f32[512,256], index: 4, kind: input, shape index: {}]   ;;  %s10126_s5 = inlined_call_operand.vmem [shape: f32[96,168], index: 5, kind: input, shape index: {}]   ;;  %s10127_s6 = inlined_call_operand.vmem [shape: f32[96,168], index: 6, kind: input, shape index: {}]   ;;  %s10128_s7 = inlined_call_operand.vmem [shape: f32[168,288], index: 7, kind: input, shape index: {}]   ;;  %s10129_s8 = inlined_call_operand.vmem [shape: f32[168,1], index: 8, kind: input, shape index: {}]   ;;  %s10130_s9 = inlined_call_operand.vmem [shape: f32[256,128], index: 9, kind: input, shape index: {}]   ;;  %s10131_s10 = inlined_call_operand.vmem [shape: f32[256,128], index: 10, kind: input, shape index: {}]   ;;  %s10132_s11 = inlined_call_operand.vmem [shape: f32[96,168], index: 11, kind: input, shape index: {}]   ;;  %s10133_s12 = inlined_call_operand.vmem [shape: f32[96,168], index: 12, kind: input, shape index: {}]   ;;  %s10134_s13 = inlined_call_operand.vmem [shape: f32[192,96], index: 13, kind: input, shape index: {}]   ;;  %s10135_s14 = inlined_call_operand.vmem [shape: f32[192,128], index: 14, kind: input, shape index: {}]   ;;  %s10136_s15 = inlined_call_operand.vmem [shape: f32[128,16], index: 15, kind: input, shape index: {}]   ;;  %s10137_s16 = inlined_call_operand.vmem [shape: f32[24,192], index: 16, kind: input, shape index: {}]   ;;  %s10138_s17 = inlined_call_operand.vmem [shape: f32[24,1], index: 17, kind: input, shape index: {}]   ;;  %s10139_s18 = inlined_call_operand.vmem [shape: f32[10,24], index: 18, kind: input, shape index: {}]   ;;  %s10140_s19 = inlined_call_operand.vmem [shape: f32[10,1], index: 19, kind: input, shape index: {}]   ;;  %s10141_s20 = inlined_call_operand.vmem [shape: f32[2,10,16], index: 20, kind: output, shape index: {}]  }
   0x1   :  { %10250 = sst [smem:[#allocation73_spill]] %s10121_s0 }
   0x2   :  { %10251 = sst [smem:[#allocation74_spill]] %s10122_s1 }
   0x3   :  { %10252 = sst [smem:[#allocation75_spill]] %s10123_s2 }
   0x4   :  { %10253 = sst [smem:[#allocation76_spill]] %s10124_s3 }
   0x5   :  { %10254 = sst [smem:[#allocation77_spill]] %s10125_s4 }
   0x6   :  { %s6339_s1 = smov 0   ;;  %s6341_s22 = smov 0  }
   0x7   :  { %s6343_s23 = smov 0  }
   0x8 LB: > { %10255 = sst [smem:[#allocation5_spill]] %s6223_s22  ;;  %s6356_s2 = sadd.s32 1, %s6227_s23   ;;  %s6227_s23 = sphi %s6343_s23, %s10567_s23   ;;  %s6223_s22 = sphi %s6341_s22, %s10566_s22   ;;  %s6219_s1 = sphi %s6339_s1, %s10565_s1  }
   0x9   : > { %s34_s25 = ssub.s32 %s6227_s23, %s6356_s2  ;;  %s37_s3 = sadd.s32 1, %s6223_s22 }
   0xa   : > { %p35_p0 = scmp.eq.s32.totalorder %s34_s25, 0  ;;  %p44_p1 = scmp.ne.s32.totalorder %s6223_s22, %s6219_s1 }
   0xb   : > { %p45_p2 = scmp.eq.s32.totalorder %s6227_s23, 0  ;;  %p5804_p4 = scmp.ge.s32.totalorder %s6227_s23, 2 }
   0xc   : > { %s6365_s26 = scalar_select %p35_p0, %s6223_s22, %s37_s3  }
   0xd   : > { %p46_p3 = por %p45_p2, %p44_p1  ;;  %552 = sbr.rel (%p5804_p4) target bundleno = 36 (0x24), region = 92 }
   0xe   : > { %10256 = sst [smem:[#allocation6_spill]] %s6365_s26 }
  0x12   : > { %555 = sbr.rel (!%p46_p3) target bundleno = 36 (0x24), region = 96  ;;  %s557_s27 = sand.u32 (%p46_p3), 1, %s6223_s22  }
  0x13   : > { %s5954_s28 = sshll.u32 (%p46_p3), %s6227_s23, 5  ;;  %s5805_s4 = sshll.u32 (%p46_p3), %s557_s27, 7 }
  0x14   : > { %s10257_s0 = sld [smem:[#allocation73_spill]] (%p46_p3)  ;;  %s559_s25 = scalar_lea.vmem (%p46_p3), [#allocation4], %s5805_s4 }
  0x1a   : > { %s6373_s21 = scalar_lea.vmem %s10257_s0, %s5954_s28 }
  0x1b   : > { %v575_v0 = vld [vmem:[%s6373_s21] sm:$0xff]  ;;  %v577_v1 = vld [vmem:[%s6373_s21 + $0x8] sm:$0xff]  ;;  %v579_v2 = vld [vmem:[%s6373_s21 + $0x10] sm:$0xff] }
  0x1c   : > { %576 = vst [vmem:[%s559_s25] sm:$0xff] %v575_v0  ;;  %578 = vst [vmem:[%s559_s25 + $0x8] sm:$0xff] %v577_v1  ;;  %v581_v3 = vld [vmem:[%s6373_s21 + $0x18] sm:$0xff]  ;;  %v583_v4 = vld [vmem:[%s6373_s21 + $0x40] sm:$0xff] }
  0x1d   : > { %580 = vst [vmem:[%s559_s25 + $0x10] sm:$0xff] %v579_v2  ;;  %v585_v5 = vld [vmem:[%s6373_s21 + $0x48] sm:$0xff]  ;;  %582 = vst [vmem:[%s559_s25 + $0x18] sm:$0xff] %v581_v3  ;;  %v587_v6 = vld [vmem:[%s6373_s21 + $0x50] sm:$0xff] }
  0x1e   : > { %584 = vst [vmem:[%s559_s25 + $0x20] sm:$0xff] %v583_v4  ;;  %586 = vst [vmem:[%s559_s25 + $0x28] sm:$0xff] %v585_v5  ;;  %v589_v7 = vld [vmem:[%s6373_s21 + $0x58] sm:$0xff]  ;;  %v591_v8 = vld [vmem:[%s6373_s21 + $0x80] sm:$0xff] }
  0x1f   : > { %588 = vst [vmem:[%s559_s25 + $0x30] sm:$0xff] %v587_v6  ;;  %590 = vst [vmem:[%s559_s25 + $0x38] sm:$0xff] %v589_v7  ;;  %v593_v9 = vld [vmem:[%s6373_s21 + $0x88] sm:$0xff]  ;;  %v595_v10 = vld [vmem:[%s6373_s21 + $0x90] sm:$0xff] }
  0x20   : > { %592 = vst [vmem:[%s559_s25 + $0x40] sm:$0xff] %v591_v8  ;;  %v597_v11 = vld [vmem:[%s6373_s21 + $0x98] sm:$0xff]  ;;  %594 = vst [vmem:[%s559_s25 + $0x48] sm:$0xff] %v593_v9  ;;  %v599_v12 = vld [vmem:[%s6373_s21 + $0xc0] sm:$0xff] }
  0x21   : > { %596 = vst [vmem:[%s559_s25 + $0x50] sm:$0xff] %v595_v10  ;;  %598 = vst [vmem:[%s559_s25 + $0x58] sm:$0xff] %v597_v11  ;;  %v601_v13 = vld [vmem:[%s6373_s21 + $0xc8] sm:$0xff]  ;;  %v603_v14 = vld [vmem:[%s6373_s21 + $0xd0] sm:$0xff] }
  0x22   : > { %600 = vst [vmem:[%s559_s25 + $0x60] sm:$0xff] %v599_v12  ;;  %602 = vst [vmem:[%s559_s25 + $0x68] sm:$0xff] %v601_v13  ;;  %v605_v15 = vld [vmem:[%s6373_s21 + $0xd8] sm:$0xff] }
  0x23   : > { %604 = vst [vmem:[%s559_s25 + $0x70] sm:$0xff] %v603_v14  ;;  %606 = vst [vmem:[%s559_s25 + $0x78] sm:$0xff] %v605_v15 }
  0x24 PF: > { %p5808_p5 = scmp.ge.s32.totalorder %s6227_s23, 1  ;;  %p611_p6 = scmp.lt.s32.totalorder %s6227_s23, 3 }
  0x26   : > { %p612_p7 = pnand %p5808_p5, %p611_p6 }
  0x28   : > { %615 = sbr.rel (%p612_p7) target bundleno = 2901 (0xb55), region = 119 }
  0x2d   : > { %s618_s3 = sand.u32 1, %s6219_s1   ;;  %v10151_v16 = vmov 0.0   ;;  %s6230_s4 = smov 126   ;;  %v6232_v35 = vmov 0   ;;  %vm891_vm0 = vcmask 1031168   ;;  %vm936_vm1 = vcmask 1048560  }
  0x2e   : > { %s5809_s27 = sshll.u32 %s618_s3, 7  ;;  %1264 = vmatprep.mubr.f32.mxu0 %v10151_v16  ;;  %1455 = vmatprep.mubr.f32.mxu1 %v10151_v16  ;;  %s10146_s1 = smov 127   ;;  %vm777_vm2 = vcmask 1039360   ;;  %vm822_vm3 = vcmask 1048568   ;;  %vm1136_vm4 = vcmask 785408   ;;  %vm2752_vm5 = vcmask 326656  }
  0x2f   : > { %s620_s28 = scalar_lea.vmem [#allocation4], %s5809_s27  ;;  %s10258_s0 = sld [smem:[#allocation75_spill]]  ;;  %6204 = vset.pattern.permute.xlu1 %v6232_v35  ;;  %6203 = vset.pattern.permute.xlu0 %v6232_v35  ;;  %vm3256_vm6 = vcmask 1047560   ;;  %vm3219_vm7 = vcmask 7168   ;;  %vm3698_vm8 = vcmask 261120   ;;  %vm5547_vm9 = vcmask 523264  }
  0x30   : > { %v6396_v17 = vld [vmem:[%s620_s28 + $0x78] sm:$0xff]  ;;  %v6398_v18 = vld [vmem:[%s620_s28 + $0x68] sm:$0xff]  ;;  %v6400_v19 = vld [vmem:[%s620_s28 + $0x70] sm:$0xff]  ;;  %s10259_s3 = sld [smem:[#allocation74_spill]]  ;;  %s6233_s25 = smov 1   ;;  %vm5654_vm10 = vcmask 195584  }
  0x31   : > { %889 = vrot.lane.b32.xlu1 %v6396_v17, %s6230_s4  ;;  %885 = vrot.lane.b32.xlu0 %v6398_v18, %s6230_s4  ;;  %v6404_v20 = vld [vmem:[%s620_s28 + $0x60] sm:$0xff]  ;;  %v6406_v21 = vld [vmem:[%s620_s28 + $0x50] sm:$0xff]  ;;  %s10562_s27 = smov 127   ;;  %vm5738_vm11 = vcmask 123904   ;;  %vm5736_vm12 = vcmask 130048  }
  0x32   : > { %v6408_v22 = vld [vmem:[%s620_s28 + $0x48] sm:$0xff]  ;;  %v6410_v23 = vld [vmem:[%s620_s28 + $0x58] sm:$0xff]  ;;  %v6412_v24 = vld [vmem:[%s620_s28 + $0x40] sm:$0xff] }
  0x33   : > { %v6414_v25 = vld [vmem:[%s620_s28 + $0x30] sm:$0xff]  ;;  %v6416_v26 = vld [vmem:[%s620_s28 + $0x28] sm:$0xff]  ;;  %v6418_v27 = vld [vmem:[%s620_s28 + $0x38] sm:$0xff] }
  0x34   : > { %v6420_v28 = vld [vmem:[%s620_s28 + $0x20] sm:$0xff]  ;;  %v6422_v29 = vld [vmem:[%s620_s28 + $0x10] sm:$0xff]  ;;  %v6424_v30 = vld [vmem:[%s620_s28 + $0x8] sm:$0xff] }
  0x35   : > { %887 = vrot.lane.b32.xlu0 %v6400_v19, %s6230_s4  ;;  %883 = vrot.lane.b32.xlu1 %v6404_v20, %s6230_s4  ;;  %v6428_v31 = vld [vmem:[%s620_s28 + $0x18] sm:$0xff]  ;;  %v6430_v32 = vld [vmem:[%s620_s28] sm:$0xff] }
  0x36   : > { %v1010_v33 = vld [vmem:[%s10258_s0] sm:$0xff]  ;;  %v1011_v34 = vld [vmem:[%s10258_s0 + $0x8] sm:$0xff]  ;;  %v1013_v36 = vld [vmem:[%s10258_s0 + $0x18] sm:$0xff] }
  0x37   : > { %v1012_v37 = vld [vmem:[%s10258_s0 + $0x10] sm:$0xff]  ;;  %v1015_v38 = vld [vmem:[%s10258_s0 + $0x28] sm:$0xff]  ;;  %v1014_v39 = vld [vmem:[%s10258_s0 + $0x20] sm:$0xff] }
  0x38   : > { %v1017_v40 = vld [vmem:[%s10258_s0 + $0x38] sm:$0xff]  ;;  %v1016_v41 = vld [vmem:[%s10258_s0 + $0x30] sm:$0xff]  ;;  %v1019_v44 = vld [vmem:[%s10258_s0 + $0x48] sm:$0xff] }
  0x39   : > { %879 = vrot.lane.b32.xlu1 %v6406_v21, %s6230_s4  ;;  %877 = vrot.lane.b32.xlu0 %v6408_v22, %s6230_s4  ;;  %v1018_v45 = vld [vmem:[%s10258_s0 + $0x40] sm:$0xff]  ;;  %v1021_v48 = vld [vmem:[%s10258_s0 + $0x58] sm:$0xff] }
  0x3a   : > { %v1020_v49 = vld [vmem:[%s10258_s0 + $0x50] sm:$0xff]  ;;  %v1023_v55 = vld [vmem:[%s10258_s0 + $0x68] sm:$0xff]  ;;  %v1022_v58 = vld [vmem:[%s10258_s0 + $0x60] sm:$0xff] }
  0x3b   : > { %v1025_v61 = vld [vmem:[%s10258_s0 + $0x78] sm:$0xff]  ;;  %v1024_v0 = vld [vmem:[%s10258_s0 + $0x70] sm:$0xff]  ;;  %v1027_v3 = vld [vmem:[%s10258_s0 + $0x88] sm:$0xff] }
  0x3c   : > { %v1026_v5 = vld [vmem:[%s10258_s0 + $0x80] sm:$0xff]  ;;  %v1029_v8 = vld [vmem:[%s10258_s0 + $0x98] sm:$0xff]  ;;  %v1028_v12 = vld [vmem:[%s10258_s0 + $0x90] sm:$0xff] }
  0x3d   : > { %881 = vrot.lane.b32.xlu0 %v6410_v23, %s6230_s4  ;;  %875 = vrot.lane.b32.xlu1 %v6412_v24, %s6230_s4 }
  0x41   : > { %871 = vrot.lane.b32.xlu1 %v6414_v25, %s6230_s4  ;;  %869 = vrot.lane.b32.xlu0 %v6416_v26, %s6230_s4 }
  0x45   : > { %873 = vrot.lane.b32.xlu0 %v6418_v27, %s6230_s4  ;;  %867 = vrot.lane.b32.xlu1 %v6420_v28, %s6230_s4 }
  0x49   : > { %863 = vrot.lane.b32.xlu1 %v6422_v29, %s6230_s4  ;;  %861 = vrot.lane.b32.xlu0 %v6424_v30, %s6230_s4 }
  0x4d   : > { %865 = vrot.lane.b32.xlu0 %v6428_v31, %s6230_s4  ;;  %859 = vrot.lane.b32.xlu1 %v6430_v32, %s6230_s4  ;;  %s10260_s4 = sld [smem:[#allocation76_spill]] }
  0x51   : > { %773 = vrot.lane.b32.xlu1 %v6400_v19, %s10146_s1  ;;  %771 = vrot.lane.b32.xlu0 %v6398_v18, %s10146_s1 }
  0x55   : > { %775 = vrot.lane.b32.xlu0 %v6396_v17, %s10146_s1  ;;  %769 = vrot.lane.b32.xlu1 %v6404_v20, %s10146_s1 }
  0x59   : > { %765 = vrot.lane.b32.xlu1 %v6406_v21, %s10146_s1  ;;  %763 = vrot.lane.b32.xlu0 %v6408_v22, %s10146_s1 }
  0x5d   : > { %767 = vrot.lane.b32.xlu0 %v6410_v23, %s10146_s1  ;;  %761 = vrot.lane.b32.xlu1 %v6412_v24, %s10146_s1 }
  0x61   : > { %757 = vrot.lane.b32.xlu1 %v6414_v25, %s10146_s1  ;;  %755 = vrot.lane.b32.xlu0 %v6416_v26, %s10146_s1 }
  0x65   : > { %759 = vrot.lane.b32.xlu0 %v6418_v27, %s10146_s1  ;;  %753 = vrot.lane.b32.xlu1 %v6420_v28, %s10146_s1 }
  0x69   : > { %749 = vrot.lane.b32.xlu1 %v6422_v29, %s10146_s1  ;;  %747 = vrot.lane.b32.xlu0 %v6424_v30, %s10146_s1 }
  0x6d   : > { %751 = vrot.lane.b32.xlu0 %v6428_v31, %s10146_s1  ;;  %745 = vrot.lane.b32.xlu1 %v6430_v32, %s10146_s1  ;;  %s10261_s1 = sld [smem:[#allocation77_spill]] }
  0x71   : > { %1033 = vperm.xlu0 %6203, %v1010_v33   ;;  %1038 = vperm.xlu1 %6204, %v1011_v34   ;;  %v1030_v33 = vld [vmem:[%s10258_s0 + $0xa0] sm:$0xff] }
  0x73   : > { %s10262_s21 = smov %s10261_s1 }
  0x75   : > { %1048 = vperm.xlu0 %6203, %v1013_v36   ;;  %1043 = vperm.xlu1 %6204, %v1012_v37  }
  0x79   : > { %1058 = vperm.xlu0 %6203, %v1015_v38   ;;  %1053 = vperm.xlu1 %6204, %v1014_v39  }
  0x7d   : > { %1068 = vperm.xlu0 %6203, %v1017_v40   ;;  %1063 = vperm.xlu1 %6204, %v1016_v41  }
  0x81   : > { %1078 = vperm.xlu0 %6203, %v1019_v44   ;;  %1073 = vperm.xlu1 %6204, %v1018_v45  }
  0x85   : > { %1088 = vperm.xlu0 %6203, %v1021_v48   ;;  %1083 = vperm.xlu1 %6204, %v1020_v49  }
  0x89   : > { %1098 = vperm.xlu0 %6203, %v1023_v55   ;;  %1093 = vperm.xlu1 %6204, %v1022_v58  }
  0x8d   : > { %1108 = vperm.xlu0 %6203, %v1025_v61   ;;  %1103 = vperm.xlu1 %6204, %v1024_v0  }
  0x91   : > { %1118 = vperm.xlu0 %6203, %v1027_v3   ;;  %1113 = vperm.xlu1 %6204, %v1026_v5  }
  0x95   : > { %1128 = vperm.xlu0 %6203, %v1029_v8   ;;  %1123 = vperm.xlu1 %6204, %v1028_v12   ;;  %v946_v12 = vld [vmem:[%s10259_s3 + $0x28] sm:$0xff] }
  0x99   : > { %1133 = vperm.xlu1 %6204, %v1030_v33   ;;  %v1753_v33 = vld [vmem:[%s10260_s4 + $0x2b8] sm:$0xff] }
  0xa3   : > { %v890_v42 = vpop.permute.xlu1 %889  ;;  %v886_v43 = vpop.permute.xlu0 %885 }
  0xa4   : > { %935 = vst.msk [vmem:[#allocation2 + $0x178] sm:$0xff] %vm891_vm0, %v890_v42 }
  0xa5   : > { %940 = vst.msk [vmem:[#allocation2 + $0x178] sm:$0xff] %vm936_vm1, %v10151_v16 }
  0xa7   : > { %v888_v46 = vpop.permute.xlu0 %887  ;;  %v884_v47 = vpop.permute.xlu1 %883 }
  0xa8   : > { %v902_v50 = vsel %vm891_vm0, %v886_v43, %v888_v46  ;;  %v903_v51 = vsel %vm891_vm0, %v888_v46, %v890_v42  ;;  %v901_v52 = vsel %vm891_vm0, %v884_v47, %v886_v43 }
  0xa9   : > { %1208 = vmatprep.subr.mxu0 %v902_v50 }
  0xaa   : > { %1209 = vmatpush1.msra.mxu0 %v901_v52 }
  0xab   : > { %v880_v53 = vpop.permute.xlu1 %879  ;;  %v878_v54 = vpop.permute.xlu0 %877 }
  0xac   : > { %v899_v56 = vsel %vm891_vm0, %v878_v54, %v880_v53  ;;  %v1009_v57 = vld [vmem:[#allocation2 + $0x178] sm:$0xff] }
  0xad   : > { %1399 = vmatprep.subr.mxu1 %v1009_v57  ;;  %1210 = vmatprep.subr.mxu0 %v899_v56 }
  0xae   : > { %1400 = vmatpush1.msra.mxu1 %v903_v51 }
  0xaf   : > { %v882_v59 = vpop.permute.xlu0 %881  ;;  %v876_v60 = vpop.permute.xlu1 %875 }
  0xb0   : > { %v900_v62 = vsel %vm891_vm0, %v880_v53, %v882_v59  ;;  %931 = vst.msk [vmem:[#allocation2 + $0x158] sm:$0xff] %vm891_vm0, %v882_v59  ;;  %v898_v63 = vsel %vm891_vm0, %v876_v60, %v878_v54 }
  0xb1   : > { %939 = vst.msk [vmem:[#allocation2 + $0x158] sm:$0xff] %vm936_vm1, %v10151_v16  ;;  %1211 = vmatpush1.msra.mxu0 %v898_v63 }
  0xb3   : > { %v872_v1 = vpop.permute.xlu1 %871  ;;  %v870_v2 = vpop.permute.xlu0 %869 }
  0xb4   : > { %v896_v4 = vsel %vm891_vm0, %v870_v2, %v872_v1 }
  0xb5   : > { %1212 = vmatprep.subr.mxu0 %v896_v4 }
  0xb7   : > { %v874_v6 = vpop.permute.xlu0 %873  ;;  %v868_v7 = vpop.permute.xlu1 %867 }
  0xb8   : > { %v897_v9 = vsel %vm891_vm0, %v872_v1, %v874_v6  ;;  %927 = vst.msk [vmem:[#allocation2 + $0x138] sm:$0xff] %vm891_vm0, %v874_v6  ;;  %v895_v10 = vsel %vm891_vm0, %v868_v7, %v870_v2  ;;  %v1005_v11 = vld [vmem:[#allocation2 + $0x158] sm:$0xff]  ;;  %v941_v7 = vld [vmem:[%s10259_s3] sm:$0xff] }
  0xb9   : > { %938 = vst.msk [vmem:[#allocation2 + $0x138] sm:$0xff] %vm936_vm1, %v10151_v16  ;;  %1401 = vmatprep.subr.mxu1 %v1005_v11  ;;  %1213 = vmatpush1.msra.mxu0 %v895_v10  ;;  %v1690_v10 = vld [vmem:[%s10260_s4 + $0xc0] sm:$0xff]  ;;  %v1755_v11 = vld [vmem:[%s10260_s4 + $0x2c8] sm:$0xff] }
  0xba   : > { %1402 = vmatpush1.msra.mxu1 %v900_v62 }
  0xbb   : > { %v864_v13 = vpop.permute.xlu1 %863  ;;  %v862_v14 = vpop.permute.xlu0 %861 }
  0xbc   : > { %v893_v15 = vsel %vm891_vm0, %v862_v14, %v864_v13 }
  0xbd   : > { %1214 = vmatprep.subr.mxu0 %v893_v15  ;;  %v1688_v15 = vld [vmem:[%s10260_s4 + $0xb0] sm:$0xff] }
  0xbf   : > { %v866_v34 = vpop.permute.xlu0 %865  ;;  %v860_v35 = vpop.permute.xlu1 %859 }
  0xc0   : > { %v894_v36 = vsel %vm891_vm0, %v864_v13, %v866_v34  ;;  %923 = vst.msk [vmem:[#allocation2 + $0x118] sm:$0xff] %vm891_vm0, %v866_v34  ;;  %v892_v37 = vsel %vm891_vm0, %v860_v35, %v862_v14  ;;  %v1001_v38 = vld [vmem:[#allocation2 + $0x138] sm:$0xff]  ;;  %v1754_v14 = vld [vmem:[%s10260_s4 + $0x2c0] sm:$0xff]  ;;  %v947_v34 = vld [vmem:[%s10259_s3 + $0x30] sm:$0xff] }
  0xc1   : > { %937 = vst.msk [vmem:[#allocation2 + $0x118] sm:$0xff] %vm936_vm1, %v10151_v16  ;;  %1403 = vmatprep.subr.mxu1 %v1001_v38  ;;  %1215 = vmatpush1.msra.mxu0 %v892_v37  ;;  %v1689_v13 = vld [vmem:[%s10260_s4 + $0xb8] sm:$0xff]  ;;  %v1687_v35 = vld [vmem:[%s10260_s4 + $0xa8] sm:$0xff]  ;;  %v1686_v37 = vld [vmem:[%s10260_s4 + $0xa0] sm:$0xff] }
  0xc2   : > { %1404 = vmatpush1.msra.mxu1 %v897_v9  ;;  %v1756_v9 = vld [vmem:[%s10260_s4 + $0x2d0] sm:$0xff]  ;;  %v1751_v38 = vld [vmem:[%s10260_s4 + $0x2a8] sm:$0xff] }
  0xc3   : > { %v774_v39 = vpop.permute.xlu1 %773  ;;  %v772_v40 = vpop.permute.xlu0 %771 }
  0xc4   : > { %v788_v41 = vsel %vm777_vm2, %v772_v40, %v774_v39 }
  0xc5   : > { %1216 = vmatprep.subr.mxu0 %v788_v41  ;;  %v1750_v41 = vld [vmem:[%s10260_s4 + $0x2a0] sm:$0xff] }
  0xc7   : > { %v776_v42 = vpop.permute.xlu0 %775  ;;  %v770_v43 = vpop.permute.xlu1 %769 }
  0xc8   : > { %v789_v44 = vsel %vm777_vm2, %v774_v39, %v776_v42  ;;  %821 = vst.msk [vmem:[#allocation2 + $0xf8] sm:$0xff] %vm777_vm2, %v776_v42  ;;  %v787_v45 = vsel %vm777_vm2, %v770_v43, %v772_v40  ;;  %v997_v46 = vld [vmem:[#allocation2 + $0x118] sm:$0xff]  ;;  %v1684_v42 = vld [vmem:[%s10260_s4 + $0x90] sm:$0xff] }
  0xc9   : > { %826 = vst.msk [vmem:[#allocation2 + $0xf8] sm:$0xff] %vm822_vm3, %v10151_v16  ;;  %1405 = vmatprep.subr.mxu1 %v997_v46  ;;  %1217 = vmatpush1.msra.mxu0 %v787_v45  ;;  %v948_v39 = vld [vmem:[%s10259_s3 + $0x38] sm:$0xff]  ;;  %v1683_v45 = vld [vmem:[%s10260_s4 + $0x88] sm:$0xff]  ;;  %v1748_v46 = vld [vmem:[%s10260_s4 + $0x290] sm:$0xff] }
  0xca   : > { %1406 = vmatpush1.msra.mxu1 %v894_v36  ;;  %v1752_v36 = vld [vmem:[%s10260_s4 + $0x2b0] sm:$0xff]  ;;  %v1685_v40 = vld [vmem:[%s10260_s4 + $0x98] sm:$0xff] }
  0xcb   : > { %v766_v47 = vpop.permute.xlu1 %765  ;;  %v764_v48 = vpop.permute.xlu0 %763  ;;  %v1749_v43 = vld [vmem:[%s10260_s4 + $0x298] sm:$0xff] }
  0xcc   : > { %v785_v49 = vsel %vm777_vm2, %v764_v48, %v766_v47 }
  0xcd   : > { %1218 = vmatprep.subr.mxu0 %v785_v49  ;;  %v950_v49 = vld [vmem:[%s10259_s3 + $0x48] sm:$0xff] }
  0xcf   : > { %v768_v50 = vpop.permute.xlu0 %767  ;;  %v762_v51 = vpop.permute.xlu1 %761 }
  0xd0   : > { %v786_v52 = vsel %vm777_vm2, %v766_v47, %v768_v50  ;;  %817 = vst.msk [vmem:[#allocation2 + $0xd8] sm:$0xff] %vm777_vm2, %v768_v50  ;;  %v784_v53 = vsel %vm777_vm2, %v762_v51, %v764_v48  ;;  %v993_v54 = vld [vmem:[#allocation2 + $0xf8] sm:$0xff]  ;;  %v1682_v47 = vld [vmem:[%s10260_s4 + $0x80] sm:$0xff]  ;;  %v1747_v48 = vld [vmem:[%s10260_s4 + $0x288] sm:$0xff] }
  0xd1   : > { %825 = vst.msk [vmem:[#allocation2 + $0xd8] sm:$0xff] %vm822_vm3, %v10151_v16  ;;  %1407 = vmatprep.subr.mxu1 %v993_v54  ;;  %1219 = vmatpush1.msra.mxu0 %v784_v53  ;;  %v1681_v50 = vld [vmem:[%s10260_s4 + $0x78] sm:$0xff]  ;;  %v1746_v51 = vld [vmem:[%s10260_s4 + $0x280] sm:$0xff]  ;;  %v951_v54 = vld [vmem:[%s10259_s3 + $0x50] sm:$0xff] }
  0xd2   : > { %1408 = vmatpush1.msra.mxu1 %v789_v44  ;;  %v949_v44 = vld [vmem:[%s10259_s3 + $0x40] sm:$0xff]  ;;  %v1745_v53 = vld [vmem:[%s10260_s4 + $0x278] sm:$0xff] }
  0xd3   : > { %v758_v55 = vpop.permute.xlu1 %757  ;;  %v756_v56 = vpop.permute.xlu0 %755 }
  0xd4   : > { %v782_v57 = vsel %vm777_vm2, %v756_v56, %v758_v55 }
  0xd5   : > { %1220 = vmatprep.subr.mxu0 %v782_v57  ;;  %v1678_v57 = vld [vmem:[%s10260_s4 + $0x60] sm:$0xff] }
  0xd7   : > { %v760_v58 = vpop.permute.xlu0 %759  ;;  %v754_v59 = vpop.permute.xlu1 %753 }
  0xd8   : > { %v783_v60 = vsel %vm777_vm2, %v758_v55, %v760_v58  ;;  %813 = vst.msk [vmem:[#allocation2 + $0xb8] sm:$0xff] %vm777_vm2, %v760_v58  ;;  %v781_v61 = vsel %vm777_vm2, %v754_v59, %v756_v56  ;;  %v989_v62 = vld [vmem:[#allocation2 + $0xd8] sm:$0xff]  ;;  %v1679_v55 = vld [vmem:[%s10260_s4 + $0x68] sm:$0xff]  ;;  %v1744_v56 = vld [vmem:[%s10260_s4 + $0x270] sm:$0xff] }
  0xd9   : > { %824 = vst.msk [vmem:[#allocation2 + $0xb8] sm:$0xff] %vm822_vm3, %v10151_v16  ;;  %1409 = vmatprep.subr.mxu1 %v989_v62  ;;  %1221 = vmatpush1.msra.mxu0 %v781_v61  ;;  %v1743_v58 = vld [vmem:[%s10260_s4 + $0x268] sm:$0xff]  ;;  %v952_v59 = vld [vmem:[%s10259_s3 + $0x58] sm:$0xff]  ;;  %v1742_v61 = vld [vmem:[%s10260_s4 + $0x260] sm:$0xff] }
  0xda   : > { %1410 = vmatpush1.msra.mxu1 %v786_v52  ;;  %v1680_v52 = vld [vmem:[%s10260_s4 + $0x70] sm:$0xff] }
  0xdb   : > { %v750_v63 = vpop.permute.xlu1 %749  ;;  %v748_v0 = vpop.permute.xlu0 %747  ;;  %v1676_v62 = vld [vmem:[%s10260_s4 + $0x50] sm:$0xff] }
  0xdc   : > { %v779_v1 = vsel %vm777_vm2, %v748_v0, %v750_v63 }
  0xdd   : > { %1222 = vmatprep.subr.mxu0 %v779_v1  ;;  %v1675_v1 = vld [vmem:[%s10260_s4 + $0x48] sm:$0xff] }
  0xdf   : > { %v752_v2 = vpop.permute.xlu0 %751  ;;  %v746_v3 = vpop.permute.xlu1 %745 }
  0xe0   : > { %v780_v4 = vsel %vm777_vm2, %v750_v63, %v752_v2  ;;  %809 = vst.msk [vmem:[#allocation2 + $0x98] sm:$0xff] %vm777_vm2, %v752_v2  ;;  %v778_v5 = vsel %vm777_vm2, %v746_v3, %v748_v0  ;;  %v985_v6 = vld [vmem:[#allocation2 + $0xb8] sm:$0xff]  ;;  %v953_v0 = vld [vmem:[%s10259_s3 + $0x60] sm:$0xff]  ;;  %v1740_v2 = vld [vmem:[%s10260_s4 + $0x250] sm:$0xff] }
  0xe1   : > { %823 = vst.msk [vmem:[#allocation2 + $0x98] sm:$0xff] %vm822_vm3, %v10151_v16  ;;  %1411 = vmatprep.subr.mxu1 %v985_v6  ;;  %1223 = vmatpush1.msra.mxu0 %v778_v5  ;;  %v1741_v63 = vld [vmem:[%s10260_s4 + $0x258] sm:$0xff]  ;;  %v1674_v3 = vld [vmem:[%s10260_s4 + $0x40] sm:$0xff]  ;;  %v954_v5 = vld [vmem:[%s10259_s3 + $0x68] sm:$0xff] }
  0xe2   : > { %1412 = vmatpush1.msra.mxu1 %v783_v60  ;;  %1224 = vmatprep.subr.mxu0 %v6398_v18  ;;  %v1697_v18 = vld [vmem:[%s10260_s4 + $0xf8] sm:$0xff] }
  0xe3   : > { %1225 = vmatpush1.msra.mxu0 %v6404_v20  ;;  %v1696_v20 = vld [vmem:[%s10260_s4 + $0xf0] sm:$0xff]  ;;  %v1677_v60 = vld [vmem:[%s10260_s4 + $0x58] sm:$0xff] }
  0xe4   : > { %1226 = vmatprep.subr.mxu0 %v6408_v22  ;;  %v942_v22 = vld [vmem:[%s10259_s3 + $0x8] sm:$0xff]  ;;  %v1673_v6 = vld [vmem:[%s10260_s4 + $0x38] sm:$0xff] }
  0xe5   : > { %1227 = vmatpush1.msra.mxu0 %v6412_v24  ;;  %v1695_v24 = vld [vmem:[%s10260_s4 + $0xe8] sm:$0xff] }
  0xe6   : > { %1228 = vmatprep.subr.mxu0 %v6416_v26  ;;  %v944_v26 = vld [vmem:[%s10259_s3 + $0x18] sm:$0xff] }
  0xe7   : > { %1229 = vmatpush1.msra.mxu0 %v6420_v28  ;;  %v1758_v28 = vld [vmem:[%s10260_s4 + $0x2e0] sm:$0xff] }
  0xe8   : > { %v981_v8 = vld [vmem:[#allocation2 + $0x98] sm:$0xff]  ;;  %1230 = vmatprep.subr.mxu0 %v6424_v30 }
  0xe9   : > { %1413 = vmatprep.subr.mxu1 %v981_v8  ;;  %1231 = vmatpush1.msra.mxu0 %v6430_v32  ;;  %v1757_v30 = vld [vmem:[%s10260_s4 + $0x2d8] sm:$0xff]  ;;  %v1691_v32 = vld [vmem:[%s10260_s4 + $0xc8] sm:$0xff]  ;;  %v1672_v8 = vld [vmem:[%s10260_s4 + $0x30] sm:$0xff] }
  0xea   : > { %1414 = vmatpush1.msra.mxu1 %v780_v4  ;;  %5812 = vmatmul.mubr.msk.f32.vlgmr.msra.gmra.mxu0 %vm1136_vm4, %v941_v7  ;;  %v1739_v4 = vld [vmem:[%s10260_s4 + $0x248] sm:$0xff] }
  0xeb   : > { %1415 = vmatprep.subr.mxu1 %v6396_v17  ;;  %1270 = vmatprep.mubr.f32.mxu0 %v10151_v16  ;;  %v1694_v17 = vld [vmem:[%s10260_s4 + $0xe0] sm:$0xff] }
  0xec   : > { %1416 = vmatpush1.msra.mxu1 %v6400_v19  ;;  %1794 = vmatprep.subr.mxu0 %v1697_v18  ;;  %v943_v19 = vld [vmem:[%s10259_s3 + $0x10] sm:$0xff]  ;;  %v1737_v18 = vld [vmem:[%s10260_s4 + $0x238] sm:$0xff] }
  0xed   : > { %1417 = vmatprep.subr.mxu1 %v6410_v23  ;;  %1795 = vmatpush1.msra.mxu0 %v1696_v20  ;;  %v1760_v23 = vld [vmem:[%s10260_s4 + $0x2f0] sm:$0xff] }
  0xee   : > { %1418 = vmatpush1.msra.mxu1 %v6406_v21  ;;  %5813 = vmatmul.mubr.msk.f32.gmra.mxu0 %vm1136_vm4, %v942_v22  ;;  %v1761_v21 = vld [vmem:[%s10260_s4 + $0x2f8] sm:$0xff]  ;;  %v955_v20 = vld [vmem:[%s10259_s3 + $0x70] sm:$0xff] }
  0xef   : > { %1419 = vmatprep.subr.mxu1 %v6418_v27  ;;  %1276 = vmatprep.mubr.f32.mxu0 %v10151_v16  ;;  %v1759_v27 = vld [vmem:[%s10260_s4 + $0x2e8] sm:$0xff] }
  0xf0   : > { %1420 = vmatpush1.msra.mxu1 %v6414_v25  ;;  %1796 = vmatprep.subr.mxu0 %v1695_v24  ;;  %v1693_v25 = vld [vmem:[%s10260_s4 + $0xd8] sm:$0xff]  ;;  %v1736_v24 = vld [vmem:[%s10260_s4 + $0x230] sm:$0xff] }
  0xf1   : > { %1421 = vmatprep.subr.mxu1 %v6428_v31  ;;  %1797 = vmatpush1.msra.mxu0 %v1694_v17  ;;  %v945_v31 = vld [vmem:[%s10259_s3 + $0x20] sm:$0xff] }
  0xf2   : > { %1422 = vmatpush1.msra.mxu1 %v6422_v29  ;;  %5814 = vmatmul.mubr.msk.f32.gmra.mxu0 %vm1136_vm4, %v943_v19  ;;  %v1692_v29 = vld [vmem:[%s10260_s4 + $0xd0] sm:$0xff]  ;;  %v1670_v17 = vld [vmem:[%s10260_s4 + $0x20] sm:$0xff] }
  0xf3   : > { %5833 = vmatmul.mubr.msk.f32.vlgmr.msra.gmra.mxu1 %vm1136_vm4, %v941_v7  ;;  %1282 = vmatprep.mubr.f32.mxu0 %v10151_v16  ;;  %v1738_v7 = vld [vmem:[%s10260_s4 + $0x240] sm:$0xff] }
  0xf4   : > { %1461 = vmatprep.mubr.f32.mxu1 %v10151_v16  ;;  %1985 = vmatprep.subr.mxu1 %v1761_v21  ;;  %v956_v21 = vld [vmem:[%s10259_s3 + $0x78] sm:$0xff] }
  0xf5   : > { %1986 = vmatpush1.msra.mxu1 %v1760_v23  ;;  %1798 = vmatprep.subr.mxu0 %v1693_v25  ;;  %v1669_v23 = vld [vmem:[%s10260_s4 + $0x18] sm:$0xff]  ;;  %v1734_v25 = vld [vmem:[%s10260_s4 + $0x220] sm:$0xff] }
  0xf6   : > { %5815 = vmatmul.mubr.msk.f32.gmra.mxu0 %vm1136_vm4, %v944_v26  ;;  %1987 = vmatprep.subr.mxu1 %v1759_v27  ;;  %v1733_v27 = vld [vmem:[%s10260_s4 + $0x218] sm:$0xff] }
  0xf7   : > { %5834 = vmatmul.mubr.msk.f32.gmra.mxu1 %vm1136_vm4, %v942_v22  ;;  %1288 = vmatprep.mubr.f32.mxu0 %v10151_v16  ;;  %v1671_v22 = vld [vmem:[%s10260_s4 + $0x28] sm:$0xff] }
  0xf8   : > { %1467 = vmatprep.mubr.f32.mxu1 %v10151_v16  ;;  %1988 = vmatpush1.msra.mxu1 %v1758_v28  ;;  %v957_v28 = vld [vmem:[%s10259_s3 + $0x80] sm:$0xff] }
  0xf9   : > { %1799 = vmatpush1.msra.mxu0 %v1692_v29  ;;  %1989 = vmatprep.subr.mxu1 %v1757_v30  ;;  %v1667_v29 = vld [vmem:[%s10260_s4 + $0x8] sm:$0xff]  ;;  %v1732_v30 = vld [vmem:[%s10260_s4 + $0x210] sm:$0xff] }
  0xfa   : > { %5816 = vmatmul.mubr.msk.f32.gmra.mxu0 %vm1136_vm4, %v945_v31  ;;  %1800 = vmatprep.subr.mxu0 %v1691_v32  ;;  %v1731_v32 = vld [vmem:[%s10260_s4 + $0x208] sm:$0xff] }
  0xfb   : > { %5835 = vmatmul.mubr.msk.f32.gmra.mxu1 %vm1136_vm4, %v943_v19  ;;  %1294 = vmatprep.mubr.f32.mxu0 %v10151_v16  ;;  %v1735_v19 = vld [vmem:[%s10260_s4 + $0x228] sm:$0xff] }
  0xfc   : > { %1473 = vmatprep.mubr.f32.mxu1 %v10151_v16  ;;  %1990 = vmatpush1.msra.mxu1 %v1756_v9  ;;  %v958_v9 = vld [vmem:[%s10259_s3 + $0x88] sm:$0xff] }
  0xfd   : > { %1801 = vmatpush1.msra.mxu0 %v1690_v10  ;;  %1991 = vmatprep.subr.mxu1 %v1755_v11  ;;  %v1729_v10 = vld [vmem:[%s10260_s4 + $0x1f8] sm:$0xff]  ;;  %v1730_v11 = vld [vmem:[%s10260_s4 + $0x200] sm:$0xff] }
  0xfe   : > { %5817 = vmatmul.mubr.msk.f32.gmra.mxu0 %vm1136_vm4, %v946_v12  ;;  %1802 = vmatprep.subr.mxu0 %v1689_v13  ;;  %v1793_v13 = vld [vmem:[%s10260_s4 + $0x3f8] sm:$0xff] }
  0xff   : > { %5836 = vmatmul.mubr.msk.f32.gmra.mxu1 %vm1136_vm4, %v944_v26  ;;  %1300 = vmatprep.mubr.f32.mxu0 %v10151_v16  ;;  %v1668_v26 = vld [vmem:[%s10260_s4 + $0x10] sm:$0xff] }
 0x100   : > { %1479 = vmatprep.mubr.f32.mxu1 %v10151_v16  ;;  %1992 = vmatpush1.msra.mxu1 %v1754_v14  ;;  %v959_v14 = vld [vmem:[%s10259_s3 + $0x90] sm:$0xff] }
 0x101   : > { %1803 = vmatpush1.msra.mxu0 %v1688_v15  ;;  %1993 = vmatprep.subr.mxu1 %v1753_v33  ;;  %v1727_v15 = vld [vmem:[%s10260_s4 + $0x1e8] sm:$0xff]  ;;  %v1792_v33 = vld [vmem:[%s10260_s4 + $0x3f0] sm:$0xff] }
 0x102   : > { %5818 = vmatmul.mubr.msk.f32.gmra.mxu0 %vm1136_vm4, %v947_v34  ;;  %1804 = vmatprep.subr.mxu0 %v1687_v35  ;;  %v1791_v35 = vld [vmem:[%s10260_s4 + $0x3e8] sm:$0xff] }
 0x103   : > { %5837 = vmatmul.mubr.msk.f32.gmra.mxu1 %vm1136_vm4, %v945_v31  ;;  %1306 = vmatprep.mubr.f32.mxu0 %v10151_v16  ;;  %v1666_v31 = vld [vmem:[%s10260_s4] sm:$0xff] }
 0x104   : > { %1485 = vmatprep.mubr.f32.mxu1 %v10151_v16  ;;  %1994 = vmatpush1.msra.mxu1 %v1752_v36  ;;  %v960_v36 = vld [vmem:[%s10259_s3 + $0x98] sm:$0xff] }
 0x105   : > { %1805 = vmatpush1.msra.mxu0 %v1686_v37  ;;  %1995 = vmatprep.subr.mxu1 %v1751_v38  ;;  %v1725_v37 = vld [vmem:[%s10260_s4 + $0x1d8] sm:$0xff]  ;;  %v1790_v38 = vld [vmem:[%s10260_s4 + $0x3e0] sm:$0xff] }
 0x106   : > { %5819 = vmatmul.mubr.msk.f32.gmra.mxu0 %vm1136_vm4, %v948_v39  ;;  %1806 = vmatprep.subr.mxu0 %v1685_v40  ;;  %v1789_v40 = vld [vmem:[%s10260_s4 + $0x3d8] sm:$0xff] }
 0x107   : > { %5838 = vmatmul.mubr.msk.f32.gmra.mxu1 %vm1136_vm4, %v946_v12  ;;  %1312 = vmatprep.mubr.f32.mxu0 %v10151_v16  ;;  %v1728_v12 = vld [vmem:[%s10260_s4 + $0x1f0] sm:$0xff] }
 0x108   : > { %1491 = vmatprep.mubr.f32.mxu1 %v10151_v16  ;;  %1996 = vmatpush1.msra.mxu1 %v1750_v41  ;;  %v961_v41 = vld [vmem:[%s10259_s3 + $0xa0] sm:$0xff]  ;;  %s10563_s3 = sadd.s32 4294967295, %s6227_s23  }
 0x109   : > { %1807 = vmatpush1.msra.mxu0 %v1684_v42  ;;  %1997 = vmatprep.subr.mxu1 %v1749_v43  ;;  %v1723_v42 = vld [vmem:[%s10260_s4 + $0x1c8] sm:$0xff]  ;;  %v1722_v43 = vld [vmem:[%s10260_s4 + $0x1c0] sm:$0xff]  ;;  %p676_p8 = scmp.lt.s32.totalorder %s10563_s3, 1 }
 0x10a   : > { %5820 = vmatmul.mubr.msk.f32.gmra.mxu0 %vm1136_vm4, %v949_v44  ;;  %1808 = vmatprep.subr.mxu0 %v1683_v45  ;;  %v1787_v45 = vld [vmem:[%s10260_s4 + $0x3c8] sm:$0xff] }
 0x10b   : > { %5839 = vmatmul.mubr.msk.f32.gmra.mxu1 %vm1136_vm4, %v947_v34  ;;  %1318 = vmatprep.mubr.f32.mxu0 %v10151_v16  ;;  %v1726_v34 = vld [vmem:[%s10260_s4 + $0x1e0] sm:$0xff] }
 0x10c   : > { %1497 = vmatprep.mubr.f32.mxu1 %v10151_v16  ;;  %1998 = vmatpush1.msra.mxu1 %v1748_v46  ;;  %v1721_v46 = vld [vmem:[%s10260_s4 + $0x1b8] sm:$0xff] }
 0x10d   : > { %1809 = vmatpush1.msra.mxu0 %v1682_v47  ;;  %1999 = vmatprep.subr.mxu1 %v1747_v48  ;;  %v1786_v47 = vld [vmem:[%s10260_s4 + $0x3c0] sm:$0xff]  ;;  %v1720_v48 = vld [vmem:[%s10260_s4 + $0x1b0] sm:$0xff] }
 0x10e   : > { %5821 = vmatmul.mubr.msk.f32.gmra.mxu0 %vm1136_vm4, %v950_v49  ;;  %1810 = vmatprep.subr.mxu0 %v1681_v50  ;;  %v1719_v50 = vld [vmem:[%s10260_s4 + $0x1a8] sm:$0xff] }
 0x10f   : > { %5840 = vmatmul.mubr.msk.f32.gmra.mxu1 %vm1136_vm4, %v948_v39  ;;  %1324 = vmatprep.mubr.f32.mxu0 %v10151_v16  ;;  %v1724_v39 = vld [vmem:[%s10260_s4 + $0x1d0] sm:$0xff] }
 0x110   : > { %1503 = vmatprep.mubr.f32.mxu1 %v10151_v16  ;;  %2000 = vmatpush1.msra.mxu1 %v1746_v51  ;;  %v1784_v51 = vld [vmem:[%s10260_s4 + $0x3b0] sm:$0xff] }
 0x111   : > { %1811 = vmatpush1.msra.mxu0 %v1680_v52  ;;  %2001 = vmatprep.subr.mxu1 %v1745_v53  ;;  %v1718_v52 = vld [vmem:[%s10260_s4 + $0x1a0] sm:$0xff]  ;;  %v1783_v53 = vld [vmem:[%s10260_s4 + $0x3a8] sm:$0xff] }
 0x112   : > { %5822 = vmatmul.mubr.msk.f32.gmra.mxu0 %vm1136_vm4, %v951_v54  ;;  %1812 = vmatprep.subr.mxu0 %v1679_v55  ;;  %v1716_v55 = vld [vmem:[%s10260_s4 + $0x190] sm:$0xff] }
 0x113   : > { %5841 = vmatmul.mubr.msk.f32.gmra.mxu1 %vm1136_vm4, %v949_v44  ;;  %1330 = vmatprep.mubr.f32.mxu0 %v10151_v16  ;;  %v1788_v44 = vld [vmem:[%s10260_s4 + $0x3d0] sm:$0xff] }
 0x114   : > { %1509 = vmatprep.mubr.f32.mxu1 %v10151_v16  ;;  %2002 = vmatpush1.msra.mxu1 %v1744_v56  ;;  %v1782_v56 = vld [vmem:[%s10260_s4 + $0x3a0] sm:$0xff] }
 0x115   : > { %1813 = vmatpush1.msra.mxu0 %v1678_v57  ;;  %2003 = vmatprep.subr.mxu1 %v1743_v58  ;;  %v1715_v57 = vld [vmem:[%s10260_s4 + $0x188] sm:$0xff]  ;;  %v1781_v58 = vld [vmem:[%s10260_s4 + $0x398] sm:$0xff] }
 0x116   : > { %5823 = vmatmul.mubr.msk.f32.gmra.mxu0 %vm1136_vm4, %v952_v59  ;;  %1814 = vmatprep.subr.mxu0 %v1677_v60  ;;  %v1780_v60 = vld [vmem:[%s10260_s4 + $0x390] sm:$0xff] }
 0x117   : > { %5842 = vmatmul.mubr.msk.f32.gmra.mxu1 %vm1136_vm4, %v950_v49  ;;  %1336 = vmatprep.mubr.f32.mxu0 %v10151_v16  ;;  %v1785_v49 = vld [vmem:[%s10260_s4 + $0x3b8] sm:$0xff] }
 0x118   : > { %1515 = vmatprep.mubr.f32.mxu1 %v10151_v16  ;;  %2004 = vmatpush1.msra.mxu1 %v1742_v61  ;;  %v1713_v61 = vld [vmem:[%s10260_s4 + $0x178] sm:$0xff] }
 0x119   : > { %1815 = vmatpush1.msra.mxu0 %v1676_v62  ;;  %2005 = vmatprep.subr.mxu1 %v1741_v63  ;;  %v1779_v62 = vld [vmem:[%s10260_s4 + $0x388] sm:$0xff]  ;;  %v1712_v63 = vld [vmem:[%s10260_s4 + $0x170] sm:$0xff] }
 0x11a   : > { %5824 = vmatmul.mubr.msk.f32.gmra.mxu0 %vm1136_vm4, %v953_v0  ;;  %1816 = vmatprep.subr.mxu0 %v1675_v1  ;;  %v1711_v1 = vld [vmem:[%s10260_s4 + $0x168] sm:$0xff] }
 0x11b   : > { %5843 = vmatmul.mubr.msk.f32.gmra.mxu1 %vm1136_vm4, %v951_v54  ;;  %1342 = vmatprep.mubr.f32.mxu0 %v10151_v16  ;;  %v1717_v54 = vld [vmem:[%s10260_s4 + $0x198] sm:$0xff] }
 0x11c   : > { %1521 = vmatprep.mubr.f32.mxu1 %v10151_v16  ;;  %2006 = vmatpush1.msra.mxu1 %v1740_v2  ;;  %v1777_v2 = vld [vmem:[%s10260_s4 + $0x378] sm:$0xff] }
 0x11d   : > { %1817 = vmatpush1.msra.mxu0 %v1674_v3  ;;  %2007 = vmatprep.subr.mxu1 %v1739_v4  ;;  %v1710_v3 = vld [vmem:[%s10260_s4 + $0x160] sm:$0xff]  ;;  %v1776_v4 = vld [vmem:[%s10260_s4 + $0x370] sm:$0xff] }
 0x11e   : > { %5825 = vmatmul.mubr.msk.f32.gmra.mxu0 %vm1136_vm4, %v954_v5  ;;  %1818 = vmatprep.subr.mxu0 %v1673_v6  ;;  %v1775_v6 = vld [vmem:[%s10260_s4 + $0x368] sm:$0xff] }
 0x11f   : > { %5844 = vmatmul.mubr.msk.f32.gmra.mxu1 %vm1136_vm4, %v952_v59  ;;  %1348 = vmatprep.mubr.f32.mxu0 %v10151_v16  ;;  %v1714_v59 = vld [vmem:[%s10260_s4 + $0x180] sm:$0xff] }
 0x120   : > { %1527 = vmatprep.mubr.f32.mxu1 %v10151_v16  ;;  %2008 = vmatpush1.msra.mxu1 %v1738_v7  ;;  %v1708_v7 = vld [vmem:[%s10260_s4 + $0x150] sm:$0xff] }
 0x121   : > { %1819 = vmatpush1.msra.mxu0 %v1672_v8  ;;  %2009 = vmatprep.subr.mxu1 %v1737_v18  ;;  %v1774_v8 = vld [vmem:[%s10260_s4 + $0x360] sm:$0xff]  ;;  %v1707_v18 = vld [vmem:[%s10260_s4 + $0x148] sm:$0xff] }
 0x122   : > { %5826 = vmatmul.mubr.msk.f32.gmra.mxu0 %vm1136_vm4, %v955_v20  ;;  %1820 = vmatprep.subr.mxu0 %v1671_v22  ;;  %v1706_v22 = vld [vmem:[%s10260_s4 + $0x140] sm:$0xff] }
 0x123   : > { %5845 = vmatmul.mubr.msk.f32.gmra.mxu1 %vm1136_vm4, %v953_v0  ;;  %1354 = vmatprep.mubr.f32.mxu0 %v10151_v16  ;;  %v1778_v0 = vld [vmem:[%s10260_s4 + $0x380] sm:$0xff] }
 0x124   : > { %1533 = vmatprep.mubr.f32.mxu1 %v10151_v16  ;;  %2010 = vmatpush1.msra.mxu1 %v1736_v24  ;;  %v1772_v24 = vld [vmem:[%s10260_s4 + $0x350] sm:$0xff] }
 0x125   : > { %1821 = vmatpush1.msra.mxu0 %v1670_v17  ;;  %2011 = vmatprep.subr.mxu1 %v1735_v19  ;;  %v1705_v17 = vld [vmem:[%s10260_s4 + $0x138] sm:$0xff]  ;;  %v1771_v19 = vld [vmem:[%s10260_s4 + $0x348] sm:$0xff] }
 0x126   : > { %5827 = vmatmul.mubr.msk.f32.gmra.mxu0 %vm1136_vm4, %v956_v21  ;;  %1822 = vmatprep.subr.mxu0 %v1669_v23  ;;  %v1770_v23 = vld [vmem:[%s10260_s4 + $0x340] sm:$0xff] }
 0x127   : > { %5846 = vmatmul.mubr.msk.f32.gmra.mxu1 %vm1136_vm4, %v954_v5  ;;  %1360 = vmatprep.mubr.f32.mxu0 %v10151_v16  ;;  %v1709_v5 = vld [vmem:[%s10260_s4 + $0x158] sm:$0xff] }
 0x128   : > { %1539 = vmatprep.mubr.f32.mxu1 %v10151_v16  ;;  %2012 = vmatpush1.msra.mxu1 %v1734_v25  ;;  %v1703_v25 = vld [vmem:[%s10260_s4 + $0x128] sm:$0xff] }
 0x129   : > { %1823 = vmatpush1.msra.mxu0 %v1668_v26  ;;  %2013 = vmatprep.subr.mxu1 %v1733_v27  ;;  %v1769_v26 = vld [vmem:[%s10260_s4 + $0x338] sm:$0xff]  ;;  %v1702_v27 = vld [vmem:[%s10260_s4 + $0x120] sm:$0xff] }
 0x12a   : > { %5828 = vmatmul.mubr.msk.f32.gmra.mxu0 %vm1136_vm4, %v957_v28  ;;  %1824 = vmatprep.subr.mxu0 %v1667_v29  ;;  %v1701_v29 = vld [vmem:[%s10260_s4 + $0x118] sm:$0xff] }
 0x12b   : > { %5847 = vmatmul.mubr.msk.f32.gmra.mxu1 %vm1136_vm4, %v955_v20  ;;  %1366 = vmatprep.mubr.f32.mxu0 %v10151_v16  ;;  %v1773_v20 = vld [vmem:[%s10260_s4 + $0x358] sm:$0xff] }
 0x12c   : > { %1545 = vmatprep.mubr.f32.mxu1 %v10151_v16  ;;  %2014 = vmatpush1.msra.mxu1 %v1732_v30  ;;  %v1767_v30 = vld [vmem:[%s10260_s4 + $0x328] sm:$0xff] }
 0x12d   : > { %1825 = vmatpush1.msra.mxu0 %v1666_v31  ;;  %2015 = vmatprep.subr.mxu1 %v1731_v32  ;;  %v1700_v31 = vld [vmem:[%s10260_s4 + $0x110] sm:$0xff]  ;;  %v1766_v32 = vld [vmem:[%s10260_s4 + $0x320] sm:$0xff] }
 0x12e   : > { %5829 = vmatmul.mubr.msk.f32.gmra.mxu0 %vm1136_vm4, %v958_v9  ;;  %1826 = vmatprep.subr.mxu0 %v1729_v10  ;;  %v1765_v10 = vld [vmem:[%s10260_s4 + $0x318] sm:$0xff] }
 0x12f   : > { %5848 = vmatmul.mubr.msk.f32.gmra.mxu1 %vm1136_vm4, %v956_v21  ;;  %1372 = vmatprep.mubr.f32.mxu0 %v10151_v16  ;;  %v1704_v21 = vld [vmem:[%s10260_s4 + $0x130] sm:$0xff] }
 0x130   : > { %1551 = vmatprep.mubr.f32.mxu1 %v10151_v16  ;;  %2016 = vmatpush1.msra.mxu1 %v1730_v11  ;;  %v1698_v11 = vld [vmem:[%s10260_s4 + $0x100] sm:$0xff] }
 0x131   : > { %1827 = vmatpush2.msra.mxu0 %v1728_v12  ;;  %2017 = vmatprep.subr.mxu1 %v1793_v13  ;;  %v1764_v12 = vld [vmem:[%s10260_s4 + $0x310] sm:$0xff]  ;;  %v2207_v13 = vld [vmem:[%s10261_s1 + $0xf8] sm:$0xff]  ;;  %s10564_s1 = smov %s10563_s3 }
 0x132   : > { %5830 = vmatmul.mubr.msk.f32.gmra.mxu0 %vm1136_vm4, %v959_v14  ;;  %1828 = vmatprep.subr.mxu0 %v1727_v15  ;;  %v1762_v15 = vld [vmem:[%s10260_s4 + $0x300] sm:$0xff]  ;;  %s10569_s1 = smov (!%p676_p8, %s10564_s1), 1 }
 0x133   : > { %5849 = vmatmul.mubr.msk.f32.gmra.mxu1 %vm1136_vm4, %v957_v28  ;;  %1378 = vmatprep.mubr.f32.mxu0 %v10151_v16  ;;  %v1768_v28 = vld [vmem:[%s10260_s4 + $0x330] sm:$0xff] }
 0x134   : > { %1557 = vmatprep.mubr.f32.mxu1 %v10151_v16  ;;  %2018 = vmatpush2.msra.mxu1 %v1792_v33  ;;  %v2271_v33 = vld [vmem:[%s10262_s21 + $0x2f8] sm:$0xff] }
 0x135   : > { %1829 = vmatpush2.msra.mxu0 %v1726_v34  ;;  %2019 = vmatprep.subr.mxu1 %v1791_v35  ;;  %v1034_v34 = vpop.permute.xlu0 %1033 }
 0x136   : > { %5831 = vmatmul.mubr.msk.f32.gmra.mxu0 %vm1136_vm4, %v960_v36  ;;  %1830 = vmatprep.subr.mxu0 %v1725_v37  ;;  %v1039_v37 = vpop.permute.xlu1 %1038 }
 0x137   : > { %5850 = vmatmul.mubr.msk.f32.gmra.mxu1 %vm1136_vm4, %v958_v9  ;;  %1384 = vmatprep.mubr.f32.mxu0 %v10151_v16  ;;  %v1699_v9 = vld [vmem:[%s10260_s4 + $0x108] sm:$0xff] }
 0x138   : > { %1563 = vmatprep.mubr.f32.mxu1 %v10151_v16  ;;  %2020 = vmatpush2.msra.mxu1 %v1790_v38 }
 0x139   : > { %1831 = vmatpush2.msra.mxu0 %v1724_v39  ;;  %2021 = vmatprep.subr.mxu1 %v1789_v40 }
 0x13a   : > { %5832 = vmatmul.mubr.msk.f32.gmra.mxu0 %vm1136_vm4, %v961_v41  ;;  %1832 = vmatprep.subr.mxu0 %v1723_v42 }
 0x13b   : > { %5851 = vmatmul.mubr.msk.f32.gmra.mxu1 %vm1136_vm4, %v959_v14  ;;  %1833 = vmatpush2.msra.mxu0 %v1722_v43  ;;  %v1763_v14 = vld [vmem:[%s10260_s4 + $0x308] sm:$0xff] }
 0x13c   : > { %1569 = vmatprep.mubr.f32.mxu1 %v10151_v16  ;;  %2022 = vmatpush2.msra.mxu1 %v1788_v44 }
 0x13d   : > { %2023 = vmatprep.subr.mxu1 %v1787_v45  ;;  %1834 = vmatprep.subr.mxu0 %v1721_v46  ;;  %v2206_v45 = vld [vmem:[%s10262_s21 + $0xf0] sm:$0xff] }
 0x13e   : > { %2024 = vmatpush2.msra.mxu1 %v1786_v47  ;;  %1835 = vmatpush2.msra.mxu0 %v1720_v48  ;;  %v2205_v47 = vld [vmem:[%s10262_s21 + $0xe8] sm:$0xff]  ;;  %v7156_v48 = vpop.permute.xlu1 %1043 }
 0x13f   : > { %5852 = vmatmul.mubr.msk.f32.gmra.mxu1 %vm1136_vm4, %v960_v36  ;;  %2025 = vmatprep.subr.mxu1 %v1785_v49 }
 0x140   : > { %1575 = vmatprep.mubr.f32.mxu1 %v10151_v16  ;;  %1836 = vmatprep.subr.mxu0 %v1719_v50 }
 0x141   : > { %2026 = vmatpush2.msra.mxu1 %v1784_v51  ;;  %1837 = vmatpush2.msra.mxu0 %v1718_v52  ;;  %v2204_v51 = vld [vmem:[%s10262_s21 + $0xe0] sm:$0xff] }
 0x142   : > { %2027 = vmatprep.subr.mxu1 %v1783_v53  ;;  %1838 = vmatprep.subr.mxu0 %v1717_v54 }
 0x143   : > { %5853 = vmatmul.mubr.msk.f32.gmra.mxu1 %vm1136_vm4, %v961_v41  ;;  %1839 = vmatpush2.msra.mxu0 %v1716_v55  ;;  %v2203_v55 = vld [vmem:[%s10262_s21 + $0xd8] sm:$0xff] }
 0x144   : > { %2028 = vmatpush2.msra.mxu1 %v1782_v56  ;;  %1840 = vmatprep.subr.mxu0 %v1715_v57  ;;  %v2202_v57 = vld [vmem:[%s10262_s21 + $0xd0] sm:$0xff] }
 0x145   : > { %2029 = vmatprep.subr.mxu1 %v1781_v58  ;;  %1841 = vmatpush2.msra.mxu0 %v1714_v59 }
 0x146   : > { %2030 = vmatpush2.msra.mxu1 %v1780_v60  ;;  %1842 = vmatprep.subr.mxu0 %v1713_v61  ;;  %v2201_v61 = vld [vmem:[%s10262_s21 + $0xc8] sm:$0xff] }
 0x147   : > { %2031 = vmatprep.subr.mxu1 %v1779_v62  ;;  %1843 = vmatpush2.msra.mxu0 %v1712_v63 }
 0x148   : > { %2032 = vmatpush2.msra.mxu1 %v1778_v0  ;;  %1844 = vmatprep.subr.mxu0 %v1711_v1  ;;  %v2200_v1 = vld [vmem:[%s10262_s21 + $0xc0] sm:$0xff] }
 0x149   : > { %2033 = vmatprep.subr.mxu1 %v1777_v2  ;;  %1845 = vmatpush2.msra.mxu0 %v1710_v3  ;;  %v7192_v2 = vpop.permute.xlu0 %1048 }
 0x14a   : > { %2034 = vmatpush2.msra.mxu1 %v1776_v4  ;;  %1846 = vmatprep.subr.mxu0 %v1709_v5 }
 0x14b   : > { %2035 = vmatprep.subr.mxu1 %v1775_v6  ;;  %1847 = vmatpush2.msra.mxu0 %v1708_v7 }
 0x14c   : > { %2036 = vmatpush2.msra.mxu1 %v1774_v8  ;;  %1848 = vmatprep.subr.mxu0 %v1707_v18  ;;  %v2199_v8 = vld [vmem:[%s10262_s21 + $0xb8] sm:$0xff] }
 0x14d   : > { %2037 = vmatprep.subr.mxu1 %v1773_v20  ;;  %1849 = vmatpush2.msra.mxu0 %v1706_v22 }
 0x14e   : > { %2038 = vmatpush2.msra.mxu1 %v1772_v24  ;;  %1850 = vmatprep.subr.mxu0 %v1705_v17  ;;  %v2270_v17 = vld [vmem:[%s10262_s21 + $0x2f0] sm:$0xff] }
 0x14f   : > { %2039 = vmatprep.subr.mxu1 %v1771_v19  ;;  %1851 = vmatpush2.msra.mxu0 %v1704_v21  ;;  %v2198_v19 = vld [vmem:[%s10262_s21 + $0xb0] sm:$0xff] }
 0x150   : > { %2040 = vmatpush2.msra.mxu1 %v1770_v23  ;;  %1852 = vmatprep.subr.mxu0 %v1703_v25  ;;  %v2269_v25 = vld [vmem:[%s10262_s21 + $0x2e8] sm:$0xff] }
 0x151   : > { %2041 = vmatprep.subr.mxu1 %v1769_v26  ;;  %1853 = vmatpush2.msra.mxu0 %v1702_v27  ;;  %v7225_v26 = vpop.permute.xlu1 %1053 }
 0x152   : > { %2042 = vmatpush2.msra.mxu1 %v1768_v28  ;;  %1854 = vmatprep.subr.mxu0 %v1701_v29 }
 0x153   : > { %2043 = vmatprep.subr.mxu1 %v1767_v30  ;;  %1855 = vmatpush2.msra.mxu0 %v1700_v31 }
 0x154   : > { %2044 = vmatpush2.msra.mxu1 %v1766_v32  ;;  %1856 = vmatprep.subr.mxu0 %v1699_v9  ;;  %v2197_v9 = vld [vmem:[%s10262_s21 + $0xa8] sm:$0xff] }
 0x155   : > { %2045 = vmatprep.subr.mxu1 %v1765_v10  ;;  %1857 = vmatpush2.msra.mxu0 %v1698_v11 }
 0x156   : > { %2046 = vmatpush2.msra.mxu1 %v1764_v12  ;;  %2304 = vmatprep.subr.mxu0 %v2207_v13 }
 0x157   : > { %2047 = vmatprep.subr.mxu1 %v1763_v14  ;;  %v2268_v14 = vld [vmem:[%s10262_s21 + $0x2e0] sm:$0xff] }
 0x158   : > { %2048 = vmatpush2.msra.mxu1 %v1762_v15  ;;  %v2196_v15 = vld [vmem:[%s10262_s21 + $0xa0] sm:$0xff] }
 0x159   : > { %2495 = vmatprep.subr.mxu1 %v2271_v33 }
 0x1aa   : > { %v1266_v35 = vpop.f32.mrf.mxu0 }
 0x1ab   : > { %v7138_v36 = vadd.f32 %v1266_v35, %v1034_v34  ;;  %v2267_v35 = vld [vmem:[%s10262_s21 + $0x2d8] sm:$0xff] }
 0x1ac   : > { %v1268_v38 = vpop.f32.mrf.mxu0 }
 0x1ad   : > { %v7140_v39 = vadd.f32 %v1268_v38, %v1034_v34  ;;  %v10190_v40 = vmax.f32 %v7138_v36, 0.0 }
 0x1ae   : > { %v1272_v41 = vpop.f32.mrf.mxu0 }
 0x1af   : > { %v10195_v42 = vmax.f32 %v7140_v39, 0.0  ;;  %v7144_v43 = vadd.f32 %v1272_v41, %v1039_v37 }
 0x1b0   : > { %v1274_v44 = vpop.f32.mrf.mxu0 }
 0x1b1   : > { %v7149_v46 = vadd.f32 %v1274_v44, %v1039_v37  ;;  %1858 = vmatprep.mubr.f32.mxu0 %v10195_v42  ;;  %v10182_v49 = vmax.f32 %v7144_v43, 0.0 }
 0x1b2   : > { %v1278_v50 = vpop.f32.mrf.mxu0  ;;  %1859 = vmatmul.mubr.f32.vlgmr.msra.gmra.mxu0 %v10190_v40 }
 0x1b3   : > { %v1457_v52 = vpop.f32.mrf.mxu1  ;;  %v10188_v53 = vmax.f32 %v7149_v46, 0.0  ;;  %v7166_v54 = vadd.f32 %v1278_v50, %v7156_v48  ;;  %2305 = vmatpush1.msra.mxu0 %v2206_v45  ;;  %v2195_v50 = vld [vmem:[%s10262_s21 + $0x98] sm:$0xff] }
 0x1b4   : > { %v1280_v56 = vpop.f32.mrf.mxu0  ;;  %2306 = vmatprep.subr.mxu0 %v2205_v47  ;;  %v7174_v58 = vadd.f32 %v1457_v52, %v1034_v34 }
 0x1b5   : > { %v1459_v59 = vpop.f32.mrf.mxu1  ;;  %v7177_v60 = vadd.f32 %v1280_v56, %v7156_v48  ;;  %1864 = vmatprep.mubr.f32.mxu0 %v10188_v53  ;;  %2307 = vmatpush1.msra.mxu0 %v2204_v51  ;;  %v10174_v63 = vmax.f32 %v7166_v54, 0.0 }
 0x1b6   : > { %v7184_v62 = vadd.f32 %v1459_v59, %v1034_v34  ;;  %v1284_v0 = vpop.f32.mrf.mxu0  ;;  %1865 = vmatmul.mubr.f32.gmra.mxu0 %v10182_v49  ;;  %2308 = vmatprep.subr.mxu0 %v2203_v55  ;;  %v10187_v18 = vmax.f32 %v7174_v58, 0.0  ;;  %v2194_v59 = vld [vmem:[%s10262_s21 + $0x90] sm:$0xff] }
 0x1b7   : > { %v1463_v3 = vpop.f32.mrf.mxu1  ;;  %v10181_v4 = vmax.f32 %v7177_v60, 0.0  ;;  %2309 = vmatpush1.msra.mxu0 %v2202_v57  ;;  %v7197_v6 = vadd.f32 %v1284_v0, %v7192_v2  ;;  %v2266_v57 = vld [vmem:[%s10262_s21 + $0x2d0] sm:$0xff] }
 0x1b8   : > { %v10193_v5 = vmax.f32 %v7184_v62, 0.0  ;;  %v1286_v7 = vpop.f32.mrf.mxu0  ;;  %2310 = vmatprep.subr.mxu0 %v2201_v61  ;;  %v7203_v20 = vadd.f32 %v1463_v3, %v1039_v37  ;;  %v7301_v3 = vpop.permute.xlu1 %1063 }
 0x1b9   : > { %v1465_v22 = vpop.f32.mrf.mxu1  ;;  %v7206_v24 = vadd.f32 %v1286_v7, %v7192_v2  ;;  %1870 = vmatprep.mubr.f32.mxu0 %v10181_v4  ;;  %2311 = vmatpush1.msra.mxu0 %v2200_v1  ;;  %v10166_v30 = vmax.f32 %v7197_v6, 0.0  ;;  %v2265_v1 = vld [vmem:[%s10262_s21 + $0x2c8] sm:$0xff] }
 0x1ba   : > { %v7216_v21 = vadd.f32 %v1465_v22, %v1039_v37  ;;  %2049 = vmatprep.mubr.f32.mxu1 %v10193_v5  ;;  %v1290_v23 = vpop.f32.mrf.mxu0  ;;  %1871 = vmatmul.mubr.f32.gmra.mxu0 %v10174_v63  ;;  %v10180_v10 = vmax.f32 %v7203_v20, 0.0  ;;  %v7263_v37 = vpop.permute.xlu0 %1058 }
 0x1bb   : > { %v1469_v27 = vpop.f32.mrf.mxu1  ;;  %2050 = vmatmul.mubr.f32.vlgmr.msra.gmra.mxu1 %v10187_v18  ;;  %v10173_v28 = vmax.f32 %v7206_v24, 0.0  ;;  %2312 = vmatprep.subr.mxu0 %v2199_v8  ;;  %v7233_v31 = vadd.f32 %v1290_v23, %v7225_v26  ;;  %v2193_v23 = vld [vmem:[%s10262_s21 + $0x88] sm:$0xff] }
 0x1bc   : > { %v10185_v29 = vmax.f32 %v7216_v21, 0.0  ;;  %v1292_v32 = vpop.f32.mrf.mxu0  ;;  %2496 = vmatpush1.msra.mxu1 %v2270_v17  ;;  %2313 = vmatpush1.msra.mxu0 %v2198_v19  ;;  %v7240_v11 = vadd.f32 %v1469_v27, %v7156_v48 }
 0x1bd   : > { %v1471_v12 = vpop.f32.mrf.mxu1  ;;  %v7243_v13 = vadd.f32 %v1292_v32, %v7225_v26  ;;  %1876 = vmatprep.mubr.f32.mxu0 %v10173_v28  ;;  %2497 = vmatprep.subr.mxu1 %v2269_v25  ;;  %v10158_v45 = vmax.f32 %v7233_v31, 0.0 }
 0x1be   : > { %v7254_v33 = vadd.f32 %v1471_v12, %v7156_v48  ;;  %2055 = vmatprep.mubr.f32.mxu1 %v10185_v29  ;;  %v1296_v34 = vpop.f32.mrf.mxu0  ;;  %1877 = vmatmul.mubr.f32.gmra.mxu0 %v10166_v30  ;;  %v10171_v51 = vmax.f32 %v7240_v11, 0.0  ;;  %v2264_v12 = vld [vmem:[%s10262_s21 + $0x2c0] sm:$0xff]  ;;  %v2249_v29 = vld [vmem:[%s10262_s21 + $0x248] sm:$0xff] }
 0x1bf   : > { %v1475_v38 = vpop.f32.mrf.mxu1  ;;  %2056 = vmatmul.mubr.f32.gmra.mxu1 %v10180_v10  ;;  %v10164_v41 = vmax.f32 %v7243_v13, 0.0  ;;  %2314 = vmatprep.subr.mxu0 %v2197_v9  ;;  %v7271_v47 = vadd.f32 %v1296_v34, %v7263_v37 }
 0x1c0   : > { %v10178_v44 = vmax.f32 %v7254_v33, 0.0  ;;  %v1298_v48 = vpop.f32.mrf.mxu0  ;;  %2498 = vmatpush1.msra.mxu1 %v2268_v14  ;;  %2315 = vmatpush1.msra.mxu0 %v2196_v15  ;;  %v7278_v52 = vadd.f32 %v1475_v38, %v7192_v2  ;;  %v2192_v14 = vld [vmem:[%s10262_s21 + $0x80] sm:$0xff]  ;;  %v7339_v38 = vpop.permute.xlu0 %1068 }
 0x1c1   : > { %v1477_v55 = vpop.f32.mrf.mxu1  ;;  %v7281_v56 = vadd.f32 %v1298_v48, %v7263_v37  ;;  %1882 = vmatprep.mubr.f32.mxu0 %v10164_v41  ;;  %2499 = vmatprep.subr.mxu1 %v2267_v35  ;;  %v10155_v22 = vmax.f32 %v7271_v47, 0.0  ;;  %v2263_v35 = vld [vmem:[%s10262_s21 + $0x2b8] sm:$0xff] }
 0x1c2   : > { %v7292_v61 = vadd.f32 %v1477_v55, %v7192_v2  ;;  %2061 = vmatprep.mubr.f32.mxu1 %v10178_v44  ;;  %v1302_v0 = vpop.f32.mrf.mxu0  ;;  %1883 = vmatmul.mubr.f32.gmra.mxu0 %v10158_v45  ;;  %v10163_v25 = vmax.f32 %v7278_v52, 0.0  ;;  %v2253_v44 = vld [vmem:[%s10262_s21 + $0x268] sm:$0xff] }
 0x1c3   : > { %v1481_v7 = vpop.f32.mrf.mxu1  ;;  %2062 = vmatmul.mubr.f32.gmra.mxu1 %v10171_v51  ;;  %v10156_v2 = vmax.f32 %v7281_v56, 0.0  ;;  %2316 = vmatprep.subr.mxu0 %v2195_v50  ;;  %v7309_v17 = vadd.f32 %v1302_v0, %v7301_v3  ;;  %v2191_v0 = vld [vmem:[%s10262_s21 + $0x78] sm:$0xff] }
 0x1c4   : > { %v10169_v8 = vmax.f32 %v7292_v61, 0.0  ;;  %v1304_v19 = vpop.f32.mrf.mxu0  ;;  %2500 = vmatpush1.msra.mxu1 %v2266_v57  ;;  %2317 = vmatpush1.msra.mxu0 %v2194_v59  ;;  %v7316_v27 = vadd.f32 %v1481_v7, %v7225_v26 }
 0x1c5   : > { %v1483_v32 = vpop.f32.mrf.mxu1  ;;  %v7319_v9 = vadd.f32 %v1304_v19, %v7301_v3  ;;  %1888 = vmatprep.mubr.f32.mxu0 %v10156_v2  ;;  %2501 = vmatprep.subr.mxu1 %v2265_v1  ;;  %v10154_v55 = vmax.f32 %v7309_v17, 0.0 }
 0x1c6   : > { %v7330_v15 = vadd.f32 %v1483_v32, %v7225_v26  ;;  %2067 = vmatprep.mubr.f32.mxu1 %v10169_v8  ;;  %v1308_v34 = vpop.f32.mrf.mxu0  ;;  %1889 = vmatmul.mubr.f32.gmra.mxu0 %v10155_v22  ;;  %v10157_v1 = vmax.f32 %v7316_v27, 0.0  ;;  %v2262_v32 = vld [vmem:[%s10262_s21 + $0x2b0] sm:$0xff]  ;;  %v2189_v22 = vld [vmem:[%s10262_s21 + $0x68] sm:$0xff] }
 0x1c7   : > { %v1487_v48 = vpop.f32.mrf.mxu1  ;;  %2068 = vmatmul.mubr.f32.gmra.mxu1 %v10163_v25  ;;  %v10153_v26 = vmax.f32 %v7319_v9, 0.0  ;;  %2318 = vmatprep.subr.mxu0 %v2193_v23  ;;  %v7347_v57 = vadd.f32 %v1308_v34, %v7339_v38  ;;  %v2187_v25 = vld [vmem:[%s10262_s21 + $0x58] sm:$0xff] }
 0x1c8   : > { %v10161_v50 = vmax.f32 %v7330_v15, 0.0  ;;  %v1310_v59 = vpop.f32.mrf.mxu0  ;;  %2502 = vmatpush1.msra.mxu1 %v2264_v12  ;;  %2319 = vmatpush1.msra.mxu0 %v2192_v14  ;;  %v7354_v7 = vadd.f32 %v1487_v48, %v7263_v37  ;;  %v2190_v12 = vld [vmem:[%s10262_s21 + $0x70] sm:$0xff]  ;;  %v7377_v48 = vpop.permute.xlu1 %1073 }
 0x1c9   : > { %v1489_v19 = vpop.f32.mrf.mxu1  ;;  %v7357_v23 = vadd.f32 %v1310_v59, %v7339_v38  ;;  %1894 = vmatprep.mubr.f32.mxu0 %v10153_v26  ;;  %2503 = vmatprep.subr.mxu1 %v2263_v35  ;;  %v2261_v35 = vld [vmem:[%s10262_s21 + $0x2a8] sm:$0xff]  ;;  %v10162_v16 = vmax.f32 %v7347_v57, 0.0 }
 0x1ca   : > { %v7368_v14 = vadd.f32 %v1489_v19, %v7263_v37  ;;  %2073 = vmatprep.mubr.f32.mxu1 %v10161_v50  ;;  %v1314_v34 = vpop.f32.mrf.mxu0  ;;  %1895 = vmatmul.mubr.f32.gmra.mxu0 %v10154_v55  ;;  %v10165_v2 = vmax.f32 %v7354_v7, 0.0 }
 0x1cb   : > { %v1493_v59 = vpop.f32.mrf.mxu1  ;;  %2074 = vmatmul.mubr.f32.gmra.mxu1 %v10157_v1  ;;  %v10159_v37 = vmax.f32 %v7357_v23, 0.0  ;;  %2320 = vmatprep.subr.mxu0 %v2191_v0  ;;  %v7385_v26 = vadd.f32 %v1314_v34, %v7377_v48 }
 0x1cc   : > { %v10160_v19 = vmax.f32 %v7368_v14, 0.0  ;;  %v1316_v55 = vpop.f32.mrf.mxu0  ;;  %2504 = vmatpush1.msra.mxu1 %v2262_v32  ;;  %2321 = vmatpush1.msra.mxu0 %v2190_v12  ;;  %v7392_v1 = vadd.f32 %v1493_v59, %v7301_v3  ;;  %v2260_v32 = vld [vmem:[%s10262_s21 + $0x2a0] sm:$0xff]  ;;  %v7415_v59 = vpop.permute.xlu0 %1078 }
 0x1cd   : > { %v1495_v0 = vpop.f32.mrf.mxu1  ;;  %v7395_v45 = vadd.f32 %v1316_v55, %v7377_v48  ;;  %1900 = vmatprep.mubr.f32.mxu0 %v10159_v37  ;;  %2505 = vmatprep.subr.mxu1 %v2261_v35  ;;  %v2188_v12 = vld [vmem:[%s10262_s21 + $0x60] sm:$0xff]  ;;  %v2259_v35 = vld [vmem:[%s10262_s21 + $0x298] sm:$0xff] }
 0x1ce   : > { %v7406_v34 = vadd.f32 %v1495_v0, %v7301_v3  ;;  %2079 = vmatprep.mubr.f32.mxu1 %v10160_v19  ;;  %v1320_v55 = vpop.f32.mrf.mxu0  ;;  %1901 = vmatmul.mubr.f32.gmra.mxu0 %v10162_v16  ;;  %v10170_v19 = vmax.f32 %v7385_v26, 0.0  ;;  %v10172_v41 = vmax.f32 %v7392_v1, 0.0 }
 0x1cf   : > { %v1499_v37 = vpop.f32.mrf.mxu1  ;;  %2080 = vmatmul.mubr.f32.gmra.mxu1 %v10165_v2  ;;  %v10167_v3 = vmax.f32 %v7395_v45, 0.0  ;;  %2322 = vmatprep.subr.mxu0 %v2189_v22  ;;  %v7423_v50 = vadd.f32 %v1320_v55, %v7415_v59 }
 0x1d0   : > { %v10168_v0 = vmax.f32 %v7406_v34, 0.0  ;;  %v1322_v16 = vpop.f32.mrf.mxu0  ;;  %2506 = vmatpush1.msra.mxu1 %v2260_v32  ;;  %2323 = vmatpush1.msra.mxu0 %v2188_v12  ;;  %v7430_v2 = vadd.f32 %v1499_v37, %v7339_v38  ;;  %v2258_v32 = vld [vmem:[%s10262_s21 + $0x290] sm:$0xff]  ;;  %v2257_v37 = vld [vmem:[%s10262_s21 + $0x288] sm:$0xff] }
 0x1d1   : > { %v1501_v22 = vpop.f32.mrf.mxu1  ;;  %v7433_v30 = vadd.f32 %v1322_v16, %v7415_v59  ;;  %1906 = vmatprep.mubr.f32.mxu0 %v10167_v3  ;;  %2507 = vmatprep.subr.mxu1 %v2259_v35  ;;  %v2186_v12 = vld [vmem:[%s10262_s21 + $0x50] sm:$0xff] }
 0x1d2   : > { %v7444_v55 = vadd.f32 %v1501_v22, %v7339_v38  ;;  %2085 = vmatprep.mubr.f32.mxu1 %v10168_v0  ;;  %v1326_v16 = vpop.f32.mrf.mxu0  ;;  %1907 = vmatmul.mubr.f32.gmra.mxu0 %v10170_v19  ;;  %v7456_v38 = vpop.permute.xlu1 %1083  ;;  %v10177_v0 = vmax.f32 %v7423_v50, 0.0  ;;  %v2185_v19 = vld [vmem:[%s10262_s21 + $0x48] sm:$0xff]  ;;  %v10179_v51 = vmax.f32 %v7430_v2, 0.0 }
 0x1d3   : > { %v1505_v35 = vpop.f32.mrf.mxu1  ;;  %2086 = vmatmul.mubr.f32.gmra.mxu1 %v10172_v41  ;;  %v10175_v3 = vmax.f32 %v7433_v30, 0.0  ;;  %2324 = vmatprep.subr.mxu0 %v2187_v25 }
 0x1d4   : > { %v10176_v22 = vmax.f32 %v7444_v55, 0.0  ;;  %v1328_v8 = vpop.f32.mrf.mxu0  ;;  %2508 = vmatpush1.msra.mxu1 %v2258_v32  ;;  %2325 = vmatpush1.msra.mxu0 %v2186_v12  ;;  %v7465_v41 = vadd.f32 %v1505_v35, %v7377_v48  ;;  %v2256_v32 = vld [vmem:[%s10262_s21 + $0x280] sm:$0xff] }
 0x1d5   : > { %v1507_v28 = vpop.f32.mrf.mxu1  ;;  %v7468_v25 = vadd.f32 %v1328_v8, %v7456_v38  ;;  %1912 = vmatprep.mubr.f32.mxu0 %v10175_v3  ;;  %2509 = vmatprep.subr.mxu1 %v2257_v37  ;;  %v2184_v12 = vld [vmem:[%s10262_s21 + $0x40] sm:$0xff]  ;;  %v7484_v8 = vadd.f32 %v1326_v16, %v7456_v38  ;;  %v2255_v37 = vld [vmem:[%s10262_s21 + $0x278] sm:$0xff]  ;;  %v7497_v16 = vpop.permute.xlu0 %1088 }
 0x1d6   : > { %v7479_v63 = vadd.f32 %v1507_v28, %v7377_v48  ;;  %2091 = vmatprep.mubr.f32.mxu1 %v10176_v22  ;;  %v1332_v35 = vpop.f32.mrf.mxu0  ;;  %1913 = vmatmul.mubr.f32.gmra.mxu0 %v10177_v0  ;;  %v2254_v48 = vld [vmem:[%s10262_s21 + $0x270] sm:$0xff] }
 0x1d7   : > { %10263 = vst [vmem:[#allocation7_spill] sm:$0xff] %v7484_v8  ;;  %v1511_v3 = vpop.f32.mrf.mxu1  ;;  %2092 = vmatmul.mubr.f32.gmra.mxu1 %v10179_v51  ;;  %v10183_v28 = vmax.f32 %v7468_v25, 0.0  ;;  %2326 = vmatprep.subr.mxu0 %v2185_v19  ;;  %v10186_v51 = vmax.f32 %v7465_v41, 0.0 }
 0x1d8   : > { %v10184_v22 = vmax.f32 %v7479_v63, 0.0  ;;  %2510 = vmatpush1.msra.mxu1 %v2256_v32  ;;  %v1334_v0 = vpop.f32.mrf.mxu0  ;;  %2327 = vmatpush1.msra.mxu0 %v2184_v12  ;;  %v7505_v10 = vadd.f32 %v1511_v3, %v7415_v59  ;;  %v2252_v32 = vld [vmem:[%s10262_s21 + $0x260] sm:$0xff]  ;;  %v10189_v12 = vmax.f32 %v7484_v8, 0.0  ;;  %v7522_v3 = vadd.f32 %v1332_v35, %v7497_v16 }
 0x1d9   : > { %v1513_v4 = vpop.f32.mrf.mxu1  ;;  %2511 = vmatprep.subr.mxu1 %v2255_v37  ;;  %v7508_v19 = vadd.f32 %v1334_v0, %v7497_v16  ;;  %1918 = vmatprep.mubr.f32.mxu0 %v10183_v28  ;;  %v2251_v37 = vld [vmem:[%s10262_s21 + $0x258] sm:$0xff] }
 0x1da   : > { %10264 = vst [vmem:[#allocation8_spill] sm:$0xff] %v7505_v10  ;;  %v7516_v49 = vadd.f32 %v1513_v4, %v7415_v59  ;;  %2097 = vmatprep.mubr.f32.mxu1 %v10184_v22  ;;  %10266 = vst [vmem:[#allocation10_spill] sm:$0xff] %v7522_v3  ;;  %2512 = vmatpush1.msra.mxu1 %v2254_v48  ;;  %v1338_v0 = vpop.f32.mrf.mxu0  ;;  %v2250_v59 = vld [vmem:[%s10262_s21 + $0x250] sm:$0xff]  ;;  %v1094_v22 = vpop.permute.xlu1 %1093  ;;  %v10197_v40 = vmax.f32 %v7522_v3, 0.0 }
 0x1db   : > { %10265 = vst [vmem:[#allocation9_spill] sm:$0xff] %v7508_v19  ;;  %v1517_v28 = vpop.f32.mrf.mxu1  ;;  %2098 = vmatmul.mubr.f32.gmra.mxu1 %v10186_v51  ;;  %v10191_v4 = vmax.f32 %v7508_v19, 0.0  ;;  %2513 = vmatprep.subr.mxu1 %v2253_v44  ;;  %v10194_v51 = vmax.f32 %v7505_v10, 0.0 }
 0x1dc   : > { %v10192_v35 = vmax.f32 %v7516_v49, 0.0  ;;  %1919 = vmatmul.mubr.f32.gmra.mxu0 %v10189_v12  ;;  %2514 = vmatpush1.msra.mxu1 %v2252_v32  ;;  %v1340_v48 = vpop.f32.mrf.mxu0  ;;  %v7541_v44 = vadd.f32 %v1517_v28, %v7456_v38  ;;  %v2183_v32 = vld [vmem:[%s10262_s21 + $0x38] sm:$0xff] }
 0x1dd   : > { %v1519_v18 = vpop.f32.mrf.mxu1  ;;  %2515 = vmatprep.subr.mxu1 %v2251_v37  ;;  %v7543_v53 = vadd.f32 %v1340_v48, %v1094_v22  ;;  %1924 = vmatprep.mubr.f32.mxu0 %v10191_v4  ;;  %v2248_v37 = vld [vmem:[%s10262_s21 + $0x240] sm:$0xff]  ;;  %v2182_v48 = vld [vmem:[%s10262_s21 + $0x30] sm:$0xff] }
 0x1de   : > { %10267 = vst [vmem:[#allocation11_spill] sm:$0xff] %v7541_v44  ;;  %v7551_v12 = vadd.f32 %v1519_v18, %v7456_v38  ;;  %2103 = vmatprep.mubr.f32.mxu1 %v10192_v35  ;;  %2516 = vmatpush1.msra.mxu1 %v2250_v59  ;;  %v1344_v28 = vpop.f32.mrf.mxu0  ;;  %v2247_v18 = vld [vmem:[%s10262_s21 + $0x238] sm:$0xff]  ;;  %v7568_v59 = vadd.f32 %v1338_v0, %v1094_v22  ;;  %v2246_v0 = vld [vmem:[%s10262_s21 + $0x230] sm:$0xff]  ;;  %v1099_v35 = vpop.permute.xlu0 %1098 }
 0x1df   : > { %10268 = vst [vmem:[#allocation12_spill] sm:$0xff] %v7543_v53  ;;  %v1523_v4 = vpop.f32.mrf.mxu1  ;;  %2104 = vmatmul.mubr.f32.gmra.mxu1 %v10194_v51  ;;  %2517 = vmatprep.subr.mxu1 %v2249_v29  ;;  %v2181_v51 = vld [vmem:[%s10262_s21 + $0x28] sm:$0xff]  ;;  %v10203_v29 = vmax.f32 %v7541_v44, 0.0 }
 0x1e0   : > { %10269 = vst [vmem:[#allocation13_spill] sm:$0xff] %v7551_v12  ;;  %v10199_v38 = vmax.f32 %v7551_v12, 0.0  ;;  %10270 = vst [vmem:[#allocation14_spill] sm:$0xff] %v7568_v59  ;;  %1925 = vmatmul.mubr.f32.gmra.mxu0 %v10197_v40  ;;  %2328 = vmatprep.subr.mxu0 %v2183_v32  ;;  %v1346_v5 = vpop.f32.mrf.mxu0  ;;  %v7578_v42 = vadd.f32 %v1523_v4, %v7497_v16  ;;  %v2180_v4 = vld [vmem:[%s10262_s21 + $0x20] sm:$0xff] }
 0x1e1   : > { %v1525_v19 = vpop.f32.mrf.mxu1  ;;  %2518 = vmatpush1.msra.mxu1 %v2248_v37  ;;  %2329 = vmatpush1.msra.mxu0 %v2182_v48  ;;  %v2245_v37 = vld [vmem:[%s10262_s21 + $0x228] sm:$0xff]  ;;  %v7596_v3 = vadd.f32 %v1346_v5, %v1099_v35 }
 0x1e2   : > { %10271 = vst [vmem:[#allocation15_spill] sm:$0xff] %v7578_v42  ;;  %v7584_v32 = vadd.f32 %v1525_v19, %v7497_v16  ;;  %2109 = vmatprep.mubr.f32.mxu1 %v10199_v38  ;;  %2519 = vmatprep.subr.mxu1 %v2247_v18  ;;  %v1350_v48 = vpop.f32.mrf.mxu0  ;;  %v10204_v19 = vmax.f32 %v7568_v59, 0.0  ;;  %v10274_v18 = vmax.f32 %v7543_v53, 0.0  ;;  %v2179_v38 = vld [vmem:[%s10262_s21 + $0x18] sm:$0xff]  ;;  %v10210_v12 = vmax.f32 %v7578_v42, 0.0 }
 0x1e3   : > { %v1529_v40 = vpop.f32.mrf.mxu1  ;;  %2110 = vmatmul.mubr.f32.gmra.mxu1 %v10203_v29  ;;  %10273 = vst [vmem:[#allocation17_spill] sm:$0xff] %v7596_v3  ;;  %2330 = vmatprep.subr.mxu0 %v2181_v51  ;;  %v2244_v51 = vld [vmem:[%s10262_s21 + $0x220] sm:$0xff]  ;;  %v7628_v29 = vadd.f32 %v1344_v28, %v1099_v35 }
 0x1e4   : > { %10272 = vst [vmem:[#allocation16_spill] sm:$0xff] %v7584_v32  ;;  %v10205_v16 = vmax.f32 %v7584_v32, 0.0  ;;  %2520 = vmatpush1.msra.mxu1 %v2246_v0  ;;  %1930 = vmatprep.mubr.f32.mxu0 %v10274_v18  ;;  %v1352_v8 = vpop.f32.mrf.mxu0  ;;  %v7606_v44 = vadd.f32 %v1529_v40, %v1094_v22  ;;  %v2178_v0 = vld [vmem:[%s10262_s21 + $0x10] sm:$0xff]  ;;  %v2243_v40 = vld [vmem:[%s10262_s21 + $0x218] sm:$0xff] }
 0x1e5   : > { %v1531_v5 = vpop.f32.mrf.mxu1  ;;  %2331 = vmatpush1.msra.mxu0 %v2180_v4  ;;  %2521 = vmatprep.subr.mxu1 %v2245_v37  ;;  %v2177_v4 = vld [vmem:[%s10262_s21 + $0x8] sm:$0xff]  ;;  %10277 = vst [vmem:[#allocation20_spill] sm:$0xff] %v7628_v29 }
 0x1e6   : > { %10275 = vst [vmem:[#allocation18_spill] sm:$0xff] %v7606_v44  ;;  %v7614_v18 = vadd.f32 %v1531_v5, %v1094_v22  ;;  %2115 = vmatprep.mubr.f32.mxu1 %v10205_v16  ;;  %1931 = vmatmul.mubr.f32.gmra.mxu0 %v10204_v19  ;;  %v7626_v37 = vpop.f32.mrf.mxu0  ;;  %v2242_v19 = vld [vmem:[%s10262_s21 + $0x210] sm:$0xff]  ;;  %v1104_v16 = vpop.permute.xlu1 %1103  ;;  %v10213_v28 = vmax.f32 %v7606_v44, 0.0  ;;  %v2241_v5 = vld [vmem:[%s10262_s21 + $0x208] sm:$0xff] }
 0x1e7   : > { %v1535_v22 = vpop.f32.mrf.mxu1  ;;  %2116 = vmatmul.mubr.f32.gmra.mxu1 %v10210_v12  ;;  %2332 = vmatprep.subr.mxu0 %v2179_v38  ;;  %v7640_v12 = vadd.f32 %v1352_v8, %v1104_v16  ;;  %v2176_v38 = vld [vmem:[%s10262_s21] sm:$0xff]  ;;  %v2239_v8 = vld [vmem:[%s10262_s21 + $0x1f8] sm:$0xff]  ;;  %v7670_v44 = vadd.f32 %v1350_v48, %v1104_v16 }
 0x1e8   : > { %10276 = vst [vmem:[#allocation19_spill] sm:$0xff] %v7614_v18  ;;  %v10211_v59 = vmax.f32 %v7614_v18, 0.0  ;;  %2522 = vmatpush1.msra.mxu1 %v2244_v51  ;;  %2333 = vmatpush1.msra.mxu0 %v2178_v0  ;;  %v1358_v53 = vpop.f32.mrf.mxu0  ;;  %v7638_v32 = vadd.f32 %v1535_v22, %v1099_v35  ;;  %v10281_v22 = vmax.f32 %v7596_v3, 0.0  ;;  %v10283_v3 = vmax.f32 %v7628_v29, 0.0 }
 0x1e9   : > { %v1537_v10 = vpop.f32.mrf.mxu1  ;;  %2523 = vmatprep.subr.mxu1 %v2243_v40  ;;  %10279 = vst [vmem:[#allocation22_spill] sm:$0xff] %v7640_v12  ;;  %2334 = vmatprep.subr.mxu0 %v2177_v4  ;;  %10282 = vst [vmem:[#allocation24_spill] sm:$0xff] %v7670_v44 }
 0x1ea   : > { %10278 = vst [vmem:[#allocation21_spill] sm:$0xff] %v7638_v32  ;;  %v7648_v51 = vadd.f32 %v1537_v10, %v1099_v35  ;;  %2121 = vmatprep.mubr.f32.mxu1 %v10211_v59  ;;  %2524 = vmatpush1.msra.mxu1 %v2242_v19  ;;  %v7655_v0 = vpop.f32.mrf.mxu0  ;;  %v2240_v10 = vld [vmem:[%s10262_s21 + $0x200] sm:$0xff]  ;;  %v2238_v19 = vld [vmem:[%s10262_s21 + $0x1f0] sm:$0xff]  ;;  %v1109_v35 = vpop.permute.xlu0 %1108  ;;  %v10287_v29 = vmax.f32 %v7638_v32, 0.0 }
 0x1eb   : > { %v1541_v4 = vpop.f32.mrf.mxu1  ;;  %2122 = vmatmul.mubr.f32.gmra.mxu1 %v10213_v28  ;;  %1936 = vmatprep.mubr.f32.mxu0 %v10281_v22  ;;  %v7694_v42 = vadd.f32 %v1358_v53, %v1109_v35  ;;  %v2235_v53 = vld [vmem:[%s10262_s21 + $0x1d8] sm:$0xff] }
 0x1ec   : > { %10280 = vst [vmem:[#allocation23_spill] sm:$0xff] %v7648_v51  ;;  %2335 = vmatpush1.msra.mxu0 %v2176_v38  ;;  %2525 = vmatprep.subr.mxu1 %v2241_v5  ;;  %v1364_v59 = vpop.f32.mrf.mxu0  ;;  %v2303_v5 = vld [vmem:[%s10262_s21 + $0x3f8] sm:$0xff]  ;;  %v2237_v38 = vld [vmem:[%s10262_s21 + $0x1e8] sm:$0xff]  ;;  %v10285_v48 = vmax.f32 %v7648_v51, 0.0  ;;  %v7690_v28 = vadd.f32 %v1541_v4, %v1104_v16 }
 0x1ed   : > { %v1543_v22 = vpop.f32.mrf.mxu1  ;;  %1937 = vmatmul.mubr.f32.gmra.mxu0 %v10283_v3  ;;  %2336 = vmatprep.subr.mxu0 %v2239_v8  ;;  %v2302_v3 = vld [vmem:[%s10262_s21 + $0x3f0] sm:$0xff]  ;;  %10288 = vst [vmem:[#allocation27_spill] sm:$0xff] %v7694_v42 }
 0x1ee   : > { %v7681_v18 = vadd.f32 %v1543_v22, %v1104_v16  ;;  %2127 = vmatprep.mubr.f32.mxu1 %v10285_v48  ;;  %2526 = vmatpush1.msra.mxu1 %v2240_v10  ;;  %v7688_v8 = vpop.f32.mrf.mxu0  ;;  %10286 = vst [vmem:[#allocation26_spill] sm:$0xff] %v7690_v28  ;;  %v2236_v22 = vld [vmem:[%s10262_s21 + $0x1e0] sm:$0xff]  ;;  %v2301_v10 = vld [vmem:[%s10262_s21 + $0x3e8] sm:$0xff]  ;;  %v10220_v16 = vmax.f32 %v7670_v44, 0.0  ;;  %v10294_v48 = vmax.f32 %v7690_v28, 0.0 }
 0x1ef   : > { %v1547_v40 = vpop.f32.mrf.mxu1  ;;  %2128 = vmatmul.mubr.f32.gmra.mxu1 %v10287_v29  ;;  %2337 = vmatpush2.msra.mxu0 %v2238_v19  ;;  %v10289_v29 = vmax.f32 %v7640_v12, 0.0  ;;  %v2300_v19 = vld [vmem:[%s10262_s21 + $0x3e0] sm:$0xff]  ;;  %v1114_v12 = vpop.permute.xlu1 %1113 }
 0x1f0   : > { %10284 = vst [vmem:[#allocation25_spill] sm:$0xff] %v7681_v18  ;;  %2527 = vmatprep.subr.mxu1 %v2303_v5  ;;  %2338 = vmatprep.subr.mxu0 %v2237_v38  ;;  %v2234_v5 = vld [vmem:[%s10262_s21 + $0x1d0] sm:$0xff]  ;;  %v1370_v38 = vpop.f32.mrf.mxu0  ;;  %v7740_v44 = vadd.f32 %v1364_v59, %v1114_v12  ;;  %v10296_v59 = vmax.f32 %v7694_v42, 0.0  ;;  %v1119_v42 = vpop.permute.xlu0 %1118 }
 0x1f1   : > { %2528 = vmatpush2.msra.mxu1 %v2302_v3  ;;  %v1549_v4 = vpop.f32.mrf.mxu1  ;;  %1942 = vmatprep.mubr.f32.mxu0 %v10289_v29  ;;  %v7719_v29 = vadd.f32 %v7626_v37, %v1109_v35  ;;  %v2233_v3 = vld [vmem:[%s10262_s21 + $0x1c8] sm:$0xff]  ;;  %v2298_v37 = vld [vmem:[%s10262_s21 + $0x3d0] sm:$0xff] }
 0x1f2   : > { %v7712_v32 = vadd.f32 %v1549_v4, %v1109_v35  ;;  %2339 = vmatpush2.msra.mxu0 %v2236_v22  ;;  %2529 = vmatprep.subr.mxu1 %v2301_v10  ;;  %v10292_v4 = vmax.f32 %v7681_v18, 0.0  ;;  %v2299_v10 = vld [vmem:[%s10262_s21 + $0x3d8] sm:$0xff] }
 0x1f3   : > { %10291 = vst [vmem:[#allocation29_spill] sm:$0xff] %v7719_v29  ;;  %1943 = vmatmul.mubr.f32.gmra.mxu0 %v10220_v16  ;;  %v1553_v22 = vpop.f32.mrf.mxu1  ;;  %2340 = vmatprep.subr.mxu0 %v2235_v53  ;;  %v7735_v16 = vadd.f32 %v1547_v40, %v1109_v35  ;;  %v2232_v53 = vld [vmem:[%s10262_s21 + $0x1c0] sm:$0xff]  ;;  %v7748_v40 = vpop.f32.mrf.mxu0  ;;  %v10225_v35 = vmax.f32 %v7719_v29, 0.0 }
 0x1f4   : > { %10290 = vst [vmem:[#allocation28_spill] sm:$0xff] %v7712_v32  ;;  %2133 = vmatprep.mubr.f32.mxu1 %v10292_v4  ;;  %2530 = vmatpush2.msra.mxu1 %v2300_v19  ;;  %v2297_v19 = vld [vmem:[%s10262_s21 + $0x3c8] sm:$0xff]  ;;  %v2296_v4 = vld [vmem:[%s10262_s21 + $0x3c0] sm:$0xff]  ;;  %v10298_v28 = vmax.f32 %v7712_v32, 0.0  ;;  %v7787_v32 = vadd.f32 %v1370_v38, %v1119_v42  ;;  %v2227_v38 = vld [vmem:[%s10262_s21 + $0x198] sm:$0xff] }
 0x1f5   : > { %10293 = vst [vmem:[#allocation30_spill] sm:$0xff] %v7735_v16  ;;  %2134 = vmatmul.mubr.f32.gmra.mxu1 %v10294_v48  ;;  %2341 = vmatpush2.msra.mxu0 %v2234_v5  ;;  %v1555_v18 = vpop.f32.mrf.mxu1  ;;  %v2231_v5 = vld [vmem:[%s10262_s21 + $0x1b8] sm:$0xff]  ;;  %v10300_v29 = vmax.f32 %v7735_v16, 0.0 }
 0x1f6   : > { %2531 = vmatprep.subr.mxu1 %v2299_v10  ;;  %2342 = vmatprep.subr.mxu0 %v2233_v3  ;;  %v7751_v48 = vadd.f32 %v1555_v18, %v1114_v12  ;;  %v2230_v3 = vld [vmem:[%s10262_s21 + $0x1b0] sm:$0xff] }
 0x1f7   : > { %2532 = vmatpush2.msra.mxu1 %v2298_v37  ;;  %1948 = vmatprep.mubr.f32.mxu0 %v10296_v59  ;;  %v1559_v10 = vpop.f32.mrf.mxu1  ;;  %v7766_v37 = vadd.f32 %v7655_v0, %v1114_v12  ;;  %v2294_v0 = vld [vmem:[%s10262_s21 + $0x3b0] sm:$0xff]  ;;  %v7782_v59 = vadd.f32 %v1553_v22, %v1114_v12 }
 0x1f8   : > { %10295 = vst [vmem:[#allocation31_spill] sm:$0xff] %v7751_v48  ;;  %2343 = vmatpush2.msra.mxu0 %v2232_v53  ;;  %2533 = vmatprep.subr.mxu1 %v2297_v19  ;;  %v2295_v53 = vld [vmem:[%s10262_s21 + $0x3b8] sm:$0xff]  ;;  %v2229_v19 = vld [vmem:[%s10262_s21 + $0x1a8] sm:$0xff]  ;;  %v10304_v16 = vmax.f32 %v7751_v48, 0.0 }
 0x1f9   : > { %10297 = vst [vmem:[#allocation32_spill] sm:$0xff] %v7766_v37  ;;  %1949 = vmatmul.mubr.f32.gmra.mxu0 %v10225_v35  ;;  %2139 = vmatprep.mubr.f32.mxu1 %v10298_v28  ;;  %v1561_v18 = vpop.f32.mrf.mxu1  ;;  %v1376_v35 = vpop.f32.mrf.mxu0  ;;  %10299 = vst [vmem:[#allocation33_spill] sm:$0xff] %v7782_v59  ;;  %v10230_v12 = vmax.f32 %v7766_v37, 0.0  ;;  %v10306_v37 = vmax.f32 %v7782_v59, 0.0 }
 0x1fa   : > { %2344 = vmatprep.subr.mxu0 %v2231_v5  ;;  %2534 = vmatpush2.msra.mxu1 %v2296_v4  ;;  %v2228_v5 = vld [vmem:[%s10262_s21 + $0x1a0] sm:$0xff]  ;;  %v2293_v4 = vld [vmem:[%s10262_s21 + $0x3a8] sm:$0xff]  ;;  %v7796_v22 = vadd.f32 %v1561_v18, %v1119_v42 }
 0x1fb   : > { %2140 = vmatmul.mubr.f32.gmra.mxu1 %v10300_v29  ;;  %2345 = vmatpush2.msra.mxu0 %v2230_v3  ;;  %v1565_v51 = vpop.f32.mrf.mxu1  ;;  %v10302_v29 = vmax.f32 %v7740_v44, 0.0  ;;  %v2292_v3 = vld [vmem:[%s10262_s21 + $0x3a0] sm:$0xff]  ;;  %v7809_v18 = vpop.f32.mrf.mxu0 }
 0x1fc   : > { %2535 = vmatprep.subr.mxu1 %v2295_v53  ;;  %2346 = vmatprep.subr.mxu0 %v2229_v19  ;;  %10301 = vst [vmem:[#allocation34_spill] sm:$0xff] %v7796_v22  ;;  %v2226_v53 = vld [vmem:[%s10262_s21 + $0x190] sm:$0xff]  ;;  %v1124_v19 = vpop.permute.xlu1 %1123  ;;  %v10310_v59 = vmax.f32 %v7796_v22, 0.0 }
 0x1fd   : > { %2536 = vmatpush2.msra.mxu1 %v2294_v0  ;;  %1954 = vmatprep.mubr.f32.mxu0 %v10302_v29  ;;  %v1567_v28 = vpop.f32.mrf.mxu1  ;;  %v7813_v0 = vadd.f32 %v7688_v8, %v1119_v42  ;;  %v2290_v8 = vld [vmem:[%s10262_s21 + $0x390] sm:$0xff]  ;;  %v7836_v48 = vadd.f32 %v1376_v35, %v1124_v19  ;;  %v2223_v35 = vld [vmem:[%s10262_s21 + $0x178] sm:$0xff] }
 0x1fe   : > { %2347 = vmatpush2.msra.mxu0 %v2228_v5  ;;  %2537 = vmatprep.subr.mxu1 %v2293_v4  ;;  %v2291_v5 = vld [vmem:[%s10262_s21 + $0x398] sm:$0xff]  ;;  %v2225_v4 = vld [vmem:[%s10262_s21 + $0x188] sm:$0xff] }
 0x1ff   : > { %10303 = vst [vmem:[#allocation35_spill] sm:$0xff] %v7813_v0  ;;  %1955 = vmatmul.mubr.f32.gmra.mxu0 %v10230_v12  ;;  %2145 = vmatprep.mubr.f32.mxu1 %v10304_v16  ;;  %v7829_v29 = vpop.f32.mrf.mxu1  ;;  %v7831_v12 = vadd.f32 %v1559_v10, %v1119_v42  ;;  %v1382_v42 = vpop.f32.mrf.mxu0  ;;  %v10234_v10 = vmax.f32 %v7813_v0, 0.0  ;;  %v7845_v16 = vadd.f32 %v1567_v28, %v1124_v19 }
 0x200   : > { %2348 = vmatprep.subr.mxu0 %v2227_v38  ;;  %2538 = vmatpush2.msra.mxu1 %v2292_v3  ;;  %v2224_v38 = vld [vmem:[%s10262_s21 + $0x180] sm:$0xff]  ;;  %v2289_v3 = vld [vmem:[%s10262_s21 + $0x388] sm:$0xff]  ;;  %v1129_v28 = vpop.permute.xlu0 %1128 }
 0x201   : > { %10305 = vst [vmem:[#allocation36_spill] sm:$0xff] %v7831_v12  ;;  %2146 = vmatmul.mubr.f32.gmra.mxu1 %v10306_v37  ;;  %2349 = vmatpush2.msra.mxu0 %v2226_v53  ;;  %10307 = vst [vmem:[#allocation37_spill] sm:$0xff] %v7845_v16  ;;  %v10308_v37 = vmax.f32 %v7787_v32, 0.0  ;;  %v2288_v53 = vld [vmem:[%s10262_s21 + $0x380] sm:$0xff]  ;;  %v10311_v0 = vmax.f32 %v7831_v12, 0.0  ;;  %v7881_v22 = vadd.f32 %v1382_v42, %v1129_v28  ;;  %v2219_v42 = vld [vmem:[%s10262_s21 + $0x158] sm:$0xff] }
 0x202   : > { %2539 = vmatprep.subr.mxu1 %v2291_v5  ;;  %2350 = vmatprep.subr.mxu0 %v2225_v4  ;;  %v2222_v5 = vld [vmem:[%s10262_s21 + $0x170] sm:$0xff]  ;;  %v1573_v4 = vpop.f32.mrf.mxu1  ;;  %v10313_v12 = vmax.f32 %v7845_v16, 0.0 }
 0x203   : > { %2540 = vmatpush2.msra.mxu1 %v2290_v8  ;;  %1960 = vmatprep.mubr.f32.mxu0 %v10308_v37  ;;  %v7860_v8 = vadd.f32 %v7748_v40, %v1124_v19  ;;  %v2286_v40 = vld [vmem:[%s10262_s21 + $0x370] sm:$0xff]  ;;  %v1386_v37 = vpop.f32.mrf.mxu0 }
 0x204   : > { %2351 = vmatpush2.msra.mxu0 %v2224_v38  ;;  %2541 = vmatprep.subr.mxu1 %v2289_v3  ;;  %v2287_v38 = vld [vmem:[%s10262_s21 + $0x378] sm:$0xff]  ;;  %v2221_v3 = vld [vmem:[%s10262_s21 + $0x168] sm:$0xff] }
 0x205   : > { %10309 = vst [vmem:[#allocation38_spill] sm:$0xff] %v7860_v8  ;;  %1961 = vmatmul.mubr.f32.gmra.mxu0 %v10234_v10  ;;  %2151 = vmatprep.mubr.f32.mxu1 %v10310_v59  ;;  %v7876_v10 = vadd.f32 %v1565_v51, %v1124_v19  ;;  %v1577_v51 = vpop.f32.mrf.mxu1  ;;  %v10238_v19 = vmax.f32 %v7860_v8, 0.0  ;;  %v7890_v59 = vadd.f32 %v1573_v4, %v1129_v28  ;;  %v1134_v4 = vpop.permute.xlu1 %1133 }
 0x206   : > { %2352 = vmatprep.subr.mxu0 %v2223_v35  ;;  %2542 = vmatpush2.msra.mxu1 %v2288_v53  ;;  %v2220_v35 = vld [vmem:[%s10262_s21 + $0x160] sm:$0xff]  ;;  %v2285_v53 = vld [vmem:[%s10262_s21 + $0x368] sm:$0xff] }
 0x207   : > { %2152 = vmatmul.mubr.f32.gmra.mxu1 %v10311_v0  ;;  %2353 = vmatpush2.msra.mxu0 %v2222_v5  ;;  %v10312_v0 = vmax.f32 %v7836_v48, 0.0  ;;  %v2284_v5 = vld [vmem:[%s10262_s21 + $0x360] sm:$0xff]  ;;  %v10314_v8 = vmax.f32 %v7876_v10, 0.0 }
 0x208   : > { %2543 = vmatprep.subr.mxu1 %v2287_v38  ;;  %2354 = vmatprep.subr.mxu0 %v2221_v3  ;;  %v2218_v38 = vld [vmem:[%s10262_s21 + $0x150] sm:$0xff]  ;;  %v1388_v3 = vpop.f32.mrf.mxu0 }
 0x209   : > { %2544 = vmatpush2.msra.mxu1 %v2286_v40  ;;  %1966 = vmatprep.mubr.f32.mxu0 %v10312_v0  ;;  %v7905_v40 = vadd.f32 %v7809_v18, %v1129_v28  ;;  %v2282_v18 = vld [vmem:[%s10262_s21 + $0x350] sm:$0xff]  ;;  %v1579_v0 = vpop.f32.mrf.mxu1  ;;  %v7927_v16 = vadd.f32 %v1388_v3, %v1134_v4  ;;  %v2280_v3 = vld [vmem:[%s10262_s21 + $0x340] sm:$0xff] }
 0x20a   : > { %2355 = vmatpush2.msra.mxu0 %v2220_v35  ;;  %2545 = vmatprep.subr.mxu1 %v2285_v53  ;;  %v2283_v35 = vld [vmem:[%s10262_s21 + $0x358] sm:$0xff]  ;;  %v2217_v53 = vld [vmem:[%s10262_s21 + $0x148] sm:$0xff] }
 0x20b   : > { %1967 = vmatmul.mubr.f32.gmra.mxu0 %v10238_v19  ;;  %2157 = vmatprep.mubr.f32.mxu1 %v10313_v12  ;;  %v7922_v19 = vadd.f32 %v7829_v29, %v1129_v28  ;;  %v10242_v12 = vmax.f32 %v7890_v59, 0.0  ;;  %v10241_v29 = vmax.f32 %v7905_v40, 0.0  ;;  %v7936_v28 = vadd.f32 %v1579_v0, %v1134_v4 }
 0x20c   : > { %2356 = vmatprep.subr.mxu0 %v2219_v42  ;;  %2546 = vmatpush2.msra.mxu1 %v2284_v5  ;;  %v2216_v42 = vld [vmem:[%s10262_s21 + $0x140] sm:$0xff]  ;;  %v2281_v5 = vld [vmem:[%s10262_s21 + $0x348] sm:$0xff] }
 0x20d   : > { %2158 = vmatmul.mubr.f32.gmra.mxu1 %v10314_v8  ;;  %2357 = vmatpush2.msra.mxu0 %v2218_v38  ;;  %v10315_v8 = vmax.f32 %v7881_v22, 0.0  ;;  %v2215_v38 = vld [vmem:[%s10262_s21 + $0x138] sm:$0xff]  ;;  %v1660_v0 = vmax.f32 %v7922_v19, 0.0 }
 0x20e   : > { %2547 = vmatprep.subr.mxu1 %v2283_v35  ;;  %2358 = vmatprep.subr.mxu0 %v2217_v53  ;;  %v2214_v35 = vld [vmem:[%s10262_s21 + $0x130] sm:$0xff]  ;;  %v7950_v53 = vadd.f32 %v1386_v37, %v1134_v4 }
 0x20f   : > { %2548 = vmatpush2.msra.mxu1 %v2282_v18  ;;  %1972 = vmatprep.mubr.f32.mxu0 %v10315_v8  ;;  %v1663_v18 = vmax.f32 %v7927_v16, 0.0  ;;  %v2278_v37 = vld [vmem:[%s10262_s21 + $0x330] sm:$0xff]  ;;  %v7966_v8 = vadd.f32 %v1577_v51, %v1134_v4  ;;  %v2211_v51 = vld [vmem:[%s10262_s21 + $0x118] sm:$0xff]  ;;  %v2276_v4 = vld [vmem:[%s10262_s21 + $0x320] sm:$0xff] }
 0x210   : > { %2359 = vmatpush2.msra.mxu0 %v2216_v42  ;;  %2549 = vmatprep.subr.mxu1 %v2281_v5  ;;  %v2279_v42 = vld [vmem:[%s10262_s21 + $0x338] sm:$0xff]  ;;  %v2213_v5 = vld [vmem:[%s10262_s21 + $0x128] sm:$0xff] }
 0x211   : > { %1973 = vmatmul.mubr.f32.gmra.mxu0 %v10241_v29  ;;  %2163 = vmatprep.mubr.f32.mxu1 %v10242_v12  ;;  %v1665_v29 = vmax.f32 %v7936_v28, 0.0  ;;  %v2212_v12 = vld [vmem:[%s10262_s21 + $0x120] sm:$0xff] }
 0x212   : > { %2360 = vmatprep.subr.mxu0 %v2215_v38  ;;  %2550 = vmatpush2.msra.mxu1 %v2280_v3  ;;  %v2277_v38 = vld [vmem:[%s10262_s21 + $0x328] sm:$0xff]  ;;  %v10243_v3 = vmax.f32 %v7950_v53, 0.0 }
 0x213   : > { %2164 = vmatmul.mubr.f32.gmra.mxu1 %v1660_v0  ;;  %2361 = vmatpush2.msra.mxu0 %v2214_v35  ;;  %v2210_v35 = vld [vmem:[%s10262_s21 + $0x110] sm:$0xff] }
 0x214   : > { %2551 = vmatprep.subr.mxu1 %v2279_v42  ;;  %2362 = vmatprep.subr.mxu0 %v2213_v5  ;;  %v10244_v42 = vmax.f32 %v7966_v8, 0.0  ;;  %v2275_v5 = vld [vmem:[%s10262_s21 + $0x318] sm:$0xff] }
 0x215   : > { %2552 = vmatpush2.msra.mxu1 %v2278_v37  ;;  %1978 = vmatprep.mubr.f32.mxu0 %v1663_v18  ;;  %v2274_v37 = vld [vmem:[%s10262_s21 + $0x310] sm:$0xff] }
 0x216   : > { %2363 = vmatpush2.msra.mxu0 %v2212_v12  ;;  %2553 = vmatprep.subr.mxu1 %v2277_v38  ;;  %v2209_v12 = vld [vmem:[%s10262_s21 + $0x108] sm:$0xff]  ;;  %v2208_v38 = vld [vmem:[%s10262_s21 + $0x100] sm:$0xff] }
 0x217   : > { %1979 = vmatmul.mubr.f32.gmra.mxu0 %v10243_v3  ;;  %2169 = vmatprep.mubr.f32.mxu1 %v1665_v29  ;;  %v10316_v3 = vmax.f32 %v7140_v39, 0.0  ;;  %v10319_v39 = vmax.f32 %v7149_v46, 0.0  ;;  %v10326_v46 = vmax.f32 %v7166_v54, 0.0  ;;  %v10333_v54 = vmax.f32 %v7330_v15, 0.0 }
 0x218   : > { %2364 = vmatprep.subr.mxu0 %v2211_v51  ;;  %2554 = vmatpush2.msra.mxu1 %v2276_v4  ;;  %v2273_v51 = vld [vmem:[%s10262_s21 + $0x308] sm:$0xff]  ;;  %v2272_v4 = vld [vmem:[%s10262_s21 + $0x300] sm:$0xff]  ;;  %v10340_v15 = vmax.f32 %v7354_v7, 0.0  ;;  %v10347_v7 = vmax.f32 %v7395_v45, 0.0  ;;  %v10354_v45 = vmax.f32 %v7423_v50, 0.0 }
 0x219   : > { %2170 = vmatmul.mubr.f32.gmra.mxu1 %v10244_v42  ;;  %2365 = vmatpush2.msra.mxu0 %v2210_v35  ;;  %v10317_v35 = vmax.f32 %v7184_v62, 0.0  ;;  %v10318_v42 = vmax.f32 %v7138_v36, 0.0  ;;  %v10323_v62 = vmax.f32 %v7177_v60, 0.0  ;;  %v10325_v36 = vmax.f32 %v7254_v33, 0.0  ;;  %v10366_v50 = vld [vmem:[#allocation16_spill] sm:$0xff] }
 0x21a   : > { %2368 = vmatprep.mubr.f32.mxu0 %v10316_v3  ;;  %2555 = vmatprep.subr.mxu1 %v2275_v5  ;;  %v10320_v3 = vmax.f32 %v7174_v58, 0.0  ;;  %v10321_v5 = vmax.f32 %v7216_v21, 0.0  ;;  %v10327_v58 = vmax.f32 %v7206_v24, 0.0  ;;  %v10328_v21 = vmax.f32 %v7240_v11, 0.0 }
 0x21b   : > { %2366 = vmatprep.subr.mxu0 %v2209_v12  ;;  %2556 = vmatpush2.msra.mxu1 %v2274_v37  ;;  %v10322_v12 = vmax.f32 %v7144_v43, 0.0  ;;  %v10324_v37 = vmax.f32 %v7203_v20, 0.0  ;;  %v10329_v43 = vmax.f32 %v7292_v61, 0.0  ;;  %v10330_v60 = vmax.f32 %v7197_v6, 0.0 }
 0x21c   : > { %2559 = vmatprep.mubr.f32.mxu1 %v10317_v35  ;;  %2367 = vmatpush2.msra.mxu0 %v2208_v38  ;;  %v10331_v20 = vmax.f32 %v7243_v13, 0.0  ;;  %v10332_v33 = vmax.f32 %v7278_v52, 0.0  ;;  %v10334_v24 = vmax.f32 %v7233_v31, 0.0  ;;  %v10335_v11 = vmax.f32 %v7281_v56, 0.0 }
 0x21d   : > { %2557 = vmatprep.subr.mxu1 %v2273_v51  ;;  %2369 = vmatmul.mubr.f32.vlgmr.msra.gmra.mxu0 %v10318_v42  ;;  %v10336_v61 = vmax.f32 %v7316_v27, 0.0  ;;  %v10337_v6 = vmax.f32 %v7368_v14, 0.0  ;;  %v10338_v13 = vmax.f32 %v7271_v47, 0.0  ;;  %v10339_v52 = vmax.f32 %v7319_v9, 0.0 }
 0x21e   : > { %2558 = vmatpush2.msra.mxu1 %v2272_v4  ;;  %2374 = vmatprep.mubr.f32.mxu0 %v10319_v39  ;;  %v10341_v31 = vmax.f32 %v7406_v34, 0.0  ;;  %v10342_v56 = vmax.f32 %v7309_v17, 0.0  ;;  %v10343_v27 = vmax.f32 %v7357_v23, 0.0  ;;  %v10344_v14 = vmax.f32 %v7392_v1, 0.0 }
 0x21f   : > { %2560 = vmatmul.mubr.f32.vlgmr.msra.gmra.mxu1 %v10320_v3  ;;  %v10345_v47 = vmax.f32 %v7444_v55, 0.0  ;;  %v10346_v9 = vmax.f32 %v7347_v57, 0.0  ;;  %v10348_v34 = vmax.f32 %v7430_v2, 0.0  ;;  %v10349_v17 = vmax.f32 %v7479_v63, 0.0  ;;  %v10356_v63 = vld [vmem:[#allocation8_spill] sm:$0xff] }
 0x220   : > { %2565 = vmatprep.mubr.f32.mxu1 %v10321_v5  ;;  %v10350_v23 = vmax.f32 %v7385_v26, 0.0  ;;  %v10351_v1 = vmax.f32 %v7433_v30, 0.0  ;;  %v10352_v55 = vmax.f32 %v7465_v41, 0.0  ;;  %v10353_v57 = vmax.f32 %v7516_v49, 0.0  ;;  %v10358_v26 = vld [vmem:[#allocation13_spill] sm:$0xff]  ;;  %v10360_v30 = vld [vmem:[#allocation7_spill] sm:$0xff] }
 0x221   : > { %2375 = vmatmul.mubr.f32.gmra.mxu0 %v10322_v12  ;;  %v10355_v2 = vmax.f32 %v7468_v25, 0.0  ;;  %v10357_v42 = vmax.f32 %v10356_v63, 0.0  ;;  %v10359_v38 = vmax.f32 %v10358_v26, 0.0  ;;  %v10361_v51 = vmax.f32 %v10360_v30, 0.0  ;;  %v10362_v41 = vld [vmem:[#allocation9_spill] sm:$0xff]  ;;  %v10364_v49 = vld [vmem:[#allocation11_spill] sm:$0xff] }
 0x222   : > { %2380 = vmatprep.mubr.f32.mxu0 %v10323_v62  ;;  %v10363_v4 = vmax.f32 %v10362_v41, 0.0  ;;  %v10365_v35 = vmax.f32 %v10364_v49, 0.0  ;;  %v10367_v39 = vmax.f32 %v10366_v50, 0.0  ;;  %v10368_v25 = vld [vmem:[#allocation10_spill] sm:$0xff]  ;;  %v10370_v5 = vld [vmem:[#allocation12_spill] sm:$0xff]  ;;  %v10372_v62 = vld [vmem:[#allocation15_spill] sm:$0xff] }
 0x223   : > { %2566 = vmatmul.mubr.f32.gmra.mxu1 %v10324_v37  ;;  %v10369_v3 = vmax.f32 %v10368_v25, 0.0  ;;  %v10371_v12 = vmax.f32 %v10370_v5, 0.0  ;;  %v10373_v37 = vmax.f32 %v10372_v62, 0.0  ;;  %v10405_v63 = vld [vmem:[#allocation31_spill] sm:$0xff]  ;;  %v10407_v26 = vld [vmem:[#allocation32_spill] sm:$0xff]  ;;  %v10409_v30 = vmax.f32 %v7787_v32, 0.0 }
 0x224   : > { %2571 = vmatprep.mubr.f32.mxu1 %v10325_v36  ;;  %v10374_v36 = vld [vmem:[#allocation19_spill] sm:$0xff]  ;;  %v10416_v50 = vmax.f32 %v7836_v48, 0.0  ;;  %v10421_v32 = vld [vmem:[#allocation38_spill] sm:$0xff]  ;;  %v10423_v62 = vmax.f32 %v7881_v22, 0.0  ;;  %v10426_v48 = vmax.f32 %v7905_v40, 0.0  ;;  %v10427_v22 = vmax.f32 %v7950_v53, 0.0 }
 0x225   : > { %2381 = vmatmul.mubr.f32.gmra.mxu0 %v10326_v46  ;;  %v10375_v46 = vmax.f32 %v10374_v36, 0.0  ;;  %v10425_v36 = vmax.f32 %v7890_v59, 0.0 }
 0x226   : > { %2386 = vmatprep.mubr.f32.mxu0 %v10327_v58  ;;  %v10376_v58 = vld [vmem:[#allocation14_spill] sm:$0xff] }
 0x227   : > { %2572 = vmatmul.mubr.f32.gmra.mxu1 %v10328_v21  ;;  %v10377_v21 = vmax.f32 %v10376_v58, 0.0 }
 0x228   : > { %2577 = vmatprep.mubr.f32.mxu1 %v10329_v43  ;;  %v10378_v43 = vld [vmem:[#allocation17_spill] sm:$0xff] }
 0x229   : > { %2387 = vmatmul.mubr.f32.gmra.mxu0 %v10330_v60  ;;  %v10379_v60 = vmax.f32 %v10378_v43, 0.0 }
 0x22a   : > { %2392 = vmatprep.mubr.f32.mxu0 %v10331_v20  ;;  %v10380_v20 = vld [vmem:[#allocation18_spill] sm:$0xff] }
 0x22b   : > { %2578 = vmatmul.mubr.f32.gmra.mxu1 %v10332_v33  ;;  %v10381_v33 = vmax.f32 %v10380_v20, 0.0 }
 0x22c   : > { %2583 = vmatprep.mubr.f32.mxu1 %v10333_v54  ;;  %v10382_v54 = vld [vmem:[#allocation23_spill] sm:$0xff] }
 0x22d   : > { %2393 = vmatmul.mubr.f32.gmra.mxu0 %v10334_v24  ;;  %v10383_v24 = vmax.f32 %v10382_v54, 0.0 }
 0x22e   : > { %2398 = vmatprep.mubr.f32.mxu0 %v10335_v11  ;;  %v10384_v11 = vld [vmem:[#allocation20_spill] sm:$0xff] }
 0x22f   : > { %2584 = vmatmul.mubr.f32.gmra.mxu1 %v10336_v61  ;;  %v10385_v61 = vmax.f32 %v10384_v11, 0.0 }
 0x230   : > { %2589 = vmatprep.mubr.f32.mxu1 %v10337_v6  ;;  %v10386_v6 = vld [vmem:[#allocation22_spill] sm:$0xff] }
 0x231   : > { %2399 = vmatmul.mubr.f32.gmra.mxu0 %v10338_v13  ;;  %v10387_v13 = vmax.f32 %v10386_v6, 0.0 }
 0x232   : > { %2404 = vmatprep.mubr.f32.mxu0 %v10339_v52  ;;  %v10388_v52 = vld [vmem:[#allocation21_spill] sm:$0xff] }
 0x233   : > { %2590 = vmatmul.mubr.f32.gmra.mxu1 %v10340_v15  ;;  %v10389_v15 = vmax.f32 %v10388_v52, 0.0 }
 0x234   : > { %2595 = vmatprep.mubr.f32.mxu1 %v10341_v31  ;;  %v10390_v31 = vld [vmem:[#allocation25_spill] sm:$0xff] }
 0x235   : > { %2405 = vmatmul.mubr.f32.gmra.mxu0 %v10342_v56  ;;  %v10391_v56 = vmax.f32 %v10390_v31, 0.0 }
 0x236   : > { %2410 = vmatprep.mubr.f32.mxu0 %v10343_v27  ;;  %v10392_v27 = vld [vmem:[#allocation24_spill] sm:$0xff] }
 0x237   : > { %2596 = vmatmul.mubr.f32.gmra.mxu1 %v10344_v14  ;;  %v10393_v14 = vmax.f32 %v10392_v27, 0.0 }
 0x238   : > { %2601 = vmatprep.mubr.f32.mxu1 %v10345_v47  ;;  %v10394_v47 = vld [vmem:[#allocation27_spill] sm:$0xff] }
 0x239   : > { %2411 = vmatmul.mubr.f32.gmra.mxu0 %v10346_v9  ;;  %v10395_v9 = vmax.f32 %v10394_v47, 0.0 }
 0x23a   : > { %2416 = vmatprep.mubr.f32.mxu0 %v10347_v7  ;;  %v10396_v7 = vld [vmem:[#allocation26_spill] sm:$0xff] }
 0x23b   : > { %2602 = vmatmul.mubr.f32.gmra.mxu1 %v10348_v34  ;;  %v10397_v34 = vmax.f32 %v10396_v7, 0.0 }
 0x23c   : > { %2607 = vmatprep.mubr.f32.mxu1 %v10349_v17  ;;  %v10398_v17 = vld [vmem:[#allocation28_spill] sm:$0xff] }
 0x23d   : > { %2417 = vmatmul.mubr.f32.gmra.mxu0 %v10350_v23  ;;  %v10399_v23 = vmax.f32 %v10398_v17, 0.0 }
 0x23e   : > { %2422 = vmatprep.mubr.f32.mxu0 %v10351_v1  ;;  %v10400_v1 = vld [vmem:[#allocation29_spill] sm:$0xff] }
 0x23f   : > { %2608 = vmatmul.mubr.f32.gmra.mxu1 %v10352_v55  ;;  %v10401_v55 = vmax.f32 %v10400_v1, 0.0 }
 0x240   : > { %2613 = vmatprep.mubr.f32.mxu1 %v10353_v57  ;;  %v10402_v57 = vmax.f32 %v7740_v44, 0.0  ;;  %v10414_v44 = vld [vmem:[#allocation35_spill] sm:$0xff] }
 0x241   : > { %2423 = vmatmul.mubr.f32.gmra.mxu0 %v10354_v45  ;;  %v10403_v45 = vld [vmem:[#allocation30_spill] sm:$0xff] }
 0x242   : > { %2428 = vmatprep.mubr.f32.mxu0 %v10355_v2  ;;  %v10404_v2 = vmax.f32 %v10403_v45, 0.0 }
 0x243   : > { %2614 = vmatmul.mubr.f32.gmra.mxu1 %v10357_v42  ;;  %v10406_v42 = vmax.f32 %v10405_v63, 0.0 }
 0x244   : > { %2619 = vmatprep.mubr.f32.mxu1 %v10359_v38  ;;  %v10408_v38 = vmax.f32 %v10407_v26, 0.0 }
 0x245   : > { %2429 = vmatmul.mubr.f32.gmra.mxu0 %v10361_v51  ;;  %v10410_v51 = vld [vmem:[#allocation33_spill] sm:$0xff] }
 0x246   : > { %2434 = vmatprep.mubr.f32.mxu0 %v10363_v4  ;;  %v10411_v41 = vmax.f32 %v10410_v51, 0.0  ;;  %v10412_v4 = vld [vmem:[#allocation34_spill] sm:$0xff] }
 0x247   : > { %2620 = vmatmul.mubr.f32.gmra.mxu1 %v10365_v35  ;;  %v10413_v49 = vmax.f32 %v10412_v4, 0.0  ;;  %v10415_v35 = vmax.f32 %v10414_v44, 0.0 }
 0x248   : > { %2625 = vmatprep.mubr.f32.mxu1 %v10367_v39  ;;  %v10417_v39 = vld [vmem:[#allocation36_spill] sm:$0xff] }
 0x249   : > { %2435 = vmatmul.mubr.f32.gmra.mxu0 %v10369_v3  ;;  %v10418_v25 = vmax.f32 %v10417_v39, 0.0  ;;  %v10419_v3 = vld [vmem:[#allocation37_spill] sm:$0xff] }
 0x24a   : > { %2440 = vmatprep.mubr.f32.mxu0 %v10371_v12  ;;  %v10420_v5 = vmax.f32 %v10419_v3, 0.0  ;;  %v10422_v12 = vmax.f32 %v10421_v32, 0.0 }
 0x24b   : > { %2626 = vmatmul.mubr.f32.gmra.mxu1 %v10373_v37  ;;  %v10424_v37 = vmax.f32 %v7876_v10, 0.0  ;;  %v10428_v10 = vmax.f32 %v7966_v8, 0.0 }
 0x24c   : > { %2631 = vmatprep.mubr.f32.mxu1 %v10375_v46 }
 0x24d   : > { %2441 = vmatmul.mubr.f32.gmra.mxu0 %v10377_v21 }
 0x24e   : > { %2446 = vmatprep.mubr.f32.mxu0 %v10379_v60 }
 0x24f   : > { %2632 = vmatmul.mubr.f32.gmra.mxu1 %v10381_v33 }
 0x250   : > { %2637 = vmatprep.mubr.f32.mxu1 %v10383_v24 }
 0x251   : > { %2447 = vmatmul.mubr.f32.gmra.mxu0 %v10385_v61 }
 0x252   : > { %2452 = vmatprep.mubr.f32.mxu0 %v10387_v13 }
 0x253   : > { %2638 = vmatmul.mubr.f32.gmra.mxu1 %v10389_v15 }
 0x254   : > { %2643 = vmatprep.mubr.f32.mxu1 %v10391_v56 }
 0x255   : > { %2453 = vmatmul.mubr.f32.gmra.mxu0 %v10393_v14 }
 0x256   : > { %2458 = vmatprep.mubr.f32.mxu0 %v10395_v9 }
 0x257   : > { %2644 = vmatmul.mubr.f32.gmra.mxu1 %v10397_v34 }
 0x258   : > { %2649 = vmatprep.mubr.f32.mxu1 %v10399_v23 }
 0x259   : > { %2459 = vmatmul.mubr.f32.gmra.mxu0 %v10401_v55 }
 0x25a   : > { %2464 = vmatprep.mubr.f32.mxu0 %v10402_v57 }
 0x25b   : > { %2650 = vmatmul.mubr.f32.gmra.mxu1 %v10404_v2 }
 0x25c   : > { %2655 = vmatprep.mubr.f32.mxu1 %v10406_v42 }
 0x25d   : > { %2465 = vmatmul.mubr.f32.gmra.mxu0 %v10408_v38 }
 0x25e   : > { %2470 = vmatprep.mubr.f32.mxu0 %v10409_v30 }
 0x25f   : > { %2656 = vmatmul.mubr.f32.gmra.mxu1 %v10411_v41 }
 0x260   : > { %2661 = vmatprep.mubr.f32.mxu1 %v10413_v49 }
 0x261   : > { %2471 = vmatmul.mubr.f32.gmra.mxu0 %v10415_v35 }
 0x262   : > { %2476 = vmatprep.mubr.f32.mxu0 %v10416_v50 }
 0x263   : > { %2662 = vmatmul.mubr.f32.gmra.mxu1 %v10418_v25 }
 0x264   : > { %2667 = vmatprep.mubr.f32.mxu1 %v10420_v5 }
 0x265   : > { %2477 = vmatmul.mubr.f32.gmra.mxu0 %v10422_v12 }
 0x266   : > { %2482 = vmatprep.mubr.f32.mxu0 %v10423_v62 }
 0x267   : > { %2668 = vmatmul.mubr.f32.gmra.mxu1 %v10424_v37 }
 0x268   : > { %2673 = vmatprep.mubr.f32.mxu1 %v10425_v36 }
 0x269   : > { %2483 = vmatmul.mubr.f32.gmra.mxu0 %v10426_v48 }
 0x26a   : > { %2488 = vmatprep.mubr.f32.mxu0 %v1663_v18 }
 0x26b   : > { %2674 = vmatmul.mubr.f32.gmra.mxu1 %v1660_v0 }
 0x26c   : > { %2679 = vmatprep.mubr.f32.mxu1 %v1665_v29 }
 0x26d   : > { %2489 = vmatmul.mubr.f32.gmra.mxu0 %v10427_v22 }
 0x26f   : > { %2680 = vmatmul.mubr.f32.gmra.mxu1 %v10428_v10 }
 0x272   : > { %v1860_v59 = vpop.f32.mrf.mxu0 }
 0x274   : > { %v8182_v46 = vpop.f32.mrf.mxu0 }
 0x275   : > { %10429 = vst [vmem:[#allocation8_spill] sm:$0xff] %v8182_v46 }
 0x276   : > { %v1866_v40 = vpop.f32.mrf.mxu0 }
 0x278   : > { %v8184_v58 = vpop.f32.mrf.mxu0 }
 0x279   : > { %10430 = vst [vmem:[#allocation13_spill] sm:$0xff] %v8184_v58 }
 0x27a   : > { %v1872_v16 = vpop.f32.mrf.mxu0 }
 0x27b   : > { %v2051_v18 = vpop.f32.mrf.mxu1 }
 0x27c   : > { %v8186_v21 = vadd.f32 %v2051_v18, %v1860_v59  ;;  %v8188_v19 = vpop.f32.mrf.mxu0 }
 0x27d   : > { %10431 = vst [vmem:[#allocation7_spill] sm:$0xff] %v8188_v19  ;;  %v8190_v28 = vpop.f32.mrf.mxu1 }
 0x27e   : > { %10432 = vst [vmem:[#allocation9_spill] sm:$0xff] %v8190_v28  ;;  %v1878_v29 = vpop.f32.mrf.mxu0 }
 0x27f   : > { %v2057_v0 = vpop.f32.mrf.mxu1 }
 0x280   : > { %v8192_v53 = vadd.f32 %v2057_v0, %v1866_v40  ;;  %v8194_v8 = vpop.f32.mrf.mxu0 }
 0x281   : > { %10433 = vst [vmem:[#allocation11_spill] sm:$0xff] %v8194_v8  ;;  %v8196_v43 = vpop.f32.mrf.mxu1 }
 0x282   : > { %10434 = vst [vmem:[#allocation16_spill] sm:$0xff] %v8196_v43  ;;  %v1884_v60 = vpop.f32.mrf.mxu0 }
 0x283   : > { %v2063_v20 = vpop.f32.mrf.mxu1 }
 0x284   : > { %v8198_v33 = vadd.f32 %v2063_v20, %v1872_v16  ;;  %v8200_v54 = vpop.f32.mrf.mxu0 }
 0x285   : > { %10435 = vst [vmem:[#allocation10_spill] sm:$0xff] %v8200_v54  ;;  %v8202_v24 = vpop.f32.mrf.mxu1 }
 0x286   : > { %10436 = vst [vmem:[#allocation12_spill] sm:$0xff] %v8202_v24  ;;  %v1890_v11 = vpop.f32.mrf.mxu0 }
 0x287   : > { %v2069_v61 = vpop.f32.mrf.mxu1 }
 0x288   : > { %v8204_v6 = vadd.f32 %v2069_v61, %v1878_v29  ;;  %v8206_v13 = vpop.f32.mrf.mxu0 }
 0x289   : > { %10437 = vst [vmem:[#allocation15_spill] sm:$0xff] %v8206_v13  ;;  %v8208_v52 = vpop.f32.mrf.mxu1 }
 0x28a   : > { %10438 = vst [vmem:[#allocation19_spill] sm:$0xff] %v8208_v52  ;;  %v1896_v15 = vpop.f32.mrf.mxu0 }
 0x28b   : > { %v2075_v31 = vpop.f32.mrf.mxu1 }
 0x28c   : > { %v8210_v56 = vadd.f32 %v2075_v31, %v1884_v60  ;;  %v8212_v27 = vpop.f32.mrf.mxu0 }
 0x28d   : > { %10439 = vst [vmem:[#allocation14_spill] sm:$0xff] %v8212_v27  ;;  %v8214_v14 = vpop.f32.mrf.mxu1 }
 0x28e   : > { %10440 = vst [vmem:[#allocation17_spill] sm:$0xff] %v8214_v14  ;;  %v1902_v47 = vpop.f32.mrf.mxu0 }
 0x28f   : > { %v2081_v9 = vpop.f32.mrf.mxu1 }
 0x290   : > { %v8216_v7 = vadd.f32 %v2081_v9, %v1890_v11  ;;  %v8218_v34 = vpop.f32.mrf.mxu0 }
 0x291   : > { %10442 = vst [vmem:[#allocation23_spill] sm:$0xff] %v8218_v34  ;;  %v8220_v17 = vpop.f32.mrf.mxu1 }
 0x292   : > { %10441 = vst [vmem:[#allocation18_spill] sm:$0xff] %v8216_v7  ;;  %10443 = vst [vmem:[#allocation20_spill] sm:$0xff] %v8220_v17  ;;  %v1908_v23 = vpop.f32.mrf.mxu0 }
 0x293   : > { %v2087_v1 = vpop.f32.mrf.mxu1 }
 0x294   : > { %v8222_v55 = vadd.f32 %v2087_v1, %v1896_v15  ;;  %v8224_v57 = vpop.f32.mrf.mxu0 }
 0x295   : > { %10445 = vst [vmem:[#allocation21_spill] sm:$0xff] %v8224_v57  ;;  %v8226_v45 = vpop.f32.mrf.mxu1 }
 0x296   : > { %10444 = vst [vmem:[#allocation22_spill] sm:$0xff] %v8222_v55  ;;  %10446 = vst [vmem:[#allocation25_spill] sm:$0xff] %v8226_v45  ;;  %v1914_v2 = vpop.f32.mrf.mxu0 }
 0x297   : > { %v2093_v63 = vpop.f32.mrf.mxu1 }
 0x298   : > { %v8228_v42 = vadd.f32 %v2093_v63, %v1902_v47  ;;  %v8230_v26 = vpop.f32.mrf.mxu0 }
 0x299   : > { %v8232_v38 = vpop.f32.mrf.mxu1 }
 0x29a   : > { %10447 = vst [vmem:[#allocation24_spill] sm:$0xff] %v8228_v42  ;;  %10448 = vst [vmem:[#allocation27_spill] sm:$0xff] %v8232_v38 }
 0x29b   : > { %v2099_v30 = vpop.f32.mrf.mxu1 }
 0x29c   : > { %v8234_v51 = vadd.f32 %v2099_v30, %v1908_v23  ;;  %v1920_v41 = vpop.f32.mrf.mxu0 }
 0x29d   : > { %v8236_v4 = vpop.f32.mrf.mxu1 }
 0x29e   : > { %10449 = vst [vmem:[#allocation26_spill] sm:$0xff] %v8234_v51  ;;  %10450 = vst [vmem:[#allocation28_spill] sm:$0xff] %v8236_v4  ;;  %v8238_v49 = vpop.f32.mrf.mxu0 }
 0x29f   : > { %v2105_v44 = vpop.f32.mrf.mxu1 }
 0x2a0   : > { %v8240_v35 = vadd.f32 %v2105_v44, %v1914_v2  ;;  %v1926_v50 = vpop.f32.mrf.mxu0 }
 0x2a1   : > { %v8242_v39 = vpop.f32.mrf.mxu1 }
 0x2a2   : > { %10451 = vst [vmem:[#allocation29_spill] sm:$0xff] %v8240_v35  ;;  %v8244_v25 = vpop.f32.mrf.mxu0 }
 0x2a3   : > { %v2111_v3 = vpop.f32.mrf.mxu1 }
 0x2a4   : > { %v8246_v5 = vadd.f32 %v2111_v3, %v1920_v41 }
 0x2a5   : > { %v8248_v32 = vpop.f32.mrf.mxu1 }
 0x2a6   : > { %v1932_v12 = vpop.f32.mrf.mxu0 }
 0x2a7   : > { %v2117_v62 = vpop.f32.mrf.mxu1 }
 0x2a8   : > { %v8250_v37 = vadd.f32 %v2117_v62, %v1926_v50  ;;  %v8254_v48 = vpop.f32.mrf.mxu0 }
 0x2a9   : > { %v8252_v36 = vpop.f32.mrf.mxu1 }
 0x2ab   : > { %v2123_v22 = vpop.f32.mrf.mxu1 }
 0x2ac   : > { %v8256_v10 = vadd.f32 %v2123_v22, %v1932_v12 }
 0x2ad   : > { %v8258_v59 = vpop.f32.mrf.mxu1  ;;  %v1938_v40 = vpop.f32.mrf.mxu0 }
 0x2af   : > { %v2129_v16 = vpop.f32.mrf.mxu1  ;;  %v8260_v18 = vpop.f32.mrf.mxu0 }
 0x2b0   : > { %v8262_v29 = vadd.f32 %v2129_v16, %v1938_v40  ;;  %v2729_v16 = vld [vmem:[%s10126_s5 + $0x8] sm:$0xff] }
 0x2b1   : > { %v8264_v0 = vpop.f32.mrf.mxu1  ;;  %5854 = vmatprep.mubr.msk.f32.mxu0 %vm2752_vm5, %v2729_v16 }
 0x2b3   : > { %v1944_v60 = vpop.f32.mrf.mxu0 }
 0x2b5   : > { %v2135_v20 = vpop.f32.mrf.mxu1  ;;  %v8266_v11 = vpop.f32.mrf.mxu0 }
 0x2b6   : > { %v8268_v61 = vadd.f32 %v2135_v20, %v1944_v60  ;;  %v2927_v60 = vld [vmem:[%s10127_s6 + $0x8] sm:$0xff] }
 0x2b7   : > { %v8270_v15 = vpop.f32.mrf.mxu1  ;;  %5866 = vmatprep.mubr.msk.f32.mxu1 %vm2752_vm5, %v2927_v60 }
 0x2b9   : > { %v1950_v31 = vpop.f32.mrf.mxu0 }
 0x2bb   : > { %v2141_v47 = vpop.f32.mrf.mxu1  ;;  %v8272_v9 = vpop.f32.mrf.mxu0 }
 0x2bc   : > { %v8274_v23 = vadd.f32 %v2141_v47, %v1950_v31 }
 0x2bd   : > { %v8276_v1 = vpop.f32.mrf.mxu1 }
 0x2bf   : > { %v1956_v2 = vpop.f32.mrf.mxu0 }
 0x2c1   : > { %v2147_v63 = vpop.f32.mrf.mxu1  ;;  %v8278_v30 = vpop.f32.mrf.mxu0 }
 0x2c2   : > { %10452 = vst [vmem:[#allocation30_spill] sm:$0xff] %v8278_v30  ;;  %v8280_v41 = vadd.f32 %v2147_v63, %v1956_v2 }
 0x2c3   : > { %v8282_v44 = vpop.f32.mrf.mxu1 }
 0x2c4   : > { %10453 = vst [vmem:[#allocation31_spill] sm:$0xff] %v8280_v41  ;;  %10454 = vst [vmem:[#allocation32_spill] sm:$0xff] %v8282_v44 }
 0x2c5   : > { %v1962_v50 = vpop.f32.mrf.mxu0 }
 0x2c7   : > { %v2153_v3 = vpop.f32.mrf.mxu1  ;;  %v8284_v12 = vpop.f32.mrf.mxu0 }
 0x2c8   : > { %10455 = vst [vmem:[#allocation33_spill] sm:$0xff] %v8284_v12  ;;  %v8286_v62 = vadd.f32 %v2153_v3, %v1962_v50 }
 0x2c9   : > { %v8288_v22 = vpop.f32.mrf.mxu1 }
 0x2ca   : > { %10456 = vst [vmem:[#allocation34_spill] sm:$0xff] %v8286_v62  ;;  %10457 = vst [vmem:[#allocation35_spill] sm:$0xff] %v8288_v22 }
 0x2cb   : > { %v1968_v40 = vpop.f32.mrf.mxu0 }
 0x2cd   : > { %v2159_v20 = vpop.f32.mrf.mxu1  ;;  %v8298_v31 = vpop.f32.mrf.mxu0 }
 0x2ce   : > { %10458 = vst [vmem:[#allocation36_spill] sm:$0xff] %v8298_v31  ;;  %v8300_v47 = vadd.f32 %v2159_v20, %v1968_v40 }
 0x2cf   : > { %v8302_v2 = vpop.f32.mrf.mxu1 }
 0x2d0   : > { %10459 = vst [vmem:[#allocation37_spill] sm:$0xff] %v8300_v47  ;;  %10460 = vst [vmem:[#allocation38_spill] sm:$0xff] %v8302_v2 }
 0x2d1   : > { %v1974_v63 = vpop.f32.mrf.mxu0 }
 0x2d3   : > { %v2165_v50 = vpop.f32.mrf.mxu1  ;;  %v8304_v3 = vpop.f32.mrf.mxu0 }
 0x2d4   : > { %10461 = vst [vmem:[#allocation39_spill] sm:$0xff] %v8304_v3  ;;  %v8306_v41 = vadd.f32 %v2165_v50, %v1974_v63 }
 0x2d5   : > { %v8308_v62 = vpop.f32.mrf.mxu1 }
 0x2d6   : > { %10462 = vst [vmem:[#allocation40_spill] sm:$0xff] %v8306_v41  ;;  %10463 = vst [vmem:[#allocation41_spill] sm:$0xff] %v8308_v62 }
 0x2d7   : > { %v1980_v44 = vpop.f32.mrf.mxu0 }
 0x2d9   : > { %v2171_v30 = vpop.f32.mrf.mxu1  ;;  %v8310_v16 = vpop.f32.mrf.mxu0 }
 0x2da   : > { %10464 = vst [vmem:[#allocation42_spill] sm:$0xff] %v8310_v16  ;;  %v8312_v60 = vadd.f32 %v2171_v30, %v1980_v44 }
 0x2db   : > { %v8314_v22 = vpop.f32.mrf.mxu1 }
 0x2dc   : > { %10465 = vst [vmem:[#allocation43_spill] sm:$0xff] %v8312_v60  ;;  %10466 = vst [vmem:[#allocation44_spill] sm:$0xff] %v8314_v22 }
 0x2dd   : > { %v2370_v40 = vpop.f32.mrf.mxu0 }
 0x2df   : > { %v2561_v20 = vpop.f32.mrf.mxu1  ;;  %v8316_v47 = vpop.f32.mrf.mxu0 }
 0x2e0   : > { %10467 = vst [vmem:[#allocation45_spill] sm:$0xff] %v8316_v47  ;;  %v2562_v12 = vadd.f32 %v2561_v20, %v2370_v40 }
 0x2e1   : > { %v8318_v2 = vpop.f32.mrf.mxu1  ;;  %v2376_v31 = vpop.f32.mrf.mxu0 }
 0x2e2   : > { %10468 = vst [vmem:[#allocation46_spill] sm:$0xff] %v8318_v2  ;;  %v8321_v63 = vmax.f32 %v8186_v21, %v2562_v12 }
 0x2e3   : > { %v2567_v50 = vpop.f32.mrf.mxu1  ;;  %v8323_v41 = vpop.f32.mrf.mxu0 }
 0x2e4   : > { %10469 = vst [vmem:[#allocation47_spill] sm:$0xff] %v8321_v63  ;;  %10470 = vst [vmem:[#allocation48_spill] sm:$0xff] %v8323_v41  ;;  %v2568_v62 = vadd.f32 %v2567_v50, %v2376_v31 }
 0x2e5   : > { %v8325_v3 = vpop.f32.mrf.mxu1  ;;  %v2382_v30 = vpop.f32.mrf.mxu0 }
 0x2e6   : > { %10471 = vst [vmem:[#allocation49_spill] sm:$0xff] %v8325_v3  ;;  %v8328_v44 = vmax.f32 %v8192_v53, %v2568_v62 }
 0x2e7   : > { %v2573_v60 = vpop.f32.mrf.mxu1  ;;  %v8330_v22 = vpop.f32.mrf.mxu0 }
 0x2e8   : > { %10472 = vst [vmem:[#allocation50_spill] sm:$0xff] %v8328_v44  ;;  %10473 = vst [vmem:[#allocation51_spill] sm:$0xff] %v8330_v22  ;;  %v2574_v40 = vadd.f32 %v2573_v60, %v2382_v30 }
 0x2e9   : > { %v8332_v20 = vpop.f32.mrf.mxu1  ;;  %v2388_v16 = vpop.f32.mrf.mxu0 }
 0x2ea   : > { %10474 = vst [vmem:[#allocation52_spill] sm:$0xff] %v8332_v20  ;;  %v8335_v21 = vmax.f32 %v8198_v33, %v2574_v40 }
 0x2eb   : > { %v2579_v12 = vpop.f32.mrf.mxu1  ;;  %v8337_v63 = vpop.f32.mrf.mxu0 }
 0x2ec   : > { %10475 = vst [vmem:[#allocation53_spill] sm:$0xff] %v8335_v21  ;;  %10476 = vst [vmem:[#allocation54_spill] sm:$0xff] %v8337_v63  ;;  %v2580_v31 = vadd.f32 %v2579_v12, %v2388_v16 }
 0x2ed   : > { %v8339_v50 = vpop.f32.mrf.mxu1  ;;  %v2394_v28 = vpop.f32.mrf.mxu0 }
 0x2ee   : > { %10477 = vst [vmem:[#allocation55_spill] sm:$0xff] %v8339_v50  ;;  %v8342_v53 = vmax.f32 %v8204_v6, %v2580_v31 }
 0x2ef   : > { %v2585_v62 = vpop.f32.mrf.mxu1  ;;  %v8344_v44 = vpop.f32.mrf.mxu0 }
 0x2f0   : > { %10478 = vst [vmem:[#allocation56_spill] sm:$0xff] %v8342_v53  ;;  %10479 = vst [vmem:[#allocation57_spill] sm:$0xff] %v8344_v44  ;;  %v2586_v60 = vadd.f32 %v2585_v62, %v2394_v28 }
 0x2f1   : > { %v8346_v30 = vpop.f32.mrf.mxu1  ;;  %v8348_v46 = vpop.f32.mrf.mxu0 }
 0x2f2   : > { %10480 = vst [vmem:[#allocation58_spill] sm:$0xff] %v8346_v30  ;;  %10481 = vst [vmem:[#allocation59_spill] sm:$0xff] %v8348_v46  ;;  %v8351_v33 = vmax.f32 %v8210_v56, %v2586_v60 }
 0x2f3   : > { %v8353_v40 = vpop.f32.mrf.mxu1  ;;  %v8355_v16 = vpop.f32.mrf.mxu0 }
 0x2f4   : > { %10482 = vst [vmem:[#allocation60_spill] sm:$0xff] %v8351_v33  ;;  %10483 = vst [vmem:[#allocation61_spill] sm:$0xff] %v8353_v40 }
 0x2f5   : > { %10484 = vst [vmem:[#allocation62_spill] sm:$0xff] %v8355_v16  ;;  %v8357_v12 = vpop.f32.mrf.mxu1  ;;  %v8359_v21 = vpop.f32.mrf.mxu0 }
 0x2f6   : > { %10485 = vst [vmem:[#allocation63_spill] sm:$0xff] %v8357_v12  ;;  %10486 = vst [vmem:[#allocation64_spill] sm:$0xff] %v8359_v21 }
 0x2f7   : > { %v8361_v6 = vpop.f32.mrf.mxu1  ;;  %v8363_v31 = vpop.f32.mrf.mxu0 }
 0x2f8   : > { %10487 = vst [vmem:[#allocation65_spill] sm:$0xff] %v8361_v6  ;;  %10488 = vst [vmem:[#allocation66_spill] sm:$0xff] %v8363_v31  ;;  %v2144_v31 = vadd.f32 %v8276_v1, %v8272_v9 }
 0x2f9   : > { %v8365_v28 = vpop.f32.mrf.mxu1  ;;  %v8367_v62 = vpop.f32.mrf.mxu0 }
 0x2fa   : > { %10489 = vst [vmem:[#allocation67_spill] sm:$0xff] %v8365_v28  ;;  %10490 = vst [vmem:[#allocation68_spill] sm:$0xff] %v8367_v62 }
 0x2fb   : > { %v8369_v53 = vpop.f32.mrf.mxu1  ;;  %v8371_v56 = vpop.f32.mrf.mxu0 }
 0x2fc   : > { %10491 = vst [vmem:[#allocation69_spill] sm:$0xff] %v8369_v53  ;;  %10492 = vst [vmem:[#allocation70_spill] sm:$0xff] %v8371_v56 }
 0x2fd   : > { %v8373_v60 = vpop.f32.mrf.mxu1  ;;  %v8375_v2 = vpop.f32.mrf.mxu0 }
 0x2fe   : > { %10493 = vst [vmem:[#allocation71_spill] sm:$0xff] %v8373_v60  ;;  %v2138_v60 = vadd.f32 %v8270_v15, %v8266_v11 }
 0x2ff   : > { %v8377_v47 = vpop.f32.mrf.mxu1  ;;  %v8379_v43 = vpop.f32.mrf.mxu0 }
 0x301   : > { %v8381_v58 = vpop.f32.mrf.mxu1  ;;  %v8383_v33 = vpop.f32.mrf.mxu0 }
 0x303   : > { %v8385_v3 = vpop.f32.mrf.mxu1  ;;  %v8387_v41 = vpop.f32.mrf.mxu0 }
 0x305   : > { %v8389_v24 = vpop.f32.mrf.mxu1  ;;  %v8391_v19 = vpop.f32.mrf.mxu0 }
 0x307   : > { %v8393_v20 = vpop.f32.mrf.mxu1  ;;  %v2432_v22 = vpop.f32.mrf.mxu0 }
 0x309   : > { %v2623_v52 = vpop.f32.mrf.mxu1  ;;  %v2436_v8 = vpop.f32.mrf.mxu0 }
 0x30b   : > { %v2627_v7 = vpop.f32.mrf.mxu1  ;;  %v2438_v50 = vpop.f32.mrf.mxu0 }
 0x30d   : > { %v2629_v63 = vpop.f32.mrf.mxu1  ;;  %v2442_v14 = vpop.f32.mrf.mxu0 }
 0x30f   : > { %v2633_v54 = vpop.f32.mrf.mxu1  ;;  %v2444_v55 = vpop.f32.mrf.mxu0 }
 0x310   : > { %v2634_v1 = vadd.f32 %v2633_v54, %v2442_v14  ;;  %v2120_v54 = vadd.f32 %v8252_v36, %v8244_v25  ;;  %v2624_v14 = vadd.f32 %v2623_v52, %v2432_v22  ;;  %v2618_v52 = vadd.f32 %v8389_v24, %v8387_v41 }
 0x311   : > { %v2635_v30 = vpop.f32.mrf.mxu1  ;;  %v2448_v44 = vpop.f32.mrf.mxu0  ;;  %v2610_v24 = vadd.f32 %v8377_v47, %v8375_v2 }
 0x313   : > { %v2639_v17 = vpop.f32.mrf.mxu1  ;;  %v2450_v13 = vpop.f32.mrf.mxu0 }
 0x314   : > { %v2640_v57 = vadd.f32 %v2639_v17, %v2448_v44  ;;  %v2630_v17 = vadd.f32 %v2629_v63, %v2438_v50  ;;  %v10503_v63 = vld [vmem:[#allocation27_spill] sm:$0xff] }
 0x315   : > { %v2641_v42 = vpop.f32.mrf.mxu1  ;;  %v2454_v40 = vpop.f32.mrf.mxu0  ;;  %v10505_v50 = vld [vmem:[#allocation67_spill] sm:$0xff] }
 0x316   : > { %v2642_v56 = vadd.f32 %v2641_v42, %v2450_v13 }
 0x317   : > { %v2645_v46 = vpop.f32.mrf.mxu1  ;;  %v2456_v12 = vpop.f32.mrf.mxu0 }
 0x318   : > { %v2646_v35 = vadd.f32 %v2645_v46, %v2454_v40  ;;  %v2636_v46 = vadd.f32 %v2635_v30, %v2444_v55  ;;  %v2628_v55 = vadd.f32 %v2627_v7, %v2436_v8  ;;  %v2114_v7 = vadd.f32 %v8248_v32, %v8238_v49  ;;  %v10506_v40 = vld [vmem:[#allocation64_spill] sm:$0xff] }
 0x319   : > { %v2647_v16 = vpop.f32.mrf.mxu1  ;;  %v2460_v45 = vpop.f32.mrf.mxu0  ;;  %v2612_v49 = vadd.f32 %v8381_v58, %v8379_v43  ;;  %v10499_v58 = vld [vmem:[#allocation68_spill] sm:$0xff]  ;;  %v10500_v43 = vld [vmem:[#allocation69_spill] sm:$0xff] }
 0x31a   : > { %v2648_v38 = vadd.f32 %v2647_v16, %v2456_v12  ;;  %v2708_v25 = vmax.f32 %v8250_v37, %v2628_v55  ;;  %v2707_v32 = vmax.f32 %v2114_v7, %v2624_v14  ;;  %v10495_v37 = vld [vmem:[#allocation21_spill] sm:$0xff]  ;;  %v2604_v22 = vadd.f32 %v10500_v43, %v10499_v58  ;;  %v10515_v55 = vld [vmem:[#allocation24_spill] sm:$0xff]  ;;  %v10516_v14 = vld [vmem:[#allocation15_spill] sm:$0xff] }
 0x31b   : > { %v2651_v27 = vpop.f32.mrf.mxu1  ;;  %v2462_v51 = vpop.f32.mrf.mxu0  ;;  %v10507_v16 = vld [vmem:[#allocation65_spill] sm:$0xff]  ;;  %v10519_v7 = vld [vmem:[#allocation58_spill] sm:$0xff]  ;;  %v10527_v58 = vld [vmem:[#allocation19_spill] sm:$0xff] }
 0x31c   : > { %v2652_v6 = vadd.f32 %v2651_v27, %v2460_v45  ;;  %v2715_v9 = vmax.f32 %v2138_v60, %v2648_v38  ;;  %v2712_v38 = vmax.f32 %v8262_v29, %v2640_v57  ;;  %v2709_v57 = vmax.f32 %v2120_v54, %v2630_v17  ;;  %v10509_v60 = vld [vmem:[#allocation14_spill] sm:$0xff]  ;;  %v10514_v17 = vld [vmem:[#allocation61_spill] sm:$0xff] }
 0x31d   : > { %v2653_v21 = vpop.f32.mrf.mxu1  ;;  %v8395_v28 = vpop.f32.mrf.mxu0  ;;  %v2598_v12 = vadd.f32 %v10507_v16, %v10506_v40 }
 0x31e   : > { %10494 = vst [vmem:[#allocation72_spill] sm:$0xff] %v8395_v28  ;;  %v2654_v34 = vadd.f32 %v2653_v21, %v2462_v51  ;;  %v2716_v27 = vmax.f32 %v8274_v23, %v2652_v6  ;;  %v2132_v51 = vadd.f32 %v8264_v0, %v8260_v18  ;;  %v2714_v21 = vmax.f32 %v8268_v61, %v2646_v35  ;;  %v10496_v61 = vld [vmem:[#allocation28_spill] sm:$0xff]  ;;  %v10497_v23 = vld [vmem:[#allocation70_spill] sm:$0xff] }
 0x31f   : > { %v8399_v53 = vpop.f32.mrf.mxu1  ;;  %v8401_v62 = vpop.f32.mrf.mxu0  ;;  %v2102_v15 = vadd.f32 %v10496_v61, %v10495_v37  ;;  %v10508_v6 = vld [vmem:[#allocation26_spill] sm:$0xff]  ;;  %v10524_v37 = vld [vmem:[#allocation55_spill] sm:$0xff] }
 0x320   : > { %v2717_v4 = vmax.f32 %v2144_v31, %v2654_v34  ;;  %v2126_v34 = vadd.f32 %v8258_v59, %v8254_v48  ;;  %v2713_v42 = vmax.f32 %v2132_v51, %v2642_v56  ;;  %v2622_v48 = vadd.f32 %v8393_v20, %v8391_v19  ;;  %v10504_v20 = vld [vmem:[#allocation66_spill] sm:$0xff] }
 0x321   : > { %v8406_v45 = vpop.f32.mrf.mxu1  ;;  %v8408_v28 = vpop.f32.mrf.mxu0  ;;  %v2710_v59 = vmax.f32 %v8256_v10, %v2634_v1  ;;  %v2616_v19 = vadd.f32 %v8385_v3, %v8383_v33  ;;  %v2108_v10 = vadd.f32 %v8242_v39, %v8230_v26  ;;  %v10498_v26 = vld [vmem:[#allocation71_spill] sm:$0xff]  ;;  %v10501_v3 = vld [vmem:[#allocation29_spill] sm:$0xff]  ;;  %v2600_v30 = vadd.f32 %v10505_v50, %v10504_v20  ;;  %v10531_v20 = vld [vmem:[#allocation12_spill] sm:$0xff] }
 0x322   : > { %2789 = vmatprep.subr.mxu0 %v2717_v4  ;;  %2986 = vmatprep.subr.mxu1 %v2717_v4  ;;  %v2711_v35 = vmax.f32 %v2126_v34, %v2636_v46  ;;  %v2706_v29 = vmax.f32 %v8246_v5, %v2622_v48  ;;  %v2606_v39 = vadd.f32 %v10498_v26, %v10497_v23  ;;  %v10502_v5 = vld [vmem:[#allocation23_spill] sm:$0xff]  ;;  %v10511_v46 = vld [vmem:[#allocation62_spill] sm:$0xff] }
 0x323   : > { %v8413_v11 = vpop.f32.mrf.mxu1  ;;  %2790 = vmatpush1.msra.mxu0 %v2716_v27  ;;  %2987 = vmatpush1.msra.mxu1 %v2716_v27  ;;  %v8415_v13 = vpop.f32.mrf.mxu0  ;;  %v2705_v41 = vmax.f32 %v2108_v10, %v2618_v52  ;;  %v2704_v47 = vmax.f32 %v10501_v3, %v2616_v19  ;;  %v2096_v44 = vadd.f32 %v10503_v63, %v10502_v5  ;;  %v10510_v27 = vld [vmem:[#allocation25_spill] sm:$0xff]  ;;  %v10513_v34 = vld [vmem:[#allocation59_spill] sm:$0xff]  ;;  %v10520_v19 = vld [vmem:[#allocation22_spill] sm:$0xff] }
 0x324   : > { %2791 = vmatprep.subr.mxu0 %v2715_v9  ;;  %2988 = vmatprep.subr.mxu1 %v2715_v9  ;;  %v2703_v33 = vmax.f32 %v2102_v15, %v2612_v49  ;;  %v2702_v31 = vmax.f32 %v10508_v6, %v2610_v24  ;;  %v2090_v51 = vadd.f32 %v10510_v27, %v10509_v60  ;;  %v10512_v9 = vld [vmem:[#allocation63_spill] sm:$0xff]  ;;  %v10521_v49 = vld [vmem:[#allocation10_spill] sm:$0xff]  ;;  %v10529_v3 = vld [vmem:[#allocation52_spill] sm:$0xff] }
 0x325   : > { %v8420_v4 = vpop.f32.mrf.mxu1  ;;  %2792 = vmatpush1.msra.mxu0 %v2714_v21  ;;  %2989 = vmatpush1.msra.mxu1 %v2714_v21  ;;  %v8427_v18 = vpop.f32.mrf.mxu0  ;;  %v2594_v1 = vadd.f32 %v10512_v9, %v10511_v46  ;;  %v2701_v21 = vmax.f32 %v2096_v44, %v2606_v39  ;;  %v10525_v23 = vld [vmem:[#allocation18_spill] sm:$0xff]  ;;  %v10530_v44 = vld [vmem:[#allocation7_spill] sm:$0xff]  ;;  %v10534_v6 = vld [vmem:[#allocation60_spill] sm:$0xff] }
 0x326   : > { %2793 = vmatprep.subr.mxu0 %v2713_v42  ;;  %2990 = vmatprep.subr.mxu1 %v2713_v42  ;;  %v2592_v42 = vadd.f32 %v10514_v17, %v10513_v34  ;;  %v2066_v50 = vadd.f32 %v10531_v20, %v10530_v44  ;;  %v10536_v60 = vld [vmem:[#allocation16_spill] sm:$0xff]  ;;  %v10538_v46 = vld [vmem:[#allocation46_spill] sm:$0xff] }
 0x327   : > { %v8429_v8 = vpop.f32.mrf.mxu1  ;;  %2794 = vmatpush1.msra.mxu0 %v2712_v38  ;;  %2991 = vmatpush1.msra.mxu1 %v2712_v38  ;;  %v8447_v0 = vpop.f32.mrf.mxu0  ;;  %v2700_v38 = vmax.f32 %v10515_v55, %v2604_v22  ;;  %v10528_v22 = vld [vmem:[#allocation51_spill] sm:$0xff]  ;;  %v10539_v34 = vld [vmem:[#allocation56_spill] sm:$0xff]  ;;  %v10559_v20 = vld [vmem:[#allocation34_spill] sm:$0xff] }
 0x328   : > { %2795 = vmatprep.subr.mxu0 %v2711_v35  ;;  %2992 = vmatprep.subr.mxu1 %v2711_v35  ;;  %v10517_v35 = vld [vmem:[#allocation20_spill] sm:$0xff]  ;;  %v2696_v26 = vmax.f32 %v10525_v23, %v2592_v42  ;;  %v10541_v42 = vld [vmem:[#allocation9_spill] sm:$0xff]  ;;  %v10549_v23 = vld [vmem:[#allocation47_spill] sm:$0xff] }
 0x329   : > { %v8438_v36 = vpop.f32.mrf.mxu1  ;;  %2796 = vmatpush1.msra.mxu0 %v2710_v59  ;;  %2993 = vmatpush1.msra.mxu1 %v2710_v59  ;;  %v8465_v56 = vpop.f32.mrf.mxu0  ;;  %v2084_v48 = vadd.f32 %v10517_v35, %v10516_v14  ;;  %v10518_v59 = vld [vmem:[#allocation57_spill] sm:$0xff]  ;;  %v10540_v17 = vld [vmem:[#allocation8_spill] sm:$0xff] }
 0x32a   : > { %2797 = vmatprep.subr.mxu0 %v2709_v57  ;;  %2994 = vmatprep.subr.mxu1 %v2709_v57  ;;  %v2588_v52 = vadd.f32 %v10519_v7, %v10518_v59  ;;  %v2699_v57 = vmax.f32 %v2090_v51, %v2600_v30  ;;  %v10532_v30 = vld [vmem:[#allocation48_spill] sm:$0xff]  ;;  %v10537_v51 = vld [vmem:[#allocation45_spill] sm:$0xff]  ;;  %v2054_v55 = vadd.f32 %v10541_v42, %v10540_v17  ;;  %v10543_v59 = vld [vmem:[#allocation42_spill] sm:$0xff] }
 0x32b   : > { %2798 = vmatpush1.msra.mxu0 %v2708_v25  ;;  %2995 = vmatpush1.msra.mxu1 %v2708_v25  ;;  %v8456_v2 = vpop.f32.mrf.mxu1  ;;  %v2698_v25 = vmax.f32 %v10520_v19, %v2598_v12  ;;  %v2486_v10 = vpop.f32.mrf.mxu0  ;;  %v2697_v15 = vmax.f32 %v2084_v48, %v2594_v1  ;;  %v2564_v9 = vadd.f32 %v10538_v46, %v10537_v51  ;;  %v10542_v48 = vld [vmem:[#allocation53_spill] sm:$0xff]  ;;  %v10544_v7 = vld [vmem:[#allocation44_spill] sm:$0xff]  ;;  %v2930_v51 = vld [vmem:[%s10127_s6 + $0x20] sm:$0xff] }
 0x32c   : > { %2799 = vmatprep.subr.mxu0 %v2707_v32  ;;  %2996 = vmatprep.subr.mxu1 %v2707_v32  ;;  %v10522_v32 = vld [vmem:[#allocation17_spill] sm:$0xff]  ;;  %v2735_v46 = vld [vmem:[%s10126_s5 + $0x38] sm:$0xff]  ;;  %v2935_v17 = vld [vmem:[%s10127_s6 + $0x48] sm:$0xff] }
 0x32d   : > { %2800 = vmatpush1.msra.mxu0 %v2706_v29  ;;  %2997 = vmatpush1.msra.mxu1 %v2706_v29  ;;  %v2677_v54 = vpop.f32.mrf.mxu1  ;;  %v2078_v24 = vadd.f32 %v10522_v32, %v10521_v49  ;;  %v10523_v29 = vld [vmem:[#allocation54_spill] sm:$0xff]  ;;  %v2490_v63 = vpop.f32.mrf.mxu0  ;;  %v10546_v32 = vld [vmem:[#allocation39_spill] sm:$0xff] }
 0x32e   : > { %2801 = vmatprep.subr.mxu0 %v2705_v41  ;;  %2998 = vmatprep.subr.mxu1 %v2705_v41  ;;  %v2582_v61 = vadd.f32 %v10524_v37, %v10523_v29  ;;  %v10526_v41 = vld [vmem:[#allocation11_spill] sm:$0xff]  ;;  %v2678_v19 = vadd.f32 %v2677_v54, %v2486_v10  ;;  %v10545_v49 = vld [vmem:[#allocation50_spill] sm:$0xff]  ;;  %v2672_v37 = vadd.f32 %v8438_v36, %v8447_v0  ;;  %v10552_v0 = vld [vmem:[#allocation40_spill] sm:$0xff] }
 0x32f   : > { %2802 = vmatpush1.msra.mxu0 %v2704_v47  ;;  %2999 = vmatpush1.msra.mxu1 %v2704_v47  ;;  %v2681_v39 = vpop.f32.mrf.mxu1  ;;  %v2072_v43 = vadd.f32 %v10527_v58, %v10526_v41  ;;  %v2576_v47 = vadd.f32 %v10529_v3, %v10528_v22  ;;  %v2695_v5 = vmax.f32 %v2078_v24, %v2588_v52  ;;  %v10547_v24 = vld [vmem:[#allocation41_spill] sm:$0xff]  ;;  %v10548_v10 = vld [vmem:[#allocation43_spill] sm:$0xff] }
 0x330   : > { %2803 = vmatprep.subr.mxu0 %v2703_v33  ;;  %3000 = vmatprep.subr.mxu1 %v2703_v33  ;;  %v10533_v33 = vld [vmem:[#allocation49_spill] sm:$0xff]  ;;  %v2682_v35 = vadd.f32 %v2681_v39, %v2490_v63  ;;  %v2174_v52 = vadd.f32 %v10544_v7, %v10543_v59  ;;  %v2168_v29 = vadd.f32 %v10547_v24, %v10546_v32  ;;  %v10554_v58 = vld [vmem:[#allocation35_spill] sm:$0xff]  ;;  %v2741_v59 = vld [vmem:[%s10126_s5 + $0x68] sm:$0xff] }
 0x331   : > { %2804 = vmatpush1.msra.mxu0 %v2702_v31  ;;  %3001 = vmatpush1.msra.mxu1 %v2702_v31  ;;  %v2570_v40 = vadd.f32 %v10533_v33, %v10532_v30  ;;  %v2693_v16 = vmax.f32 %v2072_v43, %v2582_v61  ;;  %v2683_v12 = vpop.f32.mrf.mxu1  ;;  %v10535_v31 = vld [vmem:[#allocation13_spill] sm:$0xff]  ;;  %v2691_v1 = vmax.f32 %v2066_v50, %v2576_v47  ;;  %v2926_v33 = vld [vmem:[%s10127_s6] sm:$0xff]  ;;  %v2939_v7 = vld [vmem:[%s10127_s6 + $0x68] sm:$0xff] }
 0x332   : > { %2805 = vmatprep.subr.mxu0 %v2701_v21  ;;  %3002 = vmatprep.subr.mxu1 %v2701_v21  ;;  %v2060_v27 = vadd.f32 %v10536_v60, %v10535_v31  ;;  %v2492_v21 = vpop.f32.mrf.mxu0  ;;  %v2670_v54 = vadd.f32 %v8429_v8, %v8427_v18  ;;  %v2666_v39 = vadd.f32 %v8420_v4, %v8415_v13  ;;  %v10553_v8 = vld [vmem:[#allocation33_spill] sm:$0xff]  ;;  %v10555_v13 = vld [vmem:[#allocation72_spill] sm:$0xff]  ;;  %v2736_v42 = vld [vmem:[%s10126_s5 + $0x40] sm:$0xff] }
 0x333   : > { %2806 = vmatpush1.msra.mxu0 %v2700_v38  ;;  %3003 = vmatpush1.msra.mxu1 %v2700_v38  ;;  %v2684_v14 = vadd.f32 %v2683_v12, %v2492_v21  ;;  %v2725_v41 = vmax.f32 %v2168_v29, %v2678_v19  ;;  %v2664_v36 = vadd.f32 %v8413_v11, %v8408_v28  ;;  %v10556_v47 = vld [vmem:[#allocation37_spill] sm:$0xff]  ;;  %v10557_v28 = vld [vmem:[#allocation30_spill] sm:$0xff]  ;;  %v10558_v11 = vld [vmem:[#allocation32_spill] sm:$0xff] }
 0x334   : > { %2807 = vmatprep.subr.mxu0 %v2699_v57  ;;  %3004 = vmatprep.subr.mxu1 %v2699_v57  ;;  %v2689_v38 = vmax.f32 %v2060_v27, %v2570_v40  ;;  %v2687_v57 = vmax.f32 %v2054_v55, %v2564_v9  ;;  %v2156_v43 = vadd.f32 %v10554_v58, %v10553_v8  ;;  %v2731_v40 = vld [vmem:[%s10126_s5 + $0x18] sm:$0xff]  ;;  %v2730_v12 = vld [vmem:[%s10126_s5 + $0x10] sm:$0xff]  ;;  %v2733_v31 = vld [vmem:[%s10126_s5 + $0x28] sm:$0xff]  ;;  %v10561_v8 = vmov 0.0  }
 0x335   : > { %2808 = vmatpush1.msra.mxu0 %v2698_v25  ;;  %3005 = vmatpush1.msra.mxu1 %v2698_v25  ;;  %v2676_v25 = vadd.f32 %v8456_v2, %v8465_v56  ;;  %v2727_v61 = vmax.f32 %v2174_v52, %v2684_v14  ;;  %v10550_v2 = vld [vmem:[#allocation36_spill] sm:$0xff]  ;;  %v10551_v56 = vld [vmem:[#allocation38_spill] sm:$0xff]  ;;  %v2660_v22 = vadd.f32 %v8406_v45, %v8401_v62  ;;  %v10560_v45 = vld [vmem:[#allocation31_spill] sm:$0xff] }
 0x336   : > { %2809 = vmatprep.subr.mxu0 %v2697_v15  ;;  %3006 = vmatprep.subr.mxu1 %v2697_v15  ;;  %v2726_v15 = vmax.f32 %v10548_v10, %v2682_v35  ;;  %v2658_v4 = vadd.f32 %v8399_v53, %v10555_v13  ;;  %v2150_v63 = vadd.f32 %v10558_v11, %v10557_v28  ;;  %v2728_v53 = vld [vmem:[%s10126_s5] sm:$0xff]  ;;  %v2931_v60 = vld [vmem:[%s10127_s6 + $0x28] sm:$0xff]  ;;  %v2933_v9 = vld [vmem:[%s10127_s6 + $0x38] sm:$0xff] }
 0x337   : > { %2810 = vmatpush1.msra.mxu0 %v2696_v26  ;;  %3007 = vmatpush1.msra.mxu1 %v2696_v26  ;;  %v2162_v26 = vadd.f32 %v10551_v56, %v10550_v2  ;;  %v2724_v18 = vmax.f32 %v10552_v0, %v2676_v25  ;;  %v2721_v44 = vmax.f32 %v2156_v43, %v2666_v39  ;;  %v2732_v27 = vld [vmem:[%s10126_s5 + $0x20] sm:$0xff]  ;;  %v2932_v21 = vld [vmem:[%s10127_s6 + $0x30] sm:$0xff]  ;;  %v2937_v14 = vld [vmem:[%s10127_s6 + $0x58] sm:$0xff] }
 0x338   : > { %2811 = vmatprep.subr.mxu0 %v2695_v5  ;;  %3008 = vmatprep.subr.mxu1 %v2695_v5  ;;  %v2722_v5 = vmax.f32 %v10556_v47, %v2670_v54  ;;  %v2720_v50 = vmax.f32 %v10559_v20, %v2664_v36  ;;  %v2719_v62 = vmax.f32 %v2150_v63, %v2660_v22  ;;  %v2934_v55 = vld [vmem:[%s10127_s6 + $0x40] sm:$0xff]  ;;  %v2738_v35 = vld [vmem:[%s10126_s5 + $0x50] sm:$0xff]  ;;  %v2743_v19 = vld [vmem:[%s10126_s5 + $0x78] sm:$0xff] }
 0x339   : > { %2812 = vmatpush1.msra.mxu0 %v10534_v6  ;;  %3009 = vmatpush1.msra.mxu1 %v10534_v6  ;;  %v2723_v3 = vmax.f32 %v2162_v26, %v2672_v37  ;;  %v2718_v30 = vmax.f32 %v10560_v45, %v2658_v4  ;;  %v2928_v6 = vld [vmem:[%s10127_s6 + $0x10] sm:$0xff]  ;;  %v2740_v52 = vld [vmem:[%s10126_s5 + $0x60] sm:$0xff]  ;;  %v2941_v25 = vld [vmem:[%s10127_s6 + $0x78] sm:$0xff] }
 0x33a   : > { %2813 = vmatprep.subr.mxu0 %v2693_v16  ;;  %3010 = vmatprep.subr.mxu1 %v2693_v16  ;;  %v2929_v16 = vld [vmem:[%s10127_s6 + $0x18] sm:$0xff]  ;;  %v2940_v32 = vld [vmem:[%s10127_s6 + $0x70] sm:$0xff]  ;;  %v2745_v24 = vld [vmem:[%s10126_s5 + $0x88] sm:$0xff] }
 0x33b   : > { %2814 = vmatpush1.msra.mxu0 %v10539_v34  ;;  %3011 = vmatpush1.msra.mxu1 %v10539_v34  ;;  %v2737_v34 = vld [vmem:[%s10126_s5 + $0x48] sm:$0xff]  ;;  %v2744_v37 = vld [vmem:[%s10126_s5 + $0x80] sm:$0xff]  ;;  %v2747_v54 = vld [vmem:[%s10126_s5 + $0x98] sm:$0xff] }
 0x33c   : > { %2815 = vmatprep.subr.mxu0 %v2691_v1  ;;  %3012 = vmatprep.subr.mxu1 %v2691_v1  ;;  %v2734_v1 = vld [vmem:[%s10126_s5 + $0x30] sm:$0xff]  ;;  %v2943_v29 = vld [vmem:[%s10127_s6 + $0x88] sm:$0xff]  ;;  %v2945_v10 = vld [vmem:[%s10127_s6 + $0x98] sm:$0xff] }
 0x33d   : > { %2816 = vmatpush1.msra.mxu0 %v10542_v48  ;;  %3013 = vmatpush1.msra.mxu1 %v10542_v48  ;;  %v2936_v48 = vld [vmem:[%s10127_s6 + $0x50] sm:$0xff]  ;;  %v2749_v2 = vld [vmem:[%s10126_s5 + $0xa8] sm:$0xff]  ;;  %v2748_v26 = vld [vmem:[%s10126_s5 + $0xa0] sm:$0xff] }
 0x33e   : > { %2817 = vmatprep.subr.mxu0 %v2689_v38  ;;  %3014 = vmatprep.subr.mxu1 %v2689_v38  ;;  %v2739_v38 = vld [vmem:[%s10126_s5 + $0x58] sm:$0xff]  ;;  %v2947_v56 = vld [vmem:[%s10127_s6 + $0xa8] sm:$0xff]  ;;  %v2946_v39 = vld [vmem:[%s10127_s6 + $0xa0] sm:$0xff] }
 0x33f   : > { %2818 = vmatpush1.msra.mxu0 %v10545_v49  ;;  %3015 = vmatpush1.msra.mxu1 %v10545_v49  ;;  %v2742_v49 = vld [vmem:[%s10126_s5 + $0x70] sm:$0xff]  ;;  %v2949_v36 = vld [vmem:[%s10127_s6 + $0xb8] sm:$0xff] }
 0x340   : > { %2819 = vmatprep.subr.mxu0 %v2687_v57  ;;  %3016 = vmatprep.subr.mxu1 %v2687_v57  ;;  %v2938_v57 = vld [vmem:[%s10127_s6 + $0x60] sm:$0xff]  ;;  %v2750_v0 = vld [vmem:[%s10126_s5 + $0xb0] sm:$0xff] }
 0x341   : > { %2820 = vmatpush1.msra.mxu0 %v10549_v23  ;;  %3017 = vmatpush1.msra.mxu1 %v10549_v23  ;;  %v2944_v23 = vld [vmem:[%s10127_s6 + $0x90] sm:$0xff] }
 0x342   : > { %2843 = vmatprep.subr.mxu0 %v2727_v61  ;;  %3040 = vmatprep.subr.mxu1 %v2727_v61  ;;  %v2942_v61 = vld [vmem:[%s10127_s6 + $0x80] sm:$0xff] }
 0x343   : > { %2844 = vmatpush2.msra.mxu0 %v2726_v15  ;;  %3041 = vmatpush2.msra.mxu1 %v2726_v15  ;;  %v2746_v15 = vld [vmem:[%s10126_s5 + $0x90] sm:$0xff] }
 0x344   : > { %2845 = vmatprep.subr.mxu0 %v2725_v41  ;;  %3042 = vmatprep.subr.mxu1 %v2725_v41  ;;  %v2751_v41 = vld [vmem:[%s10126_s5 + $0xb8] sm:$0xff] }
 0x345   : > { %2846 = vmatpush2.msra.mxu0 %v2724_v18  ;;  %3043 = vmatpush2.msra.mxu1 %v2724_v18  ;;  %v2948_v18 = vld [vmem:[%s10127_s6 + $0xb0] sm:$0xff] }
 0x346   : > { %2847 = vmatprep.subr.mxu0 %v2723_v3  ;;  %3044 = vmatprep.subr.mxu1 %v2723_v3 }
 0x347   : > { %2848 = vmatpush2.msra.mxu0 %v2722_v5  ;;  %3045 = vmatpush2.msra.mxu1 %v2722_v5 }
 0x348   : > { %2849 = vmatprep.subr.mxu0 %v2721_v44  ;;  %3046 = vmatprep.subr.mxu1 %v2721_v44 }
 0x349   : > { %2850 = vmatpush2.msra.mxu0 %v2720_v50  ;;  %3047 = vmatpush2.msra.mxu1 %v2720_v50 }
 0x34a   : > { %2851 = vmatprep.subr.mxu0 %v2719_v62  ;;  %3048 = vmatprep.subr.mxu1 %v2719_v62 }
 0x34b   : > { %2852 = vmatpush2.msra.mxu0 %v2718_v30  ;;  %3049 = vmatpush2.msra.mxu1 %v2718_v30 }
 0x34c   : > { %2854 = vmatmul.mubr.f32.vlgmr.msra.gmra.mxu0 %v2728_v53  ;;  %3051 = vmatmul.mubr.f32.vlgmr.msra.gmra.mxu1 %v2926_v33 }
 0x34d   : > { %5855 = vmatprep.mubr.msk.f32.mxu0 %vm2752_vm5, %v2731_v40  ;;  %5867 = vmatprep.mubr.msk.f32.mxu1 %vm2752_vm5, %v2929_v16 }
 0x350   : > { %2860 = vmatmul.mubr.f32.gmra.mxu0 %v2730_v12  ;;  %3057 = vmatmul.mubr.f32.gmra.mxu1 %v2928_v6 }
 0x351   : > { %5856 = vmatprep.mubr.msk.f32.mxu0 %vm2752_vm5, %v2733_v31  ;;  %5868 = vmatprep.mubr.msk.f32.mxu1 %vm2752_vm5, %v2931_v60 }
 0x354   : > { %2866 = vmatmul.mubr.f32.gmra.mxu0 %v2732_v27  ;;  %3063 = vmatmul.mubr.f32.gmra.mxu1 %v2930_v51 }
 0x355   : > { %5857 = vmatprep.mubr.msk.f32.mxu0 %vm2752_vm5, %v2735_v46  ;;  %5869 = vmatprep.mubr.msk.f32.mxu1 %vm2752_vm5, %v2933_v9 }
 0x358   : > { %2872 = vmatmul.mubr.f32.gmra.mxu0 %v2734_v1  ;;  %3069 = vmatmul.mubr.f32.gmra.mxu1 %v2932_v21 }
 0x359   : > { %5858 = vmatprep.mubr.msk.f32.mxu0 %vm2752_vm5, %v2737_v34  ;;  %5870 = vmatprep.mubr.msk.f32.mxu1 %vm2752_vm5, %v2935_v17 }
 0x35c   : > { %2878 = vmatmul.mubr.f32.gmra.mxu0 %v2736_v42  ;;  %3075 = vmatmul.mubr.f32.gmra.mxu1 %v2934_v55 }
 0x35d   : > { %5859 = vmatprep.mubr.msk.f32.mxu0 %vm2752_vm5, %v2739_v38  ;;  %5871 = vmatprep.mubr.msk.f32.mxu1 %vm2752_vm5, %v2937_v14 }
 0x360   : > { %2884 = vmatmul.mubr.f32.gmra.mxu0 %v2738_v35  ;;  %3081 = vmatmul.mubr.f32.gmra.mxu1 %v2936_v48 }
 0x361   : > { %5860 = vmatprep.mubr.msk.f32.mxu0 %vm2752_vm5, %v2741_v59  ;;  %5872 = vmatprep.mubr.msk.f32.mxu1 %vm2752_vm5, %v2939_v7 }
 0x364   : > { %2890 = vmatmul.mubr.f32.gmra.mxu0 %v2740_v52  ;;  %3087 = vmatmul.mubr.f32.gmra.mxu1 %v2938_v57 }
 0x365   : > { %5861 = vmatprep.mubr.msk.f32.mxu0 %vm2752_vm5, %v2743_v19  ;;  %5873 = vmatprep.mubr.msk.f32.mxu1 %vm2752_vm5, %v2941_v25 }
 0x368   : > { %2896 = vmatmul.mubr.f32.gmra.mxu0 %v2742_v49  ;;  %3093 = vmatmul.mubr.f32.gmra.mxu1 %v2940_v32 }
 0x369   : > { %5862 = vmatprep.mubr.msk.f32.mxu0 %vm2752_vm5, %v2745_v24  ;;  %5874 = vmatprep.mubr.msk.f32.mxu1 %vm2752_vm5, %v2943_v29 }
 0x36c   : > { %2902 = vmatmul.mubr.f32.gmra.mxu0 %v2744_v37  ;;  %3099 = vmatmul.mubr.f32.gmra.mxu1 %v2942_v61 }
 0x36d   : > { %5863 = vmatprep.mubr.msk.f32.mxu0 %vm2752_vm5, %v2747_v54  ;;  %5875 = vmatprep.mubr.msk.f32.mxu1 %vm2752_vm5, %v2945_v10 }
 0x370   : > { %2908 = vmatmul.mubr.f32.gmra.mxu0 %v2746_v15  ;;  %3105 = vmatmul.mubr.f32.gmra.mxu1 %v2944_v23 }
 0x371   : > { %5864 = vmatprep.mubr.msk.f32.mxu0 %vm2752_vm5, %v2749_v2  ;;  %5876 = vmatprep.mubr.msk.f32.mxu1 %vm2752_vm5, %v2947_v56 }
 0x374   : > { %2914 = vmatmul.mubr.f32.gmra.mxu0 %v2748_v26  ;;  %3111 = vmatmul.mubr.f32.gmra.mxu1 %v2946_v39 }
 0x375   : > { %5865 = vmatprep.mubr.msk.f32.mxu0 %vm2752_vm5, %v2751_v41  ;;  %5877 = vmatprep.mubr.msk.f32.mxu1 %vm2752_vm5, %v2949_v36 }
 0x378   : > { %2920 = vmatmul.mubr.f32.gmra.mxu0 %v2750_v0  ;;  %3117 = vmatmul.mubr.f32.gmra.mxu1 %v2948_v18 }
 0x379   : > { %4017 = vmatprep.mubr.f32.mxu1 %v10561_v8 }
 0x40c   : > { %v2855_v58 = vpop.f32.mrf.mxu0  ;;  %v3052_v43 = vpop.f32.mrf.mxu1 }
 0x40d   : > { %v8698_v22 = vmax.f32 %v2855_v58, %v3052_v43 }
 0x40e   : > { %v2857_v3 = vpop.f32.mrf.mxu0  ;;  %v3054_v13 = vpop.f32.mrf.mxu1 }
 0x40f   : > { %v8700_v4 = vmax.f32 %v2857_v3, %v3054_v13 }
 0x410   : > { %v2861_v47 = vpop.f32.mrf.mxu0  ;;  %v3058_v5 = vpop.f32.mrf.mxu1 }
 0x411   : > { %v8702_v28 = vmax.f32 %v2861_v47, %v3058_v5 }
 0x412   : > { %v2863_v11 = vpop.f32.mrf.mxu0  ;;  %v3060_v63 = vpop.f32.mrf.mxu1 }
 0x413   : > { %v8704_v44 = vmax.f32 %v2863_v11, %v3060_v63 }
 0x414   : > { %v2867_v20 = vpop.f32.mrf.mxu0  ;;  %v3064_v50 = vpop.f32.mrf.mxu1 }
 0x415   : > { %v8706_v62 = vmax.f32 %v2867_v20, %v3064_v50  ;;  %v3575_v50 = vld [vmem:[%s10129_s8 + $0x18] sm:$0xff] }
 0x416   : > { %v2869_v45 = vpop.f32.mrf.mxu0  ;;  %v3066_v30 = vpop.f32.mrf.mxu1 }
 0x417   : > { %v8708_v53 = vmax.f32 %v2869_v45, %v3066_v30  ;;  %3179 = vrot.lane.b32.xlu0 %v8706_v62, %s6233_s25  ;;  %v3577_v45 = vld [vmem:[%s10129_s8 + $0x28] sm:$0xff]  ;;  %v3578_v30 = vld [vmem:[%s10129_s8 + $0x30] sm:$0xff] }
 0x418   : > { %v2873_v33 = vpop.f32.mrf.mxu0  ;;  %v3070_v40 = vpop.f32.mrf.mxu1 }
 0x419   : > { %v8712_v16 = vmax.f32 %v2873_v33, %v3070_v40  ;;  %3181 = vrot.lane.b32.xlu1 %v8708_v53, %s6233_s25  ;;  %v3580_v33 = vld [vmem:[%s10129_s8 + $0x40] sm:$0xff]  ;;  %v3581_v40 = vld [vmem:[%s10129_s8 + $0x48] sm:$0xff] }
 0x41a   : > { %v2875_v12 = vpop.f32.mrf.mxu0  ;;  %v3072_v6 = vpop.f32.mrf.mxu1 }
 0x41b   : > { %v8716_v31 = vmax.f32 %v2875_v12, %v3072_v6  ;;  %3183 = vrot.lane.b32.xlu0 %v8712_v16, %s6233_s25  ;;  %v3583_v6 = vld [vmem:[%s10129_s8 + $0x58] sm:$0xff] }
 0x41c   : > { %v2879_v60 = vpop.f32.mrf.mxu0  ;;  %v3076_v27 = vpop.f32.mrf.mxu1 }
 0x41d   : > { %v8720_v51 = vmax.f32 %v2879_v60, %v3076_v27  ;;  %3185 = vrot.lane.b32.xlu1 %v8716_v31, %s6233_s25  ;;  %3762 = vmatprep.subr.mxu0 %v8716_v31  ;;  %v3584_v27 = vld [vmem:[%s10129_s8 + $0x60] sm:$0xff] }
 0x41e   : > { %v2881_v46 = vpop.f32.mrf.mxu0  ;;  %v3078_v9 = vpop.f32.mrf.mxu1  ;;  %3763 = vmatpush1.msra.mxu0 %v8712_v16 }
 0x41f   : > { %v8726_v1 = vmax.f32 %v2881_v46, %v3078_v9  ;;  %3187 = vrot.lane.b32.xlu0 %v8720_v51, %s6233_s25  ;;  %3764 = vmatprep.subr.mxu0 %v8708_v53  ;;  %v3585_v9 = vld [vmem:[%s10129_s8 + $0x68] sm:$0xff] }
 0x420   : > { %v2885_v21 = vpop.f32.mrf.mxu0  ;;  %v3082_v34 = vpop.f32.mrf.mxu1  ;;  %3765 = vmatpush1.msra.mxu0 %v8706_v62 }
 0x421   : > { %v8732_v17 = vmax.f32 %v2885_v21, %v3082_v34  ;;  %3189 = vrot.lane.b32.xlu1 %v8726_v1, %s6233_s25  ;;  %3766 = vmatprep.subr.mxu0 %v8704_v44 }
 0x422   : > { %v2887_v42 = vpop.f32.mrf.mxu0  ;;  %v3084_v55 = vpop.f32.mrf.mxu1  ;;  %3767 = vmatpush1.msra.mxu0 %v8702_v28 }
 0x423   : > { %v8738_v38 = vmax.f32 %v2887_v42, %v3084_v55  ;;  %3191 = vrot.lane.b32.xlu0 %v8732_v17, %s6233_s25  ;;  %3768 = vmatprep.subr.mxu0 %v8700_v4  ;;  %v3586_v42 = vld [vmem:[%s10129_s8 + $0x70] sm:$0xff] }
 0x424   : > { %v2891_v14 = vpop.f32.mrf.mxu0  ;;  %v3088_v35 = vpop.f32.mrf.mxu1  ;;  %3769 = vmatpush1.msra.mxu0 %v8698_v22 }
 0x425   : > { %v8744_v48 = vmax.f32 %v2891_v14, %v3088_v35  ;;  %3193 = vrot.lane.b32.xlu1 %v8738_v38, %s6233_s25  ;;  %v3587_v14 = vld [vmem:[%s10129_s8 + $0x78] sm:$0xff] }
 0x426   : > { %v2893_v59 = vpop.f32.mrf.mxu0  ;;  %v3090_v7 = vpop.f32.mrf.mxu1 }
 0x427   : > { %v8748_v52 = vmax.f32 %v2893_v59, %v3090_v7  ;;  %3195 = vrot.lane.b32.xlu0 %v8744_v48, %s6233_s25  ;;  %v3588_v7 = vld [vmem:[%s10129_s8 + $0x80] sm:$0xff] }
 0x428   : > { %v2897_v57 = vpop.f32.mrf.mxu0  ;;  %v3094_v19 = vpop.f32.mrf.mxu1 }
 0x429   : > { %v8752_v25 = vmax.f32 %v2897_v57, %v3094_v19  ;;  %3197 = vrot.lane.b32.xlu1 %v8748_v52, %s6233_s25  ;;  %v3589_v19 = vld [vmem:[%s10129_s8 + $0x88] sm:$0xff] }
 0x42a   : > { %v2899_v49 = vpop.f32.mrf.mxu0  ;;  %v3096_v32 = vpop.f32.mrf.mxu1 }
 0x42b   : > { %v8756_v24 = vmax.f32 %v2899_v49, %v3096_v32  ;;  %3199 = vrot.lane.b32.xlu0 %v8752_v25, %s6233_s25 }
 0x42c   : > { %v2903_v29 = vpop.f32.mrf.mxu0  ;;  %v3100_v37 = vpop.f32.mrf.mxu1 }
 0x42d   : > { %v8760_v61 = vmax.f32 %v2903_v29, %v3100_v37  ;;  %3201 = vrot.lane.b32.xlu1 %v8756_v24, %s6233_s25  ;;  %v3590_v29 = vld [vmem:[%s10129_s8 + $0x90] sm:$0xff] }
 0x42e   : > { %v2905_v54 = vpop.f32.mrf.mxu0  ;;  %v3102_v10 = vpop.f32.mrf.mxu1 }
 0x42f   : > { %v8764_v15 = vmax.f32 %v2905_v54, %v3102_v10  ;;  %3203 = vrot.lane.b32.xlu0 %v8760_v61, %s6233_s25  ;;  %v3591_v54 = vld [vmem:[%s10129_s8 + $0x98] sm:$0xff] }
 0x430   : > { %v2909_v23 = vpop.f32.mrf.mxu0  ;;  %v3106_v2 = vpop.f32.mrf.mxu1 }
 0x431   : > { %v8768_v56 = vmax.f32 %v2909_v23, %v3106_v2  ;;  %3205 = vrot.lane.b32.xlu1 %v8764_v15, %s6233_s25  ;;  %v3592_v2 = vld [vmem:[%s10129_s8 + $0xa0] sm:$0xff] }
 0x432   : > { %v2911_v26 = vpop.f32.mrf.mxu0  ;;  %v3108_v39 = vpop.f32.mrf.mxu1 }
 0x433   : > { %v8772_v41 = vmax.f32 %v2911_v26, %v3108_v39  ;;  %3207 = vrot.lane.b32.xlu0 %v8768_v56, %s6233_s25  ;;  %v5531_v39 = vld [vmem:[%s10138_s17 + $0x10] sm:$0xff] }
 0x434   : > { %v2915_v36 = vpop.f32.mrf.mxu0  ;;  %v3112_v0 = vpop.f32.mrf.mxu1 }
 0x435   : > { %v8776_v18 = vmax.f32 %v2915_v36, %v3112_v0  ;;  %3209 = vrot.lane.b32.xlu1 %v8772_v41, %s6233_s25 }
 0x436   : > { %v2917_v58 = vpop.f32.mrf.mxu0  ;;  %v3114_v43 = vpop.f32.mrf.mxu1 }
 0x437   : > { %v8780_v3 = vmax.f32 %v2917_v58, %v3114_v43  ;;  %3211 = vrot.lane.b32.xlu0 %v8776_v18, %s6233_s25  ;;  %v5530_v58 = vld [vmem:[%s10138_s17 + $0x8] sm:$0xff] }
 0x438   : > { %v2921_v13 = vpop.f32.mrf.mxu0  ;;  %v3118_v47 = vpop.f32.mrf.mxu1 }
 0x439   : > { %v8784_v5 = vmax.f32 %v2921_v13, %v3118_v47  ;;  %3213 = vrot.lane.b32.xlu1 %v8780_v3, %s6233_s25  ;;  %v5529_v13 = vld [vmem:[%s10138_s17] sm:$0xff] }
 0x43a   : > { %v2923_v11 = vpop.f32.mrf.mxu0  ;;  %v3120_v63 = vpop.f32.mrf.mxu1 }
 0x43b   : > { %v8788_v20 = vmax.f32 %v2923_v11, %v3120_v63  ;;  %3215 = vrot.lane.b32.xlu0 %v8784_v5, %s6233_s25  ;;  %v5642_v63 = vld [vmem:[%s10140_s19] sm:$0xff] }
 0x43d   : > { %3217 = vrot.lane.b32.xlu1 %v8788_v20, %s6233_s25 }
 0x43f   : > { %3175 = vrot.lane.b32.xlu0 %v8702_v28, %s6233_s25 }
 0x441   : > { %3177 = vrot.lane.b32.xlu1 %v8704_v44, %s6233_s25 }
 0x443   : > { %3171 = vrot.lane.b32.xlu0 %v8698_v22, %s6233_s25 }
 0x445   : > { %3173 = vrot.lane.b32.xlu1 %v8700_v4, %s6233_s25  ;;  %s5955_s25 = sshll.u32 %s10569_s1, 4 }
 0x447   : > { %3347 = vrot.lane.b32.xlu0 %v8756_v24, %s10562_s27 }
 0x449   : > { %3345 = vrot.lane.b32.xlu1 %v8752_v25, %s10562_s27 }
 0x44b   : > { %3343 = vrot.lane.b32.xlu0 %v8748_v52, %s10562_s27 }
 0x44d   : > { %3341 = vrot.lane.b32.xlu1 %v8744_v48, %s10562_s27 }
 0x44f   : > { %3339 = vrot.lane.b32.xlu0 %v8738_v38, %s10562_s27 }
 0x451   : > { %3337 = vrot.lane.b32.xlu1 %v8732_v17, %s10562_s27 }
 0x453   : > { %3335 = vrot.lane.b32.xlu0 %v8726_v1, %s10562_s27 }
 0x455   : > { %3333 = vrot.lane.b32.xlu1 %v8720_v51, %s10562_s27 }
 0x457   : > { %3331 = vrot.lane.b32.xlu0 %v8716_v31, %s10562_s27 }
 0x459   : > { %3329 = vrot.lane.b32.xlu1 %v8712_v16, %s10562_s27  ;;  %v3582_v16 = vld [vmem:[%s10129_s8 + $0x50] sm:$0xff] }
 0x45b   : > { %3327 = vrot.lane.b32.xlu0 %v8708_v53, %s10562_s27  ;;  %v3579_v53 = vld [vmem:[%s10129_s8 + $0x38] sm:$0xff] }
 0x45d   : > { %3325 = vrot.lane.b32.xlu1 %v8706_v62, %s10562_s27  ;;  %v3576_v62 = vld [vmem:[%s10129_s8 + $0x20] sm:$0xff] }
 0x45f   : > { %3323 = vrot.lane.b32.xlu0 %v8704_v44, %s10562_s27  ;;  %v3574_v44 = vld [vmem:[%s10129_s8 + $0x10] sm:$0xff] }
 0x461   : > { %3321 = vrot.lane.b32.xlu1 %v8702_v28, %s10562_s27  ;;  %v3573_v28 = vld [vmem:[%s10129_s8 + $0x8] sm:$0xff] }
 0x463   : > { %3319 = vrot.lane.b32.xlu0 %v8700_v4, %s10562_s27  ;;  %v3438_v4 = vld [vmem:[%s10128_s7 + $0x8] sm:$0xff] }
 0x464   : > { %3826 = vmatprep.mubr.f32.mxu0 %v3438_v4 }
 0x465   : > { %3317 = vrot.lane.b32.xlu1 %v8698_v22, %s10562_s27  ;;  %v3572_v22 = vld [vmem:[%s10129_s8] sm:$0xff] }
 0x467   : > { %3359 = vrot.lane.b32.xlu0 %v8780_v3, %s10562_s27 }
 0x469   : > { %3361 = vrot.lane.b32.xlu1 %v8784_v5, %s10562_s27 }
 0x46b   : > { %3363 = vrot.lane.b32.xlu0 %v8788_v20, %s10562_s27 }
 0x46d   : > { %3357 = vrot.lane.b32.xlu1 %v8776_v18, %s10562_s27 }
 0x46f   : > { %3355 = vrot.lane.b32.xlu0 %v8772_v41, %s10562_s27 }
 0x471   : > { %3353 = vrot.lane.b32.xlu1 %v8768_v56, %s10562_s27 }
 0x473   : > { %3351 = vrot.lane.b32.xlu0 %v8764_v15, %s10562_s27 }
 0x475   : > { %3349 = vrot.lane.b32.xlu1 %v8760_v61, %s10562_s27  ;;  %s680_s27 = scalar_lea.vmem %s10141_s20, %s5955_s25 }
 0x477   : > { %3595 = vperm.xlu0 %6203, %v3572_v22   ;;  %v5643_v22 = vld [vmem:[%s10140_s19 + $0x8] sm:$0x3] }
 0x479   : > { %3600 = vperm.xlu1 %6204, %v3573_v28  }
 0x47b   : > { %3605 = vperm.xlu0 %6203, %v3574_v44  }
 0x47d   : > { %3610 = vperm.xlu1 %6204, %v3575_v50  }
 0x47f   : > { %3615 = vperm.xlu0 %6203, %v3576_v62  }
 0x481   : > { %3620 = vperm.xlu1 %6204, %v3577_v45  }
 0x483   : > { %3625 = vperm.xlu0 %6203, %v3578_v30  }
 0x485   : > { %3630 = vperm.xlu1 %6204, %v3579_v53  }
 0x487   : > { %3635 = vperm.xlu0 %6203, %v3580_v33  }
 0x489   : > { %v3180_v12 = vpop.permute.xlu0 %3179  ;;  %3640 = vperm.xlu1 %6204, %v3581_v40  }
 0x48a   : > { %3261 = vst.msk [vmem:[#allocation3 + $0x20] sm:$0xff] %vm3256_vm6, %v3180_v12 }
 0x48b   : > { %3283 = vst.msk [vmem:[#allocation3 + $0x20] sm:$0xff] %vm3219_vm7, %v10561_v8  ;;  %v3182_v31 = vpop.permute.xlu1 %3181  ;;  %3645 = vperm.xlu0 %6203, %v3582_v16  }
 0x48c   : > { %v8893_v60 = vsel %vm3219_vm7, %v3180_v12, %v3182_v31 }
 0x48d   : > { %v3184_v46 = vpop.permute.xlu0 %3183  ;;  %3650 = vperm.xlu1 %6204, %v3583_v6  }
 0x48e   : > { %3263 = vst.msk [vmem:[#allocation3 + $0x30] sm:$0xff] %vm3256_vm6, %v3184_v46 }
 0x48f   : > { %3284 = vst.msk [vmem:[#allocation3 + $0x30] sm:$0xff] %vm3219_vm7, %v10561_v8  ;;  %v3186_v21 = vpop.permute.xlu1 %3185  ;;  %3655 = vperm.xlu0 %6203, %v3584_v27  }
 0x490   : > { %v8905_v34 = vsel %vm3219_vm7, %v3184_v46, %v3186_v21 }
 0x491   : > { %v3188_v55 = vpop.permute.xlu0 %3187  ;;  %3660 = vperm.xlu1 %6204, %v3585_v9  }
 0x492   : > { %3265 = vst.msk [vmem:[#allocation3 + $0x40] sm:$0xff] %vm3256_vm6, %v3188_v55 }
 0x493   : > { %3285 = vst.msk [vmem:[#allocation3 + $0x40] sm:$0xff] %vm3219_vm7, %v10561_v8  ;;  %v3190_v35 = vpop.permute.xlu1 %3189  ;;  %3665 = vperm.xlu0 %6203, %v3586_v42  }
 0x494   : > { %v8917_v59 = vsel %vm3219_vm7, %v3188_v55, %v3190_v35 }
 0x495   : > { %v3192_v57 = vpop.permute.xlu0 %3191  ;;  %3670 = vperm.xlu1 %6204, %v3587_v14  }
 0x496   : > { %3267 = vst.msk [vmem:[#allocation3 + $0x50] sm:$0xff] %vm3256_vm6, %v3192_v57 }
 0x497   : > { %3286 = vst.msk [vmem:[#allocation3 + $0x50] sm:$0xff] %vm3219_vm7, %v10561_v8  ;;  %v3194_v49 = vpop.permute.xlu1 %3193  ;;  %3675 = vperm.xlu0 %6203, %v3588_v7  }
 0x498   : > { %v8929_v32 = vsel %vm3219_vm7, %v3192_v57, %v3194_v49 }
 0x499   : > { %v3196_v37 = vpop.permute.xlu0 %3195  ;;  %3680 = vperm.xlu1 %6204, %v3589_v19  }
 0x49a   : > { %3269 = vst.msk [vmem:[#allocation3 + $0x60] sm:$0xff] %vm3256_vm6, %v3196_v37 }
 0x49b   : > { %3287 = vst.msk [vmem:[#allocation3 + $0x60] sm:$0xff] %vm3219_vm7, %v10561_v8  ;;  %v3198_v10 = vpop.permute.xlu1 %3197  ;;  %3685 = vperm.xlu0 %6203, %v3590_v29  }
 0x49c   : > { %v8941_v23 = vsel %vm3219_vm7, %v3196_v37, %v3198_v10  ;;  %v3508_v10 = vld [vmem:[#allocation3 + $0x40] sm:$0xff] }
 0x49d   : > { %v3200_v26 = vpop.permute.xlu0 %3199  ;;  %3690 = vperm.xlu1 %6204, %v3591_v54  }
 0x49e   : > { %3271 = vst.msk [vmem:[#allocation3 + $0x70] sm:$0xff] %vm3256_vm6, %v3200_v26  ;;  %v3510_v37 = vld [vmem:[#allocation3 + $0x50] sm:$0xff] }
 0x49f   : > { %3288 = vst.msk [vmem:[#allocation3 + $0x70] sm:$0xff] %vm3219_vm7, %v10561_v8  ;;  %v3202_v36 = vpop.permute.xlu1 %3201  ;;  %3695 = vperm.xlu0 %6203, %v3592_v2  }
 0x4a0   : > { %v3227_v0 = vsel %vm3219_vm7, %v3200_v26, %v3202_v36 }
 0x4a1   : > { %v3204_v43 = vpop.permute.xlu0 %3203  ;;  %5544 = vperm.xlu1 %6204, %v5531_v39   ;;  %v3506_v39 = vld [vmem:[#allocation3 + $0x30] sm:$0xff] }
 0x4a2   : > { %3273 = vst.msk [vmem:[#allocation3 + $0x80] sm:$0xff] %vm3256_vm6, %v3204_v43  ;;  %v3512_v19 = vld [vmem:[#allocation3 + $0x60] sm:$0xff] }
 0x4a3   : > { %3289 = vst.msk [vmem:[#allocation3 + $0x80] sm:$0xff] %vm3219_vm7, %v10561_v8  ;;  %v3206_v47 = vpop.permute.xlu1 %3205  ;;  %5539 = vperm.xlu0 %6203, %v5530_v58  }
 0x4a4   : > { %v3228_v11 = vsel %vm3219_vm7, %v3204_v43, %v3206_v47 }
 0x4a5   : > { %v3208_v4 = vpop.permute.xlu0 %3207  ;;  %5534 = vperm.xlu1 %6204, %v5529_v13  }
 0x4a6   : > { %3275 = vst.msk [vmem:[#allocation3 + $0x90] sm:$0xff] %vm3256_vm6, %v3208_v4  ;;  %v3514_v7 = vld [vmem:[#allocation3 + $0x70] sm:$0xff] }
 0x4a7   : > { %3290 = vst.msk [vmem:[#allocation3 + $0x90] sm:$0xff] %vm3219_vm7, %v10561_v8  ;;  %v3210_v28 = vpop.permute.xlu1 %3209  ;;  %5646 = vperm.xlu0 %6203, %v5642_v63  }
 0x4a8   : > { %v3229_v44 = vsel %vm3219_vm7, %v3208_v4, %v3210_v28 }
 0x4a9   : > { %v3212_v50 = vpop.permute.xlu0 %3211  ;;  %5651 = vperm.xlu1 %6204, %v5643_v22  }
 0x4aa   : > { %3277 = vst.msk [vmem:[#allocation3 + $0xa0] sm:$0xff] %vm3256_vm6, %v3212_v50  ;;  %v3516_v55 = vld [vmem:[#allocation3 + $0x80] sm:$0xff] }
 0x4ab   : > { %3291 = vst.msk [vmem:[#allocation3 + $0xa0] sm:$0xff] %vm3219_vm7, %v10561_v8  ;;  %v3214_v62 = vpop.permute.xlu1 %3213 }
 0x4ac   : > { %v3230_v45 = vsel %vm3219_vm7, %v3212_v50, %v3214_v62 }
 0x4ad   : > { %v3216_v30 = vpop.permute.xlu0 %3215 }
 0x4ae   : > { %3279 = vst.msk [vmem:[#allocation3 + $0xb0] sm:$0xff] %vm3256_vm6, %v3216_v30  ;;  %v3518_v21 = vld [vmem:[#allocation3 + $0x90] sm:$0xff] }
 0x4af   : > { %3292 = vst.msk [vmem:[#allocation3 + $0xb0] sm:$0xff] %vm3219_vm7, %v10561_v8  ;;  %v3218_v53 = vpop.permute.xlu1 %3217 }
 0x4b0   : > { %v3231_v33 = vsel %vm3219_vm7, %v3216_v30, %v3218_v53 }
 0x4b1   : > { %v3176_v40 = vpop.permute.xlu0 %3175  ;;  %3770 = vmatprep.subr.mxu0 %v3231_v33 }
 0x4b2   : > { %3259 = vst.msk [vmem:[#allocation3 + $0x10] sm:$0xff] %vm3256_vm6, %v3176_v40  ;;  %v3520_v27 = vld [vmem:[#allocation3 + $0xa0] sm:$0xff] }
 0x4b3   : > { %3282 = vst.msk [vmem:[#allocation3 + $0x10] sm:$0xff] %vm3219_vm7, %v10561_v8  ;;  %v3178_v16 = vpop.permute.xlu1 %3177 }
 0x4b4   : > { %v3221_v12 = vsel %vm3219_vm7, %v3176_v40, %v3178_v16 }
 0x4b5   : > { %v3172_v6 = vpop.permute.xlu0 %3171 }
 0x4b6   : > { %3257 = vst.msk [vmem:[#allocation3] sm:$0xff] %vm3256_vm6, %v3172_v6  ;;  %v3522_v31 = vld [vmem:[#allocation3 + $0xb0] sm:$0xff] }
 0x4b7   : > { %3281 = vst.msk [vmem:[#allocation3] sm:$0xff] %vm3219_vm7, %v10561_v8  ;;  %v3174_v46 = vpop.permute.xlu1 %3173  ;;  %3771 = vmatpush1.msra.mxu0 %v3522_v31 }
 0x4b8   : > { %v3220_v9 = vsel %vm3219_vm7, %v3172_v6, %v3174_v46  ;;  %3772 = vmatprep.subr.mxu0 %v3230_v45 }
 0x4b9   : > { %v3348_v42 = vpop.permute.xlu0 %3347  ;;  %3773 = vmatpush1.msra.mxu0 %v3520_v27 }
 0x4ba   : > { %3416 = vst.msk [vmem:[#allocation3 + $0x1f8] sm:$0xff] %vm777_vm2, %v3348_v42  ;;  %3774 = vmatprep.subr.mxu0 %v3229_v44  ;;  %v3502_v58 = vld [vmem:[#allocation3 + $0x10] sm:$0xff] }
 0x4bb   : > { %3432 = vst.msk [vmem:[#allocation3 + $0x1f8] sm:$0xff] %vm822_vm3, %v10561_v8  ;;  %v3346_v14 = vpop.permute.xlu1 %3345  ;;  %3775 = vmatpush1.msra.mxu0 %v3518_v21 }
 0x4bc   : > { %v3372_v35 = vsel %vm777_vm2, %v3346_v14, %v3348_v42  ;;  %3776 = vmatprep.subr.mxu0 %v3228_v11 }
 0x4bd   : > { %v3344_v57 = vpop.permute.xlu0 %3343  ;;  %3777 = vmatpush1.msra.mxu0 %v3516_v55 }
 0x4be   : > { %3414 = vst.msk [vmem:[#allocation3 + $0x1e8] sm:$0xff] %vm777_vm2, %v3344_v57  ;;  %3778 = vmatprep.subr.mxu0 %v3227_v0 }
 0x4bf   : > { %3431 = vst.msk [vmem:[#allocation3 + $0x1e8] sm:$0xff] %vm822_vm3, %v10561_v8  ;;  %v3342_v49 = vpop.permute.xlu1 %3341  ;;  %3779 = vmatpush1.msra.mxu0 %v3514_v7 }
 0x4c0   : > { %v3371_v29 = vsel %vm777_vm2, %v3342_v49, %v3344_v57  ;;  %3780 = vmatprep.subr.mxu0 %v8941_v23  ;;  %v3504_v23 = vld [vmem:[#allocation3 + $0x20] sm:$0xff]  ;;  %v4199_v49 = vld [vmem:[%s10130_s9 + $0x68] sm:$0xff] }
 0x4c1   : > { %v3340_v54 = vpop.permute.xlu0 %3339  ;;  %3781 = vmatpush1.msra.mxu0 %v3512_v19  ;;  %v3445_v57 = vld [vmem:[%s10128_s7 + $0x40] sm:$0xff]  ;;  %v3447_v19 = vld [vmem:[%s10128_s7 + $0x50] sm:$0xff] }
 0x4c2   : > { %3412 = vst.msk [vmem:[#allocation3 + $0x1d8] sm:$0xff] %vm777_vm2, %v3340_v54  ;;  %3782 = vmatprep.subr.mxu0 %v8929_v32  ;;  %v3563_v13 = vld [vmem:[#allocation3 + $0x1f8] sm:$0xff] }
 0x4c3   : > { %3430 = vst.msk [vmem:[#allocation3 + $0x1d8] sm:$0xff] %vm822_vm3, %v10561_v8  ;;  %v3338_v2 = vpop.permute.xlu1 %3337  ;;  %3783 = vmatpush1.msra.mxu0 %v3510_v37  ;;  %v3446_v37 = vld [vmem:[%s10128_s7 + $0x48] sm:$0xff] }
 0x4c4   : > { %v3370_v26 = vsel %vm777_vm2, %v3338_v2, %v3340_v54  ;;  %3784 = vmatprep.subr.mxu0 %v8917_v59  ;;  %v3500_v59 = vld [vmem:[#allocation3] sm:$0xff]  ;;  %v3448_v54 = vld [vmem:[%s10128_s7 + $0x58] sm:$0xff] }
 0x4c5   : > { %v3336_v36 = vpop.permute.xlu0 %3335  ;;  %3785 = vmatpush1.msra.mxu0 %v3508_v10  ;;  %v3450_v10 = vld [vmem:[%s10128_s7 + $0x68] sm:$0xff]  ;;  %v4198_v2 = vld [vmem:[%s10130_s9 + $0x60] sm:$0xff] }
 0x4c6   : > { %3410 = vst.msk [vmem:[#allocation3 + $0x1c8] sm:$0xff] %vm777_vm2, %v3336_v36  ;;  %3786 = vmatprep.subr.mxu0 %v8905_v34  ;;  %v3561_v63 = vld [vmem:[#allocation3 + $0x1e8] sm:$0xff] }
 0x4c7   : > { %3429 = vst.msk [vmem:[#allocation3 + $0x1c8] sm:$0xff] %vm822_vm3, %v10561_v8  ;;  %v3334_v32 = vpop.permute.xlu1 %3333  ;;  %3787 = vmatpush1.msra.mxu0 %v3506_v39  ;;  %v3449_v39 = vld [vmem:[%s10128_s7 + $0x60] sm:$0xff] }
 0x4c8   : > { %v3369_v0 = vsel %vm777_vm2, %v3334_v32, %v3336_v36  ;;  %3788 = vmatprep.subr.mxu0 %v8893_v60  ;;  %v3451_v36 = vld [vmem:[%s10128_s7 + $0x70] sm:$0xff]  ;;  %v4197_v32 = vld [vmem:[%s10130_s9 + $0x58] sm:$0xff] }
 0x4c9   : > { %v3332_v43 = vpop.permute.xlu0 %3331  ;;  %3789 = vmatpush1.msra.mxu0 %v3504_v23  ;;  %v3453_v23 = vld [vmem:[%s10128_s7 + $0x80] sm:$0xff] }
 0x4ca   : > { %3408 = vst.msk [vmem:[#allocation3 + $0x1b8] sm:$0xff] %vm777_vm2, %v3332_v43  ;;  %3790 = vmatprep.subr.mxu0 %v3221_v12  ;;  %v3559_v4 = vld [vmem:[#allocation3 + $0x1d8] sm:$0xff] }
 0x4cb   : > { %3428 = vst.msk [vmem:[#allocation3 + $0x1b8] sm:$0xff] %vm822_vm3, %v10561_v8  ;;  %v3330_v34 = vpop.permute.xlu1 %3329  ;;  %3791 = vmatpush1.msra.mxu0 %v3502_v58  ;;  %v3452_v58 = vld [vmem:[%s10128_s7 + $0x78] sm:$0xff] }
 0x4cc   : > { %v3368_v47 = vsel %vm777_vm2, %v3330_v34, %v3332_v43  ;;  %3792 = vmatprep.subr.mxu0 %v3220_v9  ;;  %v3454_v43 = vld [vmem:[%s10128_s7 + $0x88] sm:$0xff]  ;;  %v4196_v34 = vld [vmem:[%s10130_s9 + $0x50] sm:$0xff] }
 0x4cd   : > { %v3328_v11 = vpop.permute.xlu0 %3327  ;;  %3793 = vmatpush1.msra.mxu0 %v3500_v59  ;;  %v3456_v59 = vld [vmem:[%s10128_s7 + $0x98] sm:$0xff] }
 0x4ce   : > { %3406 = vst.msk [vmem:[#allocation3 + $0x1a8] sm:$0xff] %vm777_vm2, %v3328_v11  ;;  %3794 = vmatprep.subr.mxu0 %v3563_v13  ;;  %v3557_v44 = vld [vmem:[#allocation3 + $0x1c8] sm:$0xff]  ;;  %v4398_v13 = vld [vmem:[%s10131_s10 + $0x50] sm:$0xff] }
 0x4cf   : > { %3427 = vst.msk [vmem:[#allocation3 + $0x1a8] sm:$0xff] %vm822_vm3, %v10561_v8  ;;  %v3326_v60 = vpop.permute.xlu1 %3325  ;;  %3795 = vmatpush2.msra.mxu0 %v3372_v35 }
 0x4d0   : > { %v3367_v22 = vsel %vm777_vm2, %v3326_v60, %v3328_v11  ;;  %3796 = vmatprep.subr.mxu0 %v3561_v63  ;;  %v3457_v11 = vld [vmem:[%s10128_s7 + $0xa0] sm:$0xff]  ;;  %v3459_v63 = vld [vmem:[%s10128_s7 + $0xb0] sm:$0xff]  ;;  %v4195_v60 = vld [vmem:[%s10130_s9 + $0x48] sm:$0xff] }
 0x4d1   : > { %v3324_v28 = vpop.permute.xlu0 %3323  ;;  %3797 = vmatpush2.msra.mxu0 %v3371_v29  ;;  %v4401_v29 = vld [vmem:[%s10131_s10 + $0x68] sm:$0xff] }
 0x4d2   : > { %3404 = vst.msk [vmem:[#allocation3 + $0x198] sm:$0xff] %vm777_vm2, %v3324_v28  ;;  %3798 = vmatprep.subr.mxu0 %v3559_v4  ;;  %v3555_v62 = vld [vmem:[#allocation3 + $0x1b8] sm:$0xff]  ;;  %v4397_v4 = vld [vmem:[%s10131_s10 + $0x48] sm:$0xff] }
 0x4d3   : > { %3426 = vst.msk [vmem:[#allocation3 + $0x198] sm:$0xff] %vm822_vm3, %v10561_v8  ;;  %v3322_v50 = vpop.permute.xlu1 %3321  ;;  %3799 = vmatpush2.msra.mxu0 %v3370_v26  ;;  %v4400_v26 = vld [vmem:[%s10131_s10 + $0x60] sm:$0xff] }
 0x4d4   : > { %v3366_v45 = vsel %vm777_vm2, %v3322_v50, %v3324_v28  ;;  %3800 = vmatprep.subr.mxu0 %v3557_v44  ;;  %v3460_v28 = vld [vmem:[%s10128_s7 + $0xb8] sm:$0xff]  ;;  %v3462_v44 = vld [vmem:[%s10128_s7 + $0xc8] sm:$0xff]  ;;  %v4194_v50 = vld [vmem:[%s10130_s9 + $0x40] sm:$0xff] }
 0x4d5   : > { %v3320_v30 = vpop.permute.xlu0 %3319  ;;  %3801 = vmatpush2.msra.mxu0 %v3369_v0  ;;  %v4399_v0 = vld [vmem:[%s10131_s10 + $0x58] sm:$0xff] }
 0x4d6   : > { %3402 = vst.msk [vmem:[#allocation3 + $0x188] sm:$0xff] %vm777_vm2, %v3320_v30  ;;  %3802 = vmatprep.subr.mxu0 %v3555_v62  ;;  %v3553_v53 = vld [vmem:[#allocation3 + $0x1a8] sm:$0xff]  ;;  %v4396_v62 = vld [vmem:[%s10131_s10 + $0x40] sm:$0xff] }
 0x4d7   : > { %3425 = vst.msk [vmem:[#allocation3 + $0x188] sm:$0xff] %vm822_vm3, %v10561_v8  ;;  %v3318_v33 = vpop.permute.xlu1 %3317  ;;  %3803 = vmatpush2.msra.mxu0 %v3368_v47  ;;  %v3455_v47 = vld [vmem:[%s10128_s7 + $0x90] sm:$0xff] }
 0x4d8   : > { %v3365_v40 = vsel %vm777_vm2, %v3318_v33, %v3320_v30  ;;  %3804 = vmatprep.subr.mxu0 %v3553_v53  ;;  %v3463_v30 = vld [vmem:[%s10128_s7 + $0xd0] sm:$0xff]  ;;  %v3465_v53 = vld [vmem:[%s10128_s7 + $0xe0] sm:$0xff]  ;;  %v4193_v33 = vld [vmem:[%s10130_s9 + $0x38] sm:$0xff] }
 0x4d9   : > { %v3360_v16 = vpop.permute.xlu0 %3359  ;;  %3805 = vmatpush2.msra.mxu0 %v3367_v22  ;;  %v3458_v22 = vld [vmem:[%s10128_s7 + $0xa8] sm:$0xff] }
 0x4da   : > { %3422 = vst.msk [vmem:[#allocation3 + $0x228] sm:$0xff] %vm777_vm2, %v3360_v16  ;;  %v3551_v12 = vld [vmem:[#allocation3 + $0x198] sm:$0xff] }
 0x4db   : > { %3435 = vst.msk [vmem:[#allocation3 + $0x228] sm:$0xff] %vm822_vm3, %v10561_v8  ;;  %v3362_v6 = vpop.permute.xlu1 %3361  ;;  %3806 = vmatprep.subr.mxu0 %v3551_v12  ;;  %v3466_v12 = vld [vmem:[%s10128_s7 + $0xe8] sm:$0xff] }
 0x4dc   : > { %3807 = vmatpush2.msra.mxu0 %v3366_v45  ;;  %v3461_v45 = vld [vmem:[%s10128_s7 + $0xc0] sm:$0xff] }
 0x4dd   : > { %v3364_v31 = vpop.permute.xlu0 %3363 }
 0x4de   : > { %v3376_v27 = vsel %vm777_vm2, %v3362_v6, %v3364_v31  ;;  %3424 = vst.msk [vmem:[#allocation3 + $0x238] sm:$0xff] %vm777_vm2, %v3364_v31  ;;  %v3549_v46 = vld [vmem:[#allocation3 + $0x188] sm:$0xff]  ;;  %v3468_v6 = vld [vmem:[%s10128_s7 + $0xf8] sm:$0xff]  ;;  %v4192_v31 = vld [vmem:[%s10130_s9 + $0x30] sm:$0xff] }
 0x4df   : > { %3436 = vst.msk [vmem:[#allocation3 + $0x238] sm:$0xff] %vm822_vm3, %v10561_v8  ;;  %v3358_v9 = vpop.permute.xlu1 %3357  ;;  %3808 = vmatprep.subr.mxu0 %v3549_v46  ;;  %v3467_v46 = vld [vmem:[%s10128_s7 + $0xf0] sm:$0xff] }
 0x4e0   : > { %v3375_v21 = vsel %vm777_vm2, %v3358_v9, %v3360_v16  ;;  %3809 = vmatpush2.msra.mxu0 %v3365_v40  ;;  %v4395_v40 = vld [vmem:[%s10131_s10 + $0x38] sm:$0xff]  ;;  %v3469_v9 = vld [vmem:[%s10128_s7 + $0x100] sm:$0xff] }
 0x4e1   : > { %v3356_v42 = vpop.permute.xlu0 %3355  ;;  %3810 = vmatprep.subr.mxu0 %v8788_v20  ;;  %v3464_v16 = vld [vmem:[%s10128_s7 + $0xd8] sm:$0xff] }
 0x4e2   : > { %3420 = vst.msk [vmem:[#allocation3 + $0x218] sm:$0xff] %vm777_vm2, %v3356_v42  ;;  %3811 = vmatpush2.msra.mxu0 %v8784_v5  ;;  %v3569_v7 = vld [vmem:[#allocation3 + $0x228] sm:$0xff] }
 0x4e3   : > { %3434 = vst.msk [vmem:[#allocation3 + $0x218] sm:$0xff] %vm822_vm3, %v10561_v8  ;;  %v3354_v55 = vpop.permute.xlu1 %3353  ;;  %3812 = vmatprep.subr.mxu0 %v8780_v3 }
 0x4e4   : > { %v3374_v14 = vsel %vm777_vm2, %v3354_v55, %v3356_v42  ;;  %3813 = vmatpush2.msra.mxu0 %v8776_v18  ;;  %v3443_v18 = vld [vmem:[%s10128_s7 + $0x30] sm:$0xff]  ;;  %v4191_v42 = vld [vmem:[%s10130_s9 + $0x28] sm:$0xff] }
 0x4e5   : > { %v3352_v35 = vpop.permute.xlu0 %3351  ;;  %3814 = vmatprep.subr.mxu0 %v8772_v41  ;;  %v4402_v41 = vld [vmem:[%s10131_s10 + $0x70] sm:$0xff]  ;;  %v4393_v55 = vld [vmem:[%s10131_s10 + $0x28] sm:$0xff] }
 0x4e6   : > { %3418 = vst.msk [vmem:[#allocation3 + $0x208] sm:$0xff] %vm777_vm2, %v3352_v35  ;;  %v3571_v20 = vld [vmem:[#allocation3 + $0x238] sm:$0xff]  ;;  %3815 = vmatpush2.msra.mxu0 %v8768_v56 }
 0x4e7   : > { %3433 = vst.msk [vmem:[#allocation3 + $0x208] sm:$0xff] %vm822_vm3, %v10561_v8  ;;  %3977 = vmatprep.subr.mxu1 %v3571_v20  ;;  %v3350_v5 = vpop.permute.xlu1 %3349  ;;  %3816 = vmatprep.subr.mxu0 %v8764_v15  ;;  %v3474_v20 = vld [vmem:[%s10128_s7 + $0x128] sm:$0xff] }
 0x4e8   : > { %v3373_v3 = vsel %vm777_vm2, %v3350_v5, %v3352_v35  ;;  %3978 = vmatpush1.msra.mxu1 %v3376_v27  ;;  %3817 = vmatpush2.msra.mxu0 %v8760_v61  ;;  %v3437_v61 = vld [vmem:[%s10128_s7] sm:$0xff]  ;;  %v4394_v27 = vld [vmem:[%s10131_s10 + $0x30] sm:$0xff]  ;;  %v3472_v35 = vld [vmem:[%s10128_s7 + $0x118] sm:$0xff] }
 0x4e9   : > { %3979 = vmatprep.subr.mxu1 %v3569_v7  ;;  %3818 = vmatprep.subr.mxu0 %v8756_v24  ;;  %v4200_v24 = vld [vmem:[%s10130_s9 + $0x70] sm:$0xff]  ;;  %v4190_v7 = vld [vmem:[%s10130_s9 + $0x20] sm:$0xff] }
 0x4ea   : > { %3980 = vmatpush1.msra.mxu1 %v3375_v21  ;;  %3819 = vmatpush2.msra.mxu0 %v8752_v25  ;;  %v3567_v56 = vld [vmem:[#allocation3 + $0x218] sm:$0xff]  ;;  %v3439_v25 = vld [vmem:[%s10128_s7 + $0x10] sm:$0xff]  ;;  %v4392_v5 = vld [vmem:[%s10131_s10 + $0x20] sm:$0xff] }
 0x4eb   : > { %3820 = vmatprep.subr.mxu0 %v8748_v52  ;;  %3981 = vmatprep.subr.mxu1 %v3567_v56  ;;  %v3444_v52 = vld [vmem:[%s10128_s7 + $0x38] sm:$0xff]  ;;  %v3471_v21 = vld [vmem:[%s10128_s7 + $0x110] sm:$0xff] }
 0x4ec   : > { %3821 = vmatpush2.msra.mxu0 %v8744_v48  ;;  %3982 = vmatpush1.msra.mxu1 %v3374_v14  ;;  %v3441_v48 = vld [vmem:[%s10128_s7 + $0x20] sm:$0xff]  ;;  %v3470_v14 = vld [vmem:[%s10128_s7 + $0x108] sm:$0xff]  ;;  %v3475_v56 = vld [vmem:[%s10128_s7 + $0x130] sm:$0xff] }
 0x4ed   : > { %3822 = vmatprep.subr.mxu0 %v8738_v38  ;;  %v4403_v38 = vld [vmem:[%s10131_s10 + $0x78] sm:$0xff] }
 0x4ee   : > { %3823 = vmatpush2.msra.mxu0 %v8732_v17  ;;  %v3565_v15 = vld [vmem:[#allocation3 + $0x208] sm:$0xff]  ;;  %v4201_v17 = vld [vmem:[%s10130_s9 + $0x78] sm:$0xff] }
 0x4ef   : > { %3824 = vmatprep.subr.mxu0 %v8726_v1  ;;  %3983 = vmatprep.subr.mxu1 %v3565_v15  ;;  %v3440_v1 = vld [vmem:[%s10128_s7 + $0x18] sm:$0xff]  ;;  %v3477_v15 = vld [vmem:[%s10128_s7 + $0x140] sm:$0xff] }
 0x4f0   : > { %3825 = vmatpush2.msra.mxu0 %v8720_v51  ;;  %3984 = vmatpush1.msra.mxu1 %v3373_v3  ;;  %v3442_v51 = vld [vmem:[%s10128_s7 + $0x28] sm:$0xff]  ;;  %v3473_v3 = vld [vmem:[%s10128_s7 + $0x120] sm:$0xff] }
 0x4f1   : > { %3827 = vmatmul.mubr.f32.vlgmr.msra.gmra.mxu0 %v3437_v61  ;;  %5878 = vmatmul.mubr.msk.f32.vlgmr.msra.gmra.mxu1 %vm3698_vm8, %v3439_v25  ;;  %v4189_v61 = vld [vmem:[%s10130_s9 + $0x18] sm:$0xff] }
 0x4f2   : > { %3832 = vmatprep.mubr.f32.mxu0 %v3441_v48  ;;  %4023 = vmatprep.mubr.f32.mxu1 %v10561_v8  ;;  %v4391_v25 = vld [vmem:[%s10131_s10 + $0x18] sm:$0xff] }
 0x4f3   : > { %4218 = vmatprep.subr.mxu1 %v10561_v8  ;;  %4420 = vmatprep.subr.mxu0 %v10561_v8  ;;  %v3476_v48 = vld [vmem:[%s10128_s7 + $0x138] sm:$0xff] }
 0x4f4   : > { %4219 = vmatpush1.msra.mxu1 %v4201_v17  ;;  %4421 = vmatpush1.msra.mxu0 %v4403_v38  ;;  %v3478_v17 = vld [vmem:[%s10128_s7 + $0x148] sm:$0xff]  ;;  %v3480_v38 = vld [vmem:[%s10128_s7 + $0x158] sm:$0xff] }
 0x4f5   : > { %3833 = vmatmul.mubr.f32.gmra.mxu0 %v3440_v1  ;;  %5879 = vmatmul.mubr.msk.f32.gmra.mxu1 %vm3698_vm8, %v3442_v51  ;;  %v4188_v1 = vld [vmem:[%s10130_s9 + $0x10] sm:$0xff] }
 0x4f6   : > { %3838 = vmatprep.mubr.f32.mxu0 %v3444_v52  ;;  %4029 = vmatprep.mubr.f32.mxu1 %v10561_v8  ;;  %v4390_v51 = vld [vmem:[%s10131_s10 + $0x10] sm:$0xff] }
 0x4f7   : > { %4220 = vmatprep.subr.mxu1 %v10561_v8  ;;  %4422 = vmatprep.subr.mxu0 %v10561_v8  ;;  %v3479_v52 = vld [vmem:[%s10128_s7 + $0x150] sm:$0xff] }
 0x4f8   : > { %4221 = vmatpush1.msra.mxu1 %v4200_v24  ;;  %4423 = vmatpush1.msra.mxu0 %v4402_v41  ;;  %v3481_v24 = vld [vmem:[%s10128_s7 + $0x160] sm:$0xff]  ;;  %v3483_v41 = vld [vmem:[%s10128_s7 + $0x170] sm:$0xff] }
 0x4f9   : > { %3839 = vmatmul.mubr.f32.gmra.mxu0 %v3443_v18  ;;  %5880 = vmatmul.mubr.msk.f32.gmra.mxu1 %vm3698_vm8, %v3445_v57  ;;  %v4187_v18 = vld [vmem:[%s10130_s9 + $0x8] sm:$0xff] }
 0x4fa   : > { %3844 = vmatprep.mubr.f32.mxu0 %v3447_v19  ;;  %4035 = vmatprep.mubr.f32.mxu1 %v10561_v8  ;;  %v4389_v57 = vld [vmem:[%s10131_s10 + $0x8] sm:$0xff] }
 0x4fb   : > { %4222 = vmatprep.subr.mxu1 %v10561_v8  ;;  %4424 = vmatprep.subr.mxu0 %v10561_v8  ;;  %v3482_v19 = vld [vmem:[%s10128_s7 + $0x168] sm:$0xff] }
 0x4fc   : > { %4223 = vmatpush1.msra.mxu1 %v4199_v49  ;;  %4425 = vmatpush1.msra.mxu0 %v4401_v29  ;;  %v3484_v49 = vld [vmem:[%s10128_s7 + $0x178] sm:$0xff]  ;;  %v3486_v29 = vld [vmem:[%s10128_s7 + $0x188] sm:$0xff] }
 0x4fd   : > { %3845 = vmatmul.mubr.f32.gmra.mxu0 %v3446_v37  ;;  %5881 = vmatmul.mubr.msk.f32.gmra.mxu1 %vm3698_vm8, %v3448_v54  ;;  %v4186_v37 = vld [vmem:[%s10130_s9] sm:$0xff] }
 0x4fe   : > { %3850 = vmatprep.mubr.f32.mxu0 %v3450_v10  ;;  %4041 = vmatprep.mubr.f32.mxu1 %v10561_v8  ;;  %v4388_v54 = vld [vmem:[%s10131_s10] sm:$0xff] }
 0x4ff   : > { %4224 = vmatprep.subr.mxu1 %v10561_v8  ;;  %4426 = vmatprep.subr.mxu0 %v10561_v8  ;;  %v3485_v10 = vld [vmem:[%s10128_s7 + $0x180] sm:$0xff] }
 0x500   : > { %4225 = vmatpush1.msra.mxu1 %v4198_v2  ;;  %4427 = vmatpush1.msra.mxu0 %v4400_v26  ;;  %v3487_v2 = vld [vmem:[%s10128_s7 + $0x190] sm:$0xff]  ;;  %v3489_v26 = vld [vmem:[%s10128_s7 + $0x1a0] sm:$0xff] }
 0x501   : > { %3851 = vmatmul.mubr.f32.gmra.mxu0 %v3449_v39  ;;  %5882 = vmatmul.mubr.msk.f32.gmra.mxu1 %vm3698_vm8, %v3451_v36  ;;  %v4217_v39 = vld [vmem:[%s10130_s9 + $0xf8] sm:$0xff] }
 0x502   : > { %3856 = vmatprep.mubr.f32.mxu0 %v3453_v23  ;;  %4047 = vmatprep.mubr.f32.mxu1 %v10561_v8  ;;  %v4419_v36 = vld [vmem:[%s10131_s10 + $0xf8] sm:$0xff] }
 0x503   : > { %4226 = vmatprep.subr.mxu1 %v10561_v8  ;;  %4428 = vmatprep.subr.mxu0 %v10561_v8  ;;  %v3488_v23 = vld [vmem:[%s10128_s7 + $0x198] sm:$0xff] }
 0x504   : > { %4227 = vmatpush1.msra.mxu1 %v4197_v32  ;;  %4429 = vmatpush1.msra.mxu0 %v4399_v0  ;;  %v3490_v32 = vld [vmem:[%s10128_s7 + $0x1a8] sm:$0xff]  ;;  %v3492_v0 = vld [vmem:[%s10128_s7 + $0x1b8] sm:$0xff] }
 0x505   : > { %3857 = vmatmul.mubr.f32.gmra.mxu0 %v3452_v58  ;;  %5883 = vmatmul.mubr.msk.f32.gmra.mxu1 %vm3698_vm8, %v3454_v43  ;;  %v4216_v58 = vld [vmem:[%s10130_s9 + $0xf0] sm:$0xff] }
 0x506   : > { %3862 = vmatprep.mubr.f32.mxu0 %v3456_v59  ;;  %4053 = vmatprep.mubr.f32.mxu1 %v10561_v8  ;;  %v4418_v43 = vld [vmem:[%s10131_s10 + $0xf0] sm:$0xff] }
 0x507   : > { %4228 = vmatprep.subr.mxu1 %v10561_v8  ;;  %4430 = vmatprep.subr.mxu0 %v10561_v8  ;;  %v3491_v59 = vld [vmem:[%s10128_s7 + $0x1b0] sm:$0xff] }
 0x508   : > { %4229 = vmatpush1.msra.mxu1 %v4196_v34  ;;  %4431 = vmatpush1.msra.mxu0 %v4398_v13  ;;  %v3493_v34 = vld [vmem:[%s10128_s7 + $0x1c0] sm:$0xff]  ;;  %v3495_v13 = vld [vmem:[%s10128_s7 + $0x1d0] sm:$0xff] }
 0x509   : > { %3863 = vmatmul.mubr.f32.gmra.mxu0 %v3455_v47  ;;  %5884 = vmatmul.mubr.msk.f32.gmra.mxu1 %vm3698_vm8, %v3457_v11  ;;  %v4215_v47 = vld [vmem:[%s10130_s9 + $0xe8] sm:$0xff] }
 0x50a   : > { %3868 = vmatprep.mubr.f32.mxu0 %v3459_v63  ;;  %4059 = vmatprep.mubr.f32.mxu1 %v10561_v8  ;;  %v4417_v11 = vld [vmem:[%s10131_s10 + $0xe8] sm:$0xff] }
 0x50b   : > { %4230 = vmatprep.subr.mxu1 %v10561_v8  ;;  %4432 = vmatprep.subr.mxu0 %v10561_v8  ;;  %v3494_v63 = vld [vmem:[%s10128_s7 + $0x1c8] sm:$0xff] }
 0x50c   : > { %4231 = vmatpush1.msra.mxu1 %v4195_v60  ;;  %4433 = vmatpush1.msra.mxu0 %v4397_v4  ;;  %v3496_v60 = vld [vmem:[%s10128_s7 + $0x1d8] sm:$0xff]  ;;  %v3498_v4 = vld [vmem:[%s10128_s7 + $0x1e8] sm:$0xff] }
 0x50d   : > { %3869 = vmatmul.mubr.f32.gmra.mxu0 %v3458_v22  ;;  %5885 = vmatmul.mubr.msk.f32.gmra.mxu1 %vm3698_vm8, %v3460_v28  ;;  %v4214_v22 = vld [vmem:[%s10130_s9 + $0xe0] sm:$0xff] }
 0x50e   : > { %3874 = vmatprep.mubr.f32.mxu0 %v3462_v44  ;;  %4065 = vmatprep.mubr.f32.mxu1 %v10561_v8  ;;  %v4416_v28 = vld [vmem:[%s10131_s10 + $0xe0] sm:$0xff] }
 0x50f   : > { %4232 = vmatprep.subr.mxu1 %v10561_v8  ;;  %4434 = vmatprep.subr.mxu0 %v10561_v8  ;;  %v3497_v44 = vld [vmem:[%s10128_s7 + $0x1e0] sm:$0xff] }
 0x510   : > { %4233 = vmatpush1.msra.mxu1 %v4194_v50  ;;  %4435 = vmatpush1.msra.mxu0 %v4396_v62  ;;  %v3499_v50 = vld [vmem:[%s10128_s7 + $0x1f0] sm:$0xff]  ;;  %v4213_v62 = vld [vmem:[%s10130_s9 + $0xd8] sm:$0xff] }
 0x511   : > { %3875 = vmatmul.mubr.f32.gmra.mxu0 %v3461_v45  ;;  %5886 = vmatmul.mubr.msk.f32.gmra.mxu1 %vm3698_vm8, %v3463_v30  ;;  %v4415_v45 = vld [vmem:[%s10131_s10 + $0xd8] sm:$0xff]  ;;  %v4212_v30 = vld [vmem:[%s10130_s9 + $0xd0] sm:$0xff] }
 0x512   : > { %3880 = vmatprep.mubr.f32.mxu0 %v3465_v53  ;;  %4071 = vmatprep.mubr.f32.mxu1 %v10561_v8  ;;  %v4414_v53 = vld [vmem:[%s10131_s10 + $0xd0] sm:$0xff] }
 0x513   : > { %4234 = vmatprep.subr.mxu1 %v10561_v8  ;;  %4436 = vmatprep.subr.mxu0 %v10561_v8 }
 0x514   : > { %4235 = vmatpush1.msra.mxu1 %v4193_v33  ;;  %4437 = vmatpush1.msra.mxu0 %v4395_v40  ;;  %v4211_v33 = vld [vmem:[%s10130_s9 + $0xc8] sm:$0xff] }
 0x515   : > { %3881 = vmatmul.mubr.f32.gmra.mxu0 %v3464_v16  ;;  %5887 = vmatmul.mubr.msk.f32.gmra.mxu1 %vm3698_vm8, %v3466_v12  ;;  %v4413_v40 = vld [vmem:[%s10131_s10 + $0xc8] sm:$0xff]  ;;  %v4210_v16 = vld [vmem:[%s10130_s9 + $0xc0] sm:$0xff] }
 0x516   : > { %3886 = vmatprep.mubr.f32.mxu0 %v3468_v6  ;;  %4077 = vmatprep.mubr.f32.mxu1 %v10561_v8  ;;  %v4412_v12 = vld [vmem:[%s10131_s10 + $0xc0] sm:$0xff]  ;;  %v4209_v6 = vld [vmem:[%s10130_s9 + $0xb8] sm:$0xff] }
 0x517   : > { %4236 = vmatprep.subr.mxu1 %v10561_v8  ;;  %4438 = vmatprep.subr.mxu0 %v10561_v8 }
 0x518   : > { %4237 = vmatpush1.msra.mxu1 %v4192_v31  ;;  %4439 = vmatpush1.msra.mxu0 %v4394_v27  ;;  %v4411_v31 = vld [vmem:[%s10131_s10 + $0xb8] sm:$0xff]  ;;  %v4208_v27 = vld [vmem:[%s10130_s9 + $0xb0] sm:$0xff] }
 0x519   : > { %3887 = vmatmul.mubr.f32.gmra.mxu0 %v3467_v46  ;;  %5888 = vmatmul.mubr.msk.f32.gmra.mxu1 %vm3698_vm8, %v3469_v9  ;;  %v4410_v46 = vld [vmem:[%s10131_s10 + $0xb0] sm:$0xff]  ;;  %v4207_v9 = vld [vmem:[%s10130_s9 + $0xa8] sm:$0xff] }
 0x51a   : > { %3892 = vmatprep.mubr.f32.mxu0 %v3471_v21  ;;  %4083 = vmatprep.mubr.f32.mxu1 %v10561_v8  ;;  %v4409_v21 = vld [vmem:[%s10131_s10 + $0xa8] sm:$0xff] }
 0x51b   : > { %4238 = vmatprep.subr.mxu1 %v10561_v8  ;;  %4440 = vmatprep.subr.mxu0 %v10561_v8 }
 0x51c   : > { %4239 = vmatpush1.msra.mxu1 %v4191_v42  ;;  %4441 = vmatpush1.msra.mxu0 %v4393_v55  ;;  %v4206_v42 = vld [vmem:[%s10130_s9 + $0xa0] sm:$0xff] }
 0x51d   : > { %3893 = vmatmul.mubr.f32.gmra.mxu0 %v3470_v14  ;;  %5889 = vmatmul.mubr.msk.f32.gmra.mxu1 %vm3698_vm8, %v3472_v35  ;;  %v4408_v55 = vld [vmem:[%s10131_s10 + $0xa0] sm:$0xff]  ;;  %v4205_v14 = vld [vmem:[%s10130_s9 + $0x98] sm:$0xff] }
 0x51e   : > { %3898 = vmatprep.mubr.f32.mxu0 %v3474_v20  ;;  %4089 = vmatprep.mubr.f32.mxu1 %v10561_v8  ;;  %v4407_v35 = vld [vmem:[%s10131_s10 + $0x98] sm:$0xff]  ;;  %v4204_v20 = vld [vmem:[%s10130_s9 + $0x90] sm:$0xff] }
 0x51f   : > { %4240 = vmatprep.subr.mxu1 %v10561_v8  ;;  %4442 = vmatprep.subr.mxu0 %v10561_v8 }
 0x520   : > { %4241 = vmatpush1.msra.mxu1 %v4190_v7  ;;  %4443 = vmatpush1.msra.mxu0 %v4392_v5  ;;  %v4406_v7 = vld [vmem:[%s10131_s10 + $0x90] sm:$0xff]  ;;  %v4203_v5 = vld [vmem:[%s10130_s9 + $0x88] sm:$0xff] }
 0x521   : > { %3899 = vmatmul.mubr.f32.gmra.mxu0 %v3473_v3  ;;  %5890 = vmatmul.mubr.msk.f32.gmra.mxu1 %vm3698_vm8, %v3475_v56  ;;  %v4405_v3 = vld [vmem:[%s10131_s10 + $0x88] sm:$0xff]  ;;  %v4202_v56 = vld [vmem:[%s10130_s9 + $0x80] sm:$0xff] }
 0x522   : > { %3904 = vmatprep.mubr.f32.mxu0 %v3477_v15  ;;  %4095 = vmatprep.mubr.f32.mxu1 %v10561_v8  ;;  %v4404_v15 = vld [vmem:[%s10131_s10 + $0x80] sm:$0xff] }
 0x523   : > { %4242 = vmatprep.subr.mxu1 %v10561_v8  ;;  %4444 = vmatprep.subr.mxu0 %v10561_v8 }
 0x524   : > { %4243 = vmatpush1.msra.mxu1 %v4189_v61  ;;  %4445 = vmatpush1.msra.mxu0 %v4391_v25  ;;  %v3596_v61 = vpop.permute.xlu0 %3595 }
 0x525   : > { %3905 = vmatmul.mubr.f32.gmra.mxu0 %v3476_v48  ;;  %5891 = vmatmul.mubr.msk.f32.gmra.mxu1 %vm3698_vm8, %v3478_v17 }
 0x526   : > { %3910 = vmatprep.mubr.f32.mxu0 %v3480_v38  ;;  %4101 = vmatprep.mubr.f32.mxu1 %v10561_v8 }
 0x527   : > { %4244 = vmatprep.subr.mxu1 %v10561_v8  ;;  %4446 = vmatprep.subr.mxu0 %v10561_v8 }
 0x528   : > { %4245 = vmatpush1.msra.mxu1 %v4188_v1  ;;  %4447 = vmatpush1.msra.mxu0 %v4390_v51  ;;  %v3601_v51 = vpop.permute.xlu1 %3600 }
 0x529   : > { %3911 = vmatmul.mubr.f32.gmra.mxu0 %v3479_v52  ;;  %5892 = vmatmul.mubr.msk.f32.gmra.mxu1 %vm3698_vm8, %v3481_v24 }
 0x52a   : > { %3916 = vmatprep.mubr.f32.mxu0 %v3483_v41  ;;  %4107 = vmatprep.mubr.f32.mxu1 %v10561_v8 }
 0x52b   : > { %4246 = vmatprep.subr.mxu1 %v10561_v8  ;;  %4448 = vmatprep.subr.mxu0 %v10561_v8 }
 0x52c   : > { %4247 = vmatpush1.msra.mxu1 %v4187_v18  ;;  %4449 = vmatpush1.msra.mxu0 %v4389_v57 }
 0x52d   : > { %3917 = vmatmul.mubr.f32.gmra.mxu0 %v3482_v19  ;;  %5893 = vmatmul.mubr.msk.f32.gmra.mxu1 %vm3698_vm8, %v3484_v49 }
 0x52e   : > { %3922 = vmatprep.mubr.f32.mxu0 %v3486_v29  ;;  %4113 = vmatprep.mubr.f32.mxu1 %v10561_v8 }
 0x52f   : > { %4248 = vmatprep.subr.mxu1 %v10561_v8  ;;  %4450 = vmatprep.subr.mxu0 %v10561_v8 }
 0x530   : > { %4249 = vmatpush1.msra.mxu1 %v4186_v37  ;;  %4451 = vmatpush1.msra.mxu0 %v4388_v54  ;;  %v3606_v37 = vpop.permute.xlu0 %3605 }
 0x531   : > { %3923 = vmatmul.mubr.f32.gmra.mxu0 %v3485_v10  ;;  %5894 = vmatmul.mubr.msk.f32.gmra.mxu1 %vm3698_vm8, %v3487_v2 }
 0x532   : > { %3928 = vmatprep.mubr.f32.mxu0 %v3489_v26  ;;  %4119 = vmatprep.mubr.f32.mxu1 %v10561_v8 }
 0x533   : > { %4250 = vmatprep.subr.mxu1 %v10561_v8  ;;  %4452 = vmatprep.subr.mxu0 %v10561_v8 }
 0x534   : > { %4251 = vmatpush2.msra.mxu1 %v4217_v39  ;;  %4453 = vmatpush2.msra.mxu0 %v4419_v36 }
 0x535   : > { %3929 = vmatmul.mubr.f32.gmra.mxu0 %v3488_v23  ;;  %5895 = vmatmul.mubr.msk.f32.gmra.mxu1 %vm3698_vm8, %v3490_v32 }
 0x536   : > { %3934 = vmatprep.mubr.f32.mxu0 %v3492_v0  ;;  %4125 = vmatprep.mubr.f32.mxu1 %v10561_v8 }
 0x537   : > { %4252 = vmatprep.subr.mxu1 %v10561_v8  ;;  %4454 = vmatprep.subr.mxu0 %v10561_v8 }
 0x538   : > { %4253 = vmatpush2.msra.mxu1 %v4216_v58  ;;  %4455 = vmatpush2.msra.mxu0 %v4418_v43  ;;  %v3611_v43 = vpop.permute.xlu1 %3610 }
 0x539   : > { %3935 = vmatmul.mubr.f32.gmra.mxu0 %v3491_v59  ;;  %5896 = vmatmul.mubr.msk.f32.gmra.mxu1 %vm3698_vm8, %v3493_v34 }
 0x53a   : > { %3940 = vmatprep.mubr.f32.mxu0 %v3495_v13  ;;  %4131 = vmatprep.mubr.f32.mxu1 %v10561_v8 }
 0x53b   : > { %4254 = vmatprep.subr.mxu1 %v10561_v8  ;;  %4456 = vmatprep.subr.mxu0 %v10561_v8 }
 0x53c   : > { %4255 = vmatpush2.msra.mxu1 %v4215_v47  ;;  %4457 = vmatpush2.msra.mxu0 %v4417_v11 }
 0x53d   : > { %3941 = vmatmul.mubr.f32.gmra.mxu0 %v3494_v63  ;;  %5897 = vmatmul.mubr.msk.f32.gmra.mxu1 %vm3698_vm8, %v3496_v60 }
 0x53e   : > { %3946 = vmatprep.mubr.f32.mxu0 %v3498_v4  ;;  %4137 = vmatprep.mubr.f32.mxu1 %v10561_v8 }
 0x53f   : > { %4256 = vmatprep.subr.mxu1 %v10561_v8  ;;  %4458 = vmatprep.subr.mxu0 %v10561_v8 }
 0x540   : > { %4257 = vmatpush2.msra.mxu1 %v4214_v22  ;;  %4459 = vmatpush2.msra.mxu0 %v4416_v28 }
 0x541   : > { %3947 = vmatmul.mubr.f32.gmra.mxu0 %v3497_v44  ;;  %5898 = vmatmul.mubr.msk.f32.gmra.mxu1 %vm3698_vm8, %v3499_v50  ;;  %v3616_v44 = vpop.permute.xlu0 %3615 }
 0x542   : > { %4258 = vmatprep.subr.mxu1 %v10561_v8  ;;  %4460 = vmatprep.subr.mxu0 %v10561_v8 }
 0x543   : > { %4259 = vmatpush2.msra.mxu1 %v4213_v62  ;;  %4461 = vmatpush2.msra.mxu0 %v4415_v45 }
 0x544   : > { %4260 = vmatprep.subr.mxu1 %v10561_v8  ;;  %4462 = vmatprep.subr.mxu0 %v10561_v8 }
 0x545   : > { %4261 = vmatpush2.msra.mxu1 %v4212_v30  ;;  %4463 = vmatpush2.msra.mxu0 %v4414_v53 }
 0x546   : > { %4262 = vmatprep.subr.mxu1 %v10561_v8  ;;  %4464 = vmatprep.subr.mxu0 %v10561_v8 }
 0x547   : > { %4263 = vmatpush2.msra.mxu1 %v4211_v33  ;;  %4465 = vmatpush2.msra.mxu0 %v4413_v40 }
 0x548   : > { %4264 = vmatprep.subr.mxu1 %v10561_v8  ;;  %4466 = vmatprep.subr.mxu0 %v10561_v8 }
 0x549   : > { %4265 = vmatpush2.msra.mxu1 %v4210_v16  ;;  %4467 = vmatpush2.msra.mxu0 %v4412_v12 }
 0x54a   : > { %4266 = vmatprep.subr.mxu1 %v10561_v8  ;;  %4468 = vmatprep.subr.mxu0 %v10561_v8 }
 0x54b   : > { %4267 = vmatpush2.msra.mxu1 %v4209_v6  ;;  %4469 = vmatpush2.msra.mxu0 %v4411_v31  ;;  %v3621_v31 = vpop.permute.xlu1 %3620 }
 0x54c   : > { %4268 = vmatprep.subr.mxu1 %v10561_v8  ;;  %4470 = vmatprep.subr.mxu0 %v10561_v8 }
 0x54d   : > { %4269 = vmatpush2.msra.mxu1 %v4208_v27  ;;  %4471 = vmatpush2.msra.mxu0 %v4410_v46 }
 0x54e   : > { %4270 = vmatprep.subr.mxu1 %v10561_v8  ;;  %4472 = vmatprep.subr.mxu0 %v10561_v8 }
 0x54f   : > { %4271 = vmatpush2.msra.mxu1 %v4207_v9  ;;  %4473 = vmatpush2.msra.mxu0 %v4409_v21 }
 0x550   : > { %4272 = vmatprep.subr.mxu1 %v10561_v8  ;;  %4474 = vmatprep.subr.mxu0 %v10561_v8 }
 0x551   : > { %4273 = vmatpush2.msra.mxu1 %v4206_v42  ;;  %4475 = vmatpush2.msra.mxu0 %v4408_v55 }
 0x552   : > { %4274 = vmatprep.subr.mxu1 %v10561_v8  ;;  %4476 = vmatprep.subr.mxu0 %v10561_v8 }
 0x553   : > { %4275 = vmatpush2.msra.mxu1 %v4205_v14  ;;  %4477 = vmatpush2.msra.mxu0 %v4407_v35 }
 0x554   : > { %4276 = vmatprep.subr.mxu1 %v10561_v8  ;;  %4478 = vmatprep.subr.mxu0 %v10561_v8 }
 0x555   : > { %4277 = vmatpush2.msra.mxu1 %v4204_v20  ;;  %4479 = vmatpush2.msra.mxu0 %v4406_v7 }
 0x556   : > { %4278 = vmatprep.subr.mxu1 %v10561_v8  ;;  %4480 = vmatprep.subr.mxu0 %v10561_v8 }
 0x557   : > { %4279 = vmatpush2.msra.mxu1 %v4203_v5  ;;  %4481 = vmatpush2.msra.mxu0 %v4405_v3  ;;  %v3626_v5 = vpop.permute.xlu0 %3625 }
 0x558   : > { %4280 = vmatprep.subr.mxu1 %v10561_v8  ;;  %4482 = vmatprep.subr.mxu0 %v10561_v8 }
 0x559   : > { %4281 = vmatpush2.msra.mxu1 %v4202_v56  ;;  %4483 = vmatpush2.msra.mxu0 %v4404_v15 }
 0x55a   : > { %4671 = vmatprep.subr.mxu1 %v10561_v8  ;;  %4856 = vmatprep.subr.mxu0 %v10561_v8 }
 0x5b1   : > { %v3828_v25 = vpop.f32.mrf.mxu0  ;;  %v4019_v48 = vpop.f32.mrf.mxu1 }
 0x5b2   : > { %v3829_v17 = vadd.f32 %v3828_v25, %v3596_v61 }
 0x5b3   : > { %v3830_v38 = vpop.f32.mrf.mxu0  ;;  %v4021_v1 = vpop.f32.mrf.mxu1 }
 0x5b4   : > { %v3831_v52 = vadd.f32 %v3830_v38, %v3596_v61  ;;  %v4020_v24 = vadd.f32 %v4019_v48, %v3829_v17 }
 0x5b5   : > { %v3834_v41 = vpop.f32.mrf.mxu0  ;;  %v4025_v18 = vpop.f32.mrf.mxu1 }
 0x5b6   : > { %v4022_v57 = vadd.f32 %v4021_v1, %v3831_v52  ;;  %v3835_v19 = vadd.f32 %v3834_v41, %v3601_v51  ;;  %v4144_v2 = vmax.f32 %v4020_v24, 0.0  ;;  %v3631_v52 = vpop.permute.xlu1 %3630 }
 0x5b7   : > { %v3836_v49 = vpop.f32.mrf.mxu0  ;;  %v4027_v29 = vpop.f32.mrf.mxu1 }
 0x5b8   : > { %v4145_v54 = vmax.f32 %v4022_v57, 0.0  ;;  %v3837_v10 = vadd.f32 %v3836_v49, %v3601_v51  ;;  %v4026_v26 = vadd.f32 %v4025_v18, %v3835_v19 }
 0x5b9   : > { %v3840_v39 = vpop.f32.mrf.mxu0  ;;  %v4031_v36 = vpop.f32.mrf.mxu1 }
 0x5ba   : > { %v4028_v23 = vadd.f32 %v4027_v29, %v3837_v10  ;;  %v3841_v32 = vadd.f32 %v3840_v39, %v3606_v37  ;;  %4282 = vmatprep.mubr.f32.mxu1 %v4145_v54  ;;  %4484 = vmatprep.mubr.f32.mxu0 %v4145_v54  ;;  %v4146_v13 = vmax.f32 %v4026_v26, 0.0 }
 0x5bb   : > { %v3842_v0 = vpop.f32.mrf.mxu0  ;;  %v4033_v58 = vpop.f32.mrf.mxu1  ;;  %4283 = vmatmul.mubr.f32.vlgmr.msra.gmra.mxu1 %v4144_v2  ;;  %4485 = vmatmul.mubr.f32.vlgmr.msra.gmra.mxu0 %v4144_v2 }
 0x5bc   : > { %v4147_v59 = vmax.f32 %v4028_v23, 0.0  ;;  %v3843_v34 = vadd.f32 %v3842_v0, %v3606_v37  ;;  %v4032_v47 = vadd.f32 %v4031_v36, %v3841_v32  ;;  %v3636_v2 = vpop.permute.xlu0 %3635 }
 0x5bd   : > { %v3846_v11 = vpop.f32.mrf.mxu0  ;;  %v4037_v63 = vpop.f32.mrf.mxu1 }
 0x5be   : > { %v4034_v60 = vadd.f32 %v4033_v58, %v3843_v34  ;;  %v3847_v4 = vadd.f32 %v3846_v11, %v3611_v43  ;;  %4287 = vmatprep.mubr.f32.mxu1 %v4147_v59  ;;  %4489 = vmatprep.mubr.f32.mxu0 %v4147_v59  ;;  %v4148_v45 = vmax.f32 %v4032_v47, 0.0 }
 0x5bf   : > { %v3848_v22 = vpop.f32.mrf.mxu0  ;;  %v4039_v28 = vpop.f32.mrf.mxu1  ;;  %4288 = vmatmul.mubr.f32.gmra.mxu1 %v4146_v13  ;;  %4490 = vmatmul.mubr.f32.gmra.mxu0 %v4146_v13 }
 0x5c0   : > { %v4149_v50 = vmax.f32 %v4034_v60, 0.0  ;;  %v3849_v62 = vadd.f32 %v3848_v22, %v3611_v43  ;;  %v4038_v30 = vadd.f32 %v4037_v63, %v3847_v4  ;;  %v3641_v13 = vpop.permute.xlu1 %3640 }
 0x5c1   : > { %v3852_v53 = vpop.f32.mrf.mxu0  ;;  %v4043_v33 = vpop.f32.mrf.mxu1 }
 0x5c2   : > { %v4040_v40 = vadd.f32 %v4039_v28, %v3849_v62  ;;  %v3853_v16 = vadd.f32 %v3852_v53, %v3616_v44  ;;  %4292 = vmatprep.mubr.f32.mxu1 %v4149_v50  ;;  %4494 = vmatprep.mubr.f32.mxu0 %v4149_v50  ;;  %v4150_v9 = vmax.f32 %v4038_v30, 0.0 }
 0x5c3   : > { %v3854_v12 = vpop.f32.mrf.mxu0  ;;  %v4045_v6 = vpop.f32.mrf.mxu1  ;;  %4293 = vmatmul.mubr.f32.gmra.mxu1 %v4148_v45  ;;  %4495 = vmatmul.mubr.f32.gmra.mxu0 %v4148_v45 }
 0x5c4   : > { %v4151_v27 = vmax.f32 %v4040_v40, 0.0  ;;  %v3855_v46 = vadd.f32 %v3854_v12, %v3616_v44  ;;  %v4044_v21 = vadd.f32 %v4043_v33, %v3853_v16  ;;  %v3646_v45 = vpop.permute.xlu0 %3645 }
 0x5c5   : > { %v3858_v42 = vpop.f32.mrf.mxu0  ;;  %v4049_v55 = vpop.f32.mrf.mxu1 }
 0x5c6   : > { %v4046_v14 = vadd.f32 %v4045_v6, %v3855_v46  ;;  %v3859_v35 = vadd.f32 %v3858_v42, %v3621_v31  ;;  %4297 = vmatprep.mubr.f32.mxu1 %v4151_v27  ;;  %4499 = vmatprep.mubr.f32.mxu0 %v4151_v27  ;;  %v4152_v15 = vmax.f32 %v4044_v21, 0.0 }
 0x5c7   : > { %v3860_v20 = vpop.f32.mrf.mxu0  ;;  %v4051_v7 = vpop.f32.mrf.mxu1  ;;  %4298 = vmatmul.mubr.f32.gmra.mxu1 %v4150_v9  ;;  %4500 = vmatmul.mubr.f32.gmra.mxu0 %v4150_v9 }
 0x5c8   : > { %v4153_v3 = vmax.f32 %v4046_v14, 0.0  ;;  %v3861_v56 = vadd.f32 %v3860_v20, %v3621_v31  ;;  %v4050_v61 = vadd.f32 %v4049_v55, %v3859_v35  ;;  %v3651_v9 = vpop.permute.xlu1 %3650 }
 0x5c9   : > { %v3864_v25 = vpop.f32.mrf.mxu0  ;;  %v4055_v48 = vpop.f32.mrf.mxu1 }
 0x5ca   : > { %v4052_v17 = vadd.f32 %v4051_v7, %v3861_v56  ;;  %v3865_v38 = vadd.f32 %v3864_v25, %v3626_v5  ;;  %4302 = vmatprep.mubr.f32.mxu1 %v4153_v3  ;;  %4504 = vmatprep.mubr.f32.mxu0 %v4153_v3  ;;  %v4154_v18 = vmax.f32 %v4050_v61, 0.0 }
 0x5cb   : > { %v3866_v1 = vpop.f32.mrf.mxu0  ;;  %v4057_v51 = vpop.f32.mrf.mxu1  ;;  %4303 = vmatmul.mubr.f32.gmra.mxu1 %v4152_v15  ;;  %4505 = vmatmul.mubr.f32.gmra.mxu0 %v4152_v15 }
 0x5cc   : > { %v4155_v24 = vmax.f32 %v4052_v17, 0.0  ;;  %v3867_v41 = vadd.f32 %v3866_v1, %v3626_v5  ;;  %v4056_v57 = vadd.f32 %v4055_v48, %v3865_v38  ;;  %v3656_v15 = vpop.permute.xlu0 %3655 }
 0x5cd   : > { %v3870_v19 = vpop.f32.mrf.mxu0  ;;  %v4061_v49 = vpop.f32.mrf.mxu1 }
 0x5ce   : > { %v4058_v29 = vadd.f32 %v4057_v51, %v3867_v41  ;;  %v3871_v37 = vadd.f32 %v3870_v19, %v3631_v52  ;;  %4307 = vmatprep.mubr.f32.mxu1 %v4155_v24  ;;  %4509 = vmatprep.mubr.f32.mxu0 %v4155_v24  ;;  %v4156_v36 = vmax.f32 %v4056_v57, 0.0 }
 0x5cf   : > { %v3872_v54 = vpop.f32.mrf.mxu0  ;;  %v4063_v10 = vpop.f32.mrf.mxu1  ;;  %4308 = vmatmul.mubr.f32.gmra.mxu1 %v4154_v18  ;;  %4510 = vmatmul.mubr.f32.gmra.mxu0 %v4154_v18 }
 0x5d0   : > { %v4157_v26 = vmax.f32 %v4058_v29, 0.0  ;;  %v3873_v39 = vadd.f32 %v3872_v54, %v3631_v52  ;;  %v4062_v23 = vadd.f32 %v4061_v49, %v3871_v37  ;;  %v3661_v18 = vpop.permute.xlu1 %3660 }
 0x5d1   : > { %v3876_v32 = vpop.f32.mrf.mxu0  ;;  %v4067_v0 = vpop.f32.mrf.mxu1 }
 0x5d2   : > { %v4064_v58 = vadd.f32 %v4063_v10, %v3873_v39  ;;  %v3877_v43 = vadd.f32 %v3876_v32, %v3636_v2  ;;  %4312 = vmatprep.mubr.f32.mxu1 %v4157_v26  ;;  %4514 = vmatprep.mubr.f32.mxu0 %v4157_v26  ;;  %v4158_v63 = vmax.f32 %v4062_v23, 0.0 }
 0x5d3   : > { %v3878_v59 = vpop.f32.mrf.mxu0  ;;  %v4069_v34 = vpop.f32.mrf.mxu1  ;;  %4313 = vmatmul.mubr.f32.gmra.mxu1 %v4156_v36  ;;  %4515 = vmatmul.mubr.f32.gmra.mxu0 %v4156_v36 }
 0x5d4   : > { %v4159_v47 = vmax.f32 %v4064_v58, 0.0  ;;  %v3879_v11 = vadd.f32 %v3878_v59, %v3636_v2  ;;  %v4068_v60 = vadd.f32 %v4067_v0, %v3877_v43  ;;  %v3666_v36 = vpop.permute.xlu0 %3665 }
 0x5d5   : > { %v3882_v4 = vpop.f32.mrf.mxu0  ;;  %v4073_v22 = vpop.f32.mrf.mxu1 }
 0x5d6   : > { %v4070_v28 = vadd.f32 %v4069_v34, %v3879_v11  ;;  %v3883_v44 = vadd.f32 %v3882_v4, %v3641_v13  ;;  %4317 = vmatprep.mubr.f32.mxu1 %v4159_v47  ;;  %4519 = vmatprep.mubr.f32.mxu0 %v4159_v47  ;;  %v4160_v33 = vmax.f32 %v4068_v60, 0.0 }
 0x5d7   : > { %v3884_v50 = vpop.f32.mrf.mxu0  ;;  %v4075_v62 = vpop.f32.mrf.mxu1  ;;  %4318 = vmatmul.mubr.f32.gmra.mxu1 %v4158_v63  ;;  %4520 = vmatmul.mubr.f32.gmra.mxu0 %v4158_v63 }
 0x5d8   : > { %v4161_v30 = vmax.f32 %v4070_v28, 0.0  ;;  %v3885_v53 = vadd.f32 %v3884_v50, %v3641_v13  ;;  %v4074_v40 = vadd.f32 %v4073_v22, %v3883_v44  ;;  %v3671_v63 = vpop.permute.xlu1 %3670 }
 0x5d9   : > { %v3888_v16 = vpop.f32.mrf.mxu0  ;;  %v4079_v12 = vpop.f32.mrf.mxu1 }
 0x5da   : > { %v4076_v6 = vadd.f32 %v4075_v62, %v3885_v53  ;;  %v3889_v31 = vadd.f32 %v3888_v16, %v3646_v45  ;;  %4322 = vmatprep.mubr.f32.mxu1 %v4161_v30  ;;  %4524 = vmatprep.mubr.f32.mxu0 %v4161_v30  ;;  %v4162_v55 = vmax.f32 %v4074_v40, 0.0 }
 0x5db   : > { %v3890_v27 = vpop.f32.mrf.mxu0  ;;  %v4081_v46 = vpop.f32.mrf.mxu1  ;;  %4323 = vmatmul.mubr.f32.gmra.mxu1 %v4160_v33  ;;  %4525 = vmatmul.mubr.f32.gmra.mxu0 %v4160_v33 }
 0x5dc   : > { %v4163_v21 = vmax.f32 %v4076_v6, 0.0  ;;  %v3891_v42 = vadd.f32 %v3890_v27, %v3646_v45  ;;  %v4080_v14 = vadd.f32 %v4079_v12, %v3889_v31  ;;  %v3676_v33 = vpop.permute.xlu0 %3675 }
 0x5dd   : > { %v3894_v35 = vpop.f32.mrf.mxu0  ;;  %v4085_v20 = vpop.f32.mrf.mxu1 }
 0x5de   : > { %v4082_v7 = vadd.f32 %v4081_v46, %v3891_v42  ;;  %v3895_v5 = vadd.f32 %v3894_v35, %v3651_v9  ;;  %4327 = vmatprep.mubr.f32.mxu1 %v4163_v21  ;;  %4529 = vmatprep.mubr.f32.mxu0 %v4163_v21  ;;  %v4164_v48 = vmax.f32 %v4080_v14, 0.0 }
 0x5df   : > { %v3896_v3 = vpop.f32.mrf.mxu0  ;;  %v4087_v56 = vpop.f32.mrf.mxu1  ;;  %4328 = vmatmul.mubr.f32.gmra.mxu1 %v4162_v55  ;;  %4530 = vmatmul.mubr.f32.gmra.mxu0 %v4162_v55 }
 0x5e0   : > { %v4165_v61 = vmax.f32 %v4082_v7, 0.0  ;;  %v3897_v25 = vadd.f32 %v3896_v3, %v3651_v9  ;;  %v4086_v17 = vadd.f32 %v4085_v20, %v3895_v5  ;;  %v3681_v55 = vpop.permute.xlu1 %3680 }
 0x5e1   : > { %v3900_v38 = vpop.f32.mrf.mxu0  ;;  %v4091_v1 = vpop.f32.mrf.mxu1 }
 0x5e2   : > { %v4088_v51 = vadd.f32 %v4087_v56, %v3897_v25  ;;  %v3901_v52 = vadd.f32 %v3900_v38, %v3656_v15  ;;  %4332 = vmatprep.mubr.f32.mxu1 %v4165_v61  ;;  %4534 = vmatprep.mubr.f32.mxu0 %v4165_v61  ;;  %v4166_v49 = vmax.f32 %v4086_v17, 0.0 }
 0x5e3   : > { %v3902_v24 = vpop.f32.mrf.mxu0  ;;  %v4093_v41 = vpop.f32.mrf.mxu1  ;;  %4333 = vmatmul.mubr.f32.gmra.mxu1 %v4164_v48  ;;  %4535 = vmatmul.mubr.f32.gmra.mxu0 %v4164_v48 }
 0x5e4   : > { %v4167_v57 = vmax.f32 %v4088_v51, 0.0  ;;  %v3903_v19 = vadd.f32 %v3902_v24, %v3656_v15  ;;  %v4092_v29 = vadd.f32 %v4091_v1, %v3901_v52  ;;  %v3686_v48 = vpop.permute.xlu0 %3685 }
 0x5e5   : > { %v3906_v37 = vpop.f32.mrf.mxu0  ;;  %v4097_v54 = vpop.f32.mrf.mxu1 }
 0x5e6   : > { %v4094_v10 = vadd.f32 %v4093_v41, %v3903_v19  ;;  %v3907_v2 = vadd.f32 %v3906_v37, %v3661_v18  ;;  %4337 = vmatprep.mubr.f32.mxu1 %v4167_v57  ;;  %4539 = vmatprep.mubr.f32.mxu0 %v4167_v57  ;;  %v4168_v0 = vmax.f32 %v4092_v29, 0.0 }
 0x5e7   : > { %v3908_v26 = vpop.f32.mrf.mxu0  ;;  %v4099_v39 = vpop.f32.mrf.mxu1  ;;  %4338 = vmatmul.mubr.f32.gmra.mxu1 %v4166_v49  ;;  %4540 = vmatmul.mubr.f32.gmra.mxu0 %v4166_v49 }
 0x5e8   : > { %v4169_v23 = vmax.f32 %v4094_v10, 0.0  ;;  %v3909_v32 = vadd.f32 %v3908_v26, %v3661_v18  ;;  %v4098_v58 = vadd.f32 %v4097_v54, %v3907_v2  ;;  %v3691_v49 = vpop.permute.xlu1 %3690 }
 0x5e9   : > { %v3912_v43 = vpop.f32.mrf.mxu0  ;;  %v4103_v59 = vpop.f32.mrf.mxu1 }
 0x5ea   : > { %v4100_v34 = vadd.f32 %v4099_v39, %v3909_v32  ;;  %v3913_v13 = vadd.f32 %v3912_v43, %v3666_v36  ;;  %4342 = vmatprep.mubr.f32.mxu1 %v4169_v23  ;;  %4544 = vmatprep.mubr.f32.mxu0 %v4169_v23  ;;  %v4170_v22 = vmax.f32 %v4098_v58, 0.0 }
 0x5eb   : > { %v3914_v47 = vpop.f32.mrf.mxu0  ;;  %v4105_v11 = vpop.f32.mrf.mxu1  ;;  %4343 = vmatmul.mubr.f32.gmra.mxu1 %v4168_v0  ;;  %4545 = vmatmul.mubr.f32.gmra.mxu0 %v4168_v0 }
 0x5ec   : > { %v4171_v60 = vmax.f32 %v4100_v34, 0.0  ;;  %v3915_v4 = vadd.f32 %v3914_v47, %v3666_v36  ;;  %v4104_v28 = vadd.f32 %v4103_v59, %v3913_v13  ;;  %v3696_v0 = vpop.permute.xlu0 %3695 }
 0x5ed   : > { %v3918_v44 = vpop.f32.mrf.mxu0  ;;  %v4109_v50 = vpop.f32.mrf.mxu1 }
 0x5ee   : > { %v4106_v62 = vadd.f32 %v4105_v11, %v3915_v4  ;;  %v3919_v45 = vadd.f32 %v3918_v44, %v3671_v63  ;;  %4347 = vmatprep.mubr.f32.mxu1 %v4171_v60  ;;  %4549 = vmatprep.mubr.f32.mxu0 %v4171_v60  ;;  %v4172_v12 = vmax.f32 %v4104_v28, 0.0 }
 0x5ef   : > { %v3920_v30 = vpop.f32.mrf.mxu0  ;;  %v4111_v53 = vpop.f32.mrf.mxu1  ;;  %4348 = vmatmul.mubr.f32.gmra.mxu1 %v4170_v22  ;;  %4550 = vmatmul.mubr.f32.gmra.mxu0 %v4170_v22 }
 0x5f0   : > { %v4173_v40 = vmax.f32 %v4106_v62, 0.0  ;;  %v3921_v16 = vadd.f32 %v3920_v30, %v3671_v63  ;;  %v4110_v6 = vadd.f32 %v4109_v50, %v3919_v45 }
 0x5f1   : > { %v3924_v31 = vpop.f32.mrf.mxu0  ;;  %v4115_v27 = vpop.f32.mrf.mxu1 }
 0x5f2   : > { %v4112_v46 = vadd.f32 %v4111_v53, %v3921_v16  ;;  %v3925_v9 = vadd.f32 %v3924_v31, %v3676_v33  ;;  %4352 = vmatprep.mubr.f32.mxu1 %v4173_v40  ;;  %4554 = vmatprep.mubr.f32.mxu0 %v4173_v40  ;;  %v4174_v20 = vmax.f32 %v4110_v6, 0.0  ;;  %v4612_v53 = vld [vmem:[%s10132_s11 + $0x8] sm:$0xff] }
 0x5f3   : > { %v3926_v21 = vpop.f32.mrf.mxu0  ;;  %4353 = vmatmul.mubr.f32.gmra.mxu1 %v4172_v12  ;;  %4555 = vmatmul.mubr.f32.gmra.mxu0 %v4172_v12  ;;  %v4117_v42 = vpop.f32.mrf.mxu1 }
 0x5f4   : > { %v4175_v14 = vmax.f32 %v4112_v46, 0.0  ;;  %v3927_v35 = vadd.f32 %v3926_v21, %v3676_v33  ;;  %v4116_v7 = vadd.f32 %v4115_v27, %v3925_v9  ;;  %v4797_v33 = vld [vmem:[%s10133_s12 + $0x8] sm:$0xff] }
 0x5f5   : > { %v3930_v5 = vpop.f32.mrf.mxu0  ;;  %v4121_v3 = vpop.f32.mrf.mxu1 }
 0x5f6   : > { %v3931_v56 = vadd.f32 %v3930_v5, %v3681_v55  ;;  %v4118_v15 = vadd.f32 %v4117_v42, %v3927_v35  ;;  %4357 = vmatprep.mubr.f32.mxu1 %v4175_v14  ;;  %4559 = vmatprep.mubr.f32.mxu0 %v4175_v14  ;;  %v4176_v1 = vmax.f32 %v4116_v7, 0.0 }
 0x5f7   : > { %v3932_v61 = vpop.f32.mrf.mxu0  ;;  %4358 = vmatmul.mubr.f32.gmra.mxu1 %v4174_v20  ;;  %4560 = vmatmul.mubr.f32.gmra.mxu0 %v4174_v20  ;;  %v4123_v25 = vpop.f32.mrf.mxu1 }
 0x5f8   : > { %v4177_v17 = vmax.f32 %v4118_v15, 0.0  ;;  %v3933_v38 = vadd.f32 %v3932_v61, %v3681_v55  ;;  %v4122_v51 = vadd.f32 %v4121_v3, %v3931_v56 }
 0x5f9   : > { %v3936_v52 = vpop.f32.mrf.mxu0  ;;  %v4127_v24 = vpop.f32.mrf.mxu1 }
 0x5fa   : > { %v3937_v41 = vadd.f32 %v3936_v52, %v3686_v48  ;;  %v4124_v18 = vadd.f32 %v4123_v25, %v3933_v38  ;;  %4362 = vmatprep.mubr.f32.mxu1 %v4177_v17  ;;  %4564 = vmatprep.mubr.f32.mxu0 %v4177_v17  ;;  %v4178_v54 = vmax.f32 %v4122_v51, 0.0 }
 0x5fb   : > { %v3938_v57 = vpop.f32.mrf.mxu0  ;;  %4363 = vmatmul.mubr.f32.gmra.mxu1 %v4176_v1  ;;  %4565 = vmatmul.mubr.f32.gmra.mxu0 %v4176_v1  ;;  %v4129_v19 = vpop.f32.mrf.mxu1 }
 0x5fc   : > { %v4179_v29 = vmax.f32 %v4124_v18, 0.0  ;;  %v3939_v37 = vadd.f32 %v3938_v57, %v3686_v48  ;;  %v4128_v10 = vadd.f32 %v4127_v24, %v3937_v41 }
 0x5fd   : > { %v3942_v2 = vpop.f32.mrf.mxu0  ;;  %v4133_v26 = vpop.f32.mrf.mxu1 }
 0x5fe   : > { %v3943_v39 = vadd.f32 %v3942_v2, %v3691_v49  ;;  %v4130_v36 = vadd.f32 %v4129_v19, %v3939_v37  ;;  %4367 = vmatprep.mubr.f32.mxu1 %v4179_v29  ;;  %4569 = vmatprep.mubr.f32.mxu0 %v4179_v29  ;;  %v4180_v59 = vmax.f32 %v4128_v10, 0.0 }
 0x5ff   : > { %v3944_v23 = vpop.f32.mrf.mxu0  ;;  %4368 = vmatmul.mubr.f32.gmra.mxu1 %v4178_v54  ;;  %4570 = vmatmul.mubr.f32.gmra.mxu0 %v4178_v54  ;;  %v4135_v32 = vpop.f32.mrf.mxu1 }
 0x600   : > { %v4181_v58 = vmax.f32 %v4130_v36, 0.0  ;;  %v3945_v43 = vadd.f32 %v3944_v23, %v3691_v49  ;;  %v4134_v34 = vadd.f32 %v4133_v26, %v3943_v39 }
 0x601   : > { %v3948_v13 = vpop.f32.mrf.mxu0  ;;  %v4139_v47 = vpop.f32.mrf.mxu1 }
 0x602   : > { %v3949_v11 = vadd.f32 %v3948_v13, %v3696_v0  ;;  %v4136_v63 = vadd.f32 %v4135_v32, %v3945_v43  ;;  %4372 = vmatprep.mubr.f32.mxu1 %v4181_v58  ;;  %4574 = vmatprep.mubr.f32.mxu0 %v4181_v58  ;;  %v4182_v44 = vmax.f32 %v4134_v34, 0.0 }
 0x603   : > { %v3950_v60 = vpop.f32.mrf.mxu0  ;;  %4373 = vmatmul.mubr.f32.gmra.mxu1 %v4180_v59  ;;  %4575 = vmatmul.mubr.f32.gmra.mxu0 %v4180_v59  ;;  %v4141_v4 = vpop.f32.mrf.mxu1 }
 0x604   : > { %v4183_v22 = vmax.f32 %v4136_v63, 0.0  ;;  %v3951_v28 = vadd.f32 %v3950_v60, %v3696_v0  ;;  %v4140_v50 = vadd.f32 %v4139_v47, %v3949_v11 }
 0x606   : > { %v4142_v62 = vadd.f32 %v4141_v4, %v3951_v28  ;;  %4377 = vmatprep.mubr.f32.mxu1 %v4183_v22  ;;  %4579 = vmatprep.mubr.f32.mxu0 %v4183_v22  ;;  %v4184_v30 = vmax.f32 %v4140_v50, 0.0 }
 0x607   : > { %4378 = vmatmul.mubr.f32.gmra.mxu1 %v4182_v44  ;;  %4580 = vmatmul.mubr.f32.gmra.mxu0 %v4182_v44 }
 0x608   : > { %v4185_v45 = vmax.f32 %v4142_v62, 0.0 }
 0x60a   : > { %4382 = vmatprep.mubr.f32.mxu1 %v4185_v45  ;;  %4584 = vmatprep.mubr.f32.mxu0 %v4185_v45 }
 0x60b   : > { %4383 = vmatmul.mubr.f32.gmra.mxu1 %v4184_v30  ;;  %4585 = vmatmul.mubr.f32.gmra.mxu0 %v4184_v30 }
 0x60c   : > { %5899 = vmatprep.mubr.msk.f32.mxu1 %vm2752_vm5, %v4612_v53  ;;  %5911 = vmatprep.mubr.msk.f32.mxu0 %vm2752_vm5, %v4797_v33 }
 0x67b   : > { %v4284_v40 = vpop.f32.mrf.mxu1  ;;  %v4486_v16 = vpop.f32.mrf.mxu0 }
 0x67c   : > { %v9551_v12 = vmax.f32 %v4284_v40, %v4486_v16 }
 0x67d   : > { %v4286_v6 = vpop.f32.mrf.mxu1  ;;  %v4488_v31 = vpop.f32.mrf.mxu0 }
 0x67f   : > { %v4289_v27 = vpop.f32.mrf.mxu1  ;;  %v4491_v46 = vpop.f32.mrf.mxu0 }
 0x680   : > { %v9553_v9 = vmax.f32 %v4289_v27, %v4491_v46 }
 0x681   : > { %v4291_v21 = vpop.f32.mrf.mxu1  ;;  %v4493_v42 = vpop.f32.mrf.mxu0 }
 0x683   : > { %v4294_v55 = vpop.f32.mrf.mxu1  ;;  %v4496_v14 = vpop.f32.mrf.mxu0 }
 0x684   : > { %v9555_v35 = vmax.f32 %v4294_v55, %v4496_v14 }
 0x685   : > { %v4296_v20 = vpop.f32.mrf.mxu1  ;;  %v4498_v7 = vpop.f32.mrf.mxu0 }
 0x687   : > { %v4299_v5 = vpop.f32.mrf.mxu1  ;;  %v4501_v3 = vpop.f32.mrf.mxu0 }
 0x688   : > { %v9557_v56 = vmax.f32 %v4299_v5, %v4501_v3 }
 0x689   : > { %v4301_v15 = vpop.f32.mrf.mxu1  ;;  %v4503_v61 = vpop.f32.mrf.mxu0 }
 0x68b   : > { %v4304_v25 = vpop.f32.mrf.mxu1  ;;  %v4506_v48 = vpop.f32.mrf.mxu0 }
 0x68c   : > { %v9559_v17 = vmax.f32 %v4304_v25, %v4506_v48 }
 0x68d   : > { %v4306_v38 = vpop.f32.mrf.mxu1  ;;  %v4508_v1 = vpop.f32.mrf.mxu0 }
 0x68f   : > { %v9561_v51 = vpop.f32.mrf.mxu1  ;;  %v9563_v52 = vpop.f32.mrf.mxu0 }
 0x691   : > { %v4311_v24 = vpop.f32.mrf.mxu1  ;;  %v4513_v41 = vpop.f32.mrf.mxu0 }
 0x693   : > { %v9565_v18 = vpop.f32.mrf.mxu1  ;;  %v9567_v57 = vpop.f32.mrf.mxu0 }
 0x695   : > { %v4316_v19 = vpop.f32.mrf.mxu1  ;;  %v4518_v49 = vpop.f32.mrf.mxu0 }
 0x697   : > { %v9569_v29 = vpop.f32.mrf.mxu1  ;;  %v9571_v37 = vpop.f32.mrf.mxu0 }
 0x699   : > { %v4321_v54 = vpop.f32.mrf.mxu1  ;;  %v4523_v10 = vpop.f32.mrf.mxu0 }
 0x69b   : > { %v9573_v2 = vpop.f32.mrf.mxu1  ;;  %v9575_v26 = vpop.f32.mrf.mxu0 }
 0x69c   : > { %v4598_v10 = vmax.f32 %v9573_v2, %v9575_v26  ;;  %v4596_v2 = vmax.f32 %v9565_v18, %v9567_v57  ;;  %v4614_v18 = vld [vmem:[%s10132_s11 + $0x18] sm:$0xff] }
 0x69d   : > { %v4326_v39 = vpop.f32.mrf.mxu1  ;;  %v4528_v36 = vpop.f32.mrf.mxu0  ;;  %v4799_v57 = vld [vmem:[%s10133_s12 + $0x18] sm:$0xff] }
 0x69f   : > { %v9577_v23 = vpop.f32.mrf.mxu1  ;;  %v9579_v32 = vpop.f32.mrf.mxu0 }
 0x6a0   : > { %v4599_v19 = vmax.f32 %v9577_v23, %v9579_v32  ;;  %v4597_v23 = vmax.f32 %v9569_v29, %v9571_v37  ;;  %v4595_v29 = vmax.f32 %v9561_v51, %v9563_v52  ;;  %v4611_v51 = vld [vmem:[%s10132_s11] sm:$0xff] }
 0x6a1   : > { %v4331_v0 = vpop.f32.mrf.mxu1  ;;  %v4533_v58 = vpop.f32.mrf.mxu0  ;;  %v4796_v52 = vld [vmem:[%s10133_s12] sm:$0xff] }
 0x6a3   : > { %v4334_v43 = vpop.f32.mrf.mxu1  ;;  %v4536_v59 = vpop.f32.mrf.mxu0 }
 0x6a4   : > { %v4600_v1 = vmax.f32 %v4334_v43, %v4536_v59  ;;  %v4613_v59 = vld [vmem:[%s10132_s11 + $0x10] sm:$0xff] }
 0x6a5   : > { %v4336_v34 = vpop.f32.mrf.mxu1  ;;  %v4538_v13 = vpop.f32.mrf.mxu0 }
 0x6a6   : > { %v4798_v34 = vld [vmem:[%s10133_s12 + $0x10] sm:$0xff]  ;;  %v4616_v13 = vld [vmem:[%s10132_s11 + $0x28] sm:$0xff] }
 0x6a7   : > { %v4339_v47 = vpop.f32.mrf.mxu1  ;;  %v4541_v11 = vpop.f32.mrf.mxu0 }
 0x6a8   : > { %v4601_v25 = vmax.f32 %v4339_v47, %v4541_v11  ;;  %v4801_v47 = vld [vmem:[%s10133_s12 + $0x28] sm:$0xff]  ;;  %v4615_v11 = vld [vmem:[%s10132_s11 + $0x20] sm:$0xff] }
 0x6a9   : > { %v4341_v63 = vpop.f32.mrf.mxu1  ;;  %v4543_v60 = vpop.f32.mrf.mxu0 }
 0x6aa   : > { %v4800_v63 = vld [vmem:[%s10133_s12 + $0x20] sm:$0xff]  ;;  %v4618_v60 = vld [vmem:[%s10132_s11 + $0x38] sm:$0xff] }
 0x6ab   : > { %v4344_v4 = vpop.f32.mrf.mxu1  ;;  %v4546_v22 = vpop.f32.mrf.mxu0 }
 0x6ac   : > { %v4602_v3 = vmax.f32 %v4344_v4, %v4546_v22  ;;  %v4803_v4 = vld [vmem:[%s10133_s12 + $0x38] sm:$0xff]  ;;  %v4617_v22 = vld [vmem:[%s10132_s11 + $0x30] sm:$0xff] }
 0x6ad   : > { %v4346_v28 = vpop.f32.mrf.mxu1  ;;  %v4548_v44 = vpop.f32.mrf.mxu0 }
 0x6ae   : > { %v4802_v28 = vld [vmem:[%s10133_s12 + $0x30] sm:$0xff]  ;;  %v4620_v44 = vld [vmem:[%s10132_s11 + $0x48] sm:$0xff] }
 0x6af   : > { %v4349_v50 = vpop.f32.mrf.mxu1  ;;  %v4551_v62 = vpop.f32.mrf.mxu0 }
 0x6b0   : > { %v4603_v20 = vmax.f32 %v4349_v50, %v4551_v62  ;;  %v4805_v50 = vld [vmem:[%s10133_s12 + $0x48] sm:$0xff]  ;;  %v4619_v62 = vld [vmem:[%s10132_s11 + $0x40] sm:$0xff] }
 0x6b1   : > { %v4351_v45 = vpop.f32.mrf.mxu1  ;;  %v4553_v30 = vpop.f32.mrf.mxu0 }
 0x6b2   : > { %v4804_v45 = vld [vmem:[%s10133_s12 + $0x40] sm:$0xff]  ;;  %v4622_v30 = vld [vmem:[%s10132_s11 + $0x58] sm:$0xff] }
 0x6b3   : > { %v4354_v53 = vpop.f32.mrf.mxu1  ;;  %v4556_v33 = vpop.f32.mrf.mxu0 }
 0x6b4   : > { %v4604_v42 = vmax.f32 %v4354_v53, %v4556_v33  ;;  %v4807_v53 = vld [vmem:[%s10133_s12 + $0x58] sm:$0xff]  ;;  %v4621_v33 = vld [vmem:[%s10132_s11 + $0x50] sm:$0xff] }
 0x6b5   : > { %v4356_v40 = vpop.f32.mrf.mxu1  ;;  %v4558_v16 = vpop.f32.mrf.mxu0 }
 0x6b6   : > { %v4806_v40 = vld [vmem:[%s10133_s12 + $0x50] sm:$0xff]  ;;  %v4624_v16 = vld [vmem:[%s10132_s11 + $0x68] sm:$0xff] }
 0x6b7   : > { %v4359_v6 = vpop.f32.mrf.mxu1  ;;  %v4561_v31 = vpop.f32.mrf.mxu0 }
 0x6b8   : > { %v4605_v27 = vmax.f32 %v4359_v6, %v4561_v31  ;;  %v4809_v6 = vld [vmem:[%s10133_s12 + $0x68] sm:$0xff]  ;;  %v4623_v31 = vld [vmem:[%s10132_s11 + $0x60] sm:$0xff] }
 0x6b9   : > { %v4361_v46 = vpop.f32.mrf.mxu1  ;;  %v4563_v21 = vpop.f32.mrf.mxu0 }
 0x6ba   : > { %4672 = vmatpush1.msra.mxu1 %v4605_v27  ;;  %4857 = vmatpush1.msra.mxu0 %v4605_v27  ;;  %v4808_v27 = vld [vmem:[%s10133_s12 + $0x60] sm:$0xff]  ;;  %v4626_v46 = vld [vmem:[%s10132_s11 + $0x78] sm:$0xff] }
 0x6bb   : > { %v9581_v55 = vpop.f32.mrf.mxu1  ;;  %v9583_v14 = vpop.f32.mrf.mxu0  ;;  %4673 = vmatprep.subr.mxu1 %v10561_v8  ;;  %4858 = vmatprep.subr.mxu0 %v10561_v8  ;;  %v4811_v21 = vld [vmem:[%s10133_s12 + $0x78] sm:$0xff] }
 0x6bc   : > { %4674 = vmatpush1.msra.mxu1 %v4604_v42  ;;  %4859 = vmatpush1.msra.mxu0 %v4604_v42  ;;  %v4625_v42 = vld [vmem:[%s10132_s11 + $0x70] sm:$0xff] }
 0x6bd   : > { %v4366_v7 = vpop.f32.mrf.mxu1  ;;  %v4568_v5 = vpop.f32.mrf.mxu0  ;;  %4675 = vmatprep.subr.mxu1 %v10561_v8  ;;  %4860 = vmatprep.subr.mxu0 %v10561_v8 }
 0x6be   : > { %4676 = vmatpush1.msra.mxu1 %v4603_v20  ;;  %4861 = vmatpush1.msra.mxu0 %v4603_v20  ;;  %v4813_v20 = vld [vmem:[%s10133_s12 + $0x88] sm:$0xff]  ;;  %v4627_v7 = vld [vmem:[%s10132_s11 + $0x80] sm:$0xff] }
 0x6bf   : > { %v9589_v15 = vpop.f32.mrf.mxu1  ;;  %v9591_v61 = vpop.f32.mrf.mxu0  ;;  %4677 = vmatprep.subr.mxu1 %v10561_v8  ;;  %4862 = vmatprep.subr.mxu0 %v10561_v8  ;;  %v4812_v5 = vld [vmem:[%s10133_s12 + $0x80] sm:$0xff] }
 0x6c0   : > { %4678 = vmatpush1.msra.mxu1 %v4602_v3  ;;  %4863 = vmatpush1.msra.mxu0 %v4602_v3  ;;  %v4630_v3 = vld [vmem:[%s10132_s11 + $0x98] sm:$0xff] }
 0x6c1   : > { %v4371_v48 = vpop.f32.mrf.mxu1  ;;  %v4573_v38 = vpop.f32.mrf.mxu0  ;;  %4679 = vmatprep.subr.mxu1 %v10561_v8  ;;  %4864 = vmatprep.subr.mxu0 %v10561_v8 }
 0x6c2   : > { %4680 = vmatpush1.msra.mxu1 %v4601_v25  ;;  %4865 = vmatpush1.msra.mxu0 %v4601_v25  ;;  %v4814_v25 = vld [vmem:[%s10133_s12 + $0x90] sm:$0xff]  ;;  %v4632_v48 = vld [vmem:[%s10132_s11 + $0xa8] sm:$0xff] }
 0x6c3   : > { %v9597_v24 = vpop.f32.mrf.mxu1  ;;  %v9599_v41 = vpop.f32.mrf.mxu0  ;;  %4681 = vmatprep.subr.mxu1 %v10561_v8  ;;  %4866 = vmatprep.subr.mxu0 %v10561_v8  ;;  %v4817_v38 = vld [vmem:[%s10133_s12 + $0xa8] sm:$0xff] }
 0x6c4   : > { %4682 = vmatpush1.msra.mxu1 %v4600_v1  ;;  %4867 = vmatpush1.msra.mxu0 %v4600_v1  ;;  %v4631_v1 = vld [vmem:[%s10132_s11 + $0xa0] sm:$0xff] }
 0x6c5   : > { %v4376_v49 = vpop.f32.mrf.mxu1  ;;  %v4578_v54 = vpop.f32.mrf.mxu0  ;;  %4683 = vmatprep.subr.mxu1 %v10561_v8  ;;  %4868 = vmatprep.subr.mxu0 %v10561_v8 }
 0x6c6   : > { %4684 = vmatpush1.msra.mxu1 %v4599_v19  ;;  %4869 = vmatpush1.msra.mxu0 %v4599_v19  ;;  %v4819_v19 = vld [vmem:[%s10133_s12 + $0xb8] sm:$0xff]  ;;  %v4633_v49 = vld [vmem:[%s10132_s11 + $0xb0] sm:$0xff] }
 0x6c7   : > { %v4379_v39 = vpop.f32.mrf.mxu1  ;;  %v4581_v36 = vpop.f32.mrf.mxu0  ;;  %4685 = vmatprep.subr.mxu1 %v10561_v8  ;;  %4870 = vmatprep.subr.mxu0 %v10561_v8  ;;  %v4818_v54 = vld [vmem:[%s10133_s12 + $0xb0] sm:$0xff] }
 0x6c8   : > { %4686 = vmatpush1.msra.mxu1 %v4598_v10  ;;  %4871 = vmatpush1.msra.mxu0 %v4598_v10  ;;  %v4993_v10 = vld [vmem:[%s10134_s13] sm:$0xff] }
 0x6c9   : > { %v4381_v32 = vpop.f32.mrf.mxu1  ;;  %v4583_v0 = vpop.f32.mrf.mxu0  ;;  %4687 = vmatprep.subr.mxu1 %v10561_v8  ;;  %4872 = vmatprep.subr.mxu0 %v10561_v8 }
 0x6ca   : > { %4688 = vmatpush1.msra.mxu1 %v4597_v23  ;;  %4873 = vmatpush1.msra.mxu0 %v4597_v23  ;;  %v5335_v23 = vld [vmem:[%s10136_s15 + $0x68] sm:$0xff]  ;;  %v5334_v32 = vld [vmem:[%s10136_s15 + $0x60] sm:$0xff]  ;;  %v5333_v0 = vld [vmem:[%s10136_s15 + $0x58] sm:$0xff] }
 0x6cb   : > { %v4384_v26 = vpop.f32.mrf.mxu1  ;;  %v4586_v58 = vpop.f32.mrf.mxu0  ;;  %4689 = vmatprep.subr.mxu1 %v10561_v8  ;;  %4874 = vmatprep.subr.mxu0 %v10561_v8 }
 0x6cc   : > { %4690 = vmatpush1.msra.mxu1 %v4596_v2  ;;  %4875 = vmatpush1.msra.mxu0 %v4596_v2  ;;  %v5332_v2 = vld [vmem:[%s10136_s15 + $0x50] sm:$0xff] }
 0x6cd   : > { %v4386_v37 = vpop.f32.mrf.mxu1  ;;  %v4588_v43 = vpop.f32.mrf.mxu0  ;;  %4691 = vmatprep.subr.mxu1 %v10561_v8  ;;  %4876 = vmatprep.subr.mxu0 %v10561_v8 }
 0x6ce   : > { %4692 = vmatpush1.msra.mxu1 %v4595_v29  ;;  %4877 = vmatpush1.msra.mxu0 %v4595_v29 }
 0x6cf   : > { %4693 = vmatprep.subr.mxu1 %v10561_v8  ;;  %4878 = vmatprep.subr.mxu0 %v10561_v8 }
 0x6d0   : > { %4694 = vmatpush1.msra.mxu1 %v9559_v17  ;;  %4879 = vmatpush1.msra.mxu0 %v9559_v17  ;;  %v4606_v17 = vmax.f32 %v9581_v55, %v9583_v14  ;;  %v4810_v55 = vld [vmem:[%s10133_s12 + $0x70] sm:$0xff]  ;;  %v4628_v14 = vld [vmem:[%s10132_s11 + $0x88] sm:$0xff] }
 0x6d1   : > { %4695 = vmatprep.subr.mxu1 %v10561_v8  ;;  %4880 = vmatprep.subr.mxu0 %v10561_v8 }
 0x6d2   : > { %4696 = vmatpush1.msra.mxu1 %v9557_v56  ;;  %4881 = vmatpush1.msra.mxu0 %v9557_v56  ;;  %v4610_v56 = vmax.f32 %v4384_v26, %v4586_v58  ;;  %v5331_v26 = vld [vmem:[%s10136_s15 + $0x48] sm:$0xff]  ;;  %v5330_v58 = vld [vmem:[%s10136_s15 + $0x40] sm:$0xff] }
 0x6d3   : > { %4697 = vmatprep.subr.mxu1 %v10561_v8  ;;  %4882 = vmatprep.subr.mxu0 %v10561_v8 }
 0x6d4   : > { %4698 = vmatpush1.msra.mxu1 %v9555_v35  ;;  %4883 = vmatpush1.msra.mxu0 %v9555_v35  ;;  %v4609_v35 = vmax.f32 %v4379_v39, %v4581_v36  ;;  %v5337_v39 = vld [vmem:[%s10136_s15 + $0x78] sm:$0xff]  ;;  %v5336_v36 = vld [vmem:[%s10136_s15 + $0x70] sm:$0xff] }
 0x6d5   : > { %4699 = vmatprep.subr.mxu1 %v10561_v8  ;;  %4884 = vmatprep.subr.mxu0 %v10561_v8 }
 0x6d6   : > { %4700 = vmatpush1.msra.mxu1 %v9553_v9  ;;  %4885 = vmatpush1.msra.mxu0 %v9553_v9  ;;  %v4608_v9 = vmax.f32 %v9597_v24, %v9599_v41  ;;  %v4816_v24 = vld [vmem:[%s10133_s12 + $0xa0] sm:$0xff]  ;;  %v4634_v41 = vld [vmem:[%s10132_s11 + $0xb8] sm:$0xff] }
 0x6d7   : > { %4701 = vmatprep.subr.mxu1 %v10561_v8  ;;  %4886 = vmatprep.subr.mxu0 %v10561_v8 }
 0x6d8   : > { %4702 = vmatpush1.msra.mxu1 %v9551_v12  ;;  %4887 = vmatpush1.msra.mxu0 %v9551_v12  ;;  %v4607_v12 = vmax.f32 %v9589_v15, %v9591_v61  ;;  %v4815_v15 = vld [vmem:[%s10133_s12 + $0x98] sm:$0xff]  ;;  %v4629_v61 = vld [vmem:[%s10132_s11 + $0x90] sm:$0xff] }
 0x6d9   : > { %4725 = vmatprep.subr.mxu1 %v10561_v8  ;;  %4910 = vmatprep.subr.mxu0 %v10561_v8 }
 0x6da   : > { %4726 = vmatpush2.msra.mxu1 %v4610_v56  ;;  %4911 = vmatpush2.msra.mxu0 %v4610_v56  ;;  %v5329_v56 = vld [vmem:[%s10136_s15 + $0x38] sm:$0xff] }
 0x6db   : > { %4727 = vmatprep.subr.mxu1 %v10561_v8  ;;  %4912 = vmatprep.subr.mxu0 %v10561_v8 }
 0x6dc   : > { %4728 = vmatpush2.msra.mxu1 %v4609_v35  ;;  %4913 = vmatpush2.msra.mxu0 %v4609_v35 }
 0x6dd   : > { %4729 = vmatprep.subr.mxu1 %v10561_v8  ;;  %4914 = vmatprep.subr.mxu0 %v10561_v8 }
 0x6de   : > { %4730 = vmatpush2.msra.mxu1 %v4608_v9  ;;  %4915 = vmatpush2.msra.mxu0 %v4608_v9 }
 0x6df   : > { %4731 = vmatprep.subr.mxu1 %v10561_v8  ;;  %4916 = vmatprep.subr.mxu0 %v10561_v8 }
 0x6e0   : > { %4732 = vmatpush2.msra.mxu1 %v4607_v12  ;;  %4917 = vmatpush2.msra.mxu0 %v4607_v12  ;;  %v5328_v12 = vld [vmem:[%s10136_s15 + $0x30] sm:$0xff] }
 0x6e1   : > { %4733 = vmatprep.subr.mxu1 %v10561_v8  ;;  %4918 = vmatprep.subr.mxu0 %v10561_v8 }
 0x6e2   : > { %4734 = vmatpush2.msra.mxu1 %v4606_v17  ;;  %4919 = vmatpush2.msra.mxu0 %v4606_v17 }
 0x6e3   : > { %4736 = vmatmul.mubr.f32.vlgmr.msra.gmra.mxu1 %v4611_v51  ;;  %4921 = vmatmul.mubr.f32.vlgmr.msra.gmra.mxu0 %v4796_v52  ;;  %v5327_v52 = vld [vmem:[%s10136_s15 + $0x28] sm:$0xff] }
 0x6e4   : > { %5900 = vmatprep.mubr.msk.f32.mxu1 %vm2752_vm5, %v4614_v18  ;;  %5912 = vmatprep.mubr.msk.f32.mxu0 %vm2752_vm5, %v4799_v57 }
 0x6e5   : > { %6097 = vmatprep.subr.mxu0 %v5337_v39 }
 0x6e6   : > { %6098 = vmatpush3.msra.mxu0 %v5337_v39 }
 0x6e7   : > { %4741 = vmatmul.mubr.f32.gmra.mxu1 %v4613_v59  ;;  %4926 = vmatmul.mubr.f32.gmra.mxu0 %v4798_v34  ;;  %v5326_v59 = vld [vmem:[%s10136_s15 + $0x20] sm:$0xff] }
 0x6e8   : > { %5901 = vmatprep.mubr.msk.f32.mxu1 %vm2752_vm5, %v4616_v13  ;;  %5913 = vmatprep.mubr.msk.f32.mxu0 %vm2752_vm5, %v4801_v47  ;;  %v5325_v47 = vld [vmem:[%s10136_s15 + $0x18] sm:$0xff] }
 0x6e9   : > { %6099 = vmatprep.subr.mxu0 %v5336_v36 }
 0x6ea   : > { %6100 = vmatpush3.msra.mxu0 %v5336_v36 }
 0x6eb   : > { %4746 = vmatmul.mubr.f32.gmra.mxu1 %v4615_v11  ;;  %4931 = vmatmul.mubr.f32.gmra.mxu0 %v4800_v63 }
 0x6ec   : > { %5902 = vmatprep.mubr.msk.f32.mxu1 %vm2752_vm5, %v4618_v60  ;;  %5914 = vmatprep.mubr.msk.f32.mxu0 %vm2752_vm5, %v4803_v4 }
 0x6ed   : > { %6101 = vmatprep.subr.mxu0 %v5335_v23 }
 0x6ee   : > { %6102 = vmatpush3.msra.mxu0 %v5335_v23 }
 0x6ef   : > { %4751 = vmatmul.mubr.f32.gmra.mxu1 %v4617_v22  ;;  %4936 = vmatmul.mubr.f32.gmra.mxu0 %v4802_v28 }
 0x6f0   : > { %5903 = vmatprep.mubr.msk.f32.mxu1 %vm2752_vm5, %v4620_v44  ;;  %5915 = vmatprep.mubr.msk.f32.mxu0 %vm2752_vm5, %v4805_v50 }
 0x6f1   : > { %6103 = vmatprep.subr.mxu0 %v5334_v32 }
 0x6f2   : > { %6104 = vmatpush3.msra.mxu0 %v5334_v32 }
 0x6f3   : > { %4756 = vmatmul.mubr.f32.gmra.mxu1 %v4619_v62  ;;  %4941 = vmatmul.mubr.f32.gmra.mxu0 %v4804_v45 }
 0x6f4   : > { %5904 = vmatprep.mubr.msk.f32.mxu1 %vm2752_vm5, %v4622_v30  ;;  %5916 = vmatprep.mubr.msk.f32.mxu0 %vm2752_vm5, %v4807_v53 }
 0x6f5   : > { %6105 = vmatprep.subr.mxu0 %v5333_v0 }
 0x6f6   : > { %6106 = vmatpush3.msra.mxu0 %v5333_v0 }
 0x6f7   : > { %4761 = vmatmul.mubr.f32.gmra.mxu1 %v4621_v33  ;;  %4946 = vmatmul.mubr.f32.gmra.mxu0 %v4806_v40 }
 0x6f8   : > { %5905 = vmatprep.mubr.msk.f32.mxu1 %vm2752_vm5, %v4624_v16  ;;  %5917 = vmatprep.mubr.msk.f32.mxu0 %vm2752_vm5, %v4809_v6 }
 0x6f9   : > { %6107 = vmatprep.subr.mxu0 %v5332_v2 }
 0x6fa   : > { %6108 = vmatpush3.msra.mxu0 %v5332_v2 }
 0x6fb   : > { %4766 = vmatmul.mubr.f32.gmra.mxu1 %v4623_v31  ;;  %4951 = vmatmul.mubr.f32.gmra.mxu0 %v4808_v27 }
 0x6fc   : > { %5906 = vmatprep.mubr.msk.f32.mxu1 %vm2752_vm5, %v4626_v46  ;;  %5918 = vmatprep.mubr.msk.f32.mxu0 %vm2752_vm5, %v4811_v21 }
 0x6fd   : > { %6109 = vmatprep.subr.mxu0 %v5331_v26 }
 0x6fe   : > { %6110 = vmatpush3.msra.mxu0 %v5331_v26 }
 0x6ff   : > { %4771 = vmatmul.mubr.f32.gmra.mxu1 %v4625_v42  ;;  %4956 = vmatmul.mubr.f32.gmra.mxu0 %v4810_v55 }
 0x700   : > { %5907 = vmatprep.mubr.msk.f32.mxu1 %vm2752_vm5, %v4628_v14  ;;  %5919 = vmatprep.mubr.msk.f32.mxu0 %vm2752_vm5, %v4813_v20 }
 0x701   : > { %6111 = vmatprep.subr.mxu0 %v5330_v58 }
 0x702   : > { %6112 = vmatpush3.msra.mxu0 %v5330_v58 }
 0x703   : > { %4776 = vmatmul.mubr.f32.gmra.mxu1 %v4627_v7  ;;  %4961 = vmatmul.mubr.f32.gmra.mxu0 %v4812_v5 }
 0x704   : > { %5908 = vmatprep.mubr.msk.f32.mxu1 %vm2752_vm5, %v4630_v3  ;;  %5920 = vmatprep.mubr.msk.f32.mxu0 %vm2752_vm5, %v4815_v15 }
 0x705   : > { %6113 = vmatprep.subr.mxu0 %v5329_v56 }
 0x706   : > { %6114 = vmatpush3.msra.mxu0 %v5329_v56  ;;  %v4994_v56 = vld [vmem:[%s10134_s13 + $0x8] sm:$0xff] }
 0x707   : > { %4781 = vmatmul.mubr.f32.gmra.mxu1 %v4629_v61  ;;  %4966 = vmatmul.mubr.f32.gmra.mxu0 %v4814_v25 }
 0x708   : > { %5909 = vmatprep.mubr.msk.f32.mxu1 %vm2752_vm5, %v4632_v48  ;;  %5921 = vmatprep.mubr.msk.f32.mxu0 %vm2752_vm5, %v4817_v38 }
 0x709   : > { %6115 = vmatprep.subr.mxu0 %v5328_v12 }
 0x70a   : > { %6116 = vmatpush3.msra.mxu0 %v5328_v12  ;;  %v4997_v12 = vld [vmem:[%s10134_s13 + $0x20] sm:$0xff] }
 0x70b   : > { %4786 = vmatmul.mubr.f32.gmra.mxu1 %v4631_v1  ;;  %4971 = vmatmul.mubr.f32.gmra.mxu0 %v4816_v24 }
 0x70c   : > { %5910 = vmatprep.mubr.msk.f32.mxu1 %vm2752_vm5, %v4634_v41  ;;  %5922 = vmatprep.mubr.msk.f32.mxu0 %vm2752_vm5, %v4819_v19 }
 0x70d   : > { %6117 = vmatprep.subr.mxu0 %v5327_v52 }
 0x70e   : > { %6118 = vmatpush3.msra.mxu0 %v5327_v52  ;;  %v5001_v52 = vld [vmem:[%s10134_s13 + $0x40] sm:$0xff] }
 0x70f   : > { %4791 = vmatmul.mubr.f32.gmra.mxu1 %v4633_v49  ;;  %4976 = vmatmul.mubr.f32.gmra.mxu0 %v4818_v54 }
 0x710   : > { %6061 = vmatprep.mubr.msk.f32.mxu1 %vm1136_vm4, %v4993_v10  ;;  %6119 = vmatprep.subr.mxu0 %v5326_v59 }
 0x711   : > { %6120 = vmatpush3.msra.mxu0 %v5326_v59  ;;  %v5004_v59 = vld [vmem:[%s10134_s13 + $0x58] sm:$0xff] }
 0x712   : > { %6121 = vmatprep.subr.mxu0 %v5325_v47 }
 0x713   : > { %6122 = vmatpush3.msra.mxu0 %v5325_v47  ;;  %v5007_v47 = vld [vmem:[%s10134_s13 + $0x70] sm:$0xff] }
 0x7a3   : > { %v4737_v29 = vpop.f32.mrf.mxu1  ;;  %v4922_v37 = vpop.f32.mrf.mxu0 }
 0x7a4   : > { %v9847_v43 = vmax.f32 %v4737_v29, %v4922_v37 }
 0x7a5   : > { %v4739_v35 = vpop.f32.mrf.mxu1  ;;  %v4924_v9 = vpop.f32.mrf.mxu0 }
 0x7a6   : > { %v4995_v35 = vld [vmem:[%s10134_s13 + $0x10] sm:$0xff]  ;;  %v4996_v9 = vld [vmem:[%s10134_s13 + $0x18] sm:$0xff] }
 0x7a7   : > { %v9855_v17 = vpop.f32.mrf.mxu1  ;;  %v9857_v51 = vpop.f32.mrf.mxu0 }
 0x7a8   : > { %v4982_v37 = vmax.f32 %v9855_v17, %v9857_v51  ;;  %v4999_v17 = vld [vmem:[%s10134_s13 + $0x30] sm:$0xff]  ;;  %v5000_v51 = vld [vmem:[%s10134_s13 + $0x38] sm:$0xff] }
 0x7a9   : > { %v4744_v18 = vpop.f32.mrf.mxu1  ;;  %v4929_v57 = vpop.f32.mrf.mxu0 }
 0x7aa   : > { %v5002_v18 = vld [vmem:[%s10134_s13 + $0x48] sm:$0xff]  ;;  %v5003_v57 = vld [vmem:[%s10134_s13 + $0x50] sm:$0xff] }
 0x7ab   : > { %v9865_v34 = vpop.f32.mrf.mxu1  ;;  %v9867_v13 = vpop.f32.mrf.mxu0 }
 0x7ac   : > { %v4983_v29 = vmax.f32 %v9865_v34, %v9867_v13  ;;  %v5005_v34 = vld [vmem:[%s10134_s13 + $0x60] sm:$0xff]  ;;  %v5006_v13 = vld [vmem:[%s10134_s13 + $0x68] sm:$0xff] }
 0x7ad   : > { %v4749_v11 = vpop.f32.mrf.mxu1  ;;  %v4934_v63 = vpop.f32.mrf.mxu0 }
 0x7ae   : > { %v5008_v11 = vld [vmem:[%s10134_s13 + $0x78] sm:$0xff]  ;;  %v5009_v63 = vld [vmem:[%s10134_s13 + $0x80] sm:$0xff] }
 0x7af   : > { %v4752_v60 = vpop.f32.mrf.mxu1  ;;  %v4937_v4 = vpop.f32.mrf.mxu0 }
 0x7b0   : > { %v4984_v58 = vmax.f32 %v4752_v60, %v4937_v4  ;;  %v5010_v60 = vld [vmem:[%s10134_s13 + $0x88] sm:$0xff]  ;;  %v5011_v4 = vld [vmem:[%s10134_s13 + $0x90] sm:$0xff] }
 0x7b1   : > { %v4754_v22 = vpop.f32.mrf.mxu1  ;;  %v4939_v28 = vpop.f32.mrf.mxu0 }
 0x7b2   : > { %v5012_v22 = vld [vmem:[%s10134_s13 + $0x98] sm:$0xff]  ;;  %v5013_v28 = vld [vmem:[%s10134_s13 + $0xa0] sm:$0xff] }
 0x7b3   : > { %v4757_v44 = vpop.f32.mrf.mxu1  ;;  %v4942_v50 = vpop.f32.mrf.mxu0 }
 0x7b4   : > { %v4985_v26 = vmax.f32 %v4757_v44, %v4942_v50  ;;  %v5014_v44 = vld [vmem:[%s10134_s13 + $0xa8] sm:$0xff]  ;;  %v5015_v50 = vld [vmem:[%s10134_s13 + $0xb0] sm:$0xff] }
 0x7b5   : > { %v4759_v62 = vpop.f32.mrf.mxu1  ;;  %v4944_v45 = vpop.f32.mrf.mxu0 }
 0x7b6   : > { %v5016_v62 = vld [vmem:[%s10134_s13 + $0xb8] sm:$0xff]  ;;  %v5324_v45 = vld [vmem:[%s10136_s15 + $0x10] sm:$0xff] }
 0x7b7   : > { %v4762_v30 = vpop.f32.mrf.mxu1  ;;  %v4947_v53 = vpop.f32.mrf.mxu0  ;;  %6123 = vmatprep.subr.mxu0 %v5324_v45 }
 0x7b8   : > { %v4986_v2 = vmax.f32 %v4762_v30, %v4947_v53  ;;  %6124 = vmatpush3.msra.mxu0 %v5324_v45  ;;  %v5323_v30 = vld [vmem:[%s10136_s15 + $0x8] sm:$0xff]  ;;  %v5322_v53 = vld [vmem:[%s10136_s15] sm:$0xff] }
 0x7b9   : > { %v4764_v33 = vpop.f32.mrf.mxu1  ;;  %v4949_v40 = vpop.f32.mrf.mxu0  ;;  %6125 = vmatprep.subr.mxu0 %v5323_v30  ;;  %v5295_v45 = vld [vmem:[%s10135_s14 + $0xa8] sm:$0xff] }
 0x7ba   : > { %6126 = vmatpush3.msra.mxu0 %v5323_v30  ;;  %v5274_v40 = vld [vmem:[%s10135_s14] sm:$0xff] }
 0x7bb   : > { %v4767_v16 = vpop.f32.mrf.mxu1  ;;  %v4952_v6 = vpop.f32.mrf.mxu0  ;;  %6127 = vmatprep.subr.mxu0 %v5322_v53 }
 0x7bc   : > { %v4987_v0 = vmax.f32 %v4767_v16, %v4952_v6  ;;  %6128 = vmatpush3.msra.mxu0 %v5322_v53  ;;  %v5275_v16 = vld [vmem:[%s10135_s14 + $0x8] sm:$0xff]  ;;  %v5294_v53 = vld [vmem:[%s10135_s14 + $0xa0] sm:$0xff] }
 0x7bd   : > { %v4769_v31 = vpop.f32.mrf.mxu1  ;;  %v4954_v27 = vpop.f32.mrf.mxu0 }
 0x7bf   : > { %v4772_v46 = vpop.f32.mrf.mxu1  ;;  %v4957_v21 = vpop.f32.mrf.mxu0 }
 0x7c0   : > { %v4988_v32 = vmax.f32 %v4772_v46, %v4957_v21  ;;  %v5276_v21 = vld [vmem:[%s10135_s14 + $0x10] sm:$0xff] }
 0x7c1   : > { %v4774_v42 = vpop.f32.mrf.mxu1  ;;  %v4959_v55 = vpop.f32.mrf.mxu0 }
 0x7c2   : > { %v5277_v42 = vld [vmem:[%s10135_s14 + $0x18] sm:$0xff] }
 0x7c3   : > { %v4777_v14 = vpop.f32.mrf.mxu1  ;;  %v4962_v20 = vpop.f32.mrf.mxu0 }
 0x7c4   : > { %v4989_v23 = vmax.f32 %v4777_v14, %v4962_v20 }
 0x7c5   : > { %v4779_v7 = vpop.f32.mrf.mxu1  ;;  %v4964_v5 = vpop.f32.mrf.mxu0 }
 0x7c6   : > { %v5278_v5 = vld [vmem:[%s10135_s14 + $0x20] sm:$0xff] }
 0x7c7   : > { %v4782_v3 = vpop.f32.mrf.mxu1  ;;  %v4967_v15 = vpop.f32.mrf.mxu0 }
 0x7c8   : > { %v4990_v36 = vmax.f32 %v4782_v3, %v4967_v15  ;;  %v5279_v3 = vld [vmem:[%s10135_s14 + $0x28] sm:$0xff] }
 0x7c9   : > { %v4784_v61 = vpop.f32.mrf.mxu1  ;;  %v4969_v25 = vpop.f32.mrf.mxu0 }
 0x7cb   : > { %v4787_v48 = vpop.f32.mrf.mxu1  ;;  %v4972_v38 = vpop.f32.mrf.mxu0 }
 0x7cc   : > { %v4991_v39 = vmax.f32 %v4787_v48, %v4972_v38  ;;  %v5280_v38 = vld [vmem:[%s10135_s14 + $0x30] sm:$0xff] }
 0x7cd   : > { %v4789_v1 = vpop.f32.mrf.mxu1  ;;  %v4974_v24 = vpop.f32.mrf.mxu0 }
 0x7ce   : > { %v5281_v1 = vld [vmem:[%s10135_s14 + $0x38] sm:$0xff] }
 0x7cf   : > { %v4792_v41 = vpop.f32.mrf.mxu1  ;;  %v4977_v19 = vpop.f32.mrf.mxu0 }
 0x7d0   : > { %v4992_v49 = vmax.f32 %v4792_v41, %v4977_v19 }
 0x7d1   : > { %v4794_v54 = vpop.f32.mrf.mxu1  ;;  %v4979_v10 = vpop.f32.mrf.mxu0 }
 0x7d2   : > { %6037 = vmatprep.subr.mxu1 %v4992_v49  ;;  %v5282_v54 = vld [vmem:[%s10135_s14 + $0x40] sm:$0xff]  ;;  %v5283_v10 = vld [vmem:[%s10135_s14 + $0x48] sm:$0xff] }
 0x7d3   : > { %6038 = vmatpush3.msra.mxu1 %v4992_v49 }
 0x7d4   : > { %6039 = vmatprep.subr.mxu1 %v4991_v39 }
 0x7d5   : > { %6040 = vmatpush3.msra.mxu1 %v4991_v39 }
 0x7d6   : > { %6041 = vmatprep.subr.mxu1 %v4990_v36 }
 0x7d7   : > { %6042 = vmatpush3.msra.mxu1 %v4990_v36 }
 0x7d8   : > { %6043 = vmatprep.subr.mxu1 %v4989_v23 }
 0x7d9   : > { %6044 = vmatpush3.msra.mxu1 %v4989_v23 }
 0x7da   : > { %6045 = vmatprep.subr.mxu1 %v4988_v32 }
 0x7db   : > { %6046 = vmatpush3.msra.mxu1 %v4988_v32 }
 0x7dc   : > { %6047 = vmatprep.subr.mxu1 %v4987_v0 }
 0x7dd   : > { %6048 = vmatpush3.msra.mxu1 %v4987_v0  ;;  %v5284_v0 = vld [vmem:[%s10135_s14 + $0x50] sm:$0xff] }
 0x7de   : > { %6049 = vmatprep.subr.mxu1 %v4986_v2 }
 0x7df   : > { %6050 = vmatpush3.msra.mxu1 %v4986_v2  ;;  %v5285_v2 = vld [vmem:[%s10135_s14 + $0x58] sm:$0xff] }
 0x7e0   : > { %6051 = vmatprep.subr.mxu1 %v4985_v26 }
 0x7e1   : > { %6052 = vmatpush3.msra.mxu1 %v4985_v26 }
 0x7e2   : > { %6053 = vmatprep.subr.mxu1 %v4984_v58 }
 0x7e3   : > { %6054 = vmatpush3.msra.mxu1 %v4984_v58 }
 0x7e4   : > { %6055 = vmatprep.subr.mxu1 %v4983_v29 }
 0x7e5   : > { %6056 = vmatpush3.msra.mxu1 %v4983_v29 }
 0x7e6   : > { %6057 = vmatprep.subr.mxu1 %v4982_v37 }
 0x7e7   : > { %6058 = vmatpush3.msra.mxu1 %v4982_v37 }
 0x7e8   : > { %6059 = vmatprep.subr.mxu1 %v9847_v43 }
 0x7e9   : > { %6060 = vmatpush3.msra.mxu1 %v9847_v43  ;;  %v4998_v43 = vld [vmem:[%s10134_s13 + $0x28] sm:$0xff] }
 0x7ea   : > { %6062 = vmatmul.mubr.msk.f32.vlgmr.msra.gmra.mxu1 %vm1136_vm4, %v4994_v56  ;;  %5557 = vmatprep.subr.mxu1 %v10561_v8  ;;  %v5286_v56 = vld [vmem:[%s10135_s14 + $0x60] sm:$0xff] }
 0x7eb   : > { %6064 = vmatprep.mubr.msk.f32.mxu1 %vm1136_vm4, %v4995_v35  ;;  %v5287_v35 = vld [vmem:[%s10135_s14 + $0x68] sm:$0xff] }
 0x7ee   : > { %6065 = vmatmul.mubr.msk.f32.gmra.mxu1 %vm1136_vm4, %v4996_v9 }
 0x7ef   : > { %6067 = vmatprep.mubr.msk.f32.mxu1 %vm1136_vm4, %v4997_v12 }
 0x7f2   : > { %6068 = vmatmul.mubr.msk.f32.gmra.mxu1 %vm1136_vm4, %v4998_v43 }
 0x7f3   : > { %6070 = vmatprep.mubr.msk.f32.mxu1 %vm1136_vm4, %v4999_v17 }
 0x7f6   : > { %6071 = vmatmul.mubr.msk.f32.gmra.mxu1 %vm1136_vm4, %v5000_v51  ;;  %v5288_v51 = vld [vmem:[%s10135_s14 + $0x70] sm:$0xff] }
 0x7f7   : > { %6073 = vmatprep.mubr.msk.f32.mxu1 %vm1136_vm4, %v5001_v52  ;;  %v5289_v52 = vld [vmem:[%s10135_s14 + $0x78] sm:$0xff] }
 0x7fa   : > { %6074 = vmatmul.mubr.msk.f32.gmra.mxu1 %vm1136_vm4, %v5002_v18 }
 0x7fb   : > { %6076 = vmatprep.mubr.msk.f32.mxu1 %vm1136_vm4, %v5003_v57 }
 0x7fe   : > { %6077 = vmatmul.mubr.msk.f32.gmra.mxu1 %vm1136_vm4, %v5004_v59  ;;  %v5291_v59 = vld [vmem:[%s10135_s14 + $0x88] sm:$0xff] }
 0x7ff   : > { %6079 = vmatprep.mubr.msk.f32.mxu1 %vm1136_vm4, %v5005_v34 }
 0x802   : > { %6080 = vmatmul.mubr.msk.f32.gmra.mxu1 %vm1136_vm4, %v5006_v13 }
 0x803   : > { %6082 = vmatprep.mubr.msk.f32.mxu1 %vm1136_vm4, %v5007_v47  ;;  %v5290_v47 = vld [vmem:[%s10135_s14 + $0x80] sm:$0xff] }
 0x806   : > { %6083 = vmatmul.mubr.msk.f32.gmra.mxu1 %vm1136_vm4, %v5008_v11 }
 0x807   : > { %6085 = vmatprep.mubr.msk.f32.mxu1 %vm1136_vm4, %v5009_v63 }
 0x80a   : > { %6086 = vmatmul.mubr.msk.f32.gmra.mxu1 %vm1136_vm4, %v5010_v60 }
 0x80b   : > { %6088 = vmatprep.mubr.msk.f32.mxu1 %vm1136_vm4, %v5011_v4  ;;  %v5293_v4 = vld [vmem:[%s10135_s14 + $0x98] sm:$0xff] }
 0x80e   : > { %6089 = vmatmul.mubr.msk.f32.gmra.mxu1 %vm1136_vm4, %v5012_v22 }
 0x80f   : > { %6091 = vmatprep.mubr.msk.f32.mxu1 %vm1136_vm4, %v5013_v28  ;;  %v5292_v28 = vld [vmem:[%s10135_s14 + $0x90] sm:$0xff] }
 0x812   : > { %6092 = vmatmul.mubr.msk.f32.gmra.mxu1 %vm1136_vm4, %v5014_v44 }
 0x813   : > { %6094 = vmatprep.mubr.msk.f32.mxu1 %vm1136_vm4, %v5015_v50 }
 0x816   : > { %6095 = vmatmul.mubr.msk.f32.gmra.mxu1 %vm1136_vm4, %v5016_v62 }
 0x8aa   : > { %v6063_v33 = vpop.f32.mrf.mxu1 }
 0x8ab   : > { %v5299_v27 = vmul.f32 %v6063_v33, %v5275_v16 }
 0x8ac   : > { %v5155_v6 = vpop.f32.mrf.mxu1 }
 0x8ad   : > { %v5298_v31 = vmul.f32 %v5274_v40, %v5155_v6  ;;  %v5297_v6 = vld [vmem:[%s10135_s14 + $0xb8] sm:$0xff] }
 0x8ae   : > { %v6066_v46 = vpop.f32.mrf.mxu1 }
 0x8af   : > { %6129 = vmatprep.mubr.f32.mxu0 %v5298_v31  ;;  %v5301_v20 = vmul.f32 %v6066_v46, %v5277_v42 }
 0x8b0   : > { %v5165_v55 = vpop.f32.mrf.mxu1  ;;  %6130 = vmatmul.mubr.f32.vlgmr.msra.gmra.mxu0 %v5299_v27  ;;  %v5296_v27 = vld [vmem:[%s10135_s14 + $0xb0] sm:$0xff] }
 0x8b1   : > { %v5300_v14 = vmul.f32 %v5276_v21, %v5165_v55  ;;  %v5524_v55 = vld [vmem:[%s10137_s16 + $0x8] sm:$0xff] }
 0x8b2   : > { %v6069_v7 = vpop.f32.mrf.mxu1  ;;  %5947 = vmatprep.mubr.msk.f32.mxu1 %vm5547_vm9, %v5524_v55 }
 0x8b3   : > { %6132 = vmatprep.mubr.f32.mxu0 %v5300_v14  ;;  %v5303_v25 = vmul.f32 %v6069_v7, %v5279_v3 }
 0x8b4   : > { %v5175_v15 = vpop.f32.mrf.mxu1  ;;  %6133 = vmatmul.mubr.f32.gmra.mxu0 %v5301_v20 }
 0x8b5   : > { %v5302_v61 = vmul.f32 %v5278_v5, %v5175_v15 }
 0x8b6   : > { %v6072_v48 = vpop.f32.mrf.mxu1 }
 0x8b7   : > { %6135 = vmatprep.mubr.f32.mxu0 %v5302_v61  ;;  %v5305_v19 = vmul.f32 %v6072_v48, %v5281_v1 }
 0x8b8   : > { %v5185_v24 = vpop.f32.mrf.mxu1  ;;  %6136 = vmatmul.mubr.f32.gmra.mxu0 %v5303_v25 }
 0x8b9   : > { %v5304_v41 = vmul.f32 %v5280_v38, %v5185_v24 }
 0x8ba   : > { %v6075_v49 = vpop.f32.mrf.mxu1 }
 0x8bb   : > { %6138 = vmatprep.mubr.f32.mxu0 %v5304_v41  ;;  %v5307_v23 = vmul.f32 %v6075_v49, %v5283_v10 }
 0x8bc   : > { %v5195_v39 = vpop.f32.mrf.mxu1  ;;  %6139 = vmatmul.mubr.f32.gmra.mxu0 %v5305_v19 }
 0x8bd   : > { %v5306_v36 = vmul.f32 %v5282_v54, %v5195_v39 }
 0x8be   : > { %v6078_v32 = vpop.f32.mrf.mxu1 }
 0x8bf   : > { %6141 = vmatprep.mubr.f32.mxu0 %v5306_v36  ;;  %v5309_v29 = vmul.f32 %v6078_v32, %v5285_v2 }
 0x8c0   : > { %v5205_v26 = vpop.f32.mrf.mxu1  ;;  %6142 = vmatmul.mubr.f32.gmra.mxu0 %v5307_v23 }
 0x8c1   : > { %v5308_v58 = vmul.f32 %v5284_v0, %v5205_v26 }
 0x8c2   : > { %v6081_v37 = vpop.f32.mrf.mxu1 }
 0x8c3   : > { %6144 = vmatprep.mubr.f32.mxu0 %v5308_v58  ;;  %v5311_v43 = vmul.f32 %v6081_v37, %v5287_v35  ;;  %v5523_v58 = vld [vmem:[%s10137_s16] sm:$0xff]  ;;  %v5525_v37 = vld [vmem:[%s10137_s16 + $0x10] sm:$0xff] }
 0x8c4   : > { %v5215_v9 = vpop.f32.mrf.mxu1  ;;  %6145 = vmatmul.mubr.f32.gmra.mxu0 %v5309_v29  ;;  %v5526_v29 = vld [vmem:[%s10137_s16 + $0x18] sm:$0xff]  ;;  %v5640_v35 = vld [vmem:[%s10139_s18] sm:$0xff] }
 0x8c5   : > { %v5310_v12 = vmul.f32 %v5286_v56, %v5215_v9  ;;  %v5528_v56 = vld [vmem:[%s10137_s16 + $0x28] sm:$0xff] }
 0x8c6   : > { %v6084_v17 = vpop.f32.mrf.mxu1 }
 0x8c7   : > { %6147 = vmatprep.mubr.f32.mxu0 %v5310_v12  ;;  %v5313_v34 = vmul.f32 %v6084_v17, %v5289_v52  ;;  %v5540_v52 = vpop.permute.xlu0 %5539 }
 0x8c8   : > { %v5225_v18 = vpop.f32.mrf.mxu1  ;;  %6148 = vmatmul.mubr.f32.gmra.mxu0 %v5311_v43  ;;  %v5545_v43 = vpop.permute.xlu1 %5544 }
 0x8c9   : > { %v5312_v57 = vmul.f32 %v5288_v51, %v5225_v18 }
 0x8ca   : > { %v6087_v13 = vpop.f32.mrf.mxu1 }
 0x8cb   : > { %6150 = vmatprep.mubr.f32.mxu0 %v5312_v57  ;;  %v5315_v11 = vmul.f32 %v6087_v13, %v5291_v59 }
 0x8cc   : > { %6151 = vmatmul.mubr.f32.gmra.mxu0 %v5313_v34  ;;  %v5235_v63 = vpop.f32.mrf.mxu1  ;;  %v5535_v34 = vpop.permute.xlu1 %5534 }
 0x8cd   : > { %v5314_v60 = vmul.f32 %v5290_v47, %v5235_v63 }
 0x8ce   : > { %v6090_v22 = vpop.f32.mrf.mxu1 }
 0x8cf   : > { %6153 = vmatprep.mubr.f32.mxu0 %v5314_v60  ;;  %v5317_v44 = vmul.f32 %v6090_v22, %v5293_v4  ;;  %v5641_v4 = vld [vmem:[%s10139_s18 + $0x8] sm:$0x3] }
 0x8d0   : > { %v5245_v50 = vpop.f32.mrf.mxu1  ;;  %6154 = vmatmul.mubr.f32.gmra.mxu0 %v5315_v11  ;;  %v5652_v22 = vpop.permute.xlu1 %5651 }
 0x8d1   : > { %v5316_v62 = vmul.f32 %v5292_v28, %v5245_v50  ;;  %v5647_v50 = vpop.permute.xlu0 %5646 }
 0x8d2   : > { %v6093_v30 = vpop.f32.mrf.mxu1 }
 0x8d3   : > { %6156 = vmatprep.mubr.f32.mxu0 %v5316_v62  ;;  %v5319_v33 = vmul.f32 %v6093_v30, %v5295_v45 }
 0x8d4   : > { %v5255_v40 = vpop.f32.mrf.mxu1  ;;  %6157 = vmatmul.mubr.f32.gmra.mxu0 %v5317_v44 }
 0x8d5   : > { %v5318_v16 = vmul.f32 %v5294_v53, %v5255_v40 }
 0x8d6   : > { %v6096_v31 = vpop.f32.mrf.mxu1 }
 0x8d7   : > { %6159 = vmatprep.mubr.f32.mxu0 %v5318_v16  ;;  %v5321_v46 = vmul.f32 %v6096_v31, %v5297_v6 }
 0x8d8   : > { %v5265_v21 = vpop.f32.mrf.mxu1  ;;  %6160 = vmatmul.mubr.f32.gmra.mxu0 %v5319_v33 }
 0x8d9   : > { %v5320_v42 = vmul.f32 %v5296_v27, %v5265_v21 }
 0x8db   : > { %6162 = vmatprep.mubr.f32.mxu0 %v5320_v42 }
 0x8dc   : > { %6163 = vmatmul.mubr.f32.gmra.mxu0 %v5321_v46 }
 0x970   : > { %v6131_v14 = vpop.f32.mrf.mxu0 }
 0x972   : > { %v5404_v20 = vpop.f32.mrf.mxu0 }
 0x974   : > { %v6134_v7 = vpop.f32.mrf.mxu0 }
 0x976   : > { %v5414_v5 = vpop.f32.mrf.mxu0 }
 0x978   : > { %v6137_v3 = vpop.f32.mrf.mxu0 }
 0x97a   : > { %v5424_v15 = vpop.f32.mrf.mxu0 }
 0x97c   : > { %v6140_v61 = vpop.f32.mrf.mxu0 }
 0x97e   : > { %v5434_v25 = vpop.f32.mrf.mxu0 }
 0x980   : > { %v6143_v48 = vpop.f32.mrf.mxu0 }
 0x982   : > { %v5444_v38 = vpop.f32.mrf.mxu0 }
 0x984   : > { %v6146_v1 = vpop.f32.mrf.mxu0 }
 0x986   : > { %v5454_v24 = vpop.f32.mrf.mxu0 }
 0x988   : > { %v6149_v41 = vpop.f32.mrf.mxu0 }
 0x98a   : > { %v5464_v19 = vpop.f32.mrf.mxu0 }
 0x98c   : > { %v6152_v49 = vpop.f32.mrf.mxu0 }
 0x98d   : > { %5558 = vmatpush1.msra.mxu1 %v6152_v49 }
 0x98e   : > { %v5474_v54 = vpop.f32.mrf.mxu0  ;;  %5559 = vmatprep.subr.mxu1 %v10561_v8 }
 0x98f   : > { %5560 = vmatpush1.msra.mxu1 %v5474_v54 }
 0x990   : > { %5561 = vmatprep.subr.mxu1 %v10561_v8  ;;  %v6155_v10 = vpop.f32.mrf.mxu0 }
 0x991   : > { %5562 = vmatpush1.msra.mxu1 %v6149_v41 }
 0x992   : > { %5563 = vmatprep.subr.mxu1 %v10561_v8  ;;  %v5484_v39 = vpop.f32.mrf.mxu0 }
 0x993   : > { %5564 = vmatpush1.msra.mxu1 %v5464_v19 }
 0x994   : > { %5565 = vmatprep.subr.mxu1 %v10561_v8  ;;  %v6158_v36 = vpop.f32.mrf.mxu0 }
 0x995   : > { %5566 = vmatpush1.msra.mxu1 %v6146_v1 }
 0x996   : > { %5567 = vmatprep.subr.mxu1 %v10561_v8  ;;  %v5494_v23 = vpop.f32.mrf.mxu0 }
 0x997   : > { %5568 = vmatpush1.msra.mxu1 %v5454_v24 }
 0x998   : > { %5569 = vmatprep.subr.mxu1 %v10561_v8  ;;  %v6161_v32 = vpop.f32.mrf.mxu0 }
 0x999   : > { %5570 = vmatpush1.msra.mxu1 %v6143_v48 }
 0x99a   : > { %5571 = vmatprep.subr.mxu1 %v10561_v8  ;;  %v5504_v0 = vpop.f32.mrf.mxu0 }
 0x99b   : > { %5572 = vmatpush1.msra.mxu1 %v5444_v38 }
 0x99c   : > { %5573 = vmatprep.subr.mxu1 %v10561_v8  ;;  %v6164_v2 = vpop.f32.mrf.mxu0 }
 0x99d   : > { %5574 = vmatpush1.msra.mxu1 %v6140_v61 }
 0x99e   : > { %5575 = vmatprep.subr.mxu1 %v10561_v8  ;;  %v5514_v26 = vpop.f32.mrf.mxu0 }
 0x99f   : > { %5576 = vmatpush1.msra.mxu1 %v5434_v25 }
 0x9a0   : > { %5577 = vmatprep.subr.mxu1 %v10561_v8 }
 0x9a1   : > { %5578 = vmatpush1.msra.mxu1 %v6137_v3 }
 0x9a2   : > { %5579 = vmatprep.subr.mxu1 %v10561_v8 }
 0x9a3   : > { %5580 = vmatpush1.msra.mxu1 %v5424_v15 }
 0x9a4   : > { %5581 = vmatprep.subr.mxu1 %v10561_v8 }
 0x9a5   : > { %5582 = vmatpush1.msra.mxu1 %v6134_v7 }
 0x9a6   : > { %5583 = vmatprep.subr.mxu1 %v10561_v8 }
 0x9a7   : > { %5584 = vmatpush1.msra.mxu1 %v5414_v5 }
 0x9a8   : > { %5585 = vmatprep.subr.mxu1 %v10561_v8 }
 0x9a9   : > { %5586 = vmatpush1.msra.mxu1 %v6131_v14 }
 0x9aa   : > { %5587 = vmatprep.subr.mxu1 %v10561_v8 }
 0x9ab   : > { %5588 = vmatpush1.msra.mxu1 %v5404_v20 }
 0x9ac   : > { %5605 = vmatprep.subr.mxu1 %v10561_v8 }
 0x9ad   : > { %5606 = vmatpush2.msra.mxu1 %v6164_v2 }
 0x9ae   : > { %5607 = vmatprep.subr.mxu1 %v10561_v8 }
 0x9af   : > { %5608 = vmatpush2.msra.mxu1 %v5514_v26 }
 0x9b0   : > { %5609 = vmatprep.subr.mxu1 %v10561_v8 }
 0x9b1   : > { %5610 = vmatpush2.msra.mxu1 %v6161_v32 }
 0x9b2   : > { %5611 = vmatprep.subr.mxu1 %v10561_v8 }
 0x9b3   : > { %5612 = vmatpush2.msra.mxu1 %v5504_v0 }
 0x9b4   : > { %5613 = vmatprep.subr.mxu1 %v10561_v8 }
 0x9b5   : > { %5614 = vmatpush2.msra.mxu1 %v6158_v36 }
 0x9b6   : > { %5615 = vmatprep.subr.mxu1 %v10561_v8 }
 0x9b7   : > { %5616 = vmatpush2.msra.mxu1 %v5494_v23 }
 0x9b8   : > { %5617 = vmatprep.subr.mxu1 %v10561_v8 }
 0x9b9   : > { %5618 = vmatpush2.msra.mxu1 %v6155_v10 }
 0x9ba   : > { %5619 = vmatprep.subr.mxu1 %v10561_v8  ;;  %v5527_v8 = vld [vmem:[%s10137_s16 + $0x20] sm:$0xff] }
 0x9bb   : > { %5620 = vmatpush2.msra.mxu1 %v5484_v39 }
 0x9bc   : > { %5622 = vmatmul.mubr.f32.vlgmr.msra.gmra.mxu1 %v5523_v58 }
 0x9bd   : > { %5948 = vmatprep.mubr.msk.f32.mxu1 %vm5547_vm9, %v5526_v29 }
 0x9c0   : > { %5627 = vmatmul.mubr.f32.gmra.mxu1 %v5525_v37 }
 0x9c1   : > { %5949 = vmatprep.mubr.msk.f32.mxu1 %vm5547_vm9, %v5528_v56 }
 0x9c4   : > { %5632 = vmatmul.mubr.f32.gmra.mxu1 %v5527_v8 }
 0x9c5   : > { %6171 = vmatprep.mubr.msk.f32.mxu1 %vm5654_vm10, %v5640_v35 }
 0xa7c   : > { %v5623_v9 = vpop.f32.mrf.mxu1 }
 0xa7d   : > { %v5624_v47 = vadd.f32 %v5623_v9, %v5535_v34 }
 0xa7e   : > { %v5625_v12 = vpop.f32.mrf.mxu1 }
 0xa7f   : > { %v5637_v60 = vmax.f32 %v5624_v47, 0.0 }
 0xa80   : > { %v5628_v17 = vpop.f32.mrf.mxu1 }
 0xa81   : > { %v5629_v57 = vadd.f32 %v5628_v17, %v5540_v52 }
 0xa82   : > { %v5630_v51 = vpop.f32.mrf.mxu1 }
 0xa83   : > { %v5638_v63 = vmax.f32 %v5629_v57, 0.0 }
 0xa84   : > { %v5633_v18 = vpop.f32.mrf.mxu1 }
 0xa85   : > { %v5634_v59 = vadd.f32 %v5633_v18, %v5545_v43 }
 0xa86   : > { %v5635_v13 = vpop.f32.mrf.mxu1 }
 0xa87   : > { %v5639_v11 = vmax.f32 %v5634_v59, 0.0 }
 0xa89   : > { %6165 = vmatprep.subr.mxu1 %v5639_v11 }
 0xa8a   : > { %6166 = vmatpush3.msra.mxu1 %v5639_v11 }
 0xa8b   : > { %6167 = vmatprep.subr.mxu1 %v5638_v63 }
 0xa8c   : > { %6168 = vmatpush3.msra.mxu1 %v5638_v63 }
 0xa8d   : > { %6169 = vmatprep.subr.mxu1 %v5637_v60 }
 0xa8e   : > { %6170 = vmatpush3.msra.mxu1 %v5637_v60 }
 0xa8f   : > { %6172 = vmatmul.mubr.msk.f32.vlgmr.msra.gmra.mxu1 %vm5654_vm10, %v5641_v4 }
 0xb4f   : > { %v6173_v28 = vpop.f32.mrf.mxu1 }
 0xb50   : > { %v5733_v44 = vadd.f32 %v6173_v28, %v5652_v22 }
 0xb51   : > { %v5727_v62 = vpop.f32.mrf.mxu1 }
 0xb52   : > { %5739 = vst.msk [vmem:[%s680_s27 + $0x8] sm:$0x3] %vm5738_vm11, %v5733_v44  ;;  %v5728_v45 = vadd.f32 %v5727_v62, %v5647_v50 }
 0xb54   : > { %5737 = vst.msk [vmem:[%s680_s27] sm:$0xff] %vm5736_vm12, %v5728_v45 }
 0xb55 PF: > { %s10565_s1 = sld [smem:[#allocation5_spill]]  ;;  %p27_p9 = scmp.ge.s32.totalorder %s6356_s2, 4  }
 0xb56   : > { %s10566_s22 = sld [smem:[#allocation6_spill]]  ;;  %s10567_s23 = smov %s6356_s2 }
 0xb57   :  { %29 = sbr.rel (!%p27_p9) target bundleno = 8 (0x8), region = 158 }

</bundles_post_ra>
